<compile_context>
chip_gen: v7x
topology: tpu7x:2x2x1
jax: 0.10.0
libtpu: 0.0.40
codegen_flags: <defaults>
</compile_context>

<pallas_src>
import functools

import jax
import jax.numpy as jnp
from jax.experimental import pallas as pl
from jax.experimental.pallas import tpu as pltpu


def _round_up(n, m):
    return ((n + m - 1) // m) * m


def _vmem_limit_bytes():
    """Per-generation VMEM limit: ~85% of physical, capped at 100 MiB."""
    cap = 128 * 1024 * 1024
    try:
        info = pltpu.get_tpu_info()
        cap = int(getattr(info, "vmem_capacity_bytes", cap)) or cap
    except Exception:
        pass
    return min(int(cap * 0.85), 100 * 1024 * 1024)


# ---------------------------------------------------------------------------
# Kernel A: OmniShift (5x5 depthwise conv) + fused [Wk | Wv | Wr] projection.
# ---------------------------------------------------------------------------
def _shift_project_kernel(cur_ref, halo_ref, w5_ref, wkvr_ref,
                          k_ref, v_ref, r_ref, *, tH, W, Cp, Hp):
    # Padded rows for this tile: tH rows of the current block + a 4-row halo
    # (the halo is a separate, tiny side input -> no full next-block refetch).
    xp = jnp.concatenate([cur_ref[0], halo_ref[0]], axis=0).astype(jnp.float32)
    w5 = w5_ref[...].astype(jnp.float32)                     # (5, 5, Cp)

    # 25-tap depthwise conv (cross-correlation).  The W (sublane) slice is
    # hoisted out of the inner loop (5 shifted views instead of 25) and two
    # partial accumulators break the serial add chain so VALU slots fill.
    acc0 = jnp.zeros((tH, W, Cp), jnp.float32)
    acc1 = jnp.zeros((tH, W, Cp), jnp.float32)
    for dj in range(5):
        xw = xp[:, dj:dj + W, :]                             # (tH+4, W, Cp)
        for di in range(5):
            tap = xw[di:di + tH] * w5[di, dj][None, None, :]
            if (di + dj) % 2 == 0:
                acc0 = acc0 + tap
            else:
                acc1 = acc1 + tap
    xs = (acc0 + acc1).reshape(tH * W, Cp)                   # (tTa, Cp) tokens

    # One fused MXU matmul: xs @ [Wk | Wv | Wr], bf16 operands, f32 accumulate.
    y = jnp.dot(xs.astype(jnp.bfloat16), wkvr_ref[...],
                preferred_element_type=jnp.float32)          # (tTa, 2*Hp + Cp)
    kk = y[:, :Hp]
    vv = y[:, Hp:2 * Hp]
    rr = y[:, 2 * Hp:]
    # k stays f32 (it feeds exp in kernel B); v/r go out in bf16.
    k_ref[0] = jnp.square(jnp.maximum(kk, 0.0)).astype(k_ref.dtype)
    v_ref[0] = vv.astype(v_ref.dtype)
    r_ref[0] = jax.nn.sigmoid(rr).astype(r_ref.dtype)


# ---------------------------------------------------------------------------
# Kernel B: bidirectional WKV (RUN_CUDA) + output projection / gating.
# ---------------------------------------------------------------------------
def _wkv_output_kernel(k_ref, v_ref, r_ref, w_ref, u_ref, wo_ref, o_ref,
                       m_sc, num_sc, den_sc, *, tT, Hp, T, Tp):
    i = pl.program_id(1)
    j = pl.program_id(2)

    @pl.when(j == 0)
    def _():
        m_sc[...] = jnp.full((tT, Hp), -jnp.inf, jnp.float32)
        num_sc[...] = jnp.zeros((tT, Hp), jnp.float32)
        den_sc[...] = jnp.zeros((tT, Hp), jnp.float32)

    i0 = i * tT
    j0 = pl.multiple_of(j * tT, tT)
    # k/v are batch-resident (constant index_map) -> slice the j tile in VMEM.
    k_j = k_ref[0, pl.ds(j0, tT), :]                         # (tT, Hp) f32
    v_j = v_ref[0, pl.ds(j0, tT), :].astype(jnp.float32)     # (tT, Hp)
    w = w_ref[...].reshape(1, 1, Hp)                         # spatial_decay / T
    u = u_ref[...].reshape(1, 1, Hp)                         # spatial_first / T

    ti = i0 + jax.lax.broadcasted_iota(jnp.int32, (tT, tT), 0)
    tj = j0 + jax.lax.broadcasted_iota(jnp.int32, (tT, tT), 1)
    dist = jnp.abs(ti - tj).astype(jnp.float32)
    base = -(dist - 1.0)[:, :, None] * w + k_j[None, :, :]   # off-diag exponent

    # Only tiles that intersect the diagonal pay for the diagonal select.
    def _with_diag():
        is_diag = (ti == tj)[:, :, None]
        return jnp.where(is_diag, u + k_j[None, :, :], base)

    has_diag = jnp.logical_and(i0 < j0 + tT, j0 < i0 + tT)
    score = jax.lax.cond(has_diag, _with_diag, lambda: base)
    if Tp > T:  # static: mask padded tail tokens so they never contribute
        score = jnp.where((tj < T)[:, :, None], score, -jnp.inf)

    # Flash-style online max over j tiles, per (token, channel).
    m_prev = m_sc[...]
    m_new = jnp.maximum(m_prev, jnp.max(score, axis=1))      # (tT, Hp)
    alpha = jnp.exp(m_prev - m_new)
    p = jnp.exp(score - m_new[:, None, :])                   # (tT, tT, Hp)
    num_sc[...] = alpha * num_sc[...] + jnp.sum(p * v_j[None, :, :], axis=1)
    den_sc[...] = alpha * den_sc[...] + jnp.sum(p, axis=1)
    m_sc[...] = m_new

    @pl.when(j == pl.num_programs(2) - 1)
    def _():
        wkv = num_sc[...] * pl.reciprocal(den_sc[...], approx=True)
        ov = jnp.dot(wkv.astype(jnp.bfloat16), wo_ref[...],
                     preferred_element_type=jnp.float32)     # (tT, Cp)
        o_ref[0] = (r_ref[0].astype(jnp.float32) * ov).astype(o_ref.dtype)


# ---------------------------------------------------------------------------
# Wrapper
# ---------------------------------------------------------------------------
def vrwkv_wkv_channel_mix(x, resolution, params):
    """x: (B, T, C) float32 tokens, T == H*W. Returns (B, T, C)."""
    B, T, C = x.shape
    H, W = resolution
    assert T == H * W

    wk = params["w_key"]        # (C, Hd)
    wv = params["w_value"]      # (C, Hd)
    wr = params["w_recept"]     # (C, C)
    wo = params["w_output"]     # (Hd, C)
    Hd = wk.shape[1]

    Cp = _round_up(C, 128)      # lane-dense channel padding
    Hp = _round_up(Hd, 128)
    f32, bf16 = jnp.float32, jnp.bfloat16
    vmem_limit = _vmem_limit_bytes()

    # ---- kernel A row tiling (target ~256-token blocks, 8-aligned) --------
    A_TOKENS = 256
    cands = [d for d in range(1, H + 1) if H % d == 0 and (d * W) % 8 == 0]
    if cands:
        fit = [d for d in cands if d * W <= A_TOKENS]
        tH = max(fit) if fit else min(cands)
    else:
        tH = H                                  # single block (full-dim token block)
    nH = H // tH
    tTa = tH * W

    # ---- kernel B token tiling: pad T up to a tile multiple, mask tail ----
    temp_budget = min(vmem_limit // 2, 48 * 1024 * 1024)
    tT = 128
    while tT > 16 and 3 * tT * tT * Hp * 4 > temp_budget:
        tT //= 2
    tT = min(tT, _round_up(T, 8))
    Tp = _round_up(T, tT)
    nT = Tp // tT

    # ---- pad / pack parameters (zero rows/cols are inert downstream) ------
    wk_p = jnp.zeros((Cp, Hp), f32).at[:C, :Hd].set(wk)
    wv_p = jnp.zeros((Cp, Hp), f32).at[:C, :Hd].set(wv)
    wr_p = jnp.zeros((Cp, Cp), f32).at[:C, :C].set(wr)
    w_kvr = jnp.concatenate([wk_p, wv_p, wr_p], axis=1).astype(bf16)
    wo_p = jnp.zeros((Hp, Cp), f32).at[:Hd, :C].set(wo).astype(bf16)
    w5_p = jnp.zeros((5, 5, Cp), f32).at[:, :, :C].set(params["omni_w5"])
    w_dec = jnp.zeros((1, Hp), f32).at[0, :Hd].set(params["spatial_decay"] / T)
    w_fst = jnp.zeros((1, Hp), f32).at[0, :Hd].set(params["spatial_first"] / T)

    # ---- padded NHWC image (H+4 rows) + tiny 4-row halo side input --------
    x_img = x.reshape(B, H, W, C)
    x_pad = jnp.pad(x_img, ((0, 0), (2, 2), (2, 2), (0, Cp - C)))   # (B,H+4,W+4,Cp)
    halo_rows = (jnp.arange(nH)[:, None] + 1) * tH + jnp.arange(4)[None, :]
    x_halo = x_pad[:, halo_rows].reshape(B, nH * 4, W + 4, Cp)      # (B,4*nH,W+4,Cp)

    cost_a = pl.CostEstimate(
        flops=int(B * T * Cp * 50 + 2 * B * T * Cp * (2 * Hp + Cp)),
        transcendentals=int(B * T * Cp),
        bytes_accessed=int(B * (H + 4) * (W + 4) * Cp * 4
                           + Cp * (2 * Hp + Cp) * 2
                           + B * T * (4 * Hp + 2 * Hp + 2 * Cp)))

    kern_a = functools.partial(_shift_project_kernel, tH=tH, W=W, Cp=Cp, Hp=Hp)
    k_act, v_act, r_act = pl.pallas_call(
        kern_a,
        out_shape=(
            jax.ShapeDtypeStruct((B, T, Hp), f32),      # k (feeds exp -> f32)
            jax.ShapeDtypeStruct((B, T, Hp), bf16),     # v
            jax.ShapeDtypeStruct((B, T, Cp), bf16),     # r = sigmoid(x@Wr)
        ),
        grid_spec=pltpu.PrefetchScalarGridSpec(
            num_scalar_prefetch=0,
            grid=(B, nH),
            in_specs=[
                pl.BlockSpec((1, tH, W + 4, Cp), lambda b, h: (b, h, 0, 0)),
                pl.BlockSpec((1, 4, W + 4, Cp), lambda b, h: (b, h, 0, 0)),
                pl.BlockSpec((5, 5, Cp), lambda b, h: (0, 0, 0)),
                pl.BlockSpec((Cp, 2 * Hp + Cp), lambda b, h: (0, 0)),
            ],
            out_specs=(
                pl.BlockSpec((1, tTa, Hp), lambda b, h: (b, h, 0)),
                pl.BlockSpec((1, tTa, Hp), lambda b, h: (b, h, 0)),
                pl.BlockSpec((1, tTa, Cp), lambda b, h: (b, h, 0)),
            ),
        ),
        compiler_params=pltpu.CompilerParams(
            dimension_semantics=("parallel", "parallel"),
            vmem_limit_bytes=vmem_limit),
        cost_estimate=cost_a,
    )(x_pad, x_halo, w5_p, w_kvr)

    if Tp != T:   # pad token tail (masked to -inf inside kernel B)
        pad_t = ((0, 0), (0, Tp - T), (0, 0))
        k_act = jnp.pad(k_act, pad_t)
        v_act = jnp.pad(v_act, pad_t)
        r_act = jnp.pad(r_act, pad_t)

    cost_b = pl.CostEstimate(
        flops=int(8 * B * Tp * Tp * Hp + 2 * B * Tp * Hp * Cp),
        transcendentals=int(B * Tp * Tp * Hp),
        bytes_accessed=int(B * Tp * (6 * Hp + 2 * Cp) + B * Tp * Cp * 4
                           + Hp * Cp * 2 + 2 * Hp * 4))

    kern_b = functools.partial(_wkv_output_kernel, tT=tT, Hp=Hp, T=T, Tp=Tp)
    out_p = pl.pallas_call(
        kern_b,
        out_shape=jax.ShapeDtypeStruct((B, Tp, Cp), x.dtype),
        grid_spec=pltpu.PrefetchScalarGridSpec(
            num_scalar_prefetch=0,
            grid=(B, nT, nT),
            in_specs=[
                pl.BlockSpec((1, Tp, Hp), lambda b, i, j: (b, 0, 0)),   # k resident
                pl.BlockSpec((1, Tp, Hp), lambda b, i, j: (b, 0, 0)),   # v resident
                pl.BlockSpec((1, tT, Cp), lambda b, i, j: (b, i, 0)),   # r
                pl.BlockSpec((1, Hp), lambda b, i, j: (0, 0)),          # decay/T
                pl.BlockSpec((1, Hp), lambda b, i, j: (0, 0)),          # first/T
                pl.BlockSpec((Hp, Cp), lambda b, i, j: (0, 0)),         # Wo
            ],
            out_specs=pl.BlockSpec((1, tT, Cp), lambda b, i, j: (b, i, 0)),
            scratch_shapes=[pltpu.VMEM((tT, Hp), f32)] * 3,
        ),
        compiler_params=pltpu.CompilerParams(
            dimension_semantics=("parallel", "parallel", "arbitrary"),
            vmem_limit_bytes=vmem_limit),
        cost_estimate=cost_b,
    )(k_act, v_act, r_act, w_dec, w_fst, wo_p)

    if Tp != T or Cp != C:
        out_p = out_p[:, :T, :C]
    return out_p


# ---------------------------------------------------------------------------
# Pure-JAX f32 reference mirroring the PyTorch forward.
# ---------------------------------------------------------------------------
def _reference(x, resolution, params):
    B, T, C = x.shape
    H, W = resolution
    x_img = x.reshape(B, H, W, C)
    w_hwio = params["omni_w5"][:, :, None, :]               # (5,5,1,C) depthwise
    xs = jax.lax.conv_general_dilated(
        x_img, w_hwio, window_strides=(1, 1), padding=((2, 2), (2, 2)),
        dimension_numbers=("NHWC", "HWIO", "NHWC"),
        feature_group_count=C).reshape(B, T, C)

    k = jnp.square(jnp.maximum(xs @ params["w_key"], 0.0))  # (B,T,Hd)
    v = xs @ params["w_value"]                              # (B,T,Hd)
    w = params["spatial_decay"] / T
    u = params["spatial_first"] / T

    t_idx = jnp.arange(T)
    dist = jnp.abs(t_idx[:, None] - t_idx[None, :]).astype(jnp.float32)
    diag = jnp.eye(T, dtype=bool)[:, :, None]
    bias = jnp.where(diag, u, -(dist[:, :, None] - 1.0) * w)    # (T,T,Hd)
    score = bias[None] + k[:, None, :, :]                       # (B,T,T,Hd)
    score = score - jnp.max(score, axis=2, keepdims=True)
    e = jnp.exp(score)
    num = jnp.sum(e * v[:, None, :, :], axis=2)
    den = jnp.sum(e, axis=2)
    wkv = num / den
    return jax.nn.sigmoid(xs @ params["w_recept"]) * (wkv @ params["w_output"])


def _make_params(key, n_embd, hidden_rate=1):
    """Deterministic synthetic parameters (shapes per module __init__)."""
    C = n_embd
    Hd = int(hidden_rate * n_embd)
    ks = jax.random.split(key, 10)

    # OmniShift: alpha(4) * {identity, 1x1, 3x3, 5x5 depthwise} reparameterized
    # into a single 5x5 depthwise kernel (inference path of OmniShift).
    alpha = jax.random.normal(ks[0], (4,), jnp.float32)
    w1 = jax.random.normal(ks[1], (C,), jnp.float32) * 0.1
    w3 = jax.random.normal(ks[2], (C, 3, 3), jnp.float32) * 0.1
    w5 = jax.random.normal(ks[3], (C, 5, 5), jnp.float32) * 0.1
    eff = alpha[3] * w5
    eff = eff.at[:, 1:4, 1:4].add(alpha[2] * w3)
    eff = eff.at[:, 2, 2].add(alpha[1] * w1 + alpha[0])
    omni_w5 = jnp.transpose(eff, (1, 2, 0))                 # (5, 5, C) channel-last

    # nn.Linear weights stored as (in, out) so forward is x @ W.
    w_key = jax.random.normal(ks[4], (C, Hd), jnp.float32) * (0.25 / jnp.sqrt(C))
    w_value = jax.random.normal(ks[5], (C, Hd), jnp.float32) / jnp.sqrt(C)
    w_recept = jax.random.normal(ks[6], (C, C), jnp.float32) / jnp.sqrt(C)
    w_output = jax.random.normal(ks[7], (Hd, C), jnp.float32) / jnp.sqrt(Hd)
    # hidden_rate=1 -> hidden_sz == n_embd, matching spatial_decay/first shape.
    spatial_decay = jax.random.normal(ks[8], (Hd,), jnp.float32)
    spatial_first = jax.random.normal(ks[9], (Hd,), jnp.float32)
    return dict(omni_w5=omni_w5, w_key=w_key, w_value=w_value,
                w_recept=w_recept, w_output=w_output,
                spatial_decay=spatial_decay, spatial_first=spatial_first)


if __name__ == "__main__":
    B, H, W, C = 2, 16, 32, 32
    T = H * W

    root = jax.random.PRNGKey(0)
    k_x, k_p = jax.random.split(root)
    x = jax.random.normal(k_x, (B, T, C), jnp.float32)
    params = _make_params(k_p, n_embd=C, hidden_rate=1)

    out = vrwkv_wkv_channel_mix(x, (H, W), params)
    out = jax.block_until_ready(out)
    assert out.shape == (B, T, C)

    ref = _reference(x, (H, W), params)
    err = float(jnp.max(jnp.abs(out - ref)))
    scale = float(jnp.max(jnp.abs(ref)))
    # bf16 MXU operands / bf16 v,r intermediates (f32 accumulation everywhere)
    # -> allow a few % of the output scale.
    assert err <= 5e-2 * scale + 1e-2, (
        f"Pallas mismatch: max|err|={err:.4e}, ref scale={scale:.4e}")
    print("KERNEL_OK")
</pallas_src>

<mosaic_0001>
module attributes {stable_mosaic.version = 11 : i64} {
  func.func @_shift_project_kernel(%arg0: i32, %arg1: i32, %arg2: memref<1x8x36x128xf32, #tpu.memory_space<vmem>>, %arg3: memref<1x4x36x128xf32, #tpu.memory_space<vmem>>, %arg4: memref<5x5x128xf32, #tpu.memory_space<vmem>>, %arg5: memref<128x384xbf16, #tpu.memory_space<vmem>>, %arg6: memref<1x256x128xf32, #tpu.memory_space<vmem>>, %arg7: memref<1x256x128xbf16, #tpu.memory_space<vmem>>, %arg8: memref<1x256x128xbf16, #tpu.memory_space<vmem>>) attributes {dimension_semantics = [#tpu.dimension_semantics<parallel>, #tpu.dimension_semantics<parallel>], iteration_bounds = array<i64: 2, 2>, scalar_prefetch = 0 : i64, scratch_operands = 0 : i64, tpu.core_type = #tpu.core_type<tc>, window_params = [{transform_indices = @transform_0, window_bounds = array<i64: 1, 8, 36, 128>}, {transform_indices = @transform_1, window_bounds = array<i64: 1, 4, 36, 128>}, {pipeline_mode = #tpu.pipeline_mode<synchronous>, transform_indices = @transform_2, window_bounds = array<i64: 5, 5, 128>}, {pipeline_mode = #tpu.pipeline_mode<synchronous>, transform_indices = @transform_3, window_bounds = array<i64: 128, 384>}, {transform_indices = @transform_4, window_bounds = array<i64: 1, 256, 128>}, {transform_indices = @transform_5, window_bounds = array<i64: 1, 256, 128>}, {transform_indices = @transform_6, window_bounds = array<i64: 1, 256, 128>}]} {
    %c0 = arith.constant 0 : index
    %c0_0 = arith.constant 0 : index
    %c0_1 = arith.constant 0 : index
    %c0_2 = arith.constant 0 : index
    %0 = vector.load %arg2[%c0, %c0_0, %c0_1, %c0_2] : memref<1x8x36x128xf32, #tpu.memory_space<vmem>>, vector<1x8x36x128xf32>
    %1 = vector.shape_cast %0 : vector<1x8x36x128xf32> to vector<8x36x128xf32>
    %c0_3 = arith.constant 0 : index
    %c0_4 = arith.constant 0 : index
    %c0_5 = arith.constant 0 : index
    %c0_6 = arith.constant 0 : index
    %2 = vector.load %arg3[%c0_3, %c0_4, %c0_5, %c0_6] : memref<1x4x36x128xf32, #tpu.memory_space<vmem>>, vector<1x4x36x128xf32>
    %3 = vector.shape_cast %2 : vector<1x4x36x128xf32> to vector<4x36x128xf32>
    %4 = tpu.concatenate %1, %3 in 0 : vector<8x36x128xf32>, vector<4x36x128xf32> -> vector<12x36x128xf32>
    %c0_7 = arith.constant 0 : index
    %c0_8 = arith.constant 0 : index
    %c0_9 = arith.constant 0 : index
    %5 = vector.load %arg4[%c0_7, %c0_8, %c0_9] : memref<5x5x128xf32, #tpu.memory_space<vmem>>, vector<5x5x128xf32>
    %cst = arith.constant 0.000000e+00 : f32
    %6 = vector.broadcast %cst : f32 to vector<8x32x128xf32>
    %cst_10 = arith.constant 0.000000e+00 : f32
    %7 = vector.broadcast %cst_10 : f32 to vector<8x32x128xf32>
    %8 = vector.extract_strided_slice %4 {offsets = [0, 0, 0], sizes = [12, 32, 128], strides = [1, 1, 1]} : vector<12x36x128xf32> to vector<12x32x128xf32>
    %9 = vector.extract_strided_slice %8 {offsets = [0, 0, 0], sizes = [8, 32, 128], strides = [1, 1, 1]} : vector<12x32x128xf32> to vector<8x32x128xf32>
    %10 = vector.extract_strided_slice %5 {offsets = [0, 0, 0], sizes = [1, 1, 128], strides = [1, 1, 1]} : vector<5x5x128xf32> to vector<1x1x128xf32>
    %11 = vector.shape_cast %10 : vector<1x1x128xf32> to vector<128xf32>
    %12 = vector.shape_cast %11 : vector<128xf32> to vector<1x1x128xf32>
    %13 = vector.broadcast %12 : vector<1x1x128xf32> to vector<8x32x128xf32>
    %14 = arith.mulf %9, %13 : vector<8x32x128xf32>
    %15 = arith.addf %6, %14 : vector<8x32x128xf32>
    %16 = vector.extract_strided_slice %8 {offsets = [1, 0, 0], sizes = [8, 32, 128], strides = [1, 1, 1]} : vector<12x32x128xf32> to vector<8x32x128xf32>
    %17 = vector.extract_strided_slice %5 {offsets = [1, 0, 0], sizes = [1, 1, 128], strides = [1, 1, 1]} : vector<5x5x128xf32> to vector<1x1x128xf32>
    %18 = vector.shape_cast %17 : vector<1x1x128xf32> to vector<128xf32>
    %19 = vector.shape_cast %18 : vector<128xf32> to vector<1x1x128xf32>
    %20 = vector.broadcast %19 : vector<1x1x128xf32> to vector<8x32x128xf32>
    %21 = arith.mulf %16, %20 : vector<8x32x128xf32>
    %22 = arith.addf %7, %21 : vector<8x32x128xf32>
    %23 = vector.extract_strided_slice %8 {offsets = [2, 0, 0], sizes = [8, 32, 128], strides = [1, 1, 1]} : vector<12x32x128xf32> to vector<8x32x128xf32>
    %24 = vector.extract_strided_slice %5 {offsets = [2, 0, 0], sizes = [1, 1, 128], strides = [1, 1, 1]} : vector<5x5x128xf32> to vector<1x1x128xf32>
    %25 = vector.shape_cast %24 : vector<1x1x128xf32> to vector<128xf32>
    %26 = vector.shape_cast %25 : vector<128xf32> to vector<1x1x128xf32>
    %27 = vector.broadcast %26 : vector<1x1x128xf32> to vector<8x32x128xf32>
    %28 = arith.mulf %23, %27 : vector<8x32x128xf32>
    %29 = arith.addf %15, %28 : vector<8x32x128xf32>
    %30 = vector.extract_strided_slice %8 {offsets = [3, 0, 0], sizes = [8, 32, 128], strides = [1, 1, 1]} : vector<12x32x128xf32> to vector<8x32x128xf32>
    %31 = vector.extract_strided_slice %5 {offsets = [3, 0, 0], sizes = [1, 1, 128], strides = [1, 1, 1]} : vector<5x5x128xf32> to vector<1x1x128xf32>
    %32 = vector.shape_cast %31 : vector<1x1x128xf32> to vector<128xf32>
    %33 = vector.shape_cast %32 : vector<128xf32> to vector<1x1x128xf32>
    %34 = vector.broadcast %33 : vector<1x1x128xf32> to vector<8x32x128xf32>
    %35 = arith.mulf %30, %34 : vector<8x32x128xf32>
    %36 = arith.addf %22, %35 : vector<8x32x128xf32>
    %37 = vector.extract_strided_slice %8 {offsets = [4, 0, 0], sizes = [8, 32, 128], strides = [1, 1, 1]} : vector<12x32x128xf32> to vector<8x32x128xf32>
    %38 = vector.extract_strided_slice %5 {offsets = [4, 0, 0], sizes = [1, 1, 128], strides = [1, 1, 1]} : vector<5x5x128xf32> to vector<1x1x128xf32>
    %39 = vector.shape_cast %38 : vector<1x1x128xf32> to vector<128xf32>
    %40 = vector.shape_cast %39 : vector<128xf32> to vector<1x1x128xf32>
    %41 = vector.broadcast %40 : vector<1x1x128xf32> to vector<8x32x128xf32>
    %42 = arith.mulf %37, %41 : vector<8x32x128xf32>
    %43 = arith.addf %29, %42 : vector<8x32x128xf32>
    %44 = vector.extract_strided_slice %4 {offsets = [0, 1, 0], sizes = [12, 32, 128], strides = [1, 1, 1]} : vector<12x36x128xf32> to vector<12x32x128xf32>
    %45 = vector.extract_strided_slice %44 {offsets = [0, 0, 0], sizes = [8, 32, 128], strides = [1, 1, 1]} : vector<12x32x128xf32> to vector<8x32x128xf32>
    %46 = vector.extract_strided_slice %5 {offsets = [0, 1, 0], sizes = [1, 1, 128], strides = [1, 1, 1]} : vector<5x5x128xf32> to vector<1x1x128xf32>
    %47 = vector.shape_cast %46 : vector<1x1x128xf32> to vector<128xf32>
    %48 = vector.shape_cast %47 : vector<128xf32> to vector<1x1x128xf32>
    %49 = vector.broadcast %48 : vector<1x1x128xf32> to vector<8x32x128xf32>
    %50 = arith.mulf %45, %49 : vector<8x32x128xf32>
    %51 = arith.addf %36, %50 : vector<8x32x128xf32>
    %52 = vector.extract_strided_slice %44 {offsets = [1, 0, 0], sizes = [8, 32, 128], strides = [1, 1, 1]} : vector<12x32x128xf32> to vector<8x32x128xf32>
    %53 = vector.extract_strided_slice %5 {offsets = [1, 1, 0], sizes = [1, 1, 128], strides = [1, 1, 1]} : vector<5x5x128xf32> to vector<1x1x128xf32>
    %54 = vector.shape_cast %53 : vector<1x1x128xf32> to vector<128xf32>
    %55 = vector.shape_cast %54 : vector<128xf32> to vector<1x1x128xf32>
    %56 = vector.broadcast %55 : vector<1x1x128xf32> to vector<8x32x128xf32>
    %57 = arith.mulf %52, %56 : vector<8x32x128xf32>
    %58 = arith.addf %43, %57 : vector<8x32x128xf32>
    %59 = vector.extract_strided_slice %44 {offsets = [2, 0, 0], sizes = [8, 32, 128], strides = [1, 1, 1]} : vector<12x32x128xf32> to vector<8x32x128xf32>
    %60 = vector.extract_strided_slice %5 {offsets = [2, 1, 0], sizes = [1, 1, 128], strides = [1, 1, 1]} : vector<5x5x128xf32> to vector<1x1x128xf32>
    %61 = vector.shape_cast %60 : vector<1x1x128xf32> to vector<128xf32>
    %62 = vector.shape_cast %61 : vector<128xf32> to vector<1x1x128xf32>
    %63 = vector.broadcast %62 : vector<1x1x128xf32> to vector<8x32x128xf32>
    %64 = arith.mulf %59, %63 : vector<8x32x128xf32>
    %65 = arith.addf %51, %64 : vector<8x32x128xf32>
    %66 = vector.extract_strided_slice %44 {offsets = [3, 0, 0], sizes = [8, 32, 128], strides = [1, 1, 1]} : vector<12x32x128xf32> to vector<8x32x128xf32>
    %67 = vector.extract_strided_slice %5 {offsets = [3, 1, 0], sizes = [1, 1, 128], strides = [1, 1, 1]} : vector<5x5x128xf32> to vector<1x1x128xf32>
    %68 = vector.shape_cast %67 : vector<1x1x128xf32> to vector<128xf32>
    %69 = vector.shape_cast %68 : vector<128xf32> to vector<1x1x128xf32>
    %70 = vector.broadcast %69 : vector<1x1x128xf32> to vector<8x32x128xf32>
    %71 = arith.mulf %66, %70 : vector<8x32x128xf32>
    %72 = arith.addf %58, %71 : vector<8x32x128xf32>
    %73 = vector.extract_strided_slice %44 {offsets = [4, 0, 0], sizes = [8, 32, 128], strides = [1, 1, 1]} : vector<12x32x128xf32> to vector<8x32x128xf32>
    %74 = vector.extract_strided_slice %5 {offsets = [4, 1, 0], sizes = [1, 1, 128], strides = [1, 1, 1]} : vector<5x5x128xf32> to vector<1x1x128xf32>
    %75 = vector.shape_cast %74 : vector<1x1x128xf32> to vector<128xf32>
    %76 = vector.shape_cast %75 : vector<128xf32> to vector<1x1x128xf32>
    %77 = vector.broadcast %76 : vector<1x1x128xf32> to vector<8x32x128xf32>
    %78 = arith.mulf %73, %77 : vector<8x32x128xf32>
    %79 = arith.addf %65, %78 : vector<8x32x128xf32>
    %80 = vector.extract_strided_slice %4 {offsets = [0, 2, 0], sizes = [12, 32, 128], strides = [1, 1, 1]} : vector<12x36x128xf32> to vector<12x32x128xf32>
    %81 = vector.extract_strided_slice %80 {offsets = [0, 0, 0], sizes = [8, 32, 128], strides = [1, 1, 1]} : vector<12x32x128xf32> to vector<8x32x128xf32>
    %82 = vector.extract_strided_slice %5 {offsets = [0, 2, 0], sizes = [1, 1, 128], strides = [1, 1, 1]} : vector<5x5x128xf32> to vector<1x1x128xf32>
    %83 = vector.shape_cast %82 : vector<1x1x128xf32> to vector<128xf32>
    %84 = vector.shape_cast %83 : vector<128xf32> to vector<1x1x128xf32>
    %85 = vector.broadcast %84 : vector<1x1x128xf32> to vector<8x32x128xf32>
    %86 = arith.mulf %81, %85 : vector<8x32x128xf32>
    %87 = arith.addf %72, %86 : vector<8x32x128xf32>
    %88 = vector.extract_strided_slice %80 {offsets = [1, 0, 0], sizes = [8, 32, 128], strides = [1, 1, 1]} : vector<12x32x128xf32> to vector<8x32x128xf32>
    %89 = vector.extract_strided_slice %5 {offsets = [1, 2, 0], sizes = [1, 1, 128], strides = [1, 1, 1]} : vector<5x5x128xf32> to vector<1x1x128xf32>
    %90 = vector.shape_cast %89 : vector<1x1x128xf32> to vector<128xf32>
    %91 = vector.shape_cast %90 : vector<128xf32> to vector<1x1x128xf32>
    %92 = vector.broadcast %91 : vector<1x1x128xf32> to vector<8x32x128xf32>
    %93 = arith.mulf %88, %92 : vector<8x32x128xf32>
    %94 = arith.addf %79, %93 : vector<8x32x128xf32>
    %95 = vector.extract_strided_slice %80 {offsets = [2, 0, 0], sizes = [8, 32, 128], strides = [1, 1, 1]} : vector<12x32x128xf32> to vector<8x32x128xf32>
    %96 = vector.extract_strided_slice %5 {offsets = [2, 2, 0], sizes = [1, 1, 128], strides = [1, 1, 1]} : vector<5x5x128xf32> to vector<1x1x128xf32>
    %97 = vector.shape_cast %96 : vector<1x1x128xf32> to vector<128xf32>
    %98 = vector.shape_cast %97 : vector<128xf32> to vector<1x1x128xf32>
    %99 = vector.broadcast %98 : vector<1x1x128xf32> to vector<8x32x128xf32>
    %100 = arith.mulf %95, %99 : vector<8x32x128xf32>
    %101 = arith.addf %87, %100 : vector<8x32x128xf32>
    %102 = vector.extract_strided_slice %80 {offsets = [3, 0, 0], sizes = [8, 32, 128], strides = [1, 1, 1]} : vector<12x32x128xf32> to vector<8x32x128xf32>
    %103 = vector.extract_strided_slice %5 {offsets = [3, 2, 0], sizes = [1, 1, 128], strides = [1, 1, 1]} : vector<5x5x128xf32> to vector<1x1x128xf32>
    %104 = vector.shape_cast %103 : vector<1x1x128xf32> to vector<128xf32>
    %105 = vector.shape_cast %104 : vector<128xf32> to vector<1x1x128xf32>
    %106 = vector.broadcast %105 : vector<1x1x128xf32> to vector<8x32x128xf32>
    %107 = arith.mulf %102, %106 : vector<8x32x128xf32>
    %108 = arith.addf %94, %107 : vector<8x32x128xf32>
    %109 = vector.extract_strided_slice %80 {offsets = [4, 0, 0], sizes = [8, 32, 128], strides = [1, 1, 1]} : vector<12x32x128xf32> to vector<8x32x128xf32>
    %110 = vector.extract_strided_slice %5 {offsets = [4, 2, 0], sizes = [1, 1, 128], strides = [1, 1, 1]} : vector<5x5x128xf32> to vector<1x1x128xf32>
    %111 = vector.shape_cast %110 : vector<1x1x128xf32> to vector<128xf32>
    %112 = vector.shape_cast %111 : vector<128xf32> to vector<1x1x128xf32>
    %113 = vector.broadcast %112 : vector<1x1x128xf32> to vector<8x32x128xf32>
    %114 = arith.mulf %109, %113 : vector<8x32x128xf32>
    %115 = arith.addf %101, %114 : vector<8x32x128xf32>
    %116 = vector.extract_strided_slice %4 {offsets = [0, 3, 0], sizes = [12, 32, 128], strides = [1, 1, 1]} : vector<12x36x128xf32> to vector<12x32x128xf32>
    %117 = vector.extract_strided_slice %116 {offsets = [0, 0, 0], sizes = [8, 32, 128], strides = [1, 1, 1]} : vector<12x32x128xf32> to vector<8x32x128xf32>
    %118 = vector.extract_strided_slice %5 {offsets = [0, 3, 0], sizes = [1, 1, 128], strides = [1, 1, 1]} : vector<5x5x128xf32> to vector<1x1x128xf32>
    %119 = vector.shape_cast %118 : vector<1x1x128xf32> to vector<128xf32>
    %120 = vector.shape_cast %119 : vector<128xf32> to vector<1x1x128xf32>
    %121 = vector.broadcast %120 : vector<1x1x128xf32> to vector<8x32x128xf32>
    %122 = arith.mulf %117, %121 : vector<8x32x128xf32>
    %123 = arith.addf %108, %122 : vector<8x32x128xf32>
    %124 = vector.extract_strided_slice %116 {offsets = [1, 0, 0], sizes = [8, 32, 128], strides = [1, 1, 1]} : vector<12x32x128xf32> to vector<8x32x128xf32>
    %125 = vector.extract_strided_slice %5 {offsets = [1, 3, 0], sizes = [1, 1, 128], strides = [1, 1, 1]} : vector<5x5x128xf32> to vector<1x1x128xf32>
    %126 = vector.shape_cast %125 : vector<1x1x128xf32> to vector<128xf32>
    %127 = vector.shape_cast %126 : vector<128xf32> to vector<1x1x128xf32>
    %128 = vector.broadcast %127 : vector<1x1x128xf32> to vector<8x32x128xf32>
    %129 = arith.mulf %124, %128 : vector<8x32x128xf32>
    %130 = arith.addf %115, %129 : vector<8x32x128xf32>
    %131 = vector.extract_strided_slice %116 {offsets = [2, 0, 0], sizes = [8, 32, 128], strides = [1, 1, 1]} : vector<12x32x128xf32> to vector<8x32x128xf32>
    %132 = vector.extract_strided_slice %5 {offsets = [2, 3, 0], sizes = [1, 1, 128], strides = [1, 1, 1]} : vector<5x5x128xf32> to vector<1x1x128xf32>
    %133 = vector.shape_cast %132 : vector<1x1x128xf32> to vector<128xf32>
    %134 = vector.shape_cast %133 : vector<128xf32> to vector<1x1x128xf32>
    %135 = vector.broadcast %134 : vector<1x1x128xf32> to vector<8x32x128xf32>
    %136 = arith.mulf %131, %135 : vector<8x32x128xf32>
    %137 = arith.addf %123, %136 : vector<8x32x128xf32>
    %138 = vector.extract_strided_slice %116 {offsets = [3, 0, 0], sizes = [8, 32, 128], strides = [1, 1, 1]} : vector<12x32x128xf32> to vector<8x32x128xf32>
    %139 = vector.extract_strided_slice %5 {offsets = [3, 3, 0], sizes = [1, 1, 128], strides = [1, 1, 1]} : vector<5x5x128xf32> to vector<1x1x128xf32>
    %140 = vector.shape_cast %139 : vector<1x1x128xf32> to vector<128xf32>
    %141 = vector.shape_cast %140 : vector<128xf32> to vector<1x1x128xf32>
    %142 = vector.broadcast %141 : vector<1x1x128xf32> to vector<8x32x128xf32>
    %143 = arith.mulf %138, %142 : vector<8x32x128xf32>
    %144 = arith.addf %130, %143 : vector<8x32x128xf32>
    %145 = vector.extract_strided_slice %116 {offsets = [4, 0, 0], sizes = [8, 32, 128], strides = [1, 1, 1]} : vector<12x32x128xf32> to vector<8x32x128xf32>
    %146 = vector.extract_strided_slice %5 {offsets = [4, 3, 0], sizes = [1, 1, 128], strides = [1, 1, 1]} : vector<5x5x128xf32> to vector<1x1x128xf32>
    %147 = vector.shape_cast %146 : vector<1x1x128xf32> to vector<128xf32>
    %148 = vector.shape_cast %147 : vector<128xf32> to vector<1x1x128xf32>
    %149 = vector.broadcast %148 : vector<1x1x128xf32> to vector<8x32x128xf32>
    %150 = arith.mulf %145, %149 : vector<8x32x128xf32>
    %151 = arith.addf %137, %150 : vector<8x32x128xf32>
    %152 = vector.extract_strided_slice %4 {offsets = [0, 4, 0], sizes = [12, 32, 128], strides = [1, 1, 1]} : vector<12x36x128xf32> to vector<12x32x128xf32>
    %153 = vector.extract_strided_slice %152 {offsets = [0, 0, 0], sizes = [8, 32, 128], strides = [1, 1, 1]} : vector<12x32x128xf32> to vector<8x32x128xf32>
    %154 = vector.extract_strided_slice %5 {offsets = [0, 4, 0], sizes = [1, 1, 128], strides = [1, 1, 1]} : vector<5x5x128xf32> to vector<1x1x128xf32>
    %155 = vector.shape_cast %154 : vector<1x1x128xf32> to vector<128xf32>
    %156 = vector.shape_cast %155 : vector<128xf32> to vector<1x1x128xf32>
    %157 = vector.broadcast %156 : vector<1x1x128xf32> to vector<8x32x128xf32>
    %158 = arith.mulf %153, %157 : vector<8x32x128xf32>
    %159 = arith.addf %144, %158 : vector<8x32x128xf32>
    %160 = vector.extract_strided_slice %152 {offsets = [1, 0, 0], sizes = [8, 32, 128], strides = [1, 1, 1]} : vector<12x32x128xf32> to vector<8x32x128xf32>
    %161 = vector.extract_strided_slice %5 {offsets = [1, 4, 0], sizes = [1, 1, 128], strides = [1, 1, 1]} : vector<5x5x128xf32> to vector<1x1x128xf32>
    %162 = vector.shape_cast %161 : vector<1x1x128xf32> to vector<128xf32>
    %163 = vector.shape_cast %162 : vector<128xf32> to vector<1x1x128xf32>
    %164 = vector.broadcast %163 : vector<1x1x128xf32> to vector<8x32x128xf32>
    %165 = arith.mulf %160, %164 : vector<8x32x128xf32>
    %166 = arith.addf %151, %165 : vector<8x32x128xf32>
    %167 = vector.extract_strided_slice %152 {offsets = [2, 0, 0], sizes = [8, 32, 128], strides = [1, 1, 1]} : vector<12x32x128xf32> to vector<8x32x128xf32>
    %168 = vector.extract_strided_slice %5 {offsets = [2, 4, 0], sizes = [1, 1, 128], strides = [1, 1, 1]} : vector<5x5x128xf32> to vector<1x1x128xf32>
    %169 = vector.shape_cast %168 : vector<1x1x128xf32> to vector<128xf32>
    %170 = vector.shape_cast %169 : vector<128xf32> to vector<1x1x128xf32>
    %171 = vector.broadcast %170 : vector<1x1x128xf32> to vector<8x32x128xf32>
    %172 = arith.mulf %167, %171 : vector<8x32x128xf32>
    %173 = arith.addf %159, %172 : vector<8x32x128xf32>
    %174 = vector.extract_strided_slice %152 {offsets = [3, 0, 0], sizes = [8, 32, 128], strides = [1, 1, 1]} : vector<12x32x128xf32> to vector<8x32x128xf32>
    %175 = vector.extract_strided_slice %5 {offsets = [3, 4, 0], sizes = [1, 1, 128], strides = [1, 1, 1]} : vector<5x5x128xf32> to vector<1x1x128xf32>
    %176 = vector.shape_cast %175 : vector<1x1x128xf32> to vector<128xf32>
    %177 = vector.shape_cast %176 : vector<128xf32> to vector<1x1x128xf32>
    %178 = vector.broadcast %177 : vector<1x1x128xf32> to vector<8x32x128xf32>
    %179 = arith.mulf %174, %178 : vector<8x32x128xf32>
    %180 = arith.addf %166, %179 : vector<8x32x128xf32>
    %181 = vector.extract_strided_slice %152 {offsets = [4, 0, 0], sizes = [8, 32, 128], strides = [1, 1, 1]} : vector<12x32x128xf32> to vector<8x32x128xf32>
    %182 = vector.extract_strided_slice %5 {offsets = [4, 4, 0], sizes = [1, 1, 128], strides = [1, 1, 1]} : vector<5x5x128xf32> to vector<1x1x128xf32>
    %183 = vector.shape_cast %182 : vector<1x1x128xf32> to vector<128xf32>
    %184 = vector.shape_cast %183 : vector<128xf32> to vector<1x1x128xf32>
    %185 = vector.broadcast %184 : vector<1x1x128xf32> to vector<8x32x128xf32>
    %186 = arith.mulf %181, %185 : vector<8x32x128xf32>
    %187 = arith.addf %173, %186 : vector<8x32x128xf32>
    %188 = arith.addf %187, %180 : vector<8x32x128xf32>
    %189 = vector.shape_cast %188 : vector<8x32x128xf32> to vector<256x128xf32>
    %190 = arith.truncf %189 : vector<256x128xf32> to vector<256x128xbf16>
    %c0_11 = arith.constant 0 : index
    %c0_12 = arith.constant 0 : index
    %191 = vector.load %arg5[%c0_11, %c0_12] : memref<128x384xbf16, #tpu.memory_space<vmem>>, vector<128x384xbf16>
    %cst_13 = arith.constant dense<0.000000e+00> : vector<256x384xf32>
    %192 = tpu.matmul %190, %191, %cst_13 {dimension_numbers = #tpu.dot_dimension_numbers<[1], [0], [0], [1], [0, 0, 1, 1], [], []>} : vector<256x128xbf16>, vector<128x384xbf16>, vector<256x384xf32> -> vector<256x384xf32>
    %193 = vector.extract_strided_slice %192 {offsets = [0, 0], sizes = [256, 128], strides = [1, 1]} : vector<256x384xf32> to vector<256x128xf32>
    %194 = vector.extract_strided_slice %192 {offsets = [0, 128], sizes = [256, 128], strides = [1, 1]} : vector<256x384xf32> to vector<256x128xf32>
    %195 = vector.extract_strided_slice %192 {offsets = [0, 256], sizes = [256, 128], strides = [1, 1]} : vector<256x384xf32> to vector<256x128xf32>
    %cst_14 = arith.constant 0.000000e+00 : f32
    %196 = vector.broadcast %cst_14 : f32 to vector<256x128xf32>
    %197 = arith.maximumf %193, %196 : vector<256x128xf32>
    %198 = arith.mulf %197, %197 : vector<256x128xf32>
    %c0_15 = arith.constant 0 : index
    %c0_16 = arith.constant 0 : index
    %c0_17 = arith.constant 0 : index
    %199 = vector.load %arg6[%c0_15, %c0_16, %c0_17] : memref<1x256x128xf32, #tpu.memory_space<vmem>>, vector<1x256x128xf32>
    %200 = vector.shape_cast %199 : vector<1x256x128xf32> to vector<256x128xf32>
    %201 = vector.shape_cast %198 : vector<256x128xf32> to vector<1x256x128xf32>
    tpu.vector_store %arg6[%c0_15, %c0_16, %c0_17], %201 {strides = array<i32>} : memref<1x256x128xf32, #tpu.memory_space<vmem>>, vector<1x256x128xf32>,
    %202 = arith.truncf %194 : vector<256x128xf32> to vector<256x128xbf16>
    %c0_18 = arith.constant 0 : index
    %c0_19 = arith.constant 0 : index
    %c0_20 = arith.constant 0 : index
    %203 = vector.load %arg7[%c0_18, %c0_19, %c0_20] : memref<1x256x128xbf16, #tpu.memory_space<vmem>>, vector<1x256x128xbf16>
    %204 = vector.shape_cast %203 : vector<1x256x128xbf16> to vector<256x128xbf16>
    %205 = vector.shape_cast %202 : vector<256x128xbf16> to vector<1x256x128xbf16>
    tpu.vector_store %arg7[%c0_18, %c0_19, %c0_20], %205 {strides = array<i32>} : memref<1x256x128xbf16, #tpu.memory_space<vmem>>, vector<1x256x128xbf16>,
    %206 = arith.negf %195 : vector<256x128xf32>
    %207 = math.exp %206 : vector<256x128xf32>
    %cst_21 = arith.constant 1.000000e+00 : f32
    %208 = vector.broadcast %cst_21 : f32 to vector<256x128xf32>
    %209 = arith.addf %208, %207 : vector<256x128xf32>
    %210 = arith.divf %208, %209 : vector<256x128xf32>
    %211 = arith.truncf %210 : vector<256x128xf32> to vector<256x128xbf16>
    %c0_22 = arith.constant 0 : index
    %c0_23 = arith.constant 0 : index
    %c0_24 = arith.constant 0 : index
    %212 = vector.load %arg8[%c0_22, %c0_23, %c0_24] : memref<1x256x128xbf16, #tpu.memory_space<vmem>>, vector<1x256x128xbf16>
    %213 = vector.shape_cast %212 : vector<1x256x128xbf16> to vector<256x128xbf16>
    %214 = vector.shape_cast %211 : vector<256x128xbf16> to vector<1x256x128xbf16>
    tpu.vector_store %arg8[%c0_22, %c0_23, %c0_24], %214 {strides = array<i32>} : memref<1x256x128xbf16, #tpu.memory_space<vmem>>, vector<1x256x128xbf16>,
    return
  }
  func.func @transform_0(%arg0: i32, %arg1: i32) -> (i32, i32, i32, i32) {
    %c0_i32 = arith.constant 0 : i32
    %c0_i32_0 = arith.constant 0 : i32
    %c0_i32_1 = arith.constant 0 : i32
    return %arg0, %arg1, %c0_i32, %c0_i32_0 : i32, i32, i32, i32
  }
  func.func @transform_1(%arg0: i32, %arg1: i32) -> (i32, i32, i32, i32) {
    %c0_i32 = arith.constant 0 : i32
    %c0_i32_0 = arith.constant 0 : i32
    %c0_i32_1 = arith.constant 0 : i32
    return %arg0, %arg1, %c0_i32, %c0_i32_0 : i32, i32, i32, i32
  }
  func.func @transform_2(%arg0: i32, %arg1: i32) -> (i32, i32, i32) {
    %c0_i32 = arith.constant 0 : i32
    %c0_i32_0 = arith.constant 0 : i32
    %c0_i32_1 = arith.constant 0 : i32
    %c0_i32_2 = arith.constant 0 : i32
    return %c0_i32, %c0_i32_0, %c0_i32_1 : i32, i32, i32
  }
  func.func @transform_3(%arg0: i32, %arg1: i32) -> (i32, i32) {
    %c0_i32 = arith.constant 0 : i32
    %c0_i32_0 = arith.constant 0 : i32
    %c0_i32_1 = arith.constant 0 : i32
    return %c0_i32, %c0_i32_0 : i32, i32
  }
  func.func @transform_4(%arg0: i32, %arg1: i32) -> (i32, i32, i32) {
    %c0_i32 = arith.constant 0 : i32
    %c0_i32_0 = arith.constant 0 : i32
    return %arg0, %arg1, %c0_i32 : i32, i32, i32
  }
  func.func @transform_5(%arg0: i32, %arg1: i32) -> (i32, i32, i32) {
    %c0_i32 = arith.constant 0 : i32
    %c0_i32_0 = arith.constant 0 : i32
    return %arg0, %arg1, %c0_i32 : i32, i32, i32
  }
  func.func @transform_6(%arg0: i32, %arg1: i32) -> (i32, i32, i32) {
    %c0_i32 = arith.constant 0 : i32
    %c0_i32_0 = arith.constant 0 : i32
    return %arg0, %arg1, %c0_i32 : i32, i32, i32
  }
}

</mosaic_0001>

<bundles_post_ra>
// kernel: tpu_custom_call.1
= control target key start
LH: loop header
LB: loop body
LE: loop exit
PB: predicated region body
PF: predicated region fallthrough
CT: control target
= control target key end

     0   :  { %s12809_s0 = inlined_call_operand.hbm [shape: f32[2,20,36,128], index: 0, kind: input, shape index: {}]   ;;  %s12810_s1 = inlined_call_operand.hbm [shape: f32[2,8,36,128], index: 1, kind: input, shape index: {}]   ;;  %s12811_s2 = inlined_call_operand.hbm [shape: f32[5,5,128], index: 2, kind: input, shape index: {}]   ;;  %s12812_s3 = inlined_call_operand.hbm [shape: bf16[128,384], index: 3, kind: input, shape index: {}]   ;;  %s12813_s4 = inlined_call_operand.hbm [shape: f32[2,512,128], index: 4, kind: output, shape index: {0}]   ;;  %s12814_s5 = inlined_call_operand.hbm [shape: bf16[2,512,128], index: 5, kind: output, shape index: {1}]   ;;  %s12815_s6 = inlined_call_operand.hbm [shape: bf16[2,512,128], index: 6, kind: output, shape index: {2}]  }
   0x1   :  { %13293 = sst [smem:[#allocation100_spill]] %s12811_s2 }
   0x2   :  { %13294 = sst [smem:[#allocation101_spill]] %s12812_s3 }
   0x3   :  { %13295 = sst [smem:[#allocation102_spill]] %s12814_s5 }
   0x4   :  { %13296 = sst [smem:[#allocation103_spill]] %s12815_s6 }
   0x5   :  { %12 = vsyncpa [#allocation3], 0 }
   0x6   :  { %14 = vsyncpa [#allocation3 + $0x1], 0 }
   0x7   :  { %15 = vsyncpa [#allocation6], 0 }
   0x8   :  { %17 = vsyncpa [#allocation6 + $0x1], 0 }
   0x9   :  { %18 = vsyncpa [#allocation9], 0 }
   0xa   :  { %19 = vsyncpa [#allocation4], 0 }
   0xb   :  { %21 = vsyncpa [#allocation4 + $0x1], 0 }
   0xc   :  { %22 = vsyncpa [#allocation12], 0 }
   0xd   :  { %24 = vsyncpa [#allocation12 + $0x1], 0  ;;  %s7886_s21 = smov 0   ;;  %s7888_s22 = smov 0  }
   0xe   :  { %s7890_s23 = smov 0   ;;  %s7892_s24 = smov 0  }
   0xf   :  { %s7894_s25 = smov 0   ;;  %s7896_s26 = smov 0  }
  0x10   :  { %s7898_s27 = smov 0   ;;  %s7900_s28 = smov 0  }
  0x11 LB: > { %13297 = sst [smem:[#allocation20_spill]] %s7801_s21  ;;  %s7927_s29 = sadd.s32 4294967295, %s7829_s28   ;;  %s7829_s28 = sphi %s7900_s28, %s30_s28   ;;  %s7825_s27 = sphi %s7898_s27, %s14018_s27   ;;  %s7821_s26 = sphi %s7896_s26, %s14017_s26   ;;  %s7817_s25 = sphi %s7894_s25, %s14016_s25   ;;  %s7813_s24 = sphi %s7892_s24, %s14015_s24   ;;  %s7809_s23 = sphi %s7890_s23, %s14014_s23   ;;  %s7805_s22 = sphi %s7888_s22, %s14013_s22   ;;  %s7801_s21 = sphi %s7886_s21, %s14012_s21  }
  0x12   : > { %s12816_s30 = sadd.s32 4294967294, %s7829_s28   ;;  %s39_s7 = sadd.s32 1, %s7821_s26 }
  0x13   : > { %s42_s8 = sadd.s32 1, %s7825_s27  ;;  %p40_p0 = scmp.ge.s32.totalorder %s39_s7, 2 }
  0x14   : > { %s51_s9 = sadd.s32 1, %s7809_s23  ;;  %p58_p1 = scmp.ne.s32.totalorder %s7809_s23, %s7805_s22 }
  0x15   : > { %p59_p2 = scmp.eq.s32.totalorder %s7829_s28, 0  ;;  %s14020_s7 = smov (%p40_p0, %s39_s7), 0 }
  0x16   : > { %13298 = sst [smem:[#allocation21_spill]] %s14020_s7  ;;  %s14022_s8 = smov (!%p40_p0, %s42_s8), %s7825_s27 }
  0x17   : > { %s47_s10 = ssub.s32 %s7821_s26, %s14020_s7  ;;  %p7941_p3 = por %p59_p2, %p58_p1 }
  0x18   : > { %p44_p4 = scmp.ge.s32.totalorder %s14022_s8, 2  ;;  %p64_p5 = scmp.ne.s32.totalorder %s7805_s22, %s7801_s21 }
  0x19   : > { %s13299_s11 = scalar_select %p7941_p3, 1, 0 }
  0x1a   : > { %p12820_p6 = scmp.eq.s32.totalorder %s7927_s29, 0  ;;  %p160_p7 = scmp.eq.s32.totalorder %s7927_s29, 3 }
  0x1b   : > { %s14024_s8 = smov (%p44_p4, %s14022_s8), 0  ;;  %p166_p10 = scmp.eq.s32.totalorder %s12816_s30, 3 }
  0x1c   : > { %13300 = sst [smem:[#allocation22_spill]] %s14024_s8  ;;  %p7953_p8 = por %p12820_p6, %p64_p5 }
  0x1d   : > { %p7957_p9 = por %p160_p7, %p58_p1  ;;  %s46_s14 = ssub.s32 %s7825_s27, %s14024_s8 }
  0x1e   : > { %s13301_s12 = scalar_select %p7953_p8, 1, 0 }
  0x1f   : > { %s13302_s13 = scalar_select %p7957_p9, 1, 0 }
  0x20   : > { %s48_s15 = sor.u32 %s47_s10, %s46_s14  ;;  %p6649_p11 = scmp.ge.s32.totalorder %s7829_s28, 1 }
  0x21   : > { %13303 = sst [smem:[#allocation23_spill]] %s13302_s13  ;;  %p49_p12 = scmp.eq.s32.totalorder %s48_s15, 0 }
  0x22   : > { %p7966_p13 = por %p166_p10, %p64_p5  ;;  %p229_p0 = scmp.lt.s32.totalorder %s7829_s28, 5 }
  0x23   : > { %s7972_s17 = scalar_select %p49_p12, %s7809_s23, %s51_s9  }
  0x24   : > { %s13304_s16 = scalar_select %p7966_p13, 1, 0 }
  0x25   : > { %13306 = sst [smem:[#allocation25_spill]] %s7972_s17  ;;  %p7974_p2 = pnand %p6649_p11, %p229_p0 }
  0x26   : > { %13305 = sst [smem:[#allocation24_spill]] %s13304_s16  ;;  %s7831_s19 = smov [#allocation7]  }
  0x27   : > { %s13307_s18 = scalar_select %p7974_p2, 1, 0 }
  0x28   : > { %s241_s20 = sshll.u32 %s7831_s19, 4  ;;  %p7171_p1 = pneg %p7974_p2  ;;  %s242_s20 = int_to_ptr.vmem [resolvable:$true] %s241_s20 }
  0x29   : > { %s7832_s14 = smov [#allocation8]   ;;  %s13309_s2 = sld [smem:[#allocation100_spill]] }
  0x2a   : > { %p7982_p4 = pnand %p7171_p1, %p12820_p6  ;;  %s254_s9 = sshll.u32 %s7832_s14, 4  ;;  %s7986_s9 = int_to_ptr.vmem [resolvable:$true] %s254_s9 }
  0x2c   : > { %p7547_p7 = pneg %p7982_p4 }
  0x2f   : > { %s7545_s8 = scalar_lea.hbm %s13309_s2, 640 }
  0x30   : > { %p7546_p5 = scmp.ne.s32.totalorder %s13309_s2, %s7545_s8  ;;  %p7552_p12 = scmp.lt.u32.totalorder %s7545_s8, %s13309_s2 }
  0x32   : > { %p7548_p10 = pnand %p7547_p7, %p7546_p5 }
  0x34   : > { %p7549_p11 = pneg %p7548_p10 }
  0x36   : > { %p7554_p0 = pnand %p7552_p12, %p7549_p11 }
  0x38   : > { %7557 = shalt.err (!%p7554_p0)
}
  0x39   : > { %s7558_s14 = scalar_lea.vmem %s242_s20, 640  ;;  %p7566_p9 = scmp.lt.s32.totalorder %s242_s20, %s242_s20 }
  0x3a   : > { %p7559_p1 = scmp.ne.s32.totalorder %s242_s20, %s7558_s14  ;;  %p7567_p8 = scmp.lt.s32.totalorder %s7558_s14, %s7558_s14 }
  0x3c   : > { %p7561_p6 = pnand %p7559_p1, %p7547_p7  ;;  %p7568_p2 = por %p7567_p8, %p7566_p9 }
  0x3e   : > { %p7562_p13 = pneg %p7561_p6 }
  0x40   : > { %p7569_p3 = pnand %p7568_p2, %p7562_p13 }
  0x42   : > { %7572 = shalt.err (!%p7569_p3)
}
  0x43   : > { %s7833_s30 = smov 128   ;;  %s7834_s7 = smov 8  }
  0x44   : > { %7174 = dma.hbm_to_vmem [thread:$0]  (!%p7982_p4), %s13309_s2, 640, %s242_s20, [#allocation6], %s7833_s30, %s7833_s30, %s7834_s7  }
  0x45   : > { %s13310_s3 = sld [smem:[#allocation101_spill]] }
  0x4b   : > { %s7573_s19 = scalar_lea.hbm %s13310_s3, 3072 }
  0x4c   : > { %p7574_p6 = scmp.ne.s32.totalorder %s13310_s3, %s7573_s19  ;;  %p7580_p9 = scmp.lt.u32.totalorder %s7573_s19, %s13310_s3 }
  0x4e   : > { %p7576_p3 = pnand %p7574_p6, %p7547_p7 }
  0x50   : > { %p7577_p8 = pneg %p7576_p3 }
  0x52   : > { %p7582_p13 = pnand %p7580_p9, %p7577_p8 }
  0x54   : > { %7585 = shalt.err (!%p7582_p13)
}
  0x55   : > { %s7586_s20 = scalar_lea.vmem %s7986_s9, 3072  ;;  %p7594_p11 = scmp.lt.s32.totalorder %s7986_s9, %s7986_s9 }
  0x56   : > { %p7587_p2 = scmp.ne.s32.totalorder %s7986_s9, %s7586_s20  ;;  %p7595_p12 = scmp.lt.s32.totalorder %s7586_s20, %s7586_s20 }
  0x58   : > { %p7589_p5 = pnand %p7587_p2, %p7547_p7  ;;  %p7596_p0 = por %p7595_p12, %p7594_p11 }
  0x5a   : > { %p7590_p10 = pneg %p7589_p5 }
  0x5c   : > { %p7597_p1 = pnand %p7596_p0, %p7590_p10 }
  0x5e   : > { %7600 = shalt.err (!%p7597_p1)
}
  0x5f   : > { %s7835_s6 = smov 192   ;;  %s7836_s21 = smov 12  }
  0x60   : > { %7177 = dma.hbm_to_vmem [thread:$0]  (!%p7982_p4), %s13310_s3, 3072, %s7986_s9, [#allocation9], %s7835_s6, %s7835_s6, %s7836_s21  }
  0x61   : > { %p6652_p6 = scmp.ge.s32.totalorder %s7829_s28, 4 }
  0x62   : > { %p13311_p7 = scmp.ne.s32.totalorder (!%p6652_p6), %s13299_s11, 0 }
  0x63   : > { %264 = sbr.rel (%p6652_p6) target bundleno = 166 (0xa6), region = 24 }
  0x6a   : > { %267 = sbr.rel (!%p13311_p7) target bundleno = 136 (0x88), region = 28  ;;  %s268_s7 = sand.u32 (%p13311_p7), 1, %s7809_s23  }
  0x6b   : > { %s7146_s8 = smul.u32 (%p13311_p7), 320, %s268_s7  ;;  %s8039_s16 = scalar_lea.sflag (%p13311_p7), [#allocation3], %s268_s7 }
  0x6c   : > { %s7147_s15 = smul.u32 (%p13311_p7), 40, %s7821_s26  ;;  %s7605_s3 = scalar_lea.hbm (%p13311_p7), %s12809_s0, 25600 }
  0x6d   : > { %s272_s17 = scalar_lea.vmem (%p13311_p7), [#allocation2], %s7146_s8  ;;  %s7148_s10 = smul.u32 (%p13311_p7), 100, %s7825_s27 }
  0x6e   : > { %s290_s19 = sshll.u32 (%p13311_p7), %s272_s17, 4  ;;  %s8043_s19 = int_to_ptr.vmem [resolvable:$true] %s290_s19 }
  0x6f   : > { %s285_s9 = sadd.s32 (%p13311_p7), %s7148_s10, %s7147_s15 }
  0x70   : > { %s6658_s14 = sshll.u32 (%p13311_p7), %s285_s9, 7 }
  0x71   : > { %s287_s21 = scalar_lea.hbm %s12809_s0, %s6658_s14 }
  0x72   : > { %s7601_s13 = scalar_lea.hbm %s287_s21, 5120  ;;  %p7606_p3 = scmp.lt.u32.totalorder %s287_s21, %s12809_s0 }
  0x73   : > { %p7602_p4 = scmp.ne.s32.totalorder %s287_s21, %s7601_s13  ;;  %p7607_p8 = scmp.lt.u32.totalorder %s7605_s3, %s7601_s13 }
  0x74   : > { %p7609_p13 = scmp.lt.u32.totalorder %s7601_s13, %s287_s21 }
  0x75   : > { %p7608_p9 = por %p7607_p8, %p7606_p3 }
  0x77   : > { %p7610_p2 = por %p7609_p13, %p7608_p9 }
  0x79   : > { %p7611_p5 = pnand %p7610_p2, %p7602_p4 }
  0x7b   : > { %7614 = shalt.err (!%p7611_p5)
}
  0x7c   : > { %s7615_s8 = scalar_lea.vmem %s8043_s19, 5120  ;;  %s7837_s17 = smov [#allocation2]  }
  0x7d   : > { %p7616_p10 = scmp.ne.s32.totalorder %s8043_s19, %s7615_s8  ;;  %s7619_s15 = sshll.u32 %s7837_s17, 4  ;;  %s7620_s15 = int_to_ptr.vmem [resolvable:$false] %s7619_s15 }
  0x7e   : > { %s7621_s2 = scalar_lea.vmem %s7620_s15, 10240  ;;  %p7622_p11 = scmp.lt.s32.totalorder %s8043_s19, %s7620_s15 }
  0x7f   : > { %p7623_p12 = scmp.lt.s32.totalorder %s7621_s2, %s7615_s8 }
  0x81   : > { %p7624_p0 = por %p7623_p12, %p7622_p11 }
  0x83   : > { %p7625_p1 = pnand %p7624_p0, %p7616_p10 }
  0x85   : > { %7628 = shalt.err (!%p7625_p1)
}
  0x86   : > { %s7838_s3 = smov 128   ;;  %s7839_s5 = smov 8  }
  0x87   : > { %296 = dma.hbm_to_vmem [thread:$0]  %s287_s21, 5120, %s8043_s19, %s8039_s16, %s7838_s3, %s7838_s3, %s7839_s5  }
  0x88 PF: > { %s300_s10 = sand.u32 1, %s7829_s28   ;;  %s302_s9 = sand.u32 1, %s7809_s23  }
  0x89   : > { %s7149_s14 = smul.u32 160, %s302_s9  ;;  %s8070_s19 = scalar_lea.sflag [#allocation6], %s300_s10 }
  0x8a   : > { %s7150_s20 = smul.u32 20, %s7821_s26  ;;  %p13312_p7 = scmp.ne.s32.totalorder %s13299_s11, 0 }
  0x8b   : > { %s7151_s6 = smul.u32 40, %s7825_s27  ;;  %s304_s13 = scalar_lea.vmem [#allocation5], %s7149_s14 }
  0x8c   : > { %s314_s30 = sshll.u32 %s304_s13, 4  ;;  %s7633_s5 = scalar_lea.hbm %s12810_s1, 10240  ;;  %s8063_s30 = int_to_ptr.vmem [resolvable:$true] %s314_s30 }
  0x8d   : > { %s311_s7 = sadd.s32 %s7151_s6, %s7150_s20 }
  0x8e   : > { %s6663_s8 = sshll.u32 %s311_s7, 7 }
  0x8f   : > { %s8068_s16 = scalar_lea.hbm %s12810_s1, %s6663_s8 }
  0x90   : > { %s7629_s21 = scalar_lea.hbm %s8068_s16, 2560  ;;  %p7634_p8 = scmp.lt.u32.totalorder %s8068_s16, %s12810_s1 }
  0x91   : > { %p7630_p6 = scmp.ne.s32.totalorder %s8068_s16, %s7629_s21  ;;  %p7635_p9 = scmp.lt.u32.totalorder %s7633_s5, %s7629_s21 }
  0x92   : > { %p7637_p2 = scmp.lt.u32.totalorder %s7629_s21, %s8068_s16 }
  0x93   : > { %p7631_p4 = pnand %p7630_p6, %p13312_p7  ;;  %p7636_p13 = por %p7635_p9, %p7634_p8 }
  0x95   : > { %p7632_p3 = pneg %p7631_p4  ;;  %p7638_p5 = por %p7637_p2, %p7636_p13 }
  0x97   : > { %p7639_p10 = pnand %p7638_p5, %p7632_p3 }
  0x99   : > { %7642 = shalt.err (!%p7639_p10)
}
  0x9a   : > { %s7643_s10 = scalar_lea.vmem %s8063_s30, 2560  ;;  %s7840_s20 = smov [#allocation5]  }
  0x9b   : > { %p7644_p11 = scmp.ne.s32.totalorder %s8063_s30, %s7643_s10  ;;  %s7647_s6 = sshll.u32 %s7840_s20, 4  ;;  %s7648_s6 = int_to_ptr.vmem [resolvable:$false] %s7647_s6 }
  0x9c   : > { %s7649_s13 = scalar_lea.vmem %s7648_s6, 5120  ;;  %p7650_p1 = scmp.lt.s32.totalorder %s8063_s30, %s7648_s6 }
  0x9d   : > { %p7645_p12 = pnand %p7644_p11, %p13312_p7  ;;  %p7651_p6 = scmp.lt.s32.totalorder %s7649_s13, %s7643_s10 }
  0x9f   : > { %p7646_p0 = pneg %p7645_p12  ;;  %p7652_p4 = por %p7651_p6, %p7650_p1 }
  0xa1   : > { %p7653_p8 = pnand %p7652_p4, %p7646_p0 }
  0xa3   : > { %7656 = shalt.err (!%p7653_p8)
}
  0xa4   : > { %s7841_s7 = smov 128   ;;  %s7842_s8 = smov 8  }
  0xa5   : > { %7158 = dma.hbm_to_vmem [thread:$0]  (%p13312_p7), %s8068_s16, 2560, %s8063_s30, %s8070_s19, %s7841_s7, %s7841_s7, %s7842_s8  }
  0xa6 PF: > { %p13313_p3 = scmp.ne.s32.totalorder %s13307_s18, 0 }
  0xa8   : > { %326 = sbr.rel (%p13313_p3) target bundleno = 1361 (0x551), region = 36 }
  0xaf   : > { %s8097_s17 = sand.u32 1, %s7805_s22   ;;  %p13314_p9 = scmp.ne.s32.totalorder %s13301_s12, 0 }
  0xb0   : > { %s7152_s15 = smul.u32 320, %s8097_s17  ;;  %s329_s21 = scalar_lea.sflag [#allocation3], %s8097_s17 }
  0xb2   : > { %s8101_s2 = scalar_lea.vmem [#allocation2], %s7152_s15 }
  0xb3   : > { %7774 = dma.done.wait (%p13314_p9), %s329_s21, 5120  }
  0xb4   : > { %7776 = vsyncadd (%p13314_p9), %s329_s21, 4294962176  ;;  %s337_s11 = sand.u32 1, %s7927_s29   ;;  %s7153_s18 = smul.u32 160, %s8097_s17 }
  0xb5   : > { %s338_s30 = scalar_lea.sflag [#allocation6], %s337_s11 }
  0xb6   : > { %s8111_s16 = scalar_lea.vmem [#allocation5], %s7153_s18 }
  0xb7   : > { %7778 = dma.done.wait (%p13314_p9), %s338_s30, 2560  }
  0xb8   : > { %7780 = vsyncadd (%p13314_p9), %s338_s30, 4294964736  ;;  %p13315_p7 = scmp.eq.s32.totalorder %s7927_s29, 0 }
  0xba   : > { %7782 = dma.done.wait (%p13315_p7), [#allocation6], 640   ;;  %p13316_p13 = pmov %p13315_p7 }
  0xbb   : > { %p13317_p2 = pmov %p13315_p7 }
  0xbc   : > { %7784 = vsyncadd (%p13316_p13), [#allocation6], 4294966656 }
  0xbd   : > { %7786 = dma.done.wait (%p13317_p2), [#allocation9], 3072   ;;  %p13318_p5 = pmov %p13317_p2 }
  0xbe   : > { %v12830_v0 = vmov 0   ;;  %v7272_v1 = vld [vmem:[#allocation8 + $0x4] ss:$12 sps:$4 sm:$0xff]   ;;  %v7274_v2 = vld [vmem:[#allocation8] ss:$12 sps:$4 sm:$0xff]   ;;  %v469_v6 = vlaneseq  ;;  %v8143_v21 = vld [vmem:[%s8101_s2 + $0x120] sm:$0xff] }
  0xbf   : > { %7788 = vsyncadd (%p13318_p5), [#allocation9], 4294964224  ;;  %5573 = vmatprep.mubr.bf16.mxu1 %v12830_v0  ;;  %5453 = vmatprep.mubr.bf16.mxu0 %v12830_v0  ;;  %v7275_v3 = vld [vmem:[#allocation8 + $0x1c] ss:$12 sps:$4 sm:$0xff]   ;;  %v7277_v4 = vld [vmem:[#allocation8 + $0x18] ss:$12 sps:$4 sm:$0xff]  }
  0xc0   : > { %7130 = vmatprep.subr.bf16.mxu1 %v7272_v1  ;;  %5421 = vmatprep.subr.bf16.mxu0 %v7272_v1  ;;  %v7278_v5 = vld [vmem:[#allocation8 + $0x34] ss:$12 sps:$4 sm:$0xff]   ;;  %v7280_v7 = vld [vmem:[#allocation8 + $0x30] ss:$12 sps:$4 sm:$0xff]   ;;  %v7281_v8 = vld [vmem:[#allocation8 + $0x4c] ss:$12 sps:$4 sm:$0xff]  }
  0xc1   : > { %7138 = vmatpush1.bf16.msra.mxu1 %v7274_v2  ;;  %5422 = vmatpush1.bf16.msra.mxu0 %v7274_v2  ;;  %v470_v9 = vshrl.u32 %v469_v6, 7  ;;  %v7283_v10 = vld [vmem:[#allocation8 + $0x48] ss:$12 sps:$4 sm:$0xff]   ;;  %v7284_v11 = vld [vmem:[#allocation8 + $0x64] ss:$12 sps:$4 sm:$0xff]   ;;  %v8146_v22 = vld [vmem:[%s8111_s16] sm:$0xff] }
  0xc2   : > { %7131 = vmatprep.subr.bf16.mxu1 %v7275_v3  ;;  %5423 = vmatprep.subr.bf16.mxu0 %v7275_v3  ;;  %v7286_v16 = vld [vmem:[#allocation8 + $0x60] ss:$12 sps:$4 sm:$0xff]   ;;  %v8137_v18 = vld [vmem:[%s8101_s2 + $0xf8] sm:$0xff]  ;;  %v7287_v19 = vld [vmem:[#allocation8 + $0x7c] ss:$12 sps:$4 sm:$0xff]   ;;  %vm893_vm0 = vcmask 1046528  }
  0xc3   : > { %v471_v12 = vsub.s32 0, %v470_v9  ;;  %v8127_v13 = vsub.s32 1, %v470_v9  ;;  %v8129_v14 = vsub.s32 2, %v470_v9  ;;  %v8131_v15 = vsub.s32 3, %v470_v9  ;;  %v8134_v17 = vld [vmem:[%s8101_s2 + $0xf0] sm:$0xff]  ;;  %v8140_v20 = vld [vmem:[%s8101_s2 + $0x118] sm:$0xff] }
  0xc4   : > { %v8149_v23 = vld [vmem:[%s8111_s16 + $0x8] sm:$0xff]  ;;  %v8155_v25 = vld [vmem:[%s8111_s16 + $0x30] sm:$0xff]  ;;  %v8161_v27 = vld [vmem:[%s8111_s16 + $0x58] sm:$0xff]  ;;  %v8165_v29 = vsub.s32 4, %v470_v9  ;;  %vm1994_vm1 = vcmask 1045504   ;;  %vm3095_vm2 = vcmask 1044480  }
  0xc5   : > { %7139 = vmatpush1.bf16.msra.mxu1 %v7277_v4  ;;  %5424 = vmatpush1.bf16.msra.mxu0 %v7277_v4  ;;  %13319 = vst [vmem:[#allocation26_spill] sm:$0xff] %v8149_v23  ;;  %v8152_v24 = vld [vmem:[%s8111_s16 + $0x28] sm:$0xff]  ;;  %13321 = vst [vmem:[#allocation28_spill] sm:$0xff] %v8155_v25  ;;  %v8158_v26 = vld [vmem:[%s8111_s16 + $0x50] sm:$0xff]  ;;  %vm4196_vm3 = vcmask 1043456   ;;  %s6667_s12 = sshll.u32 %s8097_s17, 8 }
  0xc6   : > { %7132 = vmatprep.subr.bf16.mxu1 %v7278_v5  ;;  %5425 = vmatprep.subr.bf16.mxu0 %v7278_v5  ;;  %13320 = vst [vmem:[#allocation27_spill] sm:$0xff] %v8152_v24  ;;  %13322 = vst [vmem:[#allocation29_spill] sm:$0xff] %v8158_v26  ;;  %v8163_v28 = vld [vmem:[#allocation7] sm:$0x1f]  ;;  %v8167_v30 = vld [vmem:[#allocation7 + $0x8] sm:$0x1f] }
  0xc7   : > { %v8169_v31 = vld [vmem:[#allocation7 + $0x10] sm:$0x1f]  ;;  %v8171_v32 = vld [vmem:[#allocation7 + $0x18] sm:$0x1f]  ;;  %v8174_v33 = vrot.slane %v8163_v28, %v471_v12  ;;  %v8178_v34 = vrot.slane %v8163_v28, %v8127_v13  ;;  %v8182_v35 = vrot.slane %v8163_v28, %v8129_v14  ;;  %v8186_v36 = vrot.slane %v8163_v28, %v8131_v15  ;;  %v8188_v37 = vld [vmem:[#allocation7 + $0x20] sm:$0x1f] }
  0xc8   : > { %v8191_v38 = vrot.slane %v8167_v30, %v471_v12  ;;  %v8194_v39 = vrot.slane %v8169_v31, %v471_v12  ;;  %v8197_v40 = vrot.slane %v8171_v32, %v471_v12  ;;  %v8201_v41 = vrot.slane %v8167_v30, %v8127_v13  ;;  %v8204_v42 = vld [vmem:[%s8101_s2 + $0x100] sm:$0xff]  ;;  %v7290_v52 = vld [vmem:[#allocation8 + $0x94] ss:$12 sps:$4 sm:$0xff]   ;;  %v8244_v9 = vld [vmem:[%s8111_s16 + $0x10] sm:$0xff]  ;;  %s6668_s19 = sshll.u32 %s8097_s17, 7  ;;  %s12541_s3 = scalar_lea.vmem [#allocation10], %s6667_s12 }
  0xc9   : > { %7140 = vmatpush1.bf16.msra.mxu1 %v7280_v7  ;;  %5426 = vmatpush1.bf16.msra.mxu0 %v7280_v7  ;;  %13323 = vst [vmem:[#allocation30_spill] sm:$0xff] %v8178_v34  ;;  %13324 = vst [vmem:[#allocation31_spill] sm:$0xff] %v8182_v35  ;;  %v497_v43 = vmul.f32 %v8174_v33, %v8134_v17  ;;  %v498_v44 = vmul.f32 %v8174_v33, %v8137_v18  ;;  %v7289_v47 = vld [vmem:[#allocation8 + $0x78] ss:$12 sps:$4 sm:$0xff]   ;;  %v7292_v62 = vld [vmem:[#allocation8 + $0x90] ss:$12 sps:$4 sm:$0xff]  }
  0xca   : > { %7133 = vmatprep.subr.bf16.mxu1 %v7281_v8  ;;  %5427 = vmatprep.subr.bf16.mxu0 %v7281_v8  ;;  %13325 = vst [vmem:[#allocation32_spill] sm:$0xff] %v8186_v36  ;;  %13326 = vst [vmem:[#allocation33_spill] sm:$0xff] %v8191_v38  ;;  %v8211_v45 = vrot.slane %v8188_v37, %v471_v12  ;;  %v843_v46 = vmul.f32 %v8178_v34, %v8134_v17  ;;  %v8232_v57 = vld [vmem:[%s8101_s2 + $0x128] sm:$0xff]  ;;  %v7293_v4 = vld [vmem:[#allocation8 + $0xac] ss:$12 sps:$4 sm:$0xff]   ;;  %s12547_s5 = scalar_lea.vmem [#allocation11], %s6668_s19 }
  0xcb   : > { %13327 = vst [vmem:[#allocation34_spill] sm:$0xff] %v8194_v39  ;;  %13328 = vst [vmem:[#allocation35_spill] sm:$0xff] %v8197_v40  ;;  %v565_v48 = vmul.f32 %v8191_v38, %v8140_v20  ;;  %v566_v49 = vmul.f32 %v8191_v38, %v8143_v21  ;;  %v633_v50 = vmul.f32 %v8194_v39, %v8146_v22  ;;  %s12631_s9 = scalar_lea.vmem [#allocation13], %s6668_s19  ;;  %s6793_s14 = sshll.u32 %s7813_s24, 5 }
  0xcc   : > { %13329 = vst [vmem:[#allocation36_spill] sm:$0xff] %v8201_v41  ;;  %13330 = vst [vmem:[#allocation37_spill] sm:$0xff] %v8211_v45  ;;  %v634_v51 = vmul.f32 %v8194_v39, %v8149_v23  ;;  %v701_v53 = vmul.f32 %v8197_v40, %v8152_v24  ;;  %v702_v54 = vmul.f32 %v8197_v40, %v8155_v25  ;;  %v948_v2 = vrot.slane %v843_v46, 1  ;;  %s6794_s10 = sshll.u32 %s7817_s25, 6  ;;  %s6427_s7 = sshll.u32 %s12547_s5, 4  ;;  %s12678_s7 = int_to_ptr.vmem [resolvable:$true] %s6427_s7 }
  0xcd   : > { %7141 = vmatpush1.bf16.msra.mxu1 %v7283_v10  ;;  %5428 = vmatpush1.bf16.msra.mxu0 %v7283_v10  ;;  %v769_v55 = vmul.f32 %v8211_v45, %v8158_v26  ;;  %v770_v56 = vmul.f32 %v8211_v45, %v8161_v27  ;;  %13331 = vst [vmem:[#allocation38_spill] sm:$0xff] %v8232_v57  ;;  %13332 = vst [vmem:[#allocation39_spill] sm:$0xff] %v8244_v9  ;;  %s12660_s20 = sadd.s32 %s6794_s10, %s6793_s14  ;;  %s6409_s24 = sshll.u32 %s12541_s3, 4  ;;  %s12680_s24 = int_to_ptr.vmem [resolvable:$true] %s6409_s24 }
  0xce   : > { %7134 = vmatprep.subr.bf16.mxu1 %v7284_v11  ;;  %5429 = vmatprep.subr.bf16.mxu0 %v7284_v11  ;;  %v665_v58 = vadd.f32 %v633_v50, %v497_v43  ;;  %v666_v59 = vadd.f32 %v634_v51, %v498_v44  ;;  %v844_v60 = vmul.f32 %v8178_v34, %v8137_v18  ;;  %v8257_v43 = vld [vmem:[%s8111_s16 + $0x38] sm:$0xff]  ;;  %v8272_v50 = vld [vmem:[%s8111_s16 + $0x60] sm:$0xff]  ;;  %s6795_s6 = sshll.u32 %s12660_s20, 7  ;;  %s6798_s13 = sshll.u32 %s12660_s20, 6 }
  0xcf   : > { %v8238_v61 = vmul.f32 %v8178_v34, %v8204_v42  ;;  %v733_v63 = vadd.f32 %v701_v53, %v565_v48  ;;  %v734_v1 = vadd.f32 %v702_v54, %v566_v49  ;;  %v1064_v3 = vmul.f32 %v8201_v41, %v8140_v20  ;;  %13334 = vst [vmem:[#allocation41_spill] sm:$0xff] %v8257_v43  ;;  %s12668_s21 = scalar_lea.hbm %s12813_s4, %s6795_s6  ;;  %s14001_s18 = sld [smem:[#allocation102_spill]] }
  0xd0   : > { %v801_v5 = vadd.f32 %v769_v55, %v665_v58  ;;  %v802_v6 = vadd.f32 %v770_v56, %v666_v59  ;;  %v949_v7 = vrot.slane %v844_v60, 1  ;;  %v1065_v10 = vmul.f32 %v8201_v41, %v8143_v21  ;;  %13337 = vst [vmem:[#allocation44_spill] sm:$0xff] %v8272_v50  ;;  %v8275_v56 = vld [vmem:[#allocation8 + $0x8] ss:$12 sps:$4 sm:$0xff]   ;;  %s12687_s12 = scalar_lea.sflag [#allocation12], %s337_s11  ;;  %s7657_s19 = scalar_lea.vmem %s12678_s7, 2048 }
  0xd1   : > { %7142 = vmatpush1.bf16.msra.mxu1 %v7286_v16  ;;  %5430 = vmatpush1.bf16.msra.mxu0 %v7286_v16  ;;  %v12833_v8 = vrot.slane %v8238_v61, 1  ;;  %v8250_v11 = vmul.f32 %v8201_v41, %v8232_v57  ;;  %v1168_v12 = vrot.slane %v1064_v3, 1  ;;  %v8254_v16 = vrot.slane %v8169_v31, %v8127_v13  ;;  %p7658_p10 = scmp.ne.s32.totalorder %s12678_s7, %s7657_s19  ;;  %s7844_s14 = smov [#allocation11]  }
  0xd2   : > { %7135 = vmatprep.subr.bf16.mxu1 %v7287_v19  ;;  %5431 = vmatprep.subr.bf16.mxu0 %v7287_v19  ;;  %v7295_v19 = vld [vmem:[#allocation8 + $0xa8] ss:$12 sps:$4 sm:$0xff]   ;;  %v950_v44 = vsel %vm893_vm0, %v948_v2, %v949_v7  ;;  %v8265_v48 = vrot.slane %v8171_v32, %v8127_v13  ;;  %v8269_v49 = vrot.slane %v8188_v37, %v8127_v13  ;;  %v1169_v54 = vrot.slane %v1065_v10, 1  ;;  %s7661_s10 = sshll.u32 %s7844_s14, 4  ;;  %s7662_s10 = int_to_ptr.vmem [resolvable:$false] %s7661_s10 }
  0xd3   : > { %13333 = vst [vmem:[#allocation40_spill] sm:$0xff] %v8254_v16  ;;  %v952_v46 = vsel %vm893_vm0, %v949_v7, %v12833_v8  ;;  %v1022_v51 = vadd.f32 %v950_v44, %v733_v63  ;;  %v12832_v55 = vrot.slane %v8250_v11, 1  ;;  %v1284_v58 = vmul.f32 %v8254_v16, %v8146_v22  ;;  %s7663_s6 = scalar_lea.vmem %s7662_s10, 4096  ;;  %p7664_p1 = scmp.lt.s32.totalorder %s12678_s7, %s7662_s10 }
  0xd4   : > { %13335 = vst [vmem:[#allocation42_spill] sm:$0xff] %v8265_v48  ;;  %13336 = vst [vmem:[#allocation43_spill] sm:$0xff] %v8269_v49  ;;  %v1023_v53 = vadd.f32 %v952_v46, %v734_v1  ;;  %v1285_v59 = vmul.f32 %v8254_v16, %v8149_v23  ;;  %v8283_v13 = vmul.f32 %v8254_v16, %v8244_v9  ;;  %p7665_p6 = scmp.lt.s32.totalorder %s7663_s6, %s7657_s19 }
  0xd5   : > { %7143 = vmatpush1.bf16.msra.mxu1 %v7289_v47  ;;  %5432 = vmatpush1.bf16.msra.mxu0 %v7289_v47  ;;  %v1504_v47 = vmul.f32 %v8265_v48, %v8152_v24  ;;  %v1170_v60 = vsel %vm893_vm0, %v1168_v12, %v1169_v54  ;;  %v1505_v63 = vmul.f32 %v8265_v48, %v8155_v25  ;;  %v1388_v7 = vrot.slane %v1284_v58, 1  ;;  %s12676_s30 = scalar_lea.hbm %s14001_s18, %s6798_s13 }
  0xd6   : > { %7136 = vmatprep.subr.bf16.mxu1 %v7290_v52  ;;  %5433 = vmatprep.subr.bf16.mxu0 %v7290_v52  ;;  %v1172_v52 = vsel %vm893_vm0, %v1169_v54, %v12832_v55  ;;  %v8295_v1 = vmul.f32 %v8265_v48, %v8257_v43  ;;  %v1242_v2 = vadd.f32 %v1170_v60, %v801_v5  ;;  %v1389_v10 = vrot.slane %v1285_v59, 1  ;;  %p7666_p4 = por %p7665_p6, %p7664_p1 }
  0xd7   : > { %v1243_v3 = vadd.f32 %v1172_v52, %v802_v6  ;;  %v12835_v44 = vrot.slane %v8283_v13, 1  ;;  %v1608_v46 = vrot.slane %v1504_v47, 1  ;;  %v1609_v12 = vrot.slane %v1505_v63, 1 }
  0xd8   : > { %v12834_v0 = vrot.slane %v8295_v1, 1  ;;  %v1390_v54 = vsel %vm893_vm0, %v1388_v7, %v1389_v10  ;;  %v1724_v55 = vmul.f32 %v8269_v49, %v8158_v26  ;;  %v1725_v5 = vmul.f32 %v8269_v49, %v8161_v27 }
  0xd9   : > { %7144 = vmatpush1.bf16.msra.mxu1 %v7292_v62  ;;  %5434 = vmatpush1.bf16.msra.mxu0 %v7292_v62  ;;  %v8306_v6 = vmul.f32 %v8269_v49, %v8272_v50  ;;  %v1392_v62 = vsel %vm893_vm0, %v1389_v10, %v12835_v44  ;;  %v1462_v58 = vadd.f32 %v1390_v54, %v1022_v51 }
  0xda   : > { %7137 = vmatprep.subr.bf16.mxu1 %v7293_v4  ;;  %5435 = vmatprep.subr.bf16.mxu0 %v7293_v4  ;;  %v1610_v4 = vsel %vm893_vm0, %v1608_v46, %v1609_v12  ;;  %v1612_v59 = vsel %vm893_vm0, %v1609_v12, %v12834_v0  ;;  %v1463_v47 = vadd.f32 %v1392_v62, %v1023_v53  ;;  %v1828_v63 = vrot.slane %v1724_v55, 1 }
  0xdb   : > { %13338 = vst [vmem:[#allocation45_spill] sm:$0xff] %v8306_v6  ;;  %v1682_v60 = vadd.f32 %v1610_v4, %v1242_v2  ;;  %v1683_v52 = vadd.f32 %v1612_v59, %v1243_v3  ;;  %v1829_v7 = vrot.slane %v1725_v5, 1  ;;  %v12836_v8 = vrot.slane %v8306_v6, 1 }
  0xdc   : > { %v1944_v10 = vmul.f32 %v8182_v35, %v8134_v17  ;;  %v1945_v51 = vmul.f32 %v8182_v35, %v8137_v18  ;;  %v8323_v46 = vmul.f32 %v8182_v35, %v8204_v42  ;;  %v8327_v53 = vrot.slane %v8167_v30, %v8129_v14 }
  0xdd   : > { %7145 = vmatpush1.bf16.msra.mxu1 %v7295_v19  ;;  %5436 = vmatpush1.bf16.msra.mxu0 %v7295_v19  ;;  %v8331_v19 = vrot.slane %v8169_v31, %v8129_v14  ;;  %v8335_v55 = vrot.slane %v8171_v32, %v8129_v14  ;;  %v1830_v2 = vsel %vm893_vm0, %v1828_v63, %v1829_v7 }
  0xde   : > { %7082 = vmatprep.subr.bf16.mxu1 %v8275_v56  ;;  %13339 = vst [vmem:[#allocation46_spill] sm:$0xff] %v8323_v46  ;;  %13340 = vst [vmem:[#allocation47_spill] sm:$0xff] %v8327_v53  ;;  %v1832_v3 = vsel %vm893_vm0, %v1829_v7, %v12836_v8  ;;  %v2049_v12 = vrot.slane %v1944_v10, 2  ;;  %v2050_v54 = vrot.slane %v1945_v51, 2  ;;  %v1902_v5 = vadd.f32 %v1830_v2, %v1462_v58 }
  0xdf   : > { %13341 = vst [vmem:[#allocation48_spill] sm:$0xff] %v8331_v19  ;;  %13342 = vst [vmem:[#allocation49_spill] sm:$0xff] %v8335_v55  ;;  %v1903_v62 = vadd.f32 %v1832_v3, %v1463_v47  ;;  %v12841_v4 = vrot.slane %v8323_v46, 2  ;;  %v2165_v59 = vmul.f32 %v8327_v53, %v8140_v20  ;;  %v2166_v44 = vmul.f32 %v8327_v53, %v8143_v21 }
  0xe0   : > { %v2051_v0 = vsel %vm1994_vm1, %v2049_v12, %v2050_v54  ;;  %v8349_v63 = vmul.f32 %v8327_v53, %v8232_v57  ;;  %v2385_v7 = vmul.f32 %v8331_v19, %v8146_v22  ;;  %v2386_v51 = vmul.f32 %v8331_v19, %v8149_v23 }
  0xe1   : > { %v2053_v58 = vsel %vm1994_vm1, %v2050_v54, %v12841_v4  ;;  %v2123_v47 = vadd.f32 %v2051_v0, %v1682_v60  ;;  %v2269_v10 = vrot.slane %v2165_v59, 2  ;;  %v2270_v3 = vrot.slane %v2166_v44, 2 }
  0xe2   : > { %13343 = vst [vmem:[#allocation50_spill] sm:$0xff] %v8349_v63  ;;  %v2124_v2 = vadd.f32 %v2053_v58, %v1683_v52  ;;  %v12845_v12 = vrot.slane %v8349_v63, 2  ;;  %v8361_v8 = vmul.f32 %v8331_v19, %v8244_v9  ;;  %v2489_v53 = vrot.slane %v2385_v7, 2 }
  0xe3   : > { %v2490_v6 = vrot.slane %v2386_v51, 2  ;;  %v2605_v46 = vmul.f32 %v8335_v55, %v8152_v24  ;;  %v2606_v0 = vmul.f32 %v8335_v55, %v8155_v25  ;;  %v2271_v60 = vsel %vm1994_vm1, %v2269_v10, %v2270_v3 }
  0xe4   : > { %13344 = vst [vmem:[#allocation51_spill] sm:$0xff] %v8361_v8  ;;  %v2273_v44 = vsel %vm1994_vm1, %v2270_v3, %v12845_v12  ;;  %v12847_v52 = vrot.slane %v8361_v8, 2  ;;  %v8374_v54 = vmul.f32 %v8335_v55, %v8257_v43  ;;  %v2343_v59 = vadd.f32 %v2271_v60, %v1902_v5 }
  0xe5   : > { %v2344_v7 = vadd.f32 %v2273_v44, %v1903_v62  ;;  %v2491_v58 = vsel %vm1994_vm1, %v2489_v53, %v2490_v6  ;;  %v2709_v51 = vrot.slane %v2605_v46, 2  ;;  %v2710_v19 = vrot.slane %v2606_v0, 2 }
  0xe6   : > { %13345 = vst [vmem:[#allocation52_spill] sm:$0xff] %v8374_v54  ;;  %v2493_v4 = vsel %vm1994_vm1, %v2490_v6, %v12847_v52  ;;  %v2563_v10 = vadd.f32 %v2491_v58, %v2123_v47  ;;  %v12846_v63 = vrot.slane %v8374_v54, 2  ;;  %v8383_v12 = vrot.slane %v8188_v37, %v8129_v14 }
  0xe7   : > { %v2564_v3 = vadd.f32 %v2493_v4, %v2124_v2  ;;  %v3045_v5 = vmul.f32 %v8186_v36, %v8134_v17  ;;  %v3046_v53 = vmul.f32 %v8186_v36, %v8137_v18  ;;  %v2711_v46 = vsel %vm1994_vm1, %v2709_v51, %v2710_v19 }
  0xe8   : > { %13346 = vst [vmem:[#allocation53_spill] sm:$0xff] %v8383_v12  ;;  %v2713_v6 = vsel %vm1994_vm1, %v2710_v19, %v12846_v63  ;;  %v8395_v62 = vmul.f32 %v8186_v36, %v8204_v42  ;;  %v8399_v14 = vrot.slane %v8167_v30, %v8131_v15  ;;  %v2783_v4 = vadd.f32 %v2711_v46, %v2343_v59 }
  0xe9   : > { %v2784_v47 = vadd.f32 %v2713_v6, %v2344_v7  ;;  %v2825_v2 = vmul.f32 %v8383_v12, %v8158_v26  ;;  %v2826_v0 = vmul.f32 %v8383_v12, %v8161_v27  ;;  %v8407_v60 = vmul.f32 %v8383_v12, %v8272_v50 }
  0xea   : > { %13347 = vst [vmem:[#allocation54_spill] sm:$0xff] %v8395_v62  ;;  %13348 = vst [vmem:[#allocation55_spill] sm:$0xff] %v8399_v14  ;;  %v3150_v19 = vrot.slane %v3045_v5, 3  ;;  %v3151_v44 = vrot.slane %v3046_v53, 3  ;;  %v12855_v58 = vrot.slane %v8395_v62, 3  ;;  %v3266_v59 = vmul.f32 %v8399_v14, %v8140_v20 }
  0xeb   : > { %13349 = vst [vmem:[#allocation56_spill] sm:$0xff] %v8407_v60  ;;  %v2929_v51 = vrot.slane %v2825_v2, 2  ;;  %v2930_v63 = vrot.slane %v2826_v0, 2  ;;  %v3267_v7 = vmul.f32 %v8399_v14, %v8143_v21  ;;  %v12857_v46 = vrot.slane %v8407_v60, 2 }
  0xec   : > { %v3152_v6 = vsel %vm3095_vm2, %v3150_v19, %v3151_v44  ;;  %v3154_v52 = vsel %vm3095_vm2, %v3151_v44, %v12855_v58  ;;  %v8421_v5 = vmul.f32 %v8399_v14, %v8232_v57  ;;  %v3370_v36 = vrot.slane %v3266_v59, 3 }
  0xed   : > { %v2931_v53 = vsel %vm1994_vm1, %v2929_v51, %v2930_v63  ;;  %v3224_v2 = vadd.f32 %v3152_v6, %v2783_v4  ;;  %v3225_v0 = vadd.f32 %v3154_v52, %v2784_v47  ;;  %v2933_v54 = vsel %vm1994_vm1, %v2930_v63, %v12857_v46 }
  0xee   : > { %13350 = vst [vmem:[#allocation57_spill] sm:$0xff] %v8421_v5  ;;  %v3003_v12 = vadd.f32 %v2931_v53, %v2563_v10  ;;  %v3371_v8 = vrot.slane %v3267_v7, 3  ;;  %v12856_v19 = vrot.slane %v8421_v5, 3  ;;  %v3004_v62 = vadd.f32 %v2933_v54, %v2564_v3 }
  0xef   : > { %v8430_v44 = vrot.slane %v8169_v31, %v8131_v15  ;;  %v8434_v58 = vrot.slane %v8171_v32, %v8131_v15  ;;  %v8438_v52 = vrot.slane %v8188_v37, %v8131_v15  ;;  %v8446_v54 = vrot.slane %v8163_v28, %v8165_v29 }
  0xf0   : > { %v3372_v4 = vsel %vm3095_vm2, %v3370_v36, %v3371_v8  ;;  %v3374_v63 = vsel %vm3095_vm2, %v3371_v8, %v12856_v19  ;;  %v8450_v10 = vrot.slane %v8167_v30, %v8165_v29 }
  0xf1   : > { %13351 = vst [vmem:[#allocation58_spill] sm:$0xff] %v8430_v44  ;;  %13352 = vst [vmem:[#allocation59_spill] sm:$0xff] %v8434_v58  ;;  %v3444_v3 = vadd.f32 %v3372_v4, %v3003_v12  ;;  %v3445_v47 = vadd.f32 %v3374_v63, %v3004_v62  ;;  %v3486_v15 = vmul.f32 %v8430_v44, %v8146_v22 }
  0xf2   : > { %13353 = vst [vmem:[#allocation60_spill] sm:$0xff] %v8438_v52  ;;  %13354 = vst [vmem:[#allocation61_spill] sm:$0xff] %v8446_v54  ;;  %v3487_v36 = vmul.f32 %v8430_v44, %v8149_v23  ;;  %v8458_v8 = vmul.f32 %v8430_v44, %v8244_v9  ;;  %v3706_v28 = vmul.f32 %v8434_v58, %v8152_v24 }
  0xf3   : > { %v3707_v30 = vmul.f32 %v8434_v58, %v8155_v25  ;;  %v8466_v12 = vmul.f32 %v8434_v58, %v8257_v43  ;;  %v3590_v62 = vrot.slane %v3486_v15, 3  ;;  %v3926_v59 = vmul.f32 %v8438_v52, %v8158_v26 }
  0xf4   : > { %v3591_v51 = vrot.slane %v3487_v36, 3  ;;  %v3927_v7 = vmul.f32 %v8438_v52, %v8161_v27  ;;  %v12870_v6 = vrot.slane %v8458_v8, 3  ;;  %v3810_v53 = vrot.slane %v3706_v28, 3 }
  0xf5   : > { %v3811_v4 = vrot.slane %v3707_v30, 3  ;;  %v12869_v63 = vrot.slane %v8466_v12, 3  ;;  %v8477_v46 = vmul.f32 %v8438_v52, %v8272_v50  ;;  %v4030_v15 = vrot.slane %v3926_v59, 3 }
  0xf6   : > { %v3592_v19 = vsel %vm3095_vm2, %v3590_v62, %v3591_v51  ;;  %v4031_v36 = vrot.slane %v3927_v7, 3  ;;  %v3594_v58 = vsel %vm3095_vm2, %v3591_v51, %v12870_v6  ;;  %v4146_v7 = vmul.f32 %v8446_v54, %v8134_v17 }
  0xf7   : > { %v3664_v5 = vadd.f32 %v3592_v19, %v3224_v2  ;;  %v3812_v44 = vsel %vm3095_vm2, %v3810_v53, %v3811_v4  ;;  %v3814_v28 = vsel %vm3095_vm2, %v3811_v4, %v12869_v63  ;;  %v3665_v30 = vadd.f32 %v3594_v58, %v3225_v0 }
  0xf8   : > { %v3884_v60 = vadd.f32 %v3812_v44, %v3444_v3  ;;  %v3885_v62 = vadd.f32 %v3814_v28, %v3445_v47  ;;  %v4032_v14 = vsel %vm3095_vm2, %v4030_v15, %v4031_v36  ;;  %v12868_v52 = vrot.slane %v8477_v46, 3 }
  0xf9   : > { %v4104_v59 = vadd.f32 %v4032_v14, %v3664_v5  ;;  %v4147_v2 = vmul.f32 %v8446_v54, %v8137_v18  ;;  %v8494_v19 = vmul.f32 %v8446_v54, %v8204_v42  ;;  %v4367_v58 = vmul.f32 %v8450_v10, %v8140_v20 }
  0xfa   : > { %v4368_v0 = vmul.f32 %v8450_v10, %v8143_v21  ;;  %v8502_v44 = vmul.f32 %v8450_v10, %v8232_v57  ;;  %v4034_v17 = vsel %vm3095_vm2, %v4031_v36, %v12868_v52  ;;  %v4251_v18 = vrot.slane %v4146_v7, 4 }
  0xfb   : > { %v4252_v14 = vrot.slane %v4147_v2, 4  ;;  %v8509_v5 = vrot.slane %v8169_v31, %v8165_v29  ;;  %v4105_v3 = vadd.f32 %v4034_v17, %v3665_v30  ;;  %v12873_v47 = vrot.slane %v8494_v19, 4 }
  0xfc   : > { %v4471_v51 = vrot.slane %v4367_v58, 4  ;;  %v4472_v53 = vrot.slane %v4368_v0, 4  ;;  %v12872_v15 = vrot.slane %v8502_v44, 4  ;;  %v8527_v58 = vld [vmem:[%s8101_s2 + $0x108] sm:$0xff] }
  0xfd   : > { %v4253_v4 = vsel %vm4196_vm3, %v4251_v18, %v4252_v14  ;;  %v4587_v28 = vmul.f32 %v8509_v5, %v8146_v22  ;;  %v4588_v36 = vmul.f32 %v8509_v5, %v8149_v23  ;;  %v4255_v31 = vsel %vm4196_vm3, %v4252_v14, %v12873_v47  ;;  %v8581_v47 = vld [vmem:[%s8111_s16 + $0x40] sm:$0xff] }
  0xfe   : > { %v4325_v7 = vadd.f32 %v4253_v4, %v3884_v60  ;;  %v4473_v30 = vsel %vm4196_vm3, %v4471_v51, %v4472_v53  ;;  %v8524_v2 = vmul.f32 %v8509_v5, %v8244_v9  ;;  %v4326_v0 = vadd.f32 %v4255_v31, %v3885_v62  ;;  %v8565_v31 = vld [vmem:[%s8111_s16 + $0x18] sm:$0xff] }
  0xff   : > { %v4475_v17 = vsel %vm4196_vm3, %v4472_v53, %v12872_v15  ;;  %v4545_v18 = vadd.f32 %v4473_v30, %v4104_v59  ;;  %v4691_v52 = vrot.slane %v4587_v28, 4  ;;  %v4692_v6 = vrot.slane %v4588_v36, 4 }
 0x100   : > { %v4546_v63 = vadd.f32 %v4475_v17, %v4105_v3  ;;  %v12871_v60 = vrot.slane %v8524_v2, 4  ;;  %v8535_v14 = vrot.slane %v8171_v32, %v8165_v29  ;;  %v8539_v51 = vrot.slane %v8188_v37, %v8165_v29  ;;  %v8556_v37 = vld [vmem:[%s8101_s2 + $0x130] sm:$0xff] }
 0x101   : > { %v499_v62 = vmul.f32 %v8174_v33, %v8204_v42  ;;  %v500_v59 = vmul.f32 %v8174_v33, %v8527_v58  ;;  %v567_v3 = vmul.f32 %v8191_v38, %v8232_v57  ;;  %v4693_v53 = vsel %vm4196_vm3, %v4691_v52, %v4692_v6 }
 0x102   : > { %v4695_v32 = vsel %vm4196_vm3, %v4692_v6, %v12871_v60  ;;  %v4807_v4 = vmul.f32 %v8535_v14, %v8152_v24  ;;  %v4808_v29 = vmul.f32 %v8535_v14, %v8155_v25  ;;  %v4765_v42 = vadd.f32 %v4693_v53, %v4325_v7  ;;  %v8592_v25 = vld [vmem:[%s8111_s16 + $0x68] sm:$0xff] }
 0x103   : > { %v4766_v28 = vadd.f32 %v4695_v32, %v4326_v0  ;;  %v8560_v36 = vmul.f32 %v8535_v14, %v8257_v43  ;;  %v5027_v52 = vmul.f32 %v8539_v51, %v8158_v26  ;;  %v5028_v17 = vmul.f32 %v8539_v51, %v8161_v27  ;;  %v8589_v26 = vld [vmem:[%s8101_s2 + $0x110] sm:$0xf] }
 0x104   : > { %v4911_v6 = vrot.slane %v4807_v4, 4  ;;  %v4912_v30 = vrot.slane %v4808_v29, 4  ;;  %v8571_v7 = vmul.f32 %v8539_v51, %v8272_v50  ;;  %v568_v32 = vmul.f32 %v8191_v38, %v8556_v37 }
 0x105   : > { %v12884_v0 = vrot.slane %v8560_v36, 4  ;;  %v5131_v53 = vrot.slane %v5027_v52, 4  ;;  %v635_v60 = vmul.f32 %v8194_v39, %v8244_v9  ;;  %v5132_v15 = vrot.slane %v5028_v17, 4 }
 0x106   : > { %v4913_v4 = vsel %vm4196_vm3, %v4911_v6, %v4912_v30  ;;  %v636_v27 = vmul.f32 %v8194_v39, %v8565_v31  ;;  %v703_v6 = vmul.f32 %v8197_v40, %v8257_v43  ;;  %v13355_v24 = vrot.slane %v8571_v7, 4 }
 0x107   : > { %v4915_v52 = vsel %vm4196_vm3, %v4912_v30, %v12884_v0  ;;  %v4985_v57 = vadd.f32 %v4913_v4, %v4545_v18  ;;  %v667_v9 = vadd.f32 %v635_v60, %v499_v62  ;;  %v5133_v29 = vsel %vm4196_vm3, %v5131_v53, %v5132_v15  ;;  %v8603_v0 = vld [vmem:[%s8101_s2 + $0x138] sm:$0xf] }
 0x108   : > { %v4986_v17 = vadd.f32 %v4915_v52, %v4546_v63  ;;  %v5135_v39 = vsel %vm4196_vm3, %v5132_v15, %v13355_v24  ;;  %v668_v23 = vadd.f32 %v636_v27, %v500_v59  ;;  %v5205_v38 = vadd.f32 %v5133_v29, %v4765_v42  ;;  %v8614_v59 = vld [vmem:[%s8111_s16 + $0x20] sm:$0xf] }
 0x109   : > { %v5206_v30 = vadd.f32 %v5135_v39, %v4766_v28  ;;  %v704_v18 = vmul.f32 %v8197_v40, %v8581_v47  ;;  %v735_v4 = vadd.f32 %v703_v6, %v567_v3  ;;  %v771_v60 = vmul.f32 %v8211_v45, %v8272_v50  ;;  %v7297_v6 = vld [vmem:[#allocation8 + $0x20] ss:$12 sps:$4 sm:$0xff]  }
 0x10a   : > { %v772_v63 = vmul.f32 %v8211_v45, %v8592_v25  ;;  %v846_v62 = vmul.f32 %v8178_v34, %v8527_v58  ;;  %v847_v24 = vmul.f32 %v8178_v34, %v8589_v26  ;;  %v5237_v39 = vadd.f32 %v5205_v38, %v4985_v57  ;;  %v8621_v50 = vld [vmem:[%s8111_s16 + $0x48] sm:$0xf] }
 0x10b   : > { %v5238_v15 = vadd.f32 %v5206_v30, %v4986_v17  ;;  %v736_v3 = vadd.f32 %v704_v18, %v568_v32  ;;  %v1067_v42 = vmul.f32 %v8201_v41, %v8556_v37  ;;  %v803_v28 = vadd.f32 %v771_v60, %v667_v9  ;;  %v8628_v32 = vld [vmem:[%s8111_s16 + $0x70] sm:$0xf] }
 0x10c   : > { %v804_v53 = vadd.f32 %v772_v63, %v668_v23  ;;  %v953_v29 = vrot.slane %v846_v62, 1  ;;  %v955_v27 = vrot.slane %v847_v24, 1  ;;  %v1068_v43 = vmul.f32 %v8201_v41, %v8603_v0 }
 0x10d   : > { %v8618_v52 = vpack.c.bf16 %v5238_v15, %v5237_v39  ;;  %v1173_v38 = vrot.slane %v1067_v42, 1  ;;  %v1287_v57 = vmul.f32 %v8254_v16, %v8565_v31  ;;  %v13357_v17 = vrot.slane %v8238_v61, 1 }
 0x10e   : > { %v956_v9 = vsel %vm893_vm0, %v953_v29, %v955_v27  ;;  %v1288_v30 = vmul.f32 %v8254_v16, %v8614_v59  ;;  %v1507_v18 = vmul.f32 %v8265_v48, %v8581_v47  ;;  %v13358_v62 = vrot.slane %v8250_v11, 1 }
 0x10f   : > { %13356 = vst [vmem:[#allocation62_spill] sm:$0xff] %v8618_v52  ;;  %v954_v23 = vsel %vm893_vm0, %v13357_v17, %v953_v29  ;;  %5574 = vmatmul.mubr.bf16.vlgmr.msra.gmra.mrb[0].mxu1 %v8618_v52  ;;  %v1025_v63 = vadd.f32 %v956_v9, %v736_v3  ;;  %v1175_v39 = vrot.slane %v1068_v43, 1  ;;  %v13359_v61 = vmov 0   ;;  %v7298_v3 = vld [vmem:[#allocation8 + $0x38] ss:$12 sps:$4 sm:$0xff]  }
 0x110   : > { %v1024_v60 = vadd.f32 %v954_v23, %v735_v4  ;;  %v1174_v24 = vsel %vm893_vm0, %v13358_v62, %v1173_v38  ;;  %7083 = vmatpush3.bf16.msra.mxu1 %v8275_v56  ;;  %5583 = vmatprep.mubr.bf16.mxu1 %v13359_v61  ;;  %v1393_v42 = vrot.slane %v1287_v57, 1  ;;  %v1395_v29 = vrot.slane %v1288_v30, 1 }
 0x111   : > { %v1244_v15 = vadd.f32 %v1174_v24, %v803_v28  ;;  %v1508_v27 = vmul.f32 %v8265_v48, %v8621_v50  ;;  %7084 = vmatprep.subr.bf16.mxu1 %v7297_v6  ;;  %v1176_v17 = vsel %vm893_vm0, %v1173_v38, %v1175_v39  ;;  %v1613_v4 = vrot.slane %v1507_v18, 1 }
 0x112   : > { %v1727_v11 = vmul.f32 %v8269_v49, %v8592_v25  ;;  %v1728_v43 = vmul.f32 %v8269_v49, %v8628_v32  ;;  %v1245_v56 = vadd.f32 %v1176_v17, %v804_v53  ;;  %v13360_v23 = vrot.slane %v8283_v13, 1  ;;  %v13362_v17 = vld [vmem:[#allocation45_spill] sm:$0xff] }
 0x113   : > { %v1396_v57 = vsel %vm893_vm0, %v1393_v42, %v1395_v29  ;;  %v1615_v9 = vrot.slane %v1508_v27, 1  ;;  %v13361_v38 = vrot.slane %v8295_v1, 1  ;;  %v1947_v13 = vmul.f32 %v8182_v35, %v8527_v58  ;;  %v13364_v1 = vld [vmem:[#allocation47_spill] sm:$0xff] }
 0x114   : > { %v1394_v28 = vsel %vm893_vm0, %v13360_v23, %v1393_v42  ;;  %v1465_v62 = vadd.f32 %v1396_v57, %v1025_v63  ;;  %v1833_v24 = vrot.slane %v1727_v11, 1  ;;  %7085 = vmatpush3.bf16.msra.mxu1 %v7297_v6  ;;  %v1835_v49 = vrot.slane %v1728_v43, 1  ;;  %v7299_v6 = vld [vmem:[#allocation8 + $0x50] ss:$12 sps:$4 sm:$0xff]  }
 0x115   : > { %v1464_v30 = vadd.f32 %v1394_v28, %v1024_v60  ;;  %v1614_v18 = vsel %vm893_vm0, %v13361_v38, %v1613_v4  ;;  %v1616_v39 = vsel %vm893_vm0, %v1613_v4, %v1615_v9  ;;  %v13363_v23 = vrot.slane %v13362_v17, 1  ;;  %7086 = vmatprep.subr.bf16.mxu1 %v7298_v3  ;;  %v13365_v28 = vld [vmem:[#allocation48_spill] sm:$0xff]  ;;  %v13366_v9 = vld [vmem:[#allocation46_spill] sm:$0xff] }
 0x116   : > { %v1684_v52 = vadd.f32 %v1614_v18, %v1244_v15  ;;  %v1685_v53 = vadd.f32 %v1616_v39, %v1245_v56  ;;  %v1948_v60 = vmul.f32 %v8182_v35, %v8589_v26  ;;  %v2168_v63 = vmul.f32 %v13364_v1, %v8556_v37 }
 0x117   : > { %v1834_v42 = vsel %vm893_vm0, %v13363_v23, %v1833_v24  ;;  %v1836_v29 = vsel %vm893_vm0, %v1833_v24, %v1835_v49  ;;  %v2054_v27 = vrot.slane %v1947_v13, 2  ;;  %v2169_v4 = vmul.f32 %v13364_v1, %v8603_v0  ;;  %v13368_v24 = vld [vmem:[#allocation50_spill] sm:$0xff] }
 0x118   : > { %v1904_v15 = vadd.f32 %v1834_v42, %v1464_v30  ;;  %v1905_v11 = vadd.f32 %v1836_v29, %v1465_v62  ;;  %v2056_v43 = vrot.slane %v1948_v60, 2  ;;  %v2274_v56 = vrot.slane %v2168_v63, 2  ;;  %7087 = vmatpush3.bf16.msra.mxu1 %v7298_v3  ;;  %v7300_v60 = vld [vmem:[#allocation8 + $0x68] ss:$12 sps:$4 sm:$0xff]  }
 0x119   : > { %v2388_v57 = vmul.f32 %v13365_v28, %v8565_v31  ;;  %v13367_v38 = vrot.slane %v13366_v9, 2  ;;  %v2276_v39 = vrot.slane %v2169_v4, 2  ;;  %v2389_v17 = vmul.f32 %v13365_v28, %v8614_v59  ;;  %7088 = vmatprep.subr.bf16.mxu1 %v7299_v6  ;;  %v13370_v28 = vld [vmem:[#allocation51_spill] sm:$0xff] }
 0x11a   : > { %v2608_v49 = vmul.f32 %v8335_v55, %v8581_v47  ;;  %v2057_v30 = vsel %vm1994_vm1, %v2054_v27, %v2056_v43  ;;  %v13369_v13 = vrot.slane %v13368_v24, 2  ;;  %v13371_v1 = vrot.slane %v13370_v28, 2 }
 0x11b   : > { %v2055_v18 = vsel %vm1994_vm1, %v13367_v38, %v2054_v27  ;;  %v2494_v42 = vrot.slane %v2388_v57, 2  ;;  %v2126_v63 = vadd.f32 %v2057_v30, %v1685_v53  ;;  %v2277_v29 = vsel %vm1994_vm1, %v2274_v56, %v2276_v39  ;;  %v13372_v57 = vld [vmem:[#allocation53_spill] sm:$0xff]  ;;  %v13375_v39 = vld [vmem:[#allocation32_spill] sm:$0xff] }
 0x11c   : > { %v2125_v62 = vadd.f32 %v2055_v18, %v1684_v52  ;;  %v2275_v23 = vsel %vm1994_vm1, %v13369_v13, %v2274_v56  ;;  %v2496_v9 = vrot.slane %v2389_v17, 2  ;;  %v2346_v38 = vadd.f32 %v2277_v29, %v1905_v11  ;;  %7089 = vmatpush3.bf16.msra.mxu1 %v7299_v6  ;;  %v13373_v11 = vld [vmem:[#allocation52_spill] sm:$0xff] }
 0x11d   : > { %v2345_v4 = vadd.f32 %v2275_v23, %v1904_v15  ;;  %v2495_v3 = vsel %vm1994_vm1, %v13371_v1, %v2494_v42  ;;  %v2609_v52 = vmul.f32 %v8335_v55, %v8621_v50  ;;  %v2714_v27 = vrot.slane %v2608_v49, 2  ;;  %7090 = vmatprep.subr.bf16.mxu1 %v7300_v60  ;;  %v7301_v49 = vld [vmem:[#allocation8 + $0x80] ss:$12 sps:$4 sm:$0xff]  }
 0x11e   : > { %v2497_v43 = vsel %vm1994_vm1, %v2494_v42, %v2496_v9  ;;  %v2565_v18 = vadd.f32 %v2495_v3, %v2125_v62  ;;  %v2828_v24 = vmul.f32 %v13372_v57, %v8592_v25  ;;  %v2829_v53 = vmul.f32 %v13372_v57, %v8628_v32  ;;  %v13382_v57 = vld [vmem:[#allocation57_spill] sm:$0xff] }
 0x11f   : > { %v2566_v15 = vadd.f32 %v2497_v43, %v2126_v63  ;;  %v13374_v56 = vrot.slane %v13373_v11, 2  ;;  %v2716_v1 = vrot.slane %v2609_v52, 2  ;;  %v3048_v17 = vmul.f32 %v13375_v39, %v8527_v58  ;;  %v13376_v63 = vld [vmem:[#allocation55_spill] sm:$0xff]  ;;  %v13377_v52 = vld [vmem:[#allocation56_spill] sm:$0xff] }
 0x120   : > { %v2934_v62 = vrot.slane %v2828_v24, 2  ;;  %v2936_v13 = vrot.slane %v2829_v53, 2  ;;  %v3049_v23 = vmul.f32 %v13375_v39, %v8589_v26  ;;  %v3269_v29 = vmul.f32 %v13376_v63, %v8556_v37  ;;  %7091 = vmatpush3.bf16.msra.mxu1 %v7300_v60 }
 0x121   : > { %v2715_v28 = vsel %vm1994_vm1, %v13374_v56, %v2714_v27  ;;  %v2717_v42 = vsel %vm1994_vm1, %v2714_v27, %v2716_v1  ;;  %v3155_v6 = vrot.slane %v3048_v17, 3  ;;  %v3270_v9 = vmul.f32 %v13376_v63, %v8603_v0  ;;  %7092 = vmatprep.subr.bf16.mxu1 %v7301_v49 }
 0x122   : > { %v2785_v30 = vadd.f32 %v2715_v28, %v2345_v4  ;;  %v2786_v3 = vadd.f32 %v2717_v42, %v2346_v38  ;;  %v13378_v43 = vrot.slane %v13377_v52, 2  ;;  %v2937_v4 = vsel %vm1994_vm1, %v2934_v62, %v2936_v13  ;;  %v13379_v28 = vld [vmem:[#allocation54_spill] sm:$0xff] }
 0x123   : > { %v3157_v24 = vrot.slane %v3049_v23, 3  ;;  %v3006_v56 = vadd.f32 %v2937_v4, %v2566_v15  ;;  %v13380_v27 = vrot.slane %v13379_v28, 3  ;;  %v3375_v17 = vrot.slane %v3269_v29, 3  ;;  %v13381_v42 = vld [vmem:[#allocation58_spill] sm:$0xff]  ;;  %v13384_v15 = vld [vmem:[#allocation59_spill] sm:$0xff] }
 0x124   : > { %v2935_v11 = vsel %vm1994_vm1, %v13378_v43, %v2934_v62  ;;  %v3377_v38 = vrot.slane %v3270_v9, 3  ;;  %v3489_v52 = vmul.f32 %v13381_v42, %v8565_v31  ;;  %v13383_v62 = vrot.slane %v13382_v57, 3  ;;  %7093 = vmatpush3.bf16.msra.mxu1 %v7301_v49  ;;  %v13385_v57 = vld [vmem:[#allocation60_spill] sm:$0xff] }
 0x125   : > { %v3005_v53 = vadd.f32 %v2935_v11, %v2565_v18  ;;  %v3156_v1 = vsel %vm3095_vm2, %v13380_v27, %v3155_v6  ;;  %v3158_v39 = vsel %vm3095_vm2, %v3155_v6, %v3157_v24  ;;  %v3490_v18 = vmul.f32 %v13381_v42, %v8614_v59 }
 0x126   : > { %v3226_v63 = vadd.f32 %v3156_v1, %v2785_v30  ;;  %v3227_v43 = vadd.f32 %v3158_v39, %v2786_v3  ;;  %v3376_v60 = vsel %vm3095_vm2, %v13383_v62, %v3375_v17  ;;  %v3709_v13 = vmul.f32 %v13384_v15, %v8581_v47 }
 0x127   : > { %v3378_v23 = vsel %vm3095_vm2, %v3375_v17, %v3377_v38  ;;  %v3446_v29 = vadd.f32 %v3376_v60, %v3005_v53  ;;  %v3595_v6 = vrot.slane %v3489_v52, 3  ;;  %v3710_v30 = vmul.f32 %v13384_v15, %v8621_v50 }
 0x128   : > { %v3447_v9 = vadd.f32 %v3378_v23, %v3006_v56  ;;  %v3597_v39 = vrot.slane %v3490_v18, 3  ;;  %v3815_v3 = vrot.slane %v3709_v13, 3  ;;  %v3929_v11 = vmul.f32 %v13385_v57, %v8592_v25 }
 0x129   : > { %v13386_v4 = vrot.slane %v8458_v8, 3  ;;  %v3817_v28 = vrot.slane %v3710_v30, 3  ;;  %v3930_v27 = vmul.f32 %v13385_v57, %v8628_v32  ;;  %v4149_v53 = vmul.f32 %v8446_v54, %v8527_v58 }
 0x12a   : > { %v3598_v1 = vsel %vm3095_vm2, %v3595_v6, %v3597_v39  ;;  %v13387_v56 = vrot.slane %v8466_v12, 3  ;;  %v4035_v38 = vrot.slane %v3929_v11, 3  ;;  %v13388_v13 = vrot.slane %v8477_v46, 3 }
 0x12b   : > { %v3596_v24 = vsel %vm3095_vm2, %v13386_v4, %v3595_v6  ;;  %v3667_v52 = vadd.f32 %v3598_v1, %v3227_v43  ;;  %v3818_v8 = vsel %vm3095_vm2, %v3815_v3, %v3817_v28  ;;  %v4037_v60 = vrot.slane %v3930_v27, 3 }
 0x12c   : > { %v3666_v49 = vadd.f32 %v3596_v24, %v3226_v63  ;;  %v3816_v17 = vsel %vm3095_vm2, %v13387_v56, %v3815_v3  ;;  %v3887_v18 = vadd.f32 %v3818_v8, %v3447_v9  ;;  %v4036_v23 = vsel %vm3095_vm2, %v13388_v13, %v4035_v38 }
 0x12d   : > { %v3886_v62 = vadd.f32 %v3816_v17, %v3446_v29  ;;  %v4150_v58 = vmul.f32 %v8446_v54, %v8589_v26  ;;  %v4256_v6 = vrot.slane %v4149_v53, 4  ;;  %v4038_v63 = vsel %vm3095_vm2, %v4035_v38, %v4037_v60 }
 0x12e   : > { %v4106_v12 = vadd.f32 %v4036_v23, %v3666_v49  ;;  %v4370_v30 = vmul.f32 %v8450_v10, %v8556_v37  ;;  %v4371_v43 = vmul.f32 %v8450_v10, %v8603_v0  ;;  %v4107_v29 = vadd.f32 %v4038_v63, %v3667_v52  ;;  %v8782_v63 = vld [vmem:[%s8111_s16 + $0x78] sm:$0xff] }
 0x12f   : > { %v13389_v9 = vrot.slane %v8494_v19, 4  ;;  %v4258_v39 = vrot.slane %v4150_v58, 4  ;;  %v4590_v3 = vmul.f32 %v8509_v5, %v8565_v31  ;;  %v4591_v24 = vmul.f32 %v8509_v5, %v8614_v59 }
 0x130   : > { %v4476_v11 = vrot.slane %v4370_v30, 4  ;;  %v4478_v4 = vrot.slane %v4371_v43, 4  ;;  %v4810_v0 = vmul.f32 %v8535_v14, %v8581_v47  ;;  %v4811_v19 = vmul.f32 %v8535_v14, %v8621_v50  ;;  %v13393_v30 = vld [vmem:[#allocation33_spill] sm:$0xff] }
 0x131   : > { %v4257_v46 = vsel %vm4196_vm3, %v13389_v9, %v4256_v6  ;;  %v4259_v37 = vsel %vm4196_vm3, %v4256_v6, %v4258_v39  ;;  %v4696_v28 = vrot.slane %v4590_v3, 4  ;;  %v13390_v53 = vrot.slane %v8502_v44, 4  ;;  %v13396_v39 = vld [vmem:[#allocation27_spill] sm:$0xff]  ;;  %v13397_v3 = vld [vmem:[#allocation34_spill] sm:$0xff] }
 0x132   : > { %v4327_v26 = vadd.f32 %v4257_v46, %v3886_v62  ;;  %v4328_v27 = vadd.f32 %v4259_v37, %v3887_v18  ;;  %v4479_v1 = vsel %vm4196_vm3, %v4476_v11, %v4478_v4  ;;  %v4698_v49 = vrot.slane %v4591_v24, 4  ;;  %v8794_v46 = vld [vmem:[%s8111_s16 + $0x80] sm:$0xff] }
 0x133   : > { %v4477_v31 = vsel %vm4196_vm3, %v13390_v53, %v4476_v11  ;;  %v4548_v59 = vadd.f32 %v4479_v1, %v4107_v29  ;;  %v13391_v17 = vrot.slane %v8524_v2, 4  ;;  %v4916_v52 = vrot.slane %v4810_v0, 4  ;;  %v13398_v11 = vld [vmem:[#allocation28_spill] sm:$0xff]  ;;  %v13399_v4 = vld [vmem:[#allocation29_spill] sm:$0xff] }
 0x134   : > { %v4547_v56 = vadd.f32 %v4477_v31, %v4106_v12  ;;  %v4699_v47 = vsel %vm4196_vm3, %v4696_v28, %v4698_v49  ;;  %v4918_v50 = vrot.slane %v4811_v19, 4  ;;  %v5030_v44 = vmul.f32 %v8539_v51, %v8592_v25 }
 0x135   : > { %v4697_v38 = vsel %vm4196_vm3, %v13391_v17, %v4696_v28  ;;  %v4768_v62 = vadd.f32 %v4699_v47, %v4328_v27  ;;  %v13392_v60 = vrot.slane %v8560_v36, 4  ;;  %v5031_v13 = vmul.f32 %v8539_v51, %v8628_v32  ;;  %v13394_v32 = vld [vmem:[#allocation26_spill] sm:$0xff]  ;;  %v8804_v28 = vld [vmem:[%s8111_s16 + $0x58] sm:$0xff] }
 0x136   : > { %v4767_v8 = vadd.f32 %v4697_v38, %v4327_v26  ;;  %v501_v2 = vmul.f32 %v8174_v33, %v8140_v20  ;;  %v4919_v23 = vsel %vm4196_vm3, %v4916_v52, %v4918_v50  ;;  %v5136_v6 = vrot.slane %v5030_v44, 4  ;;  %v8811_v27 = vld [vmem:[%s8111_s16 + $0x88] sm:$0xff]  ;;  %v8820_v47 = vld [vmem:[%s8101_s2 + $0x118] sm:$0xff]  ;;  %v8825_v50 = vld [vmem:[%s8101_s2 + $0x120] sm:$0xff] }
 0x137   : > { %v4917_v18 = vsel %vm4196_vm3, %v13392_v60, %v4916_v52  ;;  %v502_v25 = vmul.f32 %v8174_v33, %v8143_v21  ;;  %v4988_v36 = vadd.f32 %v4919_v23, %v4548_v59  ;;  %v5138_v12 = vrot.slane %v5031_v13, 4  ;;  %v13401_v60 = vld [vmem:[#allocation38_spill] sm:$0xff]  ;;  %v8834_v13 = vld [vmem:[%s8111_s16] sm:$0xff] }
 0x138   : > { %v4987_v58 = vadd.f32 %v4917_v18, %v4547_v56  ;;  %v569_v43 = vmul.f32 %v13393_v30, %v8146_v22  ;;  %v570_v29 = vmul.f32 %v13393_v30, %v13394_v32  ;;  %v13395_v20 = vrot.slane %v8571_v7, 4  ;;  %v8839_v23 = vld [vmem:[%s8111_s16 + $0x8] sm:$0xff] }
 0x139   : > { %v637_v26 = vmul.f32 %v13397_v3, %v13396_v39  ;;  %v638_v21 = vmul.f32 %v13397_v3, %v13398_v11  ;;  %v705_v24 = vmul.f32 %v8197_v40, %v13399_v4  ;;  %v5139_v22 = vsel %vm4196_vm3, %v5136_v6, %v5138_v12  ;;  %v13404_v12 = vld [vmem:[#allocation39_spill] sm:$0xff] }
 0x13a   : > { %v5137_v9 = vsel %vm4196_vm3, %v13395_v20, %v5136_v6  ;;  %v706_v7 = vmul.f32 %v8804_v28, %v8197_v40  ;;  %v773_v0 = vmul.f32 %v8211_v45, %v8782_v63  ;;  %v5208_v19 = vadd.f32 %v5139_v22, %v4768_v62 }
 0x13b   : > { %v5207_v37 = vadd.f32 %v5137_v9, %v4767_v8  ;;  %v669_v53 = vadd.f32 %v637_v26, %v501_v2  ;;  %v670_v31 = vadd.f32 %v638_v21, %v502_v25  ;;  %v737_v1 = vadd.f32 %v705_v24, %v569_v43  ;;  %v8851_v9 = vld [vmem:[%s8111_s16 + $0x28] sm:$0xff]  ;;  %v8859_v21 = vld [vmem:[%s8111_s16 + $0x30] sm:$0xff]  ;;  %v13406_v24 = vld [vmem:[#allocation41_spill] sm:$0xff] }
 0x13c   : > { %v738_v56 = vadd.f32 %v706_v7, %v570_v29  ;;  %v774_v59 = vmul.f32 %v8211_v45, %v8794_v46  ;;  %v8817_v17 = vmul.f32 %v8211_v45, %v8811_v27  ;;  %v5240_v38 = vadd.f32 %v5208_v19, %v4988_v36 }
 0x13d   : > { %v5239_v49 = vadd.f32 %v5207_v37, %v4987_v58  ;;  %v805_v52 = vadd.f32 %v773_v0, %v669_v53  ;;  %v848_v8 = vmul.f32 %v8820_v47, %v8178_v34  ;;  %v849_v44 = vmul.f32 %v8825_v50, %v8178_v34 }
 0x13e   : > { %13400 = vst [vmem:[#allocation45_spill] sm:$0xff] %v8817_v17  ;;  %v806_v62 = vadd.f32 %v774_v59, %v670_v31  ;;  %v8831_v18 = vmul.f32 %v8178_v34, %v13401_v60  ;;  %v1069_v2 = vmul.f32 %v8834_v13, %v8201_v41  ;;  %v1070_v58 = vmul.f32 %v8839_v23, %v8201_v41 }
 0x13f   : > { %v8843_v6 = vpack.c.bf16 %v5240_v38, %v5239_v49  ;;  %v957_v25 = vrot.slane %v848_v8, 1  ;;  %v958_v36 = vrot.slane %v849_v44, 1  ;;  %v8847_v43 = vmul.f32 %v8201_v41, %v13404_v12  ;;  %v8877_v44 = vld [vmem:[%s8111_s16 + $0x50] sm:$0xff] }
 0x140   : > { %13402 = vst [vmem:[#allocation46_spill] sm:$0xff] %v8831_v18  ;;  %v12899_v32 = vrot.slane %v8831_v18, 1  ;;  %v1177_v29 = vrot.slane %v1069_v2, 1  ;;  %v1178_v20 = vrot.slane %v1070_v58, 1  ;;  %v1289_v39 = vmul.f32 %v8851_v9, %v8254_v16 }
 0x141   : > { %13403 = vst [vmem:[#allocation50_spill] sm:$0xff] %v8843_v6  ;;  %13405 = vst [vmem:[#allocation51_spill] sm:$0xff] %v8847_v43  ;;  %5584 = vmatmul.mubr.bf16.gmra.mrb[4].mxu1 %v8843_v6  ;;  %v959_v26 = vsel %vm893_vm0, %v957_v25, %v958_v36  ;;  %v12898_v11 = vrot.slane %v8847_v43, 1  ;;  %v1290_v4 = vmul.f32 %v8859_v21, %v8254_v16 }
 0x142   : > { %v8865_v22 = vmul.f32 %v8254_v16, %v13406_v24  ;;  %5593 = vmatprep.mubr.bf16.mxu1 %v13359_v61  ;;  %v961_v37 = vsel %vm893_vm0, %v958_v36, %v12899_v32  ;;  %v1026_v7 = vadd.f32 %v959_v26, %v737_v1  ;;  %v1179_v0 = vsel %vm893_vm0, %v1177_v29, %v1178_v20 }
 0x143   : > { %v1397_v19 = vrot.slane %v1289_v39, 1  ;;  %v1027_v53 = vadd.f32 %v961_v37, %v738_v56  ;;  %v1181_v31 = vsel %vm893_vm0, %v1178_v20, %v12898_v11  ;;  %v1246_v49 = vadd.f32 %v1179_v0, %v805_v52  ;;  %v13408_v56 = vld [vmem:[#allocation44_spill] sm:$0xff]  ;;  %v13410_v52 = vld [vmem:[#allocation43_spill] sm:$0xff] }
 0x144   : > { %13407 = vst [vmem:[#allocation52_spill] sm:$0xff] %v8865_v22  ;;  %v1398_v59 = vrot.slane %v1290_v4, 1  ;;  %v1247_v38 = vadd.f32 %v1181_v31, %v806_v62  ;;  %v12896_v8 = vrot.slane %v8865_v22, 1  ;;  %v1509_v60 = vmul.f32 %v8877_v44, %v8265_v48  ;;  %v8942_v11 = vld [vmem:[%s8111_s16 + $0x38] sm:$0xff] }
 0x145   : > { %v1510_v1 = vmul.f32 %v8804_v28, %v8265_v48  ;;  %v8886_v58 = vmul.f32 %v8265_v48, %v13408_v56  ;;  %v1729_v25 = vmul.f32 %v13410_v52, %v8782_v63  ;;  %v1730_v62 = vmul.f32 %v13410_v52, %v8794_v46 }
 0x146   : > { %v1399_v2 = vsel %vm893_vm0, %v1397_v19, %v1398_v59  ;;  %v1401_v36 = vsel %vm893_vm0, %v1398_v59, %v12896_v8  ;;  %v1617_v29 = vrot.slane %v1509_v60, 1  ;;  %v8898_v4 = vmul.f32 %v13410_v52, %v8811_v27  ;;  %v8910_v60 = vld [vmem:[%s8101_s2 + $0x128] sm:$0xff] }
 0x147   : > { %13409 = vst [vmem:[#allocation56_spill] sm:$0xff] %v8886_v58  ;;  %v1466_v12 = vadd.f32 %v1399_v2, %v1026_v7  ;;  %v1618_v20 = vrot.slane %v1510_v1, 1  ;;  %v1467_v39 = vadd.f32 %v1401_v36, %v1027_v53  ;;  %v12895_v26 = vrot.slane %v8886_v58, 1 }
 0x148   : > { %13411 = vst [vmem:[#allocation54_spill] sm:$0xff] %v8898_v4  ;;  %v1837_v24 = vrot.slane %v1729_v25, 1  ;;  %v1838_v0 = vrot.slane %v1730_v62, 1  ;;  %v1949_v19 = vmul.f32 %v8820_v47, %v8182_v35  ;;  %v1950_v31 = vmul.f32 %v8825_v50, %v8182_v35 }
 0x149   : > { %v1619_v37 = vsel %vm893_vm0, %v1617_v29, %v1618_v20  ;;  %v1621_v7 = vsel %vm893_vm0, %v1618_v20, %v12895_v26  ;;  %v12897_v59 = vrot.slane %v8898_v4, 1  ;;  %v8914_v1 = vmul.f32 %v8910_v60, %v8182_v35  ;;  %v13413_v20 = vld [vmem:[#allocation47_spill] sm:$0xff] }
 0x14a   : > { %v1686_v53 = vadd.f32 %v1619_v37, %v1246_v49  ;;  %v1687_v2 = vadd.f32 %v1621_v7, %v1247_v38  ;;  %v1839_v56 = vsel %vm893_vm0, %v1837_v24, %v1838_v0  ;;  %v2058_v25 = vrot.slane %v1949_v19, 2  ;;  %v8927_v24 = vld [vmem:[%s8111_s16 + $0x10] sm:$0xff]  ;;  %v13415_v7 = vld [vmem:[#allocation48_spill] sm:$0xff] }
 0x14b   : > { %13412 = vst [vmem:[#allocation57_spill] sm:$0xff] %v8914_v1  ;;  %v2059_v62 = vrot.slane %v1950_v31, 2  ;;  %v1841_v36 = vsel %vm893_vm0, %v1838_v0, %v12897_v59  ;;  %v1906_v29 = vadd.f32 %v1839_v56, %v1466_v12  ;;  %v12900_v49 = vrot.slane %v8914_v1, 2 }
 0x14c   : > { %v2170_v37 = vmul.f32 %v8834_v13, %v13413_v20  ;;  %v1907_v26 = vadd.f32 %v1841_v36, %v1467_v39  ;;  %v2171_v38 = vmul.f32 %v8839_v23, %v13413_v20  ;;  %v8931_v19 = vmul.f32 %v8927_v24, %v13413_v20 }
 0x14d   : > { %v2060_v8 = vsel %vm1994_vm1, %v2058_v25, %v2059_v62  ;;  %v2062_v12 = vsel %vm1994_vm1, %v2059_v62, %v12900_v49  ;;  %v2390_v39 = vmul.f32 %v8851_v9, %v13415_v7  ;;  %v2391_v59 = vmul.f32 %v8859_v21, %v13415_v7 }
 0x14e   : > { %13414 = vst [vmem:[#allocation33_spill] sm:$0xff] %v8931_v19  ;;  %v2127_v0 = vadd.f32 %v2060_v8, %v1686_v53  ;;  %v2278_v31 = vrot.slane %v2170_v37, 2  ;;  %v2128_v56 = vadd.f32 %v2062_v12, %v1687_v2  ;;  %v2279_v25 = vrot.slane %v2171_v38, 2  ;;  %v8957_v12 = vld [vmem:[%s8111_s16 + $0x60] sm:$0xff] }
 0x14f   : > { %v12907_v36 = vrot.slane %v8931_v19, 2  ;;  %v8946_v32 = vmul.f32 %v8942_v11, %v13415_v7  ;;  %v2498_v62 = vrot.slane %v2390_v39, 2  ;;  %v2610_v8 = vmul.f32 %v8877_v44, %v8335_v55  ;;  %v13418_v19 = vld [vmem:[#allocation53_spill] sm:$0xff] }
 0x150   : > { %v2611_v53 = vmul.f32 %v8804_v28, %v8335_v55  ;;  %v2280_v2 = vsel %vm1994_vm1, %v2278_v31, %v2279_v25  ;;  %v2499_v38 = vrot.slane %v2391_v59, 2  ;;  %v8961_v49 = vmul.f32 %v8957_v12, %v8335_v55 }
 0x151   : > { %13416 = vst [vmem:[#allocation26_spill] sm:$0xff] %v8946_v32  ;;  %v2282_v37 = vsel %vm1994_vm1, %v2279_v25, %v12907_v36  ;;  %v2347_v39 = vadd.f32 %v2280_v2, %v1906_v29  ;;  %v12910_v1 = vrot.slane %v8946_v32, 2  ;;  %v2718_v4 = vrot.slane %v2610_v8, 2 }
 0x152   : > { %13417 = vst [vmem:[#allocation27_spill] sm:$0xff] %v8961_v49  ;;  %v2348_v6 = vadd.f32 %v2282_v37, %v1907_v26  ;;  %v2500_v58 = vsel %vm1994_vm1, %v2498_v62, %v2499_v38  ;;  %v2719_v22 = vrot.slane %v2611_v53, 2  ;;  %v12911_v31 = vrot.slane %v8961_v49, 2  ;;  %v7302_v49 = vld [vmem:[#allocation8 + $0x98] ss:$12 sps:$4 sm:$0xff]  }
 0x153   : > { %v2830_v25 = vmul.f32 %v13418_v19, %v8782_v63  ;;  %v2502_v59 = vsel %vm1994_vm1, %v2499_v38, %v12910_v1  ;;  %v2567_v36 = vadd.f32 %v2500_v58, %v2127_v0  ;;  %v2831_v29 = vmul.f32 %v13418_v19, %v8794_v46  ;;  %v13420_v0 = vld [vmem:[#allocation32_spill] sm:$0xff]  ;;  %7094 = vmatprep.subr.bf16.mxu1 %v7302_v49 }
 0x154   : > { %v8975_v26 = vmul.f32 %v13418_v19, %v8811_v27  ;;  %v2568_v8 = vadd.f32 %v2502_v59, %v2128_v56  ;;  %v2720_v62 = vsel %vm1994_vm1, %v2718_v4, %v2719_v22  ;;  %v2722_v53 = vsel %vm1994_vm1, %v2719_v22, %v12911_v31  ;;  %v13422_v4 = vld [vmem:[#allocation55_spill] sm:$0xff]  ;;  %7095 = vmatpush3.bf16.msra.mxu1 %v7302_v49 }
 0x155   : > { %v2938_v2 = vrot.slane %v2830_v25, 2  ;;  %v2787_v37 = vadd.f32 %v2720_v62, %v2347_v39  ;;  %v2788_v32 = vadd.f32 %v2722_v53, %v2348_v6  ;;  %v2939_v43 = vrot.slane %v2831_v29, 2 }
 0x156   : > { %13419 = vst [vmem:[#allocation34_spill] sm:$0xff] %v8975_v26  ;;  %v12915_v58 = vrot.slane %v8975_v26, 2  ;;  %v3050_v38 = vmul.f32 %v8820_v47, %v13420_v0  ;;  %v3051_v1 = vmul.f32 %v8825_v50, %v13420_v0  ;;  %v8988_v56 = vmul.f32 %v8910_v60, %v13420_v0 }
 0x157   : > { %v3271_v59 = vmul.f32 %v8834_v13, %v13422_v4  ;;  %v2940_v22 = vsel %vm1994_vm1, %v2938_v2, %v2939_v43  ;;  %v3272_v39 = vmul.f32 %v8839_v23, %v13422_v4  ;;  %v9000_v25 = vmul.f32 %v8927_v24, %v13422_v4 }
 0x158   : > { %13421 = vst [vmem:[#allocation28_spill] sm:$0xff] %v8988_v56  ;;  %v2942_v6 = vsel %vm1994_vm1, %v2939_v43, %v12915_v58  ;;  %v3007_v29 = vadd.f32 %v2940_v22, %v2567_v36  ;;  %v3159_v53 = vrot.slane %v3050_v38, 3  ;;  %v3160_v31 = vrot.slane %v3051_v1, 3  ;;  %v7303_v1 = vld [vmem:[#allocation8 + $0xb0] ss:$12 sps:$4 sm:$0xff]  }
 0x159   : > { %13423 = vst [vmem:[#allocation29_spill] sm:$0xff] %v9000_v25  ;;  %v3008_v62 = vadd.f32 %v2942_v6, %v2568_v8  ;;  %v12922_v18 = vrot.slane %v8988_v56, 3  ;;  %v3379_v17 = vrot.slane %v3271_v59, 3  ;;  %v3380_v2 = vrot.slane %v3272_v39, 3  ;;  %7096 = vmatprep.subr.bf16.mxu1 %v7303_v1 }
 0x15a   : > { %v12921_v26 = vrot.slane %v9000_v25, 3  ;;  %v3161_v43 = vsel %vm3095_vm2, %v3159_v53, %v3160_v31  ;;  %v3491_v58 = vmul.f32 %v8851_v9, %v13381_v42  ;;  %v3492_v4 = vmul.f32 %v8859_v21, %v13381_v42  ;;  %7097 = vmatpush3.bf16.msra.mxu1 %v7303_v1  ;;  %v9221_v25 = vld [vmem:[%s8101_s2 + $0xb0] sm:$0xff] }
 0x15b   : > { %v9011_v36 = vmul.f32 %v8942_v11, %v13381_v42  ;;  %v3163_v8 = vsel %vm3095_vm2, %v3160_v31, %v12922_v18  ;;  %v3228_v38 = vadd.f32 %v3161_v43, %v2787_v37  ;;  %v3381_v59 = vsel %vm3095_vm2, %v3379_v17, %v3380_v2 }
 0x15c   : > { %v3383_v22 = vsel %vm3095_vm2, %v3380_v2, %v12921_v26  ;;  %v3229_v6 = vadd.f32 %v3163_v8, %v2788_v32  ;;  %v3448_v39 = vadd.f32 %v3381_v59, %v3007_v29  ;;  %v3599_v0 = vrot.slane %v3491_v58, 3 }
 0x15d   : > { %13424 = vst [vmem:[#allocation38_spill] sm:$0xff] %v9011_v36  ;;  %v3449_v53 = vadd.f32 %v3383_v22, %v3008_v62  ;;  %v3600_v42 = vrot.slane %v3492_v4, 3  ;;  %v12928_v19 = vrot.slane %v9011_v36, 3  ;;  %v3711_v56 = vmul.f32 %v8877_v44, %v13384_v15 }
 0x15e   : > { %v3712_v31 = vmul.f32 %v8804_v28, %v13384_v15  ;;  %v9027_v17 = vmul.f32 %v8957_v12, %v13384_v15  ;;  %v3931_v32 = vmul.f32 %v13385_v57, %v8782_v63  ;;  %v3932_v49 = vmul.f32 %v13385_v57, %v8794_v46 }
 0x15f   : > { %v9035_v37 = vmul.f32 %v13385_v57, %v8811_v27  ;;  %v3601_v58 = vsel %vm3095_vm2, %v3599_v0, %v3600_v42  ;;  %v3603_v4 = vsel %vm3095_vm2, %v3600_v42, %v12928_v19  ;;  %v3819_v29 = vrot.slane %v3711_v56, 3  ;;  %v9148_v19 = vld [vmem:[%s8101_s2 + $0xa0] sm:$0xff] }
 0x160   : > { %13425 = vst [vmem:[#allocation39_spill] sm:$0xff] %v9027_v17  ;;  %v3820_v62 = vrot.slane %v3712_v31, 3  ;;  %v3668_v2 = vadd.f32 %v3601_v58, %v3228_v38  ;;  %v3669_v43 = vadd.f32 %v3603_v4, %v3229_v6  ;;  %v12927_v8 = vrot.slane %v9027_v17, 3 }
 0x161   : > { %13426 = vst [vmem:[#allocation41_spill] sm:$0xff] %v9035_v37  ;;  %v4039_v59 = vrot.slane %v3931_v32, 3  ;;  %v4040_v26 = vrot.slane %v3932_v49, 3  ;;  %v12926_v18 = vrot.slane %v9035_v37, 3  ;;  %v4151_v0 = vmul.f32 %v8820_v47, %v8446_v54  ;;  %v9172_v37 = vld [vmem:[%s8101_s2 + $0x38] sm:$0xff] }
 0x162   : > { %v3821_v22 = vsel %vm3095_vm2, %v3819_v29, %v3820_v62  ;;  %v3823_v42 = vsel %vm3095_vm2, %v3820_v62, %v12927_v8  ;;  %v4152_v1 = vmul.f32 %v8825_v50, %v8446_v54  ;;  %v9053_v38 = vmul.f32 %v8910_v60, %v8446_v54 }
 0x163   : > { %v3888_v56 = vadd.f32 %v3821_v22, %v3448_v39  ;;  %v3889_v6 = vadd.f32 %v3823_v42, %v3449_v53  ;;  %v4041_v31 = vsel %vm3095_vm2, %v4039_v59, %v4040_v26  ;;  %v4043_v32 = vsel %vm3095_vm2, %v4040_v26, %v12926_v18 }
 0x164   : > { %13427 = vst [vmem:[#allocation44_spill] sm:$0xff] %v9053_v38  ;;  %v4260_v47 = vrot.slane %v4151_v0, 4  ;;  %v4108_v49 = vadd.f32 %v4041_v31, %v3668_v2  ;;  %v4109_v58 = vadd.f32 %v4043_v32, %v3669_v43  ;;  %v4261_v4 = vrot.slane %v4152_v1, 4 }
 0x165   : > { %v12925_v39 = vrot.slane %v9053_v38, 4  ;;  %v4372_v50 = vmul.f32 %v8834_v13, %v8450_v10  ;;  %v4373_v29 = vmul.f32 %v8839_v23, %v8450_v10  ;;  %v9066_v53 = vmul.f32 %v8927_v24, %v8450_v10 }
 0x166   : > { %v4592_v62 = vmul.f32 %v8851_v9, %v8509_v5  ;;  %v4262_v26 = vsel %vm4196_vm3, %v4260_v47, %v4261_v4  ;;  %v4593_v43 = vmul.f32 %v8859_v21, %v8509_v5  ;;  %v9078_v13 = vmul.f32 %v8942_v11, %v8509_v5 }
 0x167   : > { %13428 = vst [vmem:[#allocation63_spill] sm:$0xff] %v9066_v53  ;;  %v4264_v2 = vsel %vm4196_vm3, %v4261_v4, %v12925_v39  ;;  %v4329_v23 = vadd.f32 %v4262_v26, %v3888_v56  ;;  %v4480_v22 = vrot.slane %v4372_v50, 4  ;;  %v4481_v0 = vrot.slane %v4373_v29, 4  ;;  %v9102_v29 = vld [vmem:[%s8101_s2 + $0x8] sm:$0xff] }
 0x168   : > { %13429 = vst [vmem:[#allocation64_spill] sm:$0xff] %v9078_v13  ;;  %v4330_v59 = vadd.f32 %v4264_v2, %v3889_v6  ;;  %v12924_v9 = vrot.slane %v9066_v53, 4  ;;  %v4700_v42 = vrot.slane %v4592_v62, 4  ;;  %v4701_v1 = vrot.slane %v4593_v43, 4 }
 0x169   : > { %v12923_v31 = vrot.slane %v9078_v13, 4  ;;  %v4482_v32 = vsel %vm4196_vm3, %v4480_v22, %v4481_v0  ;;  %v4812_v21 = vmul.f32 %v8877_v44, %v8535_v14  ;;  %v4813_v47 = vmul.f32 %v8804_v28, %v8535_v14  ;;  %v9099_v28 = vld [vmem:[%s8101_s2] sm:$0xff] }
 0x16a   : > { %v9089_v56 = vmul.f32 %v8957_v12, %v8535_v14  ;;  %v4484_v6 = vsel %vm4196_vm3, %v4481_v0, %v12924_v9  ;;  %v4549_v4 = vadd.f32 %v4482_v32, %v4108_v49  ;;  %v4702_v50 = vsel %vm4196_vm3, %v4700_v42, %v4701_v1  ;;  %v9113_v32 = vld [vmem:[%s8101_s2 + $0x28] sm:$0xff]  ;;  %v9144_v9 = vld [vmem:[%s8101_s2 + $0x80] sm:$0xff] }
 0x16b   : > { %v4704_v44 = vsel %vm4196_vm3, %v4701_v1, %v12923_v31  ;;  %v4550_v62 = vadd.f32 %v4484_v6, %v4109_v58  ;;  %v4769_v26 = vadd.f32 %v4702_v50, %v4329_v23  ;;  %v4920_v43 = vrot.slane %v4812_v21, 4  ;;  %v9110_v1 = vld [vmem:[%s8101_s2 + $0x10] sm:$0xff]  ;;  %v9126_v21 = vld [vmem:[%s8101_s2 + $0x58] sm:$0xff] }
 0x16c   : > { %13430 = vst [vmem:[#allocation65_spill] sm:$0xff] %v9089_v56  ;;  %v4770_v2 = vadd.f32 %v4704_v44, %v4330_v59  ;;  %v4921_v22 = vrot.slane %v4813_v47, 4  ;;  %v12930_v49 = vrot.slane %v9089_v56, 4  ;;  %v5032_v0 = vmul.f32 %v8539_v51, %v8782_v63  ;;  %v9120_v23 = vld [vmem:[%s8101_s2 + $0x30] sm:$0xff]  ;;  %v9141_v31 = vld [vmem:[%s8101_s2 + $0x78] sm:$0xff]  ;;  %v9154_v56 = vld [vmem:[%s8101_s2 + $0xa8] sm:$0xff] }
 0x16d   : > { %v5033_v42 = vmul.f32 %v8539_v51, %v8794_v46  ;;  %v9117_v58 = vmul.f32 %v8539_v51, %v8811_v27  ;;  %v9123_v59 = vld [vmem:[%s8101_s2 + $0x50] sm:$0xff]  ;;  %v473_v63 = vmul.f32 %v8174_v33, %v9099_v28  ;;  %v474_v46 = vmul.f32 %v8174_v33, %v9102_v29 }
 0x16e   : > { %v9134_v47 = vmul.f32 %v8174_v33, %v9110_v1  ;;  %v4922_v27 = vsel %vm4196_vm3, %v4920_v43, %v4921_v22  ;;  %v4924_v6 = vsel %vm4196_vm3, %v4921_v22, %v12930_v49  ;;  %v5140_v50 = vrot.slane %v5032_v0, 4 }
 0x16f   : > { %13431 = vst [vmem:[#allocation66_spill] sm:$0xff] %v9117_v58  ;;  %v5141_v44 = vrot.slane %v5033_v42, 4  ;;  %v4989_v39 = vadd.f32 %v4922_v27, %v4549_v4  ;;  %v4990_v18 = vadd.f32 %v4924_v6, %v4550_v62  ;;  %v12937_v8 = vrot.slane %v9117_v58, 4 }
 0x170   : > { %13432 = vst [vmem:[#allocation67_spill] sm:$0xff] %v9134_v47  ;;  %v541_v43 = vmul.f32 %v13393_v30, %v9113_v32  ;;  %v542_v22 = vmul.f32 %v13393_v30, %v9120_v23  ;;  %v609_v0 = vmul.f32 %v13397_v3, %v9123_v59  ;;  %v610_v4 = vmul.f32 %v13397_v3, %v9126_v21 }
 0x171   : > { %v5142_v47 = vsel %vm4196_vm3, %v5140_v50, %v5141_v44  ;;  %v5144_v62 = vsel %vm4196_vm3, %v5141_v44, %v12937_v8  ;;  %v677_v27 = vmul.f32 %v8197_v40, %v9141_v31  ;;  %v678_v6 = vmul.f32 %v8197_v40, %v9144_v9 }
 0x172   : > { %v5209_v42 = vadd.f32 %v5142_v47, %v4769_v26  ;;  %v5210_v50 = vadd.f32 %v5144_v62, %v4770_v2  ;;  %v641_v49 = vadd.f32 %v609_v0, %v473_v63  ;;  %v642_v13 = vadd.f32 %v610_v4, %v474_v46  ;;  %v9181_v63 = vld [vmem:[%s8101_s2 + $0x60] sm:$0xff] }
 0x173   : > { %v745_v53 = vmul.f32 %v8211_v45, %v9148_v19  ;;  %v709_v58 = vadd.f32 %v677_v27, %v541_v43  ;;  %v710_v17 = vadd.f32 %v678_v6, %v542_v22  ;;  %v746_v26 = vmul.f32 %v8211_v45, %v9154_v56 }
 0x174   : > { %v5241_v38 = vadd.f32 %v5209_v42, %v4989_v39  ;;  %v5242_v47 = vadd.f32 %v5210_v50, %v4990_v18  ;;  %v813_v8 = vmul.f32 %v8178_v34, %v9099_v28  ;;  %v814_v2 = vmul.f32 %v8178_v34, %v9102_v29  ;;  %v9210_v50 = vld [vmem:[%s8101_s2 + $0x88] sm:$0xff] }
 0x175   : > { %v777_v44 = vadd.f32 %v745_v53, %v641_v49  ;;  %v778_v46 = vadd.f32 %v746_v26, %v642_v13  ;;  %v9185_v39 = vmul.f32 %v8178_v34, %v9110_v1  ;;  %v1034_v43 = vmul.f32 %v8201_v41, %v9113_v32 }
 0x176   : > { %v1035_v18 = vmul.f32 %v8201_v41, %v9120_v23  ;;  %v9191_v53 = vpack.c.bf16 %v5242_v47, %v5241_v38  ;;  %v894_v49 = vrot.slane %v813_v8, 1  ;;  %v895_v22 = vrot.slane %v814_v2, 1 }
 0x177   : > { %13433 = vst [vmem:[#allocation68_spill] sm:$0xff] %v9185_v39  ;;  %v9195_v0 = vmul.f32 %v8201_v41, %v9172_v37  ;;  %v12945_v13 = vrot.slane %v9185_v39, 1  ;;  %v1114_v4 = vrot.slane %v1034_v43, 1  ;;  %v1254_v42 = vmul.f32 %v8254_v16, %v9123_v59 }
 0x178   : > { %13434 = vst [vmem:[#allocation69_spill] sm:$0xff] %v9191_v53  ;;  %v1115_v62 = vrot.slane %v1035_v18, 1  ;;  %5594 = vmatmul.mubr.bf16.gmra.mrb[8].mxu1 %v9191_v53  ;;  %v896_v27 = vsel %vm893_vm0, %v894_v49, %v895_v22  ;;  %v1255_v8 = vmul.f32 %v8254_v16, %v9126_v21  ;;  %v9207_v6 = vmul.f32 %v8254_v16, %v9181_v63 }
 0x179   : > { %13435 = vst [vmem:[#allocation70_spill] sm:$0xff] %v9195_v0  ;;  %v12944_v38 = vrot.slane %v9195_v0, 1  ;;  %v898_v26 = vsel %vm893_vm0, %v895_v22, %v12945_v13  ;;  %v998_v47 = vadd.f32 %v896_v27, %v709_v58  ;;  %v1334_v43 = vrot.slane %v1254_v42, 1  ;;  %5603 = vmatprep.mubr.bf16.mxu1 %v13359_v61 }
 0x17a   : > { %13436 = vst [vmem:[#allocation71_spill] sm:$0xff] %v9207_v6  ;;  %v1116_v2 = vsel %vm893_vm0, %v1114_v4, %v1115_v62  ;;  %v999_v18 = vadd.f32 %v898_v26, %v710_v17  ;;  %v1335_v36 = vrot.slane %v1255_v8, 1  ;;  %v12947_v39 = vrot.slane %v9207_v6, 1 }
 0x17b   : > { %v1118_v49 = vsel %vm893_vm0, %v1115_v62, %v12944_v38  ;;  %v1218_v53 = vadd.f32 %v1116_v2, %v777_v44  ;;  %v1474_v58 = vmul.f32 %v8265_v48, %v9141_v31  ;;  %v1475_v22 = vmul.f32 %v8265_v48, %v9144_v9 }
 0x17c   : > { %v1219_v16 = vadd.f32 %v1118_v49, %v778_v46  ;;  %v1336_v4 = vsel %vm893_vm0, %v1334_v43, %v1335_v36  ;;  %v9231_v17 = vmul.f32 %v8265_v48, %v9210_v50  ;;  %v1694_v44 = vmul.f32 %v13410_v52, %v9148_v19 }
 0x17d   : > { %v1695_v46 = vmul.f32 %v13410_v52, %v9154_v56  ;;  %v1338_v62 = vsel %vm893_vm0, %v1335_v36, %v12947_v39  ;;  %v1438_v42 = vadd.f32 %v1336_v4, %v998_v47  ;;  %v1554_v27 = vrot.slane %v1474_v58, 1 }
 0x17e   : > { %13437 = vst [vmem:[#allocation72_spill] sm:$0xff] %v9231_v17  ;;  %v1555_v8 = vrot.slane %v1475_v22, 1  ;;  %v1439_v26 = vadd.f32 %v1338_v62, %v999_v18  ;;  %v12951_v2 = vrot.slane %v9231_v17, 1  ;;  %v9243_v43 = vmul.f32 %v13410_v52, %v9221_v25 }
 0x17f   : > { %v1774_v49 = vrot.slane %v1694_v44, 1  ;;  %v1775_v13 = vrot.slane %v1695_v46, 1  ;;  %v1914_v0 = vmul.f32 %v8182_v35, %v9099_v28  ;;  %v1915_v36 = vmul.f32 %v8182_v35, %v9102_v29 }
 0x180   : > { %13438 = vst [vmem:[#allocation73_spill] sm:$0xff] %v9243_v43  ;;  %v1556_v38 = vsel %vm893_vm0, %v1554_v27, %v1555_v8  ;;  %v1558_v47 = vsel %vm893_vm0, %v1555_v8, %v12951_v2  ;;  %v12949_v58 = vrot.slane %v9243_v43, 1  ;;  %v9256_v22 = vmul.f32 %v8182_v35, %v9110_v1 }
 0x181   : > { %v1658_v18 = vadd.f32 %v1556_v38, %v1218_v53  ;;  %v1659_v4 = vadd.f32 %v1558_v47, %v1219_v16  ;;  %v1776_v44 = vsel %vm893_vm0, %v1774_v49, %v1775_v13  ;;  %v1995_v46 = vrot.slane %v1914_v0, 2 }
 0x182   : > { %13439 = vst [vmem:[#allocation74_spill] sm:$0xff] %v9256_v22  ;;  %v1996_v62 = vrot.slane %v1915_v36, 2  ;;  %v1778_v27 = vsel %vm893_vm0, %v1775_v13, %v12949_v58  ;;  %v1878_v39 = vadd.f32 %v1776_v44, %v1438_v42  ;;  %v12950_v17 = vrot.slane %v9256_v22, 2 }
 0x183   : > { %v2135_v53 = vmul.f32 %v13413_v20, %v9113_v32  ;;  %v1879_v38 = vadd.f32 %v1778_v27, %v1439_v26  ;;  %v2136_v16 = vmul.f32 %v13413_v20, %v9120_v23  ;;  %v9270_v0 = vmul.f32 %v13413_v20, %v9172_v37 }
 0x184   : > { %v1997_v8 = vsel %vm1994_vm1, %v1995_v46, %v1996_v62  ;;  %v1999_v13 = vsel %vm1994_vm1, %v1996_v62, %v12950_v17  ;;  %v2355_v36 = vmul.f32 %v13415_v7, %v9123_v59  ;;  %v2356_v46 = vmul.f32 %v13415_v7, %v9126_v21 }
 0x185   : > { %13440 = vst [vmem:[#allocation75_spill] sm:$0xff] %v9270_v0  ;;  %v2099_v42 = vadd.f32 %v1997_v8, %v1658_v18  ;;  %v2215_v49 = vrot.slane %v2135_v53, 2  ;;  %v2100_v47 = vadd.f32 %v1999_v13, %v1659_v4  ;;  %v2216_v26 = vrot.slane %v2136_v16, 2 }
 0x186   : > { %v12956_v44 = vrot.slane %v9270_v0, 2  ;;  %v9282_v27 = vmul.f32 %v13415_v7, %v9181_v63  ;;  %v2435_v58 = vrot.slane %v2355_v36, 2  ;;  %v2575_v62 = vmul.f32 %v8335_v55, %v9141_v31 }
 0x187   : > { %v2576_v18 = vmul.f32 %v8335_v55, %v9144_v9  ;;  %v2217_v53 = vsel %vm1994_vm1, %v2215_v49, %v2216_v26  ;;  %v2436_v8 = vrot.slane %v2356_v46, 2  ;;  %v9294_v16 = vmul.f32 %v8335_v55, %v9210_v50  ;;  %v13443_v49 = vld [vmem:[#allocation53_spill] sm:$0xff] }
 0x188   : > { %13441 = vst [vmem:[#allocation76_spill] sm:$0xff] %v9282_v27  ;;  %v2219_v4 = vsel %vm1994_vm1, %v2216_v26, %v12956_v44  ;;  %v2319_v13 = vadd.f32 %v2217_v53, %v1878_v39  ;;  %v12958_v36 = vrot.slane %v9282_v27, 2  ;;  %v2655_v2 = vrot.slane %v2575_v62, 2 }
 0x189   : > { %13442 = vst [vmem:[#allocation77_spill] sm:$0xff] %v9294_v16  ;;  %v2320_v17 = vadd.f32 %v2219_v4, %v1879_v38  ;;  %v2437_v22 = vsel %vm1994_vm1, %v2435_v58, %v2436_v8  ;;  %v2656_v43 = vrot.slane %v2576_v18, 2  ;;  %v12959_v6 = vrot.slane %v9294_v16, 2 }
 0x18a   : > { %v2795_v0 = vmul.f32 %v13443_v49, %v9148_v19  ;;  %v2439_v26 = vsel %vm1994_vm1, %v2436_v8, %v12958_v36  ;;  %v2539_v46 = vadd.f32 %v2437_v22, %v2099_v42  ;;  %v2796_v39 = vmul.f32 %v13443_v49, %v9154_v56  ;;  %v13445_v42 = vld [vmem:[#allocation32_spill] sm:$0xff] }
 0x18b   : > { %v9308_v38 = vmul.f32 %v13443_v49, %v9221_v25  ;;  %v2540_v62 = vadd.f32 %v2439_v26, %v2100_v47  ;;  %v2657_v58 = vsel %vm1994_vm1, %v2655_v2, %v2656_v43  ;;  %v2659_v18 = vsel %vm1994_vm1, %v2656_v43, %v12959_v6  ;;  %v13447_v2 = vld [vmem:[#allocation55_spill] sm:$0xff] }
 0x18c   : > { %v2875_v53 = vrot.slane %v2795_v0, 2  ;;  %v2759_v4 = vadd.f32 %v2657_v58, %v2319_v13  ;;  %v2760_v44 = vadd.f32 %v2659_v18, %v2320_v17  ;;  %v2876_v27 = vrot.slane %v2796_v39, 2 }
 0x18d   : > { %13444 = vst [vmem:[#allocation78_spill] sm:$0xff] %v9308_v38  ;;  %v12964_v22 = vrot.slane %v9308_v38, 2  ;;  %v3015_v8 = vmul.f32 %v13445_v42, %v9099_v28  ;;  %v3016_v36 = vmul.f32 %v13445_v42, %v9102_v29  ;;  %v9321_v47 = vmul.f32 %v13445_v42, %v9110_v1 }
 0x18e   : > { %v3236_v26 = vmul.f32 %v13447_v2, %v9113_v32  ;;  %v2877_v43 = vsel %vm1994_vm1, %v2875_v53, %v2876_v27  ;;  %v3237_v0 = vmul.f32 %v13447_v2, %v9120_v23  ;;  %v9333_v13 = vmul.f32 %v13447_v2, %v9172_v37 }
 0x18f   : > { %13446 = vst [vmem:[#allocation79_spill] sm:$0xff] %v9321_v47  ;;  %v2879_v17 = vsel %vm1994_vm1, %v2876_v27, %v12964_v22  ;;  %v2979_v39 = vadd.f32 %v2877_v43, %v2539_v46  ;;  %v3096_v18 = vrot.slane %v3015_v8, 3  ;;  %v3097_v6 = vrot.slane %v3016_v36, 3  ;;  %v13449_v27 = vld [vmem:[#allocation58_spill] sm:$0xff] }
 0x190   : > { %13448 = vst [vmem:[#allocation80_spill] sm:$0xff] %v9333_v13  ;;  %v2980_v58 = vadd.f32 %v2879_v17, %v2540_v62  ;;  %v12971_v16 = vrot.slane %v9321_v47, 3  ;;  %v3316_v42 = vrot.slane %v3236_v26, 3  ;;  %v3317_v49 = vrot.slane %v3237_v0, 3 }
 0x191   : > { %v12970_v53 = vrot.slane %v9333_v13, 3  ;;  %v3098_v38 = vsel %vm3095_vm2, %v3096_v18, %v3097_v6  ;;  %v3456_v22 = vmul.f32 %v13449_v27, %v9123_v59  ;;  %v3457_v55 = vmul.f32 %v13449_v27, %v9126_v21 }
 0x192   : > { %v9344_v46 = vmul.f32 %v13449_v27, %v9181_v63  ;;  %v3100_v36 = vsel %vm3095_vm2, %v3097_v6, %v12971_v16  ;;  %v3200_v62 = vadd.f32 %v3098_v38, %v2759_v4  ;;  %v3318_v8 = vsel %vm3095_vm2, %v3316_v42, %v3317_v49 }
 0x193   : > { %v3320_v26 = vsel %vm3095_vm2, %v3317_v49, %v12970_v53  ;;  %v3201_v43 = vadd.f32 %v3100_v36, %v2760_v44  ;;  %v3420_v17 = vadd.f32 %v3318_v8, %v2979_v39  ;;  %v3536_v18 = vrot.slane %v3456_v22, 3 }
 0x194   : > { %13450 = vst [vmem:[#allocation81_spill] sm:$0xff] %v9344_v46  ;;  %v3421_v0 = vadd.f32 %v3320_v26, %v2980_v58  ;;  %v3537_v2 = vrot.slane %v3457_v55, 3  ;;  %v12981_v7 = vrot.slane %v9344_v46, 3  ;;  %v3676_v27 = vmul.f32 %v13384_v15, %v9141_v31 }
 0x195   : > { %v3677_v6 = vmul.f32 %v13384_v15, %v9144_v9  ;;  %v9360_v38 = vmul.f32 %v13384_v15, %v9210_v50  ;;  %v3896_v49 = vmul.f32 %v13385_v57, %v9148_v19  ;;  %v3897_v44 = vmul.f32 %v13385_v57, %v9154_v56 }
 0x196   : > { %v9368_v55 = vmul.f32 %v13385_v57, %v9221_v25  ;;  %v3538_v4 = vsel %vm3095_vm2, %v3536_v18, %v3537_v2  ;;  %v3540_v22 = vsel %vm3095_vm2, %v3537_v2, %v12981_v7  ;;  %v3756_v42 = vrot.slane %v3676_v27, 3 }
 0x197   : > { %13451 = vst [vmem:[#allocation82_spill] sm:$0xff] %v9360_v38  ;;  %v3757_v39 = vrot.slane %v3677_v6, 3  ;;  %v3640_v58 = vadd.f32 %v3538_v4, %v3200_v62  ;;  %v3641_v36 = vadd.f32 %v3540_v22, %v3201_v43  ;;  %v12980_v8 = vrot.slane %v9360_v38, 3  ;;  %v13481_v38 = vld [vmem:[#allocation32_spill] sm:$0xff] }
 0x198   : > { %13452 = vst [vmem:[#allocation83_spill] sm:$0xff] %v9368_v55  ;;  %v3976_v26 = vrot.slane %v3896_v49, 3  ;;  %v3977_v16 = vrot.slane %v3897_v44, 3  ;;  %v12979_v13 = vrot.slane %v9368_v55, 3  ;;  %v4116_v47 = vmul.f32 %v8446_v54, %v9099_v28 }
 0x199   : > { %v3758_v53 = vsel %vm3095_vm2, %v3756_v42, %v3757_v39  ;;  %v3760_v18 = vsel %vm3095_vm2, %v3757_v39, %v12980_v8  ;;  %v4117_v27 = vmul.f32 %v8446_v54, %v9102_v29  ;;  %v9386_v62 = vmul.f32 %v8446_v54, %v9110_v1 }
 0x19a   : > { %v3860_v2 = vadd.f32 %v3758_v53, %v3420_v17  ;;  %v3861_v43 = vadd.f32 %v3760_v18, %v3421_v0  ;;  %v3978_v6 = vsel %vm3095_vm2, %v3976_v26, %v3977_v16  ;;  %v3980_v49 = vsel %vm3095_vm2, %v3977_v16, %v12979_v13 }
 0x19b   : > { %13453 = vst [vmem:[#allocation84_spill] sm:$0xff] %v9386_v62  ;;  %v4197_v28 = vrot.slane %v4116_v47, 4  ;;  %v4080_v44 = vadd.f32 %v3978_v6, %v3640_v58  ;;  %v4081_v4 = vadd.f32 %v3980_v49, %v3641_v36  ;;  %v4198_v22 = vrot.slane %v4117_v27, 4 }
 0x19c   : > { %v12978_v53 = vrot.slane %v9386_v62, 4  ;;  %v4337_v29 = vmul.f32 %v8450_v10, %v9113_v32  ;;  %v4338_v1 = vmul.f32 %v8450_v10, %v9120_v23  ;;  %v9399_v17 = vmul.f32 %v8450_v10, %v9172_v37 }
 0x19d   : > { %v4557_v0 = vmul.f32 %v8509_v5, %v9123_v59  ;;  %v4199_v16 = vsel %vm4196_vm3, %v4197_v28, %v4198_v22  ;;  %v4558_v42 = vmul.f32 %v8509_v5, %v9126_v21  ;;  %v9411_v32 = vmul.f32 %v8509_v5, %v9181_v63 }
 0x19e   : > { %13454 = vst [vmem:[#allocation85_spill] sm:$0xff] %v9399_v17  ;;  %v4201_v47 = vsel %vm4196_vm3, %v4198_v22, %v12978_v53  ;;  %v4301_v23 = vadd.f32 %v4199_v16, %v3860_v2  ;;  %v4417_v58 = vrot.slane %v4337_v29, 4  ;;  %v4418_v36 = vrot.slane %v4338_v1, 4  ;;  %v13458_v53 = vld [vmem:[#allocation45_spill] sm:$0xff] }
 0x19f   : > { %13455 = vst [vmem:[#allocation86_spill] sm:$0xff] %v9411_v32  ;;  %v4302_v39 = vadd.f32 %v4201_v47, %v3861_v43  ;;  %v12976_v26 = vrot.slane %v9399_v17, 4  ;;  %v4637_v59 = vrot.slane %v4557_v0, 4  ;;  %v4638_v18 = vrot.slane %v4558_v42, 4  ;;  %v13470_v17 = vld [vmem:[#allocation48_spill] sm:$0xff] }
 0x1a0   : > { %v12975_v27 = vrot.slane %v9411_v32, 4  ;;  %v4419_v6 = vsel %vm4196_vm3, %v4417_v58, %v4418_v36  ;;  %v4777_v49 = vmul.f32 %v8535_v14, %v9141_v31  ;;  %v4778_v21 = vmul.f32 %v8535_v14, %v9144_v9  ;;  %v13464_v32 = vld [vmem:[#allocation52_spill] sm:$0xff] }
 0x1a1   : > { %v9422_v2 = vmul.f32 %v8535_v14, %v9210_v50  ;;  %v4421_v43 = vsel %vm4196_vm3, %v4418_v36, %v12976_v26  ;;  %v4521_v28 = vadd.f32 %v4419_v6, %v4080_v44  ;;  %v4639_v22 = vsel %vm4196_vm3, %v4637_v59, %v4638_v18  ;;  %v9454_v6 = vld [vmem:[%s8111_s16 + $0x90] sm:$0xff] }
 0x1a2   : > { %v4641_v29 = vsel %vm4196_vm3, %v4638_v18, %v12975_v27  ;;  %v4522_v31 = vadd.f32 %v4421_v43, %v4081_v4  ;;  %v4741_v1 = vadd.f32 %v4639_v22, %v4301_v23  ;;  %v4857_v0 = vrot.slane %v4777_v49, 4  ;;  %v9443_v23 = vld [vmem:[%s8101_s2 + $0x130] sm:$0xff]  ;;  %v9458_v43 = vld [vmem:[%s8111_s16 + $0x18] sm:$0xff] }
 0x1a3   : > { %13456 = vst [vmem:[#allocation87_spill] sm:$0xff] %v9422_v2  ;;  %v4742_v9 = vadd.f32 %v4641_v29, %v4302_v39  ;;  %v4858_v16 = vrot.slane %v4778_v21, 4  ;;  %v12974_v47 = vrot.slane %v9422_v2, 4  ;;  %v4997_v42 = vmul.f32 %v8539_v51, %v9148_v19 }
 0x1a4   : > { %v4998_v44 = vmul.f32 %v8539_v51, %v9154_v56  ;;  %v9438_v58 = vmul.f32 %v8539_v51, %v9221_v25  ;;  %v503_v4 = vmul.f32 %v8910_v60, %v8174_v33  ;;  %v504_v39 = vmul.f32 %v9443_v23, %v8174_v33 }
 0x1a5   : > { %v571_v36 = vmul.f32 %v8927_v24, %v13393_v30  ;;  %v4859_v19 = vsel %vm4196_vm3, %v4857_v0, %v4858_v16  ;;  %v4861_v56 = vsel %vm4196_vm3, %v4858_v16, %v12974_v47  ;;  %v5077_v59 = vrot.slane %v4997_v42, 4  ;;  %v9466_v0 = vld [vmem:[%s8111_s16 + $0x40] sm:$0xff] }
 0x1a6   : > { %13457 = vst [vmem:[#allocation88_spill] sm:$0xff] %v9438_v58  ;;  %v5078_v18 = vrot.slane %v4998_v44, 4  ;;  %v4961_v60 = vadd.f32 %v4859_v19, %v4521_v28  ;;  %v4962_v49 = vadd.f32 %v4861_v56, %v4522_v31  ;;  %v12977_v21 = vrot.slane %v9438_v58, 4  ;;  %v9476_v44 = vld [vmem:[%s8111_s16 + $0x68] sm:$0xff] }
 0x1a7   : > { %v572_v24 = vmul.f32 %v9458_v43, %v13393_v30  ;;  %v639_v29 = vmul.f32 %v8942_v11, %v13397_v3  ;;  %v640_v16 = vmul.f32 %v9466_v0, %v13397_v3  ;;  %v707_v28 = vmul.f32 %v8957_v12, %v8197_v40 }
 0x1a8   : > { %v5079_v22 = vsel %vm4196_vm3, %v5077_v59, %v5078_v18  ;;  %v5081_v31 = vsel %vm4196_vm3, %v5078_v18, %v12977_v21  ;;  %v708_v19 = vmul.f32 %v9476_v44, %v8197_v40  ;;  %v776_v11 = vmul.f32 %v8211_v45, %v9454_v6 }
 0x1a9   : > { %v5181_v42 = vadd.f32 %v5079_v22, %v4741_v1  ;;  %v5182_v56 = vadd.f32 %v5081_v31, %v4742_v9  ;;  %v671_v59 = vadd.f32 %v639_v29, %v503_v4  ;;  %v672_v47 = vadd.f32 %v640_v16, %v504_v39  ;;  %v9485_v1 = vld [vmem:[%s8101_s2 + $0x138] sm:$0xf]  ;;  %v13460_v31 = vld [vmem:[#allocation46_spill] sm:$0xff] }
 0x1aa   : > { %v739_v27 = vadd.f32 %v707_v28, %v571_v36  ;;  %v740_v12 = vadd.f32 %v708_v19, %v572_v24  ;;  %v851_v18 = vmul.f32 %v9443_v23, %v8178_v34  ;;  %v852_v22 = vmul.f32 %v9485_v1, %v8178_v34  ;;  %v9493_v36 = vld [vmem:[%s8111_s16 + $0x20] sm:$0xf]  ;;  %v13459_v24 = vld [vmem:[#allocation40_spill] sm:$0xff]  ;;  %v9502_v28 = vld [vmem:[%s8111_s16 + $0x48] sm:$0xf] }
 0x1ab   : > { %v5213_v26 = vadd.f32 %v5181_v42, %v4961_v60  ;;  %v5214_v21 = vadd.f32 %v5182_v56, %v4962_v49  ;;  %v807_v13 = vadd.f32 %v13458_v53, %v671_v59  ;;  %v808_v8 = vadd.f32 %v776_v11, %v672_v47 }
 0x1ac   : > { %v1072_v9 = vmul.f32 %v9458_v43, %v8201_v41  ;;  %v962_v4 = vrot.slane %v851_v18, 1  ;;  %v964_v39 = vrot.slane %v852_v22, 1  ;;  %v1073_v60 = vmul.f32 %v9493_v36, %v8201_v41  ;;  %v13462_v22 = vld [vmem:[#allocation51_spill] sm:$0xff] }
 0x1ad   : > { %v1292_v29 = vmul.f32 %v9466_v0, %v13459_v24  ;;  %v9499_v16 = vpack.c.bf16 %v5214_v21, %v5213_v26  ;;  %v1293_v53 = vmul.f32 %v9502_v28, %v13459_v24  ;;  %v1512_v47 = vmul.f32 %v9476_v44, %v8265_v48  ;;  %v9514_v26 = vld [vmem:[%s8111_s16 + $0x98] sm:$0xf] }
 0x1ae   : > { %v1182_v49 = vrot.slane %v1072_v9, 1  ;;  %v13461_v42 = vrot.slane %v13460_v31, 1  ;;  %v965_v11 = vsel %vm893_vm0, %v962_v4, %v964_v39  ;;  %v1184_v56 = vrot.slane %v1073_v60, 1  ;;  %v9524_v39 = vld [vmem:[%s8111_s16 + $0x70] sm:$0xf] }
 0x1af   : > { %v1402_v59 = vrot.slane %v1292_v29, 1  ;;  %5454 = vmatmul.mubr.bf16.vlgmr.msra.gmra.mrb[0].mxu0 %v9499_v16  ;;  %v1029_v18 = vadd.f32 %v965_v11, %v740_v12  ;;  %v13463_v9 = vrot.slane %v13462_v22, 1  ;;  %v1404_v58 = vrot.slane %v1293_v53, 1 }
 0x1b0   : > { %v963_v19 = vsel %vm893_vm0, %v13461_v42, %v962_v4  ;;  %v1185_v2 = vsel %vm893_vm0, %v1182_v49, %v1184_v56  ;;  %v13465_v42 = vrot.slane %v13464_v32, 1  ;;  %v1513_v60 = vmul.f32 %v9524_v39, %v8265_v48  ;;  %5463 = vmatprep.mubr.bf16.mxu0 %v13359_v61  ;;  %v13466_v32 = vld [vmem:[#allocation56_spill] sm:$0xff] }
 0x1b1   : > { %v1028_v21 = vadd.f32 %v963_v19, %v739_v27  ;;  %v1183_v7 = vsel %vm893_vm0, %v13463_v9, %v1182_v49  ;;  %v1249_v27 = vadd.f32 %v1185_v2, %v808_v8  ;;  %v1405_v12 = vsel %vm893_vm0, %v1402_v59, %v1404_v58 }
 0x1b2   : > { %v1248_v31 = vadd.f32 %v1183_v7, %v807_v13  ;;  %v1403_v4 = vsel %vm893_vm0, %v13465_v42, %v1402_v59  ;;  %v1622_v19 = vrot.slane %v1512_v47, 1  ;;  %v1469_v53 = vadd.f32 %v1405_v12, %v1029_v18 }
 0x1b3   : > { %v1468_v29 = vadd.f32 %v1403_v4, %v1028_v21  ;;  %v1624_v11 = vrot.slane %v1513_v60, 1  ;;  %v1732_v7 = vmul.f32 %v13410_v52, %v9454_v6  ;;  %v1733_v13 = vmul.f32 %v13410_v52, %v9514_v26  ;;  %v13468_v60 = vld [vmem:[#allocation54_spill] sm:$0xff] }
 0x1b4   : > { %v13467_v49 = vrot.slane %v13466_v32, 1  ;;  %v1952_v22 = vmul.f32 %v9443_v23, %v8182_v35  ;;  %v1953_v8 = vmul.f32 %v9485_v1, %v8182_v35  ;;  %v2173_v2 = vmul.f32 %v9458_v43, %v13413_v20 }
 0x1b5   : > { %v1625_v58 = vsel %vm893_vm0, %v1622_v19, %v1624_v11  ;;  %v1842_v59 = vrot.slane %v1732_v7, 1  ;;  %v1844_v21 = vrot.slane %v1733_v13, 1  ;;  %v2174_v4 = vmul.f32 %v9493_v36, %v13413_v20  ;;  %v13471_v11 = vld [vmem:[#allocation57_spill] sm:$0xff] }
 0x1b6   : > { %v1623_v56 = vsel %vm893_vm0, %v13467_v49, %v1622_v19  ;;  %v1689_v18 = vadd.f32 %v1625_v58, %v1249_v27  ;;  %v2063_v9 = vrot.slane %v1952_v22, 2  ;;  %v2065_v42 = vrot.slane %v1953_v8, 2  ;;  %v13473_v8 = vld [vmem:[#allocation33_spill] sm:$0xff] }
 0x1b7   : > { %v1688_v47 = vadd.f32 %v1623_v56, %v1248_v31  ;;  %v13469_v12 = vrot.slane %v13468_v60, 1  ;;  %v1845_v49 = vsel %vm893_vm0, %v1842_v59, %v1844_v21  ;;  %v2283_v61 = vrot.slane %v2173_v2, 2 }
 0x1b8   : > { %v2393_v62 = vmul.f32 %v9466_v0, %v13470_v17  ;;  %v1909_v31 = vadd.f32 %v1845_v49, %v1469_v53  ;;  %v13472_v7 = vrot.slane %v13471_v11, 2  ;;  %v2066_v13 = vsel %vm1994_vm1, %v2063_v9, %v2065_v42  ;;  %v13477_v49 = vld [vmem:[#allocation26_spill] sm:$0xff] }
 0x1b9   : > { %v1843_v32 = vsel %vm893_vm0, %v13469_v12, %v1842_v59  ;;  %v2130_v22 = vadd.f32 %v2066_v13, %v1689_v18  ;;  %v13474_v58 = vrot.slane %v13473_v8, 2  ;;  %v2285_v12 = vrot.slane %v2174_v4, 2 }
 0x1ba   : > { %v1908_v19 = vadd.f32 %v1843_v32, %v1468_v29  ;;  %v2064_v27 = vsel %vm1994_vm1, %v13472_v7, %v2063_v9  ;;  %v2394_v2 = vmul.f32 %v9502_v28, %v13470_v17  ;;  %v2503_v21 = vrot.slane %v2393_v62, 2  ;;  %v13475_v29 = vld [vmem:[#allocation49_spill] sm:$0xff] }
 0x1bb   : > { %v2129_v56 = vadd.f32 %v2064_v27, %v1688_v47  ;;  %v2284_v60 = vsel %vm1994_vm1, %v13474_v58, %v2283_v61  ;;  %v2613_v53 = vmul.f32 %v9476_v44, %v13475_v29  ;;  %v2286_v32 = vsel %vm1994_vm1, %v2283_v61, %v2285_v12  ;;  %v13476_v47 = vld [vmem:[#allocation53_spill] sm:$0xff] }
 0x1bc   : > { %v2349_v59 = vadd.f32 %v2284_v60, %v1908_v19  ;;  %v2614_v9 = vmul.f32 %v9524_v39, %v13475_v29  ;;  %v2833_v18 = vmul.f32 %v13476_v47, %v9454_v6  ;;  %v2834_v42 = vmul.f32 %v13476_v47, %v9514_v26  ;;  %v13479_v60 = vld [vmem:[#allocation27_spill] sm:$0xff] }
 0x1bd   : > { %v2350_v4 = vadd.f32 %v2286_v32, %v1909_v31  ;;  %v13478_v19 = vrot.slane %v13477_v49, 2  ;;  %v2505_v62 = vrot.slane %v2394_v2, 2  ;;  %v2723_v7 = vrot.slane %v2613_v53, 2 }
 0x1be   : > { %v2725_v13 = vrot.slane %v2614_v9, 2  ;;  %v2943_v8 = vrot.slane %v2833_v18, 2  ;;  %v2945_v61 = vrot.slane %v2834_v42, 2  ;;  %v13480_v12 = vrot.slane %v13479_v60, 2  ;;  %v13484_v60 = vld [vmem:[#allocation55_spill] sm:$0xff] }
 0x1bf   : > { %v2504_v11 = vsel %vm1994_vm1, %v13478_v19, %v2503_v21  ;;  %v2506_v58 = vsel %vm1994_vm1, %v2503_v21, %v2505_v62  ;;  %v3053_v46 = vmul.f32 %v9443_v23, %v13481_v38  ;;  %v3054_v31 = vmul.f32 %v9485_v1, %v13481_v38 }
 0x1c0   : > { %v2569_v27 = vadd.f32 %v2504_v11, %v2129_v56  ;;  %v2724_v55 = vsel %vm1994_vm1, %v13480_v12, %v2723_v7  ;;  %v2570_v32 = vadd.f32 %v2506_v58, %v2130_v22  ;;  %v2726_v2 = vsel %vm1994_vm1, %v2723_v7, %v2725_v13  ;;  %v13482_v56 = vld [vmem:[#allocation34_spill] sm:$0xff]  ;;  %v13485_v58 = vld [vmem:[#allocation28_spill] sm:$0xff] }
 0x1c1   : > { %v2789_v53 = vadd.f32 %v2724_v55, %v2349_v59  ;;  %v13483_v9 = vrot.slane %v13482_v56, 2  ;;  %v2790_v42 = vadd.f32 %v2726_v2, %v2350_v4  ;;  %v2946_v21 = vsel %vm1994_vm1, %v2943_v8, %v2945_v61  ;;  %v13487_v59 = vld [vmem:[#allocation58_spill] sm:$0xff] }
 0x1c2   : > { %v3164_v19 = vrot.slane %v3053_v46, 3  ;;  %v3010_v11 = vadd.f32 %v2946_v21, %v2570_v32  ;;  %v3166_v62 = vrot.slane %v3054_v31, 3  ;;  %v3274_v12 = vmul.f32 %v9458_v43, %v13484_v60 }
 0x1c3   : > { %v2944_v18 = vsel %vm1994_vm1, %v13483_v9, %v2943_v8  ;;  %v3275_v22 = vmul.f32 %v9493_v36, %v13484_v60  ;;  %v13486_v7 = vrot.slane %v13485_v58, 3  ;;  %v3494_v13 = vmul.f32 %v9466_v0, %v13487_v59 }
 0x1c4   : > { %v3009_v49 = vadd.f32 %v2944_v18, %v2569_v27  ;;  %v3495_v4 = vmul.f32 %v9502_v28, %v13487_v59  ;;  %v3714_v46 = vmul.f32 %v9476_v44, %v13384_v15  ;;  %v3167_v27 = vsel %vm3095_vm2, %v3164_v19, %v3166_v62  ;;  %v13488_v18 = vld [vmem:[#allocation29_spill] sm:$0xff]  ;;  %v13490_v62 = vld [vmem:[#allocation38_spill] sm:$0xff] }
 0x1c5   : > { %v3165_v55 = vsel %vm3095_vm2, %v13486_v7, %v3164_v19  ;;  %v3384_v61 = vrot.slane %v3274_v12, 3  ;;  %v3386_v31 = vrot.slane %v3275_v22, 3  ;;  %v3231_v32 = vadd.f32 %v3167_v27, %v2790_v42 }
 0x1c6   : > { %v3230_v8 = vadd.f32 %v3165_v55, %v2789_v53  ;;  %v3604_v2 = vrot.slane %v3494_v13, 3  ;;  %v3606_v56 = vrot.slane %v3495_v4, 3  ;;  %v3715_v9 = vmul.f32 %v9524_v39, %v13384_v15  ;;  %v13492_v4 = vld [vmem:[#allocation39_spill] sm:$0xff] }
 0x1c7   : > { %v13489_v21 = vrot.slane %v13488_v18, 3  ;;  %v3387_v7 = vsel %vm3095_vm2, %v3384_v61, %v3386_v31  ;;  %v3824_v59 = vrot.slane %v3714_v46, 3  ;;  %v3934_v60 = vmul.f32 %v13385_v57, %v9454_v6 }
 0x1c8   : > { %v3451_v53 = vadd.f32 %v3387_v7, %v3010_v11  ;;  %v13491_v12 = vrot.slane %v13490_v62, 3  ;;  %v3607_v22 = vsel %vm3095_vm2, %v3604_v2, %v3606_v56  ;;  %v13493_v27 = vrot.slane %v13492_v4, 3 }
 0x1c9   : > { %v3385_v58 = vsel %vm3095_vm2, %v13489_v21, %v3384_v61  ;;  %v3671_v13 = vadd.f32 %v3607_v22, %v3231_v32  ;;  %v3826_v21 = vrot.slane %v3715_v9, 3  ;;  %v3935_v46 = vmul.f32 %v13385_v57, %v9514_v26  ;;  %v13494_v9 = vld [vmem:[#allocation41_spill] sm:$0xff] }
 0x1ca   : > { %v3450_v19 = vadd.f32 %v3385_v58, %v3009_v49  ;;  %v3605_v42 = vsel %vm3095_vm2, %v13491_v12, %v3604_v2  ;;  %v3825_v18 = vsel %vm3095_vm2, %v13493_v27, %v3824_v59  ;;  %v4044_v31 = vrot.slane %v3934_v60, 3 }
 0x1cb   : > { %v3670_v55 = vadd.f32 %v3605_v42, %v3230_v8  ;;  %v4154_v49 = vmul.f32 %v9443_v23, %v8446_v54  ;;  %v3827_v11 = vsel %vm3095_vm2, %v3824_v59, %v3826_v21  ;;  %v4155_v2 = vmul.f32 %v9485_v1, %v8446_v54  ;;  %v13496_v42 = vld [vmem:[#allocation44_spill] sm:$0xff] }
 0x1cc   : > { %v3890_v61 = vadd.f32 %v3825_v18, %v3450_v19  ;;  %v4375_v8 = vmul.f32 %v9458_v43, %v8450_v10  ;;  %v4376_v32 = vmul.f32 %v9493_v36, %v8450_v10  ;;  %v3891_v56 = vadd.f32 %v3827_v11, %v3451_v53  ;;  %v13498_v18 = vld [vmem:[#allocation63_spill] sm:$0xff] }
 0x1cd   : > { %v13495_v58 = vrot.slane %v13494_v9, 3  ;;  %v4046_v7 = vrot.slane %v3935_v46, 3  ;;  %v4265_v19 = vrot.slane %v4154_v49, 4  ;;  %v4267_v62 = vrot.slane %v4155_v2, 4 }
 0x1ce   : > { %v4485_v59 = vrot.slane %v4375_v8, 4  ;;  %v4487_v12 = vrot.slane %v4376_v32, 4  ;;  %v13497_v22 = vrot.slane %v13496_v42, 4  ;;  %v4595_v36 = vmul.f32 %v9466_v0, %v8509_v5  ;;  %v9663_v42 = vld [vmem:[%s8101_s2 + $0x68] sm:$0xff] }
 0x1cf   : > { %v4045_v60 = vsel %vm3095_vm2, %v13495_v58, %v4044_v31  ;;  %v4047_v1 = vsel %vm3095_vm2, %v4044_v31, %v4046_v7  ;;  %v4596_v53 = vmul.f32 %v9502_v28, %v8509_v5  ;;  %v4268_v27 = vsel %vm4196_vm3, %v4265_v19, %v4267_v62  ;;  %v9642_v31 = vld [vmem:[%s8101_s2 + $0x18] sm:$0xff]  ;;  %v9657_v7 = vld [vmem:[%s8101_s2 + $0x40] sm:$0xff] }
 0x1d0   : > { %v4110_v23 = vadd.f32 %v4045_v60, %v3670_v55  ;;  %v4266_v43 = vsel %vm4196_vm3, %v13497_v22, %v4265_v19  ;;  %v4111_v4 = vadd.f32 %v4047_v1, %v3671_v13  ;;  %v13499_v21 = vrot.slane %v13498_v18, 4 }
 0x1d1   : > { %v4331_v55 = vadd.f32 %v4266_v43, %v3890_v61  ;;  %v4332_v49 = vadd.f32 %v4268_v27, %v3891_v56  ;;  %v4488_v11 = vsel %vm4196_vm3, %v4485_v59, %v4487_v12  ;;  %v4705_v8 = vrot.slane %v4595_v36, 4  ;;  %v13500_v61 = vld [vmem:[#allocation64_spill] sm:$0xff] }
 0x1d2   : > { %v4486_v46 = vsel %vm4196_vm3, %v13499_v21, %v4485_v59  ;;  %v4552_v0 = vadd.f32 %v4488_v11, %v4111_v4  ;;  %v4707_v32 = vrot.slane %v4596_v53, 4  ;;  %v4815_v28 = vmul.f32 %v9476_v44, %v8535_v14  ;;  %v9672_v53 = vld [vmem:[%s8101_s2 + $0x90] sm:$0xff]  ;;  %v9675_v4 = vld [vmem:[%s8101_s2 + $0xb8] sm:$0xff]  ;;  %v13504_v21 = vld [vmem:[#allocation66_spill] sm:$0xff] }
 0x1d3   : > { %v4551_v2 = vadd.f32 %v4486_v46, %v4110_v23  ;;  %v4816_v13 = vmul.f32 %v9524_v39, %v8535_v14  ;;  %v13501_v9 = vrot.slane %v13500_v61, 4  ;;  %v5035_v56 = vmul.f32 %v8539_v51, %v9454_v6  ;;  %v13506_v61 = vld [vmem:[#allocation67_spill] sm:$0xff] }
 0x1d4   : > { %v5036_v60 = vmul.f32 %v8539_v51, %v9514_v26  ;;  %v476_v44 = vmul.f32 %v8174_v33, %v9642_v31  ;;  %v4708_v19 = vsel %vm4196_vm3, %v4705_v8, %v4707_v32  ;;  %v4925_v23 = vrot.slane %v4815_v28, 4  ;;  %v13502_v26 = vld [vmem:[#allocation65_spill] sm:$0xff] }
 0x1d5   : > { %v4706_v58 = vsel %vm4196_vm3, %v13501_v9, %v4705_v8  ;;  %v4927_v62 = vrot.slane %v4816_v13, 4  ;;  %v4772_v59 = vadd.f32 %v4708_v19, %v4332_v49  ;;  %v5145_v12 = vrot.slane %v5035_v56, 4  ;;  %v9686_v28 = vld [vmem:[%s8101_s2 + $0x20] sm:$0xf]  ;;  %v9700_v19 = vld [vmem:[%s8101_s2 + $0x48] sm:$0xf] }
 0x1d6   : > { %v4771_v39 = vadd.f32 %v4706_v58, %v4331_v55  ;;  %v5147_v1 = vrot.slane %v5036_v60, 4  ;;  %v543_v6 = vmul.f32 %v13393_v30, %v9172_v37  ;;  %v13503_v22 = vrot.slane %v13502_v26, 4  ;;  %13507 = vst [vmem:[#allocation45_spill] sm:$0xff] %v9700_v19 }
 0x1d7   : > { %v4928_v36 = vsel %vm4196_vm3, %v4925_v23, %v4927_v62  ;;  %v544_v27 = vmul.f32 %v13393_v30, %v9657_v7  ;;  %v611_v55 = vmul.f32 %v13397_v3, %v9181_v63  ;;  %v13505_v46 = vrot.slane %v13504_v21, 4 }
 0x1d8   : > { %v4926_v43 = vsel %vm4196_vm3, %v13503_v22, %v4925_v23  ;;  %v4992_v37 = vadd.f32 %v4928_v36, %v4552_v0  ;;  %v5148_v11 = vsel %vm4196_vm3, %v5145_v12, %v5147_v1  ;;  %v612_v13 = vmul.f32 %v13397_v3, %v9663_v42 }
 0x1d9   : > { %v4991_v18 = vadd.f32 %v4926_v43, %v4551_v2  ;;  %v5146_v49 = vsel %vm4196_vm3, %v13505_v46, %v5145_v12  ;;  %v5212_v32 = vadd.f32 %v5148_v11, %v4772_v59  ;;  %v643_v63 = vadd.f32 %v611_v55, %v13506_v61 }
 0x1da   : > { %v5211_v8 = vadd.f32 %v5146_v49, %v4771_v39  ;;  %v679_v2 = vmul.f32 %v8197_v40, %v9210_v50  ;;  %v680_v0 = vmul.f32 %v8197_v40, %v9672_v53  ;;  %v747_v9 = vmul.f32 %v8211_v45, %v9221_v25  ;;  %v9703_v39 = vld [vmem:[%s8101_s2 + $0x70] sm:$0xf]  ;;  %v9708_v50 = vld [vmem:[%s8101_s2 + $0x98] sm:$0xf] }
 0x1db   : > { %v748_v58 = vmul.f32 %v8211_v45, %v9675_v4  ;;  %v5244_v60 = vadd.f32 %v5212_v32, %v4992_v37  ;;  %13508 = vst [vmem:[#allocation46_spill] sm:$0xff] %v9703_v39  ;;  %v644_v23 = vadd.f32 %v612_v13, %v476_v44  ;;  %v816_v62 = vmul.f32 %v8178_v34, %v9642_v31 }
 0x1dc   : > { %v5243_v56 = vadd.f32 %v5211_v8, %v4991_v18  ;;  %13509 = vst [vmem:[#allocation51_spill] sm:$0xff] %v9708_v50  ;;  %v711_v59 = vadd.f32 %v679_v2, %v543_v6  ;;  %v712_v12 = vadd.f32 %v680_v0, %v544_v27  ;;  %v779_v1 = vadd.f32 %v747_v9, %v643_v63  ;;  %v13511_v27 = vld [vmem:[#allocation68_spill] sm:$0xff]  ;;  %v13513_v2 = vld [vmem:[#allocation70_spill] sm:$0xff] }
 0x1dd   : > { %v817_v25 = vmul.f32 %v8178_v34, %v9686_v28  ;;  %v780_v22 = vadd.f32 %v748_v58, %v644_v23  ;;  %v899_v43 = vrot.slane %v816_v62, 1  ;;  %v1037_v36 = vmul.f32 %v8201_v41, %v9657_v7 }
 0x1de   : > { %v9712_v26 = vpack.c.bf16 %v5244_v60, %v5243_v56  ;;  %v1038_v44 = vmul.f32 %v8201_v41, %v9700_v19  ;;  %v1257_v18 = vmul.f32 %v13459_v24, %v9663_v42  ;;  %v1258_v6 = vmul.f32 %v13459_v24, %v9703_v39  ;;  %v9736_v60 = vld [vmem:[%s8101_s2 + $0xc0] sm:$0xf] }
 0x1df   : > { %v901_v55 = vrot.slane %v817_v25, 1  ;;  %v13512_v37 = vrot.slane %v13511_v27, 1  ;;  %v1119_v46 = vrot.slane %v1037_v36, 1  ;;  %v1477_v49 = vmul.f32 %v8265_v48, %v9672_v53  ;;  %13515 = vst [vmem:[#allocation56_spill] sm:$0xff] %v9736_v60  ;;  %v13516_v25 = vld [vmem:[#allocation71_spill] sm:$0xff] }
 0x1e0   : > { %13510 = vst [vmem:[#allocation52_spill] sm:$0xff] %v9712_v26  ;;  %5604 = vmatmul.mubr.bf16.gmra.mrb[12].mxu1 %v9712_v26  ;;  %v1478_v11 = vmul.f32 %v8265_v48, %v9708_v50  ;;  %v1121_v13 = vrot.slane %v1038_v44, 1  ;;  %v1339_v61 = vrot.slane %v1257_v18, 1  ;;  %v13514_v0 = vrot.slane %v13513_v2, 1  ;;  %v13518_v44 = vld [vmem:[#allocation72_spill] sm:$0xff] }
 0x1e1   : > { %v900_v21 = vsel %vm893_vm0, %v13512_v37, %v899_v43  ;;  %v902_v8 = vsel %vm893_vm0, %v899_v43, %v901_v55  ;;  %7098 = vmatprep.mubr.bf16.mxu1 %v9499_v16  ;;  %v1341_v58 = vrot.slane %v1258_v6, 1  ;;  %v1559_v56 = vrot.slane %v1477_v49, 1 }
 0x1e2   : > { %v1000_v32 = vadd.f32 %v900_v21, %v711_v59  ;;  %v1001_v63 = vadd.f32 %v902_v8, %v712_v12  ;;  %v1120_v9 = vsel %vm893_vm0, %v13514_v0, %v1119_v46  ;;  %v1122_v23 = vsel %vm893_vm0, %v1119_v46, %v1121_v13 }
 0x1e3   : > { %v1220_v62 = vadd.f32 %v1120_v9, %v779_v1  ;;  %v13517_v36 = vrot.slane %v13516_v25, 1  ;;  %v1561_v43 = vrot.slane %v1478_v11, 1  ;;  %v1221_v55 = vadd.f32 %v1122_v23, %v780_v22 }
 0x1e4   : > { %v1342_v16 = vsel %vm893_vm0, %v1339_v61, %v1341_v58  ;;  %v13519_v18 = vrot.slane %v13518_v44, 1  ;;  %v1697_v1 = vmul.f32 %v13410_v52, %v9675_v4  ;;  %v1698_v49 = vmul.f32 %v13410_v52, %v9736_v60  ;;  %v13520_v58 = vld [vmem:[#allocation73_spill] sm:$0xff] }
 0x1e5   : > { %v1340_v59 = vsel %vm893_vm0, %v13517_v36, %v1339_v61  ;;  %v1441_v6 = vadd.f32 %v1342_v16, %v1001_v63  ;;  %v1562_v37 = vsel %vm893_vm0, %v1559_v56, %v1561_v43  ;;  %v1917_v22 = vmul.f32 %v8182_v35, %v9642_v31 }
 0x1e6   : > { %v1440_v12 = vadd.f32 %v1340_v59, %v1000_v32  ;;  %v1560_v27 = vsel %vm893_vm0, %v13519_v18, %v1559_v56  ;;  %v1661_v46 = vadd.f32 %v1562_v37, %v1221_v55  ;;  %v1918_v11 = vmul.f32 %v8182_v35, %v9686_v28  ;;  %v13522_v55 = vld [vmem:[#allocation74_spill] sm:$0xff] }
 0x1e7   : > { %v1660_v21 = vadd.f32 %v1560_v27, %v1220_v62  ;;  %v1779_v8 = vrot.slane %v1697_v1, 1  ;;  %v2138_v32 = vmul.f32 %v13413_v20, %v9657_v7  ;;  %v2139_v13 = vmul.f32 %v13413_v20, %v9700_v19 }
 0x1e8   : > { %v2358_v61 = vmul.f32 %v13470_v17, %v9663_v42  ;;  %v1781_v63 = vrot.slane %v1698_v49, 1  ;;  %v2000_v2 = vrot.slane %v1917_v22, 2  ;;  %v2002_v0 = vrot.slane %v1918_v11, 2  ;;  %v13524_v49 = vld [vmem:[#allocation75_spill] sm:$0xff] }
 0x1e9   : > { %v2359_v9 = vmul.f32 %v13470_v17, %v9703_v39  ;;  %v13521_v56 = vrot.slane %v13520_v58, 1  ;;  %v2220_v62 = vrot.slane %v2138_v32, 2  ;;  %v2222_v25 = vrot.slane %v2139_v13, 2 }
 0x1ea   : > { %v2440_v36 = vrot.slane %v2358_v61, 2  ;;  %v1782_v59 = vsel %vm893_vm0, %v1779_v8, %v1781_v63  ;;  %v13523_v16 = vrot.slane %v13522_v55, 2  ;;  %v2003_v18 = vsel %vm1994_vm1, %v2000_v2, %v2002_v0  ;;  %v13526_v61 = vld [vmem:[#allocation76_spill] sm:$0xff] }
 0x1eb   : > { %v1780_v23 = vsel %vm893_vm0, %v13521_v56, %v1779_v8  ;;  %v1881_v27 = vadd.f32 %v1782_v59, %v1441_v6  ;;  %v2102_v1 = vadd.f32 %v2003_v18, %v1661_v46  ;;  %v13525_v22 = vrot.slane %v13524_v49, 2  ;;  %v13529_v18 = vld [vmem:[#allocation77_spill] sm:$0xff] }
 0x1ec   : > { %v1880_v43 = vadd.f32 %v1780_v23, %v1440_v12  ;;  %v2001_v44 = vsel %vm1994_vm1, %v13523_v16, %v2000_v2  ;;  %v2223_v32 = vsel %vm1994_vm1, %v2220_v62, %v2222_v25  ;;  %v13527_v58 = vrot.slane %v13526_v61, 2  ;;  %v13531_v61 = vld [vmem:[#allocation78_spill] sm:$0xff] }
 0x1ed   : > { %v2101_v37 = vadd.f32 %v2001_v44, %v1660_v21  ;;  %v2221_v11 = vsel %vm1994_vm1, %v13525_v22, %v2220_v62  ;;  %v2442_v8 = vrot.slane %v2359_v9, 2  ;;  %v2322_v63 = vadd.f32 %v2223_v32, %v1881_v27 }
 0x1ee   : > { %v2321_v13 = vadd.f32 %v2221_v11, %v1880_v43  ;;  %v2441_v12 = vsel %vm1994_vm1, %v13527_v58, %v2440_v36  ;;  %v2578_v2 = vmul.f32 %v13475_v29, %v9672_v53  ;;  %v2579_v6 = vmul.f32 %v13475_v29, %v9708_v50 }
 0x1ef   : > { %v2541_v56 = vadd.f32 %v2441_v12, %v2101_v37  ;;  %v2443_v21 = vsel %vm1994_vm1, %v2440_v36, %v2442_v8  ;;  %v2798_v46 = vmul.f32 %v13476_v47, %v9675_v4  ;;  %v2799_v0 = vmul.f32 %v13476_v47, %v9736_v60  ;;  %v13528_v36 = vld [vmem:[#allocation55_spill] sm:$0xff] }
 0x1f0   : > { %v3018_v23 = vmul.f32 %v13481_v38, %v9642_v31  ;;  %v2542_v9 = vadd.f32 %v2443_v21, %v2102_v1  ;;  %v2660_v62 = vrot.slane %v2578_v2, 2  ;;  %v2662_v25 = vrot.slane %v2579_v6, 2  ;;  %v13533_v21 = vld [vmem:[#allocation79_spill] sm:$0xff] }
 0x1f1   : > { %v3019_v59 = vmul.f32 %v13481_v38, %v9686_v28  ;;  %v2880_v43 = vrot.slane %v2798_v46, 2  ;;  %v2882_v55 = vrot.slane %v2799_v0, 2  ;;  %v3239_v44 = vmul.f32 %v13528_v36, %v9657_v7 }
 0x1f2   : > { %v3101_v16 = vrot.slane %v3018_v23, 3  ;;  %v13530_v27 = vrot.slane %v13529_v18, 2  ;;  %v2663_v49 = vsel %vm1994_vm1, %v2660_v62, %v2662_v25  ;;  %v3240_v1 = vmul.f32 %v13528_v36, %v9700_v19 }
 0x1f3   : > { %v3103_v22 = vrot.slane %v3019_v59, 3  ;;  %v2762_v32 = vadd.f32 %v2663_v49, %v2322_v63  ;;  %v13532_v58 = vrot.slane %v13531_v61, 2  ;;  %v2883_v8 = vsel %vm1994_vm1, %v2880_v43, %v2882_v55 }
 0x1f4   : > { %v2661_v37 = vsel %vm1994_vm1, %v13530_v27, %v2660_v62  ;;  %v2982_v6 = vadd.f32 %v2883_v8, %v2542_v9  ;;  %v13534_v46 = vrot.slane %v13533_v21, 3  ;;  %v3321_v59 = vrot.slane %v3239_v44, 3  ;;  %v13538_v21 = vld [vmem:[#allocation81_spill] sm:$0xff] }
 0x1f5   : > { %v2761_v11 = vadd.f32 %v2661_v37, %v2321_v13  ;;  %v2881_v12 = vsel %vm1994_vm1, %v13532_v58, %v2880_v43  ;;  %v3104_v23 = vsel %vm3095_vm2, %v3101_v16, %v3103_v22  ;;  %v3323_v18 = vrot.slane %v3240_v1, 3  ;;  %v13535_v13 = vld [vmem:[#allocation58_spill] sm:$0xff]  ;;  %v13536_v43 = vld [vmem:[#allocation80_spill] sm:$0xff] }
 0x1f6   : > { %v2981_v2 = vadd.f32 %v2881_v12, %v2541_v56  ;;  %v3102_v0 = vsel %vm3095_vm2, %v13534_v46, %v3101_v16  ;;  %v3203_v25 = vadd.f32 %v3104_v23, %v2762_v32  ;;  %v3459_v63 = vmul.f32 %v13535_v13, %v9663_v42 }
 0x1f7   : > { %v3202_v62 = vadd.f32 %v3102_v0, %v2761_v11  ;;  %v3460_v27 = vmul.f32 %v13535_v13, %v9703_v39  ;;  %v3679_v56 = vmul.f32 %v13384_v15, %v9672_v53  ;;  %v3680_v9 = vmul.f32 %v13384_v15, %v9708_v50 }
 0x1f8   : > { %v13537_v55 = vrot.slane %v13536_v43, 3  ;;  %v3324_v37 = vsel %vm3095_vm2, %v3321_v59, %v3323_v18  ;;  %v3899_v44 = vmul.f32 %v13385_v57, %v9675_v4  ;;  %v3900_v49 = vmul.f32 %v13385_v57, %v9736_v60 }
 0x1f9   : > { %v3423_v1 = vadd.f32 %v3324_v37, %v2982_v6  ;;  %v3541_v11 = vrot.slane %v3459_v63, 3  ;;  %v3543_v32 = vrot.slane %v3460_v27, 3  ;;  %v3761_v61 = vrot.slane %v3679_v56, 3  ;;  %v13540_v63 = vld [vmem:[#allocation82_spill] sm:$0xff] }
 0x1fa   : > { %v3322_v16 = vsel %vm3095_vm2, %v13537_v55, %v3321_v59  ;;  %v3763_v58 = vrot.slane %v3680_v9, 3  ;;  %v3981_v12 = vrot.slane %v3899_v44, 3  ;;  %v3983_v8 = vrot.slane %v3900_v49, 3 }
 0x1fb   : > { %v3422_v22 = vadd.f32 %v3322_v16, %v2981_v2  ;;  %v13539_v46 = vrot.slane %v13538_v21, 3  ;;  %v3544_v23 = vsel %vm3095_vm2, %v3541_v11, %v3543_v32  ;;  %v4119_v59 = vmul.f32 %v8446_v54, %v9642_v31  ;;  %v13542_v16 = vld [vmem:[#allocation83_spill] sm:$0xff] }
 0x1fc   : > { %v4120_v18 = vmul.f32 %v8446_v54, %v9686_v28  ;;  %v3643_v6 = vadd.f32 %v3544_v23, %v3203_v25  ;;  %v13541_v27 = vrot.slane %v13540_v63, 3  ;;  %v3764_v9 = vsel %vm3095_vm2, %v3761_v61, %v3763_v58 }
 0x1fd   : > { %v3542_v0 = vsel %vm3095_vm2, %v13539_v46, %v3541_v11  ;;  %v3863_v55 = vadd.f32 %v3764_v9, %v3423_v1  ;;  %v13543_v37 = vrot.slane %v13542_v16, 3  ;;  %v3984_v49 = vsel %vm3095_vm2, %v3981_v12, %v3983_v8 }
 0x1fe   : > { %v3642_v2 = vadd.f32 %v3542_v0, %v3202_v62  ;;  %v3762_v56 = vsel %vm3095_vm2, %v13541_v27, %v3761_v61  ;;  %v4083_v11 = vadd.f32 %v3984_v49, %v3643_v6  ;;  %v4202_v32 = vrot.slane %v4119_v59, 4  ;;  %v13544_v61 = vld [vmem:[#allocation84_spill] sm:$0xff] }
 0x1ff   : > { %v3862_v43 = vadd.f32 %v3762_v56, %v3422_v22  ;;  %v3982_v44 = vsel %vm3095_vm2, %v13543_v37, %v3981_v12  ;;  %v4204_v28 = vrot.slane %v4120_v18, 4  ;;  %v4340_v62 = vmul.f32 %v8450_v10, %v9657_v7  ;;  %v13546_v56 = vld [vmem:[#allocation85_spill] sm:$0xff] }
 0x200   : > { %v4082_v31 = vadd.f32 %v3982_v44, %v3642_v2  ;;  %v4341_v25 = vmul.f32 %v8450_v10, %v9700_v19  ;;  %v4560_v22 = vmul.f32 %v8509_v5, %v9663_v42  ;;  %v4561_v1 = vmul.f32 %v8509_v5, %v9703_v39 }
 0x201   : > { %v13545_v58 = vrot.slane %v13544_v61, 4  ;;  %v4205_v8 = vsel %vm4196_vm3, %v4202_v32, %v4204_v28  ;;  %v4780_v21 = vmul.f32 %v8535_v14, %v9672_v53  ;;  %v4781_v46 = vmul.f32 %v8535_v14, %v9708_v50  ;;  %v13550_v61 = vld [vmem:[#allocation87_spill] sm:$0xff] }
 0x202   : > { %v4304_v23 = vadd.f32 %v4205_v8, %v3863_v55  ;;  %v4422_v59 = vrot.slane %v4340_v62, 4  ;;  %v4424_v18 = vrot.slane %v4341_v25, 4  ;;  %v4642_v2 = vrot.slane %v4560_v22, 4 }
 0x203   : > { %v4203_v12 = vsel %vm4196_vm3, %v13545_v58, %v4202_v32  ;;  %v4644_v6 = vrot.slane %v4561_v1, 4  ;;  %v4862_v63 = vrot.slane %v4780_v21, 4  ;;  %v4864_v27 = vrot.slane %v4781_v46, 4  ;;  %v13548_v32 = vld [vmem:[#allocation86_spill] sm:$0xff] }
 0x204   : > { %v4303_v0 = vadd.f32 %v4203_v12, %v3862_v43  ;;  %v13547_v9 = vrot.slane %v13546_v56, 4  ;;  %v4425_v37 = vsel %vm4196_vm3, %v4422_v59, %v4424_v18  ;;  %v5000_v44 = vmul.f32 %v8539_v51, %v9675_v4  ;;  %v9875_v18 = vld [vmem:[%s8101_s2 + $0xd0] sm:$0xff]  ;;  %v9893_v56 = vld [vmem:[%s8101_s2 + $0x58] sm:$0xff] }
 0x205   : > { %v5001_v43 = vmul.f32 %v8539_v51, %v9736_v60  ;;  %v4524_v49 = vadd.f32 %v4425_v37, %v4083_v11  ;;  %v13549_v28 = vrot.slane %v13548_v32, 4  ;;  %v4645_v25 = vsel %vm4196_vm3, %v4642_v2, %v4644_v6  ;;  %13553 = vst [vmem:[#allocation57_spill] sm:$0xff] %v9875_v18  ;;  %v9907_v32 = vld [vmem:[%s8101_s2 + $0x80] sm:$0xff] }
 0x206   : > { %v4423_v16 = vsel %vm4196_vm3, %v13547_v9, %v4422_v59  ;;  %v4744_v1 = vadd.f32 %v4645_v25, %v4304_v23  ;;  %v13551_v58 = vrot.slane %v13550_v61, 4  ;;  %v4865_v8 = vsel %vm4196_vm3, %v4862_v63, %v4864_v27  ;;  %v9872_v59 = vld [vmem:[%s8101_s2 + $0xc8] sm:$0xff]  ;;  %v9883_v23 = vld [vmem:[%s8101_s2 + $0x30] sm:$0xff]  ;;  %v9912_v61 = vld [vmem:[%s8101_s2 + $0xa0] sm:$0xff] }
 0x207   : > { %v4523_v55 = vadd.f32 %v4423_v16, %v4082_v31  ;;  %v4643_v62 = vsel %vm4196_vm3, %v13549_v28, %v4642_v2  ;;  %v4964_v31 = vadd.f32 %v4865_v8, %v4524_v49  ;;  %v5082_v11 = vrot.slane %v5000_v44, 4  ;;  %13552 = vst [vmem:[#allocation54_spill] sm:$0xff] %v9872_v59  ;;  %v9878_v2 = vld [vmem:[%s8101_s2 + $0x28] sm:$0xff]  ;;  %v13554_v16 = vld [vmem:[#allocation88_spill] sm:$0xff]  ;;  %13556 = vst [vmem:[#allocation33_spill] sm:$0xff] %v9912_v61 }
 0x208   : > { %v4743_v22 = vadd.f32 %v4643_v62, %v4303_v0  ;;  %v4863_v12 = vsel %vm4196_vm3, %v13551_v58, %v4862_v63  ;;  %v5084_v46 = vrot.slane %v5001_v43, 4  ;;  %v477_v0 = vmul.f32 %v9878_v2, %v8174_v33  ;;  %v9888_v63 = vld [vmem:[%s8101_s2 + $0x50] sm:$0xff] }
 0x209   : > { %v4963_v21 = vadd.f32 %v4863_v12, %v4523_v55  ;;  %v478_v6 = vmul.f32 %v9883_v23, %v8174_v33  ;;  %v545_v27 = vmul.f32 %v9888_v63, %v13393_v30  ;;  %v546_v9 = vmul.f32 %v9893_v56, %v13393_v30  ;;  %v9902_v55 = vld [vmem:[%s8101_s2 + $0x78] sm:$0xff]  ;;  %v9917_v12 = vld [vmem:[%s8101_s2 + $0xa8] sm:$0xff] }
 0x20a   : > { %v13555_v37 = vrot.slane %v13554_v16, 4  ;;  %v5085_v43 = vsel %vm4196_vm3, %v5082_v11, %v5084_v46  ;;  %v613_v49 = vmul.f32 %v9902_v55, %v13397_v3  ;;  %v614_v28 = vmul.f32 %v9907_v32, %v13397_v3  ;;  %13557 = vst [vmem:[#allocation26_spill] sm:$0xff] %v9917_v12 }
 0x20b   : > { %v5184_v25 = vadd.f32 %v5085_v43, %v4744_v1  ;;  %v681_v58 = vmul.f32 %v9912_v61, %v8197_v40  ;;  %v682_v8 = vmul.f32 %v9917_v12, %v8197_v40  ;;  %v749_v16 = vmul.f32 %v8211_v45, %v9872_v59 }
 0x20c   : > { %v5083_v44 = vsel %vm4196_vm3, %v13555_v37, %v5082_v11  ;;  %v645_v11 = vadd.f32 %v613_v49, %v477_v0  ;;  %v646_v46 = vadd.f32 %v614_v28, %v478_v6  ;;  %v818_v50 = vmul.f32 %v9878_v2, %v8178_v34  ;;  %v9930_v49 = vld [vmem:[%s8101_s2 + $0x38] sm:$0xff] }
 0x20d   : > { %v5183_v62 = vadd.f32 %v5083_v44, %v4743_v22  ;;  %v750_v22 = vmul.f32 %v8211_v45, %v9875_v18  ;;  %v5216_v37 = vadd.f32 %v5184_v25, %v4964_v31  ;;  %v713_v44 = vadd.f32 %v681_v58, %v545_v27 }
 0x20e   : > { %v714_v43 = vadd.f32 %v682_v8, %v546_v9  ;;  %v781_v26 = vadd.f32 %v749_v16, %v645_v11  ;;  %v819_v0 = vmul.f32 %v9883_v23, %v8178_v34  ;;  %v9934_v28 = vmul.f32 %v9930_v49, %v8178_v34 }
 0x20f   : > { %v5215_v1 = vadd.f32 %v5183_v62, %v4963_v21  ;;  %v782_v60 = vadd.f32 %v750_v22, %v646_v46  ;;  %v1039_v21 = vmul.f32 %v9888_v63, %v8201_v41  ;;  %v1040_v31 = vmul.f32 %v9893_v56, %v8201_v41  ;;  %v9941_v62 = vld [vmem:[%s8101_s2 + $0x60] sm:$0xff] }
 0x210   : > { %13558 = vst [vmem:[#allocation27_spill] sm:$0xff] %v9934_v28  ;;  %v903_v27 = vrot.slane %v818_v50, 1  ;;  %v904_v9 = vrot.slane %v819_v0, 1  ;;  %13559 = vst [vmem:[#allocation34_spill] sm:$0xff] %v9941_v62  ;;  %v9945_v25 = vmul.f32 %v9941_v62, %v8201_v41  ;;  %v1259_v58 = vmul.f32 %v9902_v55, %v13459_v24 }
 0x211   : > { %v5246_v6 = vpack.c.bf16 %v5216_v37, %v5215_v1  ;;  %v13010_v8 = vrot.slane %v9934_v28, 1  ;;  %v1123_v11 = vrot.slane %v1039_v21, 1  ;;  %v1124_v46 = vrot.slane %v1040_v31, 1  ;;  %v9956_v37 = vld [vmem:[%s8101_s2 + $0x88] sm:$0xff] }
 0x212   : > { %v1260_v50 = vmul.f32 %v9907_v32, %v13459_v24  ;;  %v13560_v16 = vmov 0   ;;  %v905_v22 = vsel %vm893_vm0, %v903_v27, %v904_v9  ;;  %v13009_v1 = vrot.slane %v9945_v25, 1  ;;  %13561 = vst [vmem:[#allocation28_spill] sm:$0xff] %v9956_v37 }
 0x213   : > { %5464 = vmatmul.mubr.bf16.gmra.mrb[4].mxu0 %v5246_v6  ;;  %7099 = vmatmul.mubr.bf16.vlgmr.msra.gmra.mrb[16].mxu1 %v5246_v6  ;;  %v9960_v0 = vmul.f32 %v9956_v37, %v13459_v24  ;;  %v1343_v6 = vrot.slane %v1259_v58, 1  ;;  %v907_v21 = vsel %vm893_vm0, %v904_v9, %v13010_v8  ;;  %v1002_v31 = vadd.f32 %v905_v22, %v713_v44  ;;  %v9971_v24 = vld [vmem:[%s8101_s2 + $0xd8] sm:$0xff] }
 0x214   : > { %5473 = vmatprep.mubr.bf16.mxu0 %v13560_v16  ;;  %v1125_v39 = vsel %vm893_vm0, %v1123_v11, %v1124_v46  ;;  %v1344_v16 = vrot.slane %v1260_v50, 1  ;;  %v1003_v41 = vadd.f32 %v907_v21, %v714_v43  ;;  %v1127_v27 = vsel %vm893_vm0, %v1124_v46, %v13009_v1  ;;  %13563 = vst [vmem:[#allocation38_spill] sm:$0xff] %v9971_v24  ;;  %v9982_v46 = vld [vmem:[%s8101_s2 + $0xb0] sm:$0xff] }
 0x215   : > { %13562 = vst [vmem:[#allocation29_spill] sm:$0xff] %v9960_v0  ;;  %v1222_v19 = vadd.f32 %v1125_v39, %v781_v26  ;;  %v13008_v34 = vrot.slane %v9960_v0, 1  ;;  %v1223_v58 = vadd.f32 %v1127_v27, %v782_v60  ;;  %v1479_v9 = vmul.f32 %v9912_v61, %v8265_v48  ;;  %13564 = vst [vmem:[#allocation39_spill] sm:$0xff] %v9982_v46 }
 0x216   : > { %v1345_v28 = vsel %vm893_vm0, %v1343_v6, %v1344_v16  ;;  %v1480_v44 = vmul.f32 %v9917_v12, %v8265_v48  ;;  %v9986_v39 = vmul.f32 %v9982_v46, %v8265_v48  ;;  %v1699_v26 = vmul.f32 %v13410_v52, %v9872_v59 }
 0x217   : > { %v1347_v43 = vsel %vm893_vm0, %v1344_v16, %v13008_v34  ;;  %v1442_v11 = vadd.f32 %v1345_v28, %v1002_v31  ;;  %v1563_v50 = vrot.slane %v1479_v9, 1  ;;  %v1700_v6 = vmul.f32 %v13410_v52, %v9875_v18 }
 0x218   : > { %13565 = vst [vmem:[#allocation41_spill] sm:$0xff] %v9986_v39  ;;  %v1443_v60 = vadd.f32 %v1347_v43, %v1003_v41  ;;  %v1564_v22 = vrot.slane %v1480_v44, 1  ;;  %v13018_v21 = vrot.slane %v9986_v39, 1  ;;  %v9995_v28 = vmul.f32 %v13410_v52, %v9971_v24 }
 0x219   : > { %v1783_v16 = vrot.slane %v1699_v26, 1  ;;  %v1919_v31 = vmul.f32 %v9878_v2, %v8182_v35  ;;  %v1784_v34 = vrot.slane %v1700_v6, 1  ;;  %v1920_v41 = vmul.f32 %v9883_v23, %v8182_v35 }
 0x21a   : > { %v1565_v27 = vsel %vm893_vm0, %v1563_v50, %v1564_v22  ;;  %v10004_v9 = vmul.f32 %v9930_v49, %v8182_v35  ;;  %v1567_v44 = vsel %vm893_vm0, %v1564_v22, %v13018_v21  ;;  %v13017_v26 = vrot.slane %v9995_v28, 1 }
 0x21b   : > { %v1662_v43 = vadd.f32 %v1565_v27, %v1222_v19  ;;  %v2004_v1 = vrot.slane %v1919_v31, 2  ;;  %v1663_v8 = vadd.f32 %v1567_v44, %v1223_v58  ;;  %v1785_v52 = vsel %vm893_vm0, %v1783_v16, %v1784_v34 }
 0x21c   : > { %13566 = vst [vmem:[#allocation44_spill] sm:$0xff] %v10004_v9  ;;  %v2005_v50 = vrot.slane %v1920_v41, 2  ;;  %v13016_v6 = vrot.slane %v10004_v9, 2  ;;  %v1787_v0 = vsel %vm893_vm0, %v1784_v34, %v13017_v26  ;;  %v1882_v35 = vadd.f32 %v1785_v52, %v1442_v11 }
 0x21d   : > { %v2140_v39 = vmul.f32 %v9888_v63, %v13413_v20  ;;  %v2141_v19 = vmul.f32 %v9893_v56, %v13413_v20  ;;  %v1883_v22 = vadd.f32 %v1787_v0, %v1443_v60  ;;  %v10025_v16 = vmul.f32 %v9941_v62, %v13413_v20 }
 0x21e   : > { %v2006_v31 = vsel %vm1994_vm1, %v2004_v1, %v2005_v50  ;;  %v2008_v58 = vsel %vm1994_vm1, %v2005_v50, %v13016_v6  ;;  %v2360_v44 = vmul.f32 %v9902_v55, %v13470_v17  ;;  %v2361_v1 = vmul.f32 %v9907_v32, %v13470_v17 }
 0x21f   : > { %13567 = vst [vmem:[#allocation63_spill] sm:$0xff] %v10025_v16  ;;  %v2103_v27 = vadd.f32 %v2006_v31, %v1662_v43  ;;  %v2104_v34 = vadd.f32 %v2008_v58, %v1663_v8  ;;  %v2224_v52 = vrot.slane %v2140_v39, 2  ;;  %v2225_v11 = vrot.slane %v2141_v19, 2 }
 0x220   : > { %v13023_v41 = vrot.slane %v10025_v16, 2  ;;  %v10034_v0 = vmul.f32 %v9956_v37, %v13470_v17  ;;  %v2580_v43 = vmul.f32 %v9912_v61, %v13475_v29  ;;  %v2581_v8 = vmul.f32 %v9917_v12, %v13475_v29 }
 0x221   : > { %v2226_v60 = vsel %vm1994_vm1, %v2224_v52, %v2225_v11  ;;  %v10043_v39 = vmul.f32 %v9982_v46, %v13475_v29  ;;  %v2444_v31 = vrot.slane %v2360_v44, 2  ;;  %v2445_v58 = vrot.slane %v2361_v1, 2 }
 0x222   : > { %v2228_v50 = vsel %vm1994_vm1, %v2225_v11, %v13023_v41  ;;  %v2323_v19 = vadd.f32 %v2226_v60, %v1882_v35  ;;  %v13025_v52 = vrot.slane %v10034_v0, 2  ;;  %v2664_v26 = vrot.slane %v2580_v43, 2 }
 0x223   : > { %13568 = vst [vmem:[#allocation64_spill] sm:$0xff] %v10043_v39  ;;  %v2324_v6 = vadd.f32 %v2228_v50, %v1883_v22  ;;  %v2665_v21 = vrot.slane %v2581_v8, 2  ;;  %v2446_v17 = vsel %vm1994_vm1, %v2444_v31, %v2445_v58  ;;  %v13024_v9 = vrot.slane %v10043_v39, 2 }
 0x224   : > { %v2800_v29 = vmul.f32 %v13476_v47, %v9872_v59  ;;  %v2801_v16 = vmul.f32 %v13476_v47, %v9875_v18  ;;  %v2448_v35 = vsel %vm1994_vm1, %v2445_v58, %v13025_v52  ;;  %v2543_v11 = vadd.f32 %v2446_v17, %v2103_v27 }
 0x225   : > { %v2666_v22 = vsel %vm1994_vm1, %v2664_v26, %v2665_v21  ;;  %v10061_v44 = vmul.f32 %v13476_v47, %v9971_v24  ;;  %v2544_v1 = vadd.f32 %v2448_v35, %v2104_v34  ;;  %v2668_v60 = vsel %vm1994_vm1, %v2665_v21, %v13024_v9 }
 0x226   : > { %v2763_v43 = vadd.f32 %v2666_v22, %v2323_v19  ;;  %v2884_v8 = vrot.slane %v2800_v29, 2  ;;  %v2764_v50 = vadd.f32 %v2668_v60, %v2324_v6  ;;  %v2885_v31 = vrot.slane %v2801_v16, 2 }
 0x227   : > { %13569 = vst [vmem:[#allocation65_spill] sm:$0xff] %v10061_v44  ;;  %v13028_v41 = vrot.slane %v10061_v44, 2  ;;  %v3020_v17 = vmul.f32 %v9878_v2, %v13481_v38  ;;  %v3021_v26 = vmul.f32 %v9883_v23, %v13481_v38  ;;  %v10073_v27 = vmul.f32 %v9930_v49, %v13481_v38 }
 0x228   : > { %v3241_v34 = vmul.f32 %v9888_v63, %v13528_v36  ;;  %v3242_v29 = vmul.f32 %v9893_v56, %v13528_v36  ;;  %v2886_v21 = vsel %vm1994_vm1, %v2884_v8, %v2885_v31  ;;  %v10085_v19 = vmul.f32 %v9941_v62, %v13528_v36 }
 0x229   : > { %v2888_v6 = vsel %vm1994_vm1, %v2885_v31, %v13028_v41  ;;  %v3105_v16 = vrot.slane %v3020_v17, 3  ;;  %v2983_v58 = vadd.f32 %v2886_v21, %v2543_v11  ;;  %v3106_v22 = vrot.slane %v3021_v26, 3 }
 0x22a   : > { %13570 = vst [vmem:[#allocation66_spill] sm:$0xff] %v10085_v19  ;;  %v2984_v35 = vadd.f32 %v2888_v6, %v2544_v1  ;;  %v13029_v60 = vrot.slane %v10073_v27, 3  ;;  %v3325_v9 = vrot.slane %v3241_v34, 3  ;;  %v3326_v52 = vrot.slane %v3242_v29, 3 }
 0x22b   : > { %v13031_v39 = vrot.slane %v10085_v19, 3  ;;  %v3461_v8 = vmul.f32 %v9902_v55, %v13535_v13  ;;  %v3107_v44 = vsel %vm3095_vm2, %v3105_v16, %v3106_v22  ;;  %v3462_v11 = vmul.f32 %v9907_v32, %v13535_v13 }
 0x22c   : > { %v3109_v31 = vsel %vm3095_vm2, %v3106_v22, %v13029_v60  ;;  %v10099_v1 = vmul.f32 %v9956_v37, %v13535_v13  ;;  %v3204_v17 = vadd.f32 %v3107_v44, %v2763_v43  ;;  %v3327_v34 = vsel %vm3095_vm2, %v3325_v9, %v3326_v52 }
 0x22d   : > { %v3205_v26 = vadd.f32 %v3109_v31, %v2764_v50  ;;  %v3329_v29 = vsel %vm3095_vm2, %v3326_v52, %v13031_v39  ;;  %v3424_v21 = vadd.f32 %v3327_v34, %v2983_v58  ;;  %v3545_v16 = vrot.slane %v3461_v8, 3 }
 0x22e   : > { %13571 = vst [vmem:[#allocation67_spill] sm:$0xff] %v10099_v1  ;;  %v3425_v6 = vadd.f32 %v3329_v29, %v2984_v35  ;;  %v3546_v41 = vrot.slane %v3462_v11, 3  ;;  %v13037_v22 = vrot.slane %v10099_v1, 3  ;;  %v3681_v60 = vmul.f32 %v9912_v61, %v13384_v15 }
 0x22f   : > { %v3682_v13 = vmul.f32 %v9917_v12, %v13384_v15  ;;  %v10112_v44 = vmul.f32 %v9982_v46, %v13384_v15  ;;  %v3901_v52 = vmul.f32 %v13385_v57, %v9872_v59  ;;  %v3902_v43 = vmul.f32 %v13385_v57, %v9875_v18 }
 0x230   : > { %v3547_v9 = vsel %vm3095_vm2, %v3545_v16, %v3546_v41  ;;  %v10121_v50 = vmul.f32 %v13385_v57, %v9971_v24  ;;  %v3549_v58 = vsel %vm3095_vm2, %v3546_v41, %v13037_v22  ;;  %v3765_v8 = vrot.slane %v3681_v60, 3 }
 0x231   : > { %v3644_v35 = vadd.f32 %v3547_v9, %v3204_v17  ;;  %v3766_v31 = vrot.slane %v3682_v13, 3  ;;  %v3645_v11 = vadd.f32 %v3549_v58, %v3205_v26  ;;  %v13036_v34 = vrot.slane %v10112_v44, 3 }
 0x232   : > { %v3985_v29 = vrot.slane %v3901_v52, 3  ;;  %v3986_v16 = vrot.slane %v3902_v43, 3  ;;  %v13035_v19 = vrot.slane %v10121_v50, 3  ;;  %v4121_v57 = vmul.f32 %v9878_v2, %v8446_v54 }
 0x233   : > { %v3767_v39 = vsel %vm3095_vm2, %v3765_v8, %v3766_v31  ;;  %v4122_v1 = vmul.f32 %v9883_v23, %v8446_v54  ;;  %v3769_v41 = vsel %vm3095_vm2, %v3766_v31, %v13036_v34  ;;  %v10139_v17 = vmul.f32 %v9930_v49, %v8446_v54 }
 0x234   : > { %v3864_v13 = vadd.f32 %v3767_v39, %v3424_v21  ;;  %v3987_v60 = vsel %vm3095_vm2, %v3985_v29, %v3986_v16  ;;  %v3865_v26 = vadd.f32 %v3769_v41, %v3425_v6  ;;  %v3989_v9 = vsel %vm3095_vm2, %v3986_v16, %v13035_v19 }
 0x235   : > { %v4084_v2 = vadd.f32 %v3987_v60, %v3644_v35  ;;  %v4206_v52 = vrot.slane %v4121_v57, 4  ;;  %v4085_v43 = vadd.f32 %v3989_v9, %v3645_v11  ;;  %v4207_v23 = vrot.slane %v4122_v1, 4 }
 0x236   : > { %v13038_v58 = vrot.slane %v10139_v17, 4  ;;  %v4342_v39 = vmul.f32 %v9888_v63, %v8450_v10  ;;  %v4343_v21 = vmul.f32 %v9893_v56, %v8450_v10  ;;  %v10151_v8 = vmul.f32 %v9941_v62, %v8450_v10 }
 0x237   : > { %v4562_v6 = vmul.f32 %v9902_v55, %v8509_v5  ;;  %v4563_v57 = vmul.f32 %v9907_v32, %v8509_v5  ;;  %v4208_v1 = vsel %vm4196_vm3, %v4206_v52, %v4207_v23  ;;  %v10163_v11 = vmul.f32 %v9956_v37, %v8509_v5 }
 0x238   : > { %v4210_v35 = vsel %vm4196_vm3, %v4207_v23, %v13038_v58  ;;  %v4426_v31 = vrot.slane %v4342_v39, 4  ;;  %v4305_v29 = vadd.f32 %v4208_v1, %v3864_v13  ;;  %v4427_v41 = vrot.slane %v4343_v21, 4 }
 0x239   : > { %v4306_v16 = vadd.f32 %v4210_v35, %v3865_v26  ;;  %v13039_v60 = vrot.slane %v10151_v8, 4  ;;  %v4646_v9 = vrot.slane %v4562_v6, 4  ;;  %v4647_v19 = vrot.slane %v4563_v57, 4 }
 0x23a   : > { %v13040_v34 = vrot.slane %v10163_v11, 4  ;;  %v4782_v52 = vmul.f32 %v9912_v61, %v8535_v14  ;;  %v4428_v22 = vsel %vm4196_vm3, %v4426_v31, %v4427_v41  ;;  %v4783_v13 = vmul.f32 %v9917_v12, %v8535_v14  ;;  %v13575_v61 = vld [vmem:[#allocation45_spill] sm:$0xff] }
 0x23b   : > { %v4430_v23 = vsel %vm4196_vm3, %v4427_v41, %v13039_v60  ;;  %v10177_v26 = vmul.f32 %v9982_v46, %v8535_v14  ;;  %v4525_v39 = vadd.f32 %v4428_v22, %v4084_v2  ;;  %v4648_v6 = vsel %vm4196_vm3, %v4646_v9, %v4647_v19 }
 0x23c   : > { %v4526_v21 = vadd.f32 %v4430_v23, %v4085_v43  ;;  %v4650_v57 = vsel %vm4196_vm3, %v4647_v19, %v13040_v34  ;;  %v4745_v1 = vadd.f32 %v4648_v6, %v4305_v29  ;;  %v4866_v31 = vrot.slane %v4782_v52, 4 }
 0x23d   : > { %13572 = vst [vmem:[#allocation68_spill] sm:$0xff] %v10177_v26  ;;  %v4746_v35 = vadd.f32 %v4650_v57, %v4306_v16  ;;  %v4867_v58 = vrot.slane %v4783_v13, 4  ;;  %v13045_v41 = vrot.slane %v10177_v26, 4  ;;  %v5002_v60 = vmul.f32 %v8539_v51, %v9872_v59 }
 0x23e   : > { %v5003_v22 = vmul.f32 %v8539_v51, %v9875_v18  ;;  %v10190_v2 = vmul.f32 %v8539_v51, %v9971_v24  ;;  %v479_v19 = vmul.f32 %v9930_v49, %v8174_v33  ;;  %v480_v29 = vmul.f32 %v8174_v33, %v9657_v7  ;;  %v10209_v18 = vld [vmem:[%s8101_s2 + $0xe0] sm:$0xff] }
 0x23f   : > { %v4868_v43 = vsel %vm4196_vm3, %v4866_v31, %v4867_v58  ;;  %v547_v16 = vmul.f32 %v9941_v62, %v13393_v30  ;;  %v4870_v9 = vsel %vm4196_vm3, %v4867_v58, %v13045_v41  ;;  %v5086_v23 = vrot.slane %v5002_v60, 4 }
 0x240   : > { %13573 = vst [vmem:[#allocation70_spill] sm:$0xff] %v10190_v2  ;;  %v4965_v52 = vadd.f32 %v4868_v43, %v4525_v39  ;;  %v5087_v13 = vrot.slane %v5003_v22, 4  ;;  %v4966_v6 = vadd.f32 %v4870_v9, %v4526_v21  ;;  %v13060_v57 = vrot.slane %v10190_v2, 4 }
 0x241   : > { %v548_v31 = vmul.f32 %v13393_v30, %v9663_v42  ;;  %v615_v49 = vmul.f32 %v9956_v37, %v13397_v3  ;;  %v616_v62 = vmul.f32 %v13397_v3, %v9672_v53  ;;  %v683_v58 = vmul.f32 %v9982_v46, %v8197_v40 }
 0x242   : > { %v5088_v34 = vsel %vm4196_vm3, %v5086_v23, %v5087_v13  ;;  %v684_v60 = vmul.f32 %v8197_v40, %v9675_v4  ;;  %v5090_v39 = vsel %vm4196_vm3, %v5087_v13, %v13060_v57  ;;  %v751_v43 = vmul.f32 %v8211_v45, %v9971_v24  ;;  %v13574_v40 = vld [vmem:[#allocation30_spill] sm:$0xff] }
 0x243   : > { %v5185_v21 = vadd.f32 %v5088_v34, %v4745_v1  ;;  %v647_v22 = vadd.f32 %v615_v49, %v479_v19  ;;  %v5186_v9 = vadd.f32 %v5090_v39, %v4746_v35  ;;  %v648_v23 = vadd.f32 %v616_v62, %v480_v29  ;;  %v13576_v1 = vld [vmem:[#allocation36_spill] sm:$0xff]  ;;  %v13577_v13 = vld [vmem:[#allocation46_spill] sm:$0xff] }
 0x244   : > { %v715_v41 = vadd.f32 %v683_v58, %v547_v16  ;;  %v716_v37 = vadd.f32 %v684_v60, %v548_v31  ;;  %v752_v46 = vmul.f32 %v8211_v45, %v10209_v18  ;;  %v821_v26 = vmul.f32 %v13574_v40, %v9657_v7  ;;  %v13578_v16 = vld [vmem:[#allocation40_spill] sm:$0xff]  ;;  %v13579_v31 = vld [vmem:[#allocation51_spill] sm:$0xff] }
 0x245   : > { %v5217_v59 = vadd.f32 %v5185_v21, %v4965_v52  ;;  %v783_v12 = vadd.f32 %v751_v43, %v647_v22  ;;  %v5218_v2 = vadd.f32 %v5186_v9, %v4966_v6  ;;  %v822_v34 = vmul.f32 %v13574_v40, %v13575_v61  ;;  %v13580_v21 = vld [vmem:[#allocation27_spill] sm:$0xff] }
 0x246   : > { %v1042_v19 = vmul.f32 %v13576_v1, %v9663_v42  ;;  %v1043_v62 = vmul.f32 %v13576_v1, %v13577_v13  ;;  %v784_v35 = vadd.f32 %v752_v46, %v648_v23  ;;  %v908_v29 = vrot.slane %v821_v26, 1  ;;  %v10242_v26 = vld [vmem:[%s8101_s2 + $0xe8] sm:$0xf] }
 0x247   : > { %v1262_v52 = vmul.f32 %v13578_v16, %v9672_v53  ;;  %v1263_v49 = vmul.f32 %v13578_v16, %v13579_v31  ;;  %v5247_v58 = vpack.c.bf16 %v5218_v2, %v5217_v59  ;;  %v910_v6 = vrot.slane %v822_v34, 1  ;;  %13582 = vst [vmem:[#allocation71_spill] sm:$0xff] %v10242_v26 }
 0x248   : > { %v1128_v60 = vrot.slane %v1042_v19, 1  ;;  %v1130_v39 = vrot.slane %v1043_v62, 1  ;;  %v13581_v22 = vrot.slane %v13580_v21, 1  ;;  %v1482_v46 = vmul.f32 %v8265_v48, %v9675_v4 }
 0x249   : > { %v1348_v9 = vrot.slane %v1262_v52, 1  ;;  %v1350_v57 = vrot.slane %v1263_v49, 1  ;;  %5474 = vmatmul.mubr.bf16.gmra.mrb[8].mxu0 %v5247_v58  ;;  %7102 = vmatprep.mubr.bf16.mxu1 %v5247_v58  ;;  %v911_v23 = vsel %vm893_vm0, %v908_v29, %v910_v6  ;;  %v13583_v59 = vrot.slane %v9945_v25, 1  ;;  %v13584_v52 = vld [vmem:[#allocation29_spill] sm:$0xff] }
 0x24a   : > { %v909_v43 = vsel %vm893_vm0, %v13581_v22, %v908_v29  ;;  %v1005_v34 = vadd.f32 %v911_v23, %v716_v37  ;;  %v1131_v19 = vsel %vm893_vm0, %v1128_v60, %v1130_v39  ;;  %v13585_v49 = vrot.slane %v13584_v52, 1  ;;  %v13587_v29 = vld [vmem:[#allocation56_spill] sm:$0xff]  ;;  %v13588_v37 = vld [vmem:[#allocation43_spill] sm:$0xff] }
 0x24b   : > { %v1004_v24 = vadd.f32 %v909_v43, %v715_v41  ;;  %v1129_v2 = vsel %vm893_vm0, %v13583_v59, %v1128_v60  ;;  %v13586_v22 = vmov 0   ;;  %v1225_v58 = vadd.f32 %v1131_v19, %v784_v35  ;;  %v13589_v39 = vld [vmem:[#allocation31_spill] sm:$0xff] }
 0x24c   : > { %v1224_v62 = vadd.f32 %v1129_v2, %v783_v12  ;;  %v1349_v21 = vsel %vm893_vm0, %v13585_v49, %v1348_v9  ;;  %5483 = vmatprep.mubr.bf16.mxu0 %v13586_v22  ;;  %v1351_v16 = vsel %vm893_vm0, %v1348_v9, %v1350_v57  ;;  %v1483_v41 = vmul.f32 %v8265_v48, %v13587_v29  ;;  %v13590_v57 = vld [vmem:[#allocation41_spill] sm:$0xff] }
 0x24d   : > { %v1444_v1 = vadd.f32 %v1349_v21, %v1004_v24  ;;  %v1445_v25 = vadd.f32 %v1351_v16, %v1005_v34  ;;  %v1568_v6 = vrot.slane %v1482_v46, 1  ;;  %v1702_v43 = vmul.f32 %v13588_v37, %v10209_v18 }
 0x24e   : > { %v1703_v12 = vmul.f32 %v13588_v37, %v10242_v26  ;;  %v1570_v60 = vrot.slane %v1483_v41, 1  ;;  %v1922_v23 = vmul.f32 %v13589_v39, %v9657_v7  ;;  %v1923_v35 = vmul.f32 %v13589_v39, %v13575_v61 }
 0x24f   : > { %v2143_v24 = vmul.f32 %v13413_v20, %v9663_v42  ;;  %v13591_v9 = vrot.slane %v13590_v57, 1  ;;  %v1788_v46 = vrot.slane %v1702_v43, 1  ;;  %v2144_v2 = vmul.f32 %v13413_v20, %v13577_v13  ;;  %v13593_v43 = vld [vmem:[#allocation44_spill] sm:$0xff] }
 0x250   : > { %v1790_v59 = vrot.slane %v1703_v12, 1  ;;  %v1571_v34 = vsel %vm893_vm0, %v1568_v6, %v1570_v60  ;;  %v2009_v52 = vrot.slane %v1922_v23, 2  ;;  %v2011_v7 = vrot.slane %v1923_v35, 2  ;;  %v13595_v60 = vld [vmem:[#allocation63_spill] sm:$0xff] }
 0x251   : > { %v1569_v16 = vsel %vm893_vm0, %v13591_v9, %v1568_v6  ;;  %v1665_v49 = vadd.f32 %v1571_v34, %v1225_v58  ;;  %v13592_v21 = vrot.slane %v9995_v28, 1  ;;  %v2229_v57 = vrot.slane %v2143_v24, 2 }
 0x252   : > { %v1664_v19 = vadd.f32 %v1569_v16, %v1224_v62  ;;  %v1791_v42 = vsel %vm893_vm0, %v1788_v46, %v1790_v59  ;;  %v13594_v12 = vrot.slane %v13593_v43, 2  ;;  %v2012_v20 = vsel %vm1994_vm1, %v2009_v52, %v2011_v7  ;;  %v13597_v16 = vld [vmem:[#allocation48_spill] sm:$0xff] }
 0x253   : > { %v1789_v41 = vsel %vm893_vm0, %v13592_v21, %v1788_v46  ;;  %v1885_v9 = vadd.f32 %v1791_v42, %v1445_v25  ;;  %v2106_v62 = vadd.f32 %v2012_v20, %v1665_v49  ;;  %v13596_v23 = vrot.slane %v13595_v60, 2  ;;  %v13598_v25 = vld [vmem:[#allocation49_spill] sm:$0xff]  ;;  %v13600_v43 = vld [vmem:[#allocation64_spill] sm:$0xff] }
 0x254   : > { %v1884_v39 = vadd.f32 %v1789_v41, %v1444_v1  ;;  %v2010_v37 = vsel %vm1994_vm1, %v13594_v12, %v2009_v52  ;;  %v2231_v28 = vrot.slane %v2144_v2, 2  ;;  %v2363_v24 = vmul.f32 %v13597_v16, %v9672_v53  ;;  %v7464_v21 = vld [vmem:[%s8101_s2 + $0x40] sm:$0xff] }
 0x255   : > { %v2105_v6 = vadd.f32 %v2010_v37, %v1664_v19  ;;  %v2230_v58 = vsel %vm1994_vm1, %v13596_v23, %v2229_v57  ;;  %v2364_v1 = vmul.f32 %v13597_v16, %v13579_v31  ;;  %v2583_v46 = vmul.f32 %v13598_v25, %v9675_v4 }
 0x256   : > { %v2325_v35 = vadd.f32 %v2230_v58, %v1884_v39  ;;  %v2232_v59 = vsel %vm1994_vm1, %v2229_v57, %v2231_v28  ;;  %v2584_v20 = vmul.f32 %v13598_v25, %v13587_v29  ;;  %v2803_v37 = vmul.f32 %v13476_v47, %v10209_v18 }
 0x257   : > { %v2804_v39 = vmul.f32 %v13476_v47, %v10242_v26  ;;  %v2326_v2 = vadd.f32 %v2232_v59, %v1885_v9  ;;  %v2449_v34 = vrot.slane %v2363_v24, 2  ;;  %v2451_v53 = vrot.slane %v2364_v1, 2 }
 0x258   : > { %v2669_v19 = vrot.slane %v2583_v46, 2  ;;  %v2671_v52 = vrot.slane %v2584_v20, 2  ;;  %v2889_v7 = vrot.slane %v2803_v37, 2  ;;  %v3023_v4 = vmul.f32 %v7464_v21, %v13481_v38 }
 0x259   : > { %v2891_v49 = vrot.slane %v2804_v39, 2  ;;  %v13599_v41 = vrot.slane %v10034_v0, 2  ;;  %v2452_v57 = vsel %vm1994_vm1, %v2449_v34, %v2451_v53  ;;  %v13601_v12 = vrot.slane %v13600_v43, 2  ;;  %v13602_v0 = vld [vmem:[#allocation65_spill] sm:$0xff] }
 0x25a   : > { %v3024_v60 = vmul.f32 %v13481_v38, %v13575_v61  ;;  %v2546_v58 = vadd.f32 %v2452_v57, %v2106_v62  ;;  %v2672_v28 = vsel %vm1994_vm1, %v2669_v19, %v2671_v52  ;;  %v13603_v46 = vrot.slane %v13602_v0, 2  ;;  %v10331_v57 = vld [vmem:[%s8101_s2 + $0xb8] sm:$0xff] }
 0x25b   : > { %v2450_v42 = vsel %vm1994_vm1, %v13599_v41, %v2449_v34  ;;  %v2670_v9 = vsel %vm1994_vm1, %v13601_v12, %v2669_v19  ;;  %v2766_v1 = vadd.f32 %v2672_v28, %v2326_v2  ;;  %v2892_v20 = vsel %vm1994_vm1, %v2889_v7, %v2891_v49  ;;  %v10313_v41 = vld [vmem:[%s8101_s2 + $0x68] sm:$0xff]  ;;  %v10323_v2 = vld [vmem:[%s8101_s2 + $0x90] sm:$0xff] }
 0x25c   : > { %v2545_v23 = vadd.f32 %v2450_v42, %v2105_v6  ;;  %v2765_v24 = vadd.f32 %v2670_v9, %v2325_v35  ;;  %v2890_v59 = vsel %vm1994_vm1, %v13603_v46, %v2889_v7  ;;  %v3110_v37 = vrot.slane %v3023_v4, 3  ;;  %v13605_v19 = vld [vmem:[#allocation58_spill] sm:$0xff] }
 0x25d   : > { %v2986_v34 = vadd.f32 %v2892_v20, %v2546_v58  ;;  %v3112_v53 = vrot.slane %v3024_v60, 3  ;;  %v3244_v61 = vmul.f32 %v10313_v41, %v13528_v36  ;;  %v13604_v6 = vrot.slane %v10073_v27, 3  ;;  %v13606_v60 = vld [vmem:[#allocation66_spill] sm:$0xff] }
 0x25e   : > { %v2985_v39 = vadd.f32 %v2890_v59, %v2545_v23  ;;  %v3245_v35 = vmul.f32 %v13528_v36, %v13577_v13  ;;  %v3464_v52 = vmul.f32 %v10323_v2, %v13605_v19  ;;  %v3465_v7 = vmul.f32 %v13605_v19, %v13579_v31 }
 0x25f   : > { %v3111_v62 = vsel %vm3095_vm2, %v13604_v6, %v3110_v37  ;;  %v3113_v49 = vsel %vm3095_vm2, %v3110_v37, %v3112_v53  ;;  %v3330_v42 = vrot.slane %v3244_v61, 3  ;;  %v3684_v27 = vmul.f32 %v10331_v57, %v13384_v15 }
 0x260   : > { %v3206_v4 = vadd.f32 %v3111_v62, %v2765_v24  ;;  %v3207_v43 = vadd.f32 %v3113_v49, %v2766_v1  ;;  %v3332_v12 = vrot.slane %v3245_v35, 3  ;;  %v3550_v13 = vrot.slane %v3464_v52, 3  ;;  %v13608_v24 = vld [vmem:[#allocation60_spill] sm:$0xff]  ;;  %v13609_v1 = vld [vmem:[#allocation67_spill] sm:$0xff] }
 0x261   : > { %v3552_v9 = vrot.slane %v3465_v7, 3  ;;  %v13607_v23 = vrot.slane %v13606_v60, 3  ;;  %v3685_v31 = vmul.f32 %v13384_v15, %v13587_v29  ;;  %v3770_v28 = vrot.slane %v3684_v27, 3  ;;  %v7468_v27 = vld [vmem:[%s8101_s2 + $0x48] sm:$0xf] }
 0x262   : > { %v3904_v0 = vmul.f32 %v13608_v24, %v10209_v18  ;;  %v3333_v46 = vsel %vm3095_vm2, %v3330_v42, %v3332_v12  ;;  %v13610_v20 = vrot.slane %v13609_v1, 3  ;;  %v13611_v29 = vrot.slane %v10112_v44, 3 }
 0x263   : > { %v3331_v58 = vsel %vm3095_vm2, %v13607_v23, %v3330_v42  ;;  %v3553_v53 = vsel %vm3095_vm2, %v3550_v13, %v3552_v9  ;;  %v3427_v61 = vadd.f32 %v3333_v46, %v2986_v34  ;;  %v3772_v52 = vrot.slane %v3685_v31, 3 }
 0x264   : > { %v3426_v59 = vadd.f32 %v3331_v58, %v2985_v39  ;;  %v3551_v37 = vsel %vm3095_vm2, %v13610_v20, %v3550_v13  ;;  %v3647_v62 = vadd.f32 %v3553_v53, %v3207_v43  ;;  %v3771_v35 = vsel %vm3095_vm2, %v13611_v29, %v3770_v28  ;;  %v10370_v20 = vld [vmem:[%s8101_s2 + $0x98] sm:$0xf] }
 0x265   : > { %v3646_v6 = vadd.f32 %v3551_v37, %v3206_v4  ;;  %v3905_v49 = vmul.f32 %v13608_v24, %v10242_v26  ;;  %v3990_v42 = vrot.slane %v3904_v0, 3  ;;  %v4124_v39 = vmul.f32 %v7464_v21, %v8446_v54  ;;  %v10358_v4 = vld [vmem:[%s8101_s2 + $0x70] sm:$0xf]  ;;  %13613 = vst [vmem:[#allocation72_spill] sm:$0xff] %v10370_v20 }
 0x266   : > { %v3866_v7 = vadd.f32 %v3771_v35, %v3426_v59  ;;  %v4125_v12 = vmul.f32 %v7468_v27, %v8446_v54  ;;  %v4345_v34 = vmul.f32 %v10313_v41, %v8450_v10  ;;  %v4346_v44 = vmul.f32 %v10358_v4, %v8450_v10 }
 0x267   : > { %v3773_v43 = vsel %vm3095_vm2, %v3770_v28, %v3772_v52  ;;  %v13612_v13 = vrot.slane %v10121_v50, 3  ;;  %v3992_v60 = vrot.slane %v3905_v49, 3  ;;  %v4565_v21 = vmul.f32 %v10323_v2, %v8509_v5 }
 0x268   : > { %v3867_v23 = vadd.f32 %v3773_v43, %v3427_v61  ;;  %v4211_v31 = vrot.slane %v4124_v39, 4  ;;  %v4213_v0 = vrot.slane %v4125_v12, 4  ;;  %v4431_v59 = vrot.slane %v4345_v34, 4  ;;  %v10388_v43 = vld [vmem:[%s8101_s2 + $0xc0] sm:$0xf] }
 0x269   : > { %v3991_v9 = vsel %vm3095_vm2, %v13612_v13, %v3990_v42  ;;  %v3993_v46 = vsel %vm3095_vm2, %v3990_v42, %v3992_v60  ;;  %v4433_v1 = vrot.slane %v4346_v44, 4  ;;  %v4566_v50 = vmul.f32 %v10370_v20, %v8509_v5  ;;  %13617 = vst [vmem:[#allocation73_spill] sm:$0xff] %v10388_v43 }
 0x26a   : > { %v4086_v58 = vadd.f32 %v3991_v9, %v3646_v6  ;;  %v4087_v28 = vadd.f32 %v3993_v46, %v3647_v62  ;;  %v13614_v37 = vrot.slane %v10139_v17, 4  ;;  %v4214_v61 = vsel %vm4196_vm3, %v4211_v31, %v4213_v0 }
 0x26b   : > { %v4651_v6 = vrot.slane %v4565_v21, 4  ;;  %v4308_v35 = vadd.f32 %v4214_v61, %v3867_v23  ;;  %v13615_v52 = vrot.slane %v10151_v8, 4  ;;  %v4434_v42 = vsel %vm4196_vm3, %v4431_v59, %v4433_v1  ;;  %v13618_v1 = vld [vmem:[#allocation33_spill] sm:$0xff] }
 0x26c   : > { %v4212_v53 = vsel %vm4196_vm3, %v13614_v37, %v4211_v31  ;;  %v4528_v27 = vadd.f32 %v4434_v42, %v4087_v28  ;;  %v13616_v12 = vrot.slane %v10163_v11, 4  ;;  %v4653_v17 = vrot.slane %v4566_v50, 4  ;;  %v13619_v28 = vld [vmem:[#allocation68_spill] sm:$0xff] }
 0x26d   : > { %v4307_v29 = vadd.f32 %v4212_v53, %v3866_v7  ;;  %v4432_v49 = vsel %vm4196_vm3, %v13615_v52, %v4431_v59  ;;  %v4785_v44 = vmul.f32 %v10331_v57, %v8535_v14  ;;  %v4786_v8 = vmul.f32 %v10388_v43, %v8535_v14  ;;  %v13623_v52 = vld [vmem:[#allocation26_spill] sm:$0xff] }
 0x26e   : > { %v4527_v39 = vadd.f32 %v4432_v49, %v4086_v58  ;;  %v4652_v62 = vsel %vm4196_vm3, %v13616_v12, %v4651_v6  ;;  %v5005_v7 = vmul.f32 %v8539_v51, %v10209_v18  ;;  %v4654_v13 = vsel %vm4196_vm3, %v4651_v6, %v4653_v17  ;;  %v13621_v6 = vld [vmem:[#allocation70_spill] sm:$0xff] }
 0x26f   : > { %v4747_v34 = vadd.f32 %v4652_v62, %v4307_v29  ;;  %v5006_v11 = vmul.f32 %v8539_v51, %v10242_v26  ;;  %v481_v9 = vmul.f32 %v9888_v63, %v8174_v33  ;;  %v482_v60 = vmul.f32 %v9893_v56, %v8174_v33 }
 0x270   : > { %v4748_v21 = vadd.f32 %v4654_v13, %v4308_v35  ;;  %v4871_v23 = vrot.slane %v4785_v44, 4  ;;  %v4873_v58 = vrot.slane %v4786_v8, 4  ;;  %v5091_v31 = vrot.slane %v5005_v7, 4  ;;  %v13624_v13 = vld [vmem:[#allocation54_spill] sm:$0xff] }
 0x271   : > { %v5093_v0 = vrot.slane %v5006_v11, 4  ;;  %v549_v46 = vmul.f32 %v9902_v55, %v13393_v30  ;;  %v550_v59 = vmul.f32 %v9907_v32, %v13393_v30  ;;  %v617_v50 = vmul.f32 %v13618_v1, %v13397_v3  ;;  %v13625_v11 = vld [vmem:[#allocation35_spill] sm:$0xff] }
 0x272   : > { %v13620_v37 = vrot.slane %v13619_v28, 4  ;;  %v4874_v61 = vsel %vm4196_vm3, %v4871_v23, %v4873_v58  ;;  %v13622_v29 = vrot.slane %v13621_v6, 4  ;;  %v618_v49 = vmul.f32 %v13623_v52, %v13397_v3  ;;  %v10422_v6 = vld [vmem:[%s8101_s2 + $0xf0] sm:$0xff] }
 0x273   : > { %v4968_v12 = vadd.f32 %v4874_v61, %v4528_v27  ;;  %v5094_v62 = vsel %vm4196_vm3, %v5091_v31, %v5093_v0  ;;  %v649_v8 = vadd.f32 %v617_v50, %v481_v9  ;;  %v685_v28 = vmul.f32 %v13625_v11, %v13624_v13  ;;  %13627 = vst [vmem:[#allocation74_spill] sm:$0xff] %v10422_v6 }
 0x274   : > { %v4872_v53 = vsel %vm4196_vm3, %v13620_v37, %v4871_v23  ;;  %v5092_v35 = vsel %vm4196_vm3, %v13622_v29, %v5091_v31  ;;  %v5188_v44 = vadd.f32 %v5094_v62, %v4748_v21  ;;  %v650_v7 = vadd.f32 %v618_v49, %v482_v60  ;;  %v13626_v23 = vld [vmem:[#allocation57_spill] sm:$0xff]  ;;  %v13631_v62 = vld [vmem:[#allocation36_spill] sm:$0xff] }
 0x275   : > { %v4967_v42 = vadd.f32 %v4872_v53, %v4527_v39  ;;  %v5187_v17 = vadd.f32 %v5092_v35, %v4747_v34  ;;  %v686_v58 = vmul.f32 %v13625_v11, %v13626_v23  ;;  %v753_v29 = vmul.f32 %v10422_v6, %v8211_v45  ;;  %v10427_v39 = vld [vmem:[%s8101_s2 + $0xf8] sm:$0xff]  ;;  %v13629_v53 = vld [vmem:[#allocation34_spill] sm:$0xff] }
 0x276   : > { %13628 = vst [vmem:[#allocation75_spill] sm:$0xff] %v10427_v39  ;;  %v754_v27 = vmul.f32 %v10427_v39, %v8211_v45  ;;  %v5220_v34 = vadd.f32 %v5188_v44, %v4968_v12  ;;  %v717_v9 = vadd.f32 %v685_v28, %v549_v46  ;;  %v823_v60 = vmul.f32 %v9888_v63, %v13574_v40  ;;  %v13632_v44 = vld [vmem:[#allocation28_spill] sm:$0xff] }
 0x277   : > { %v5219_v37 = vadd.f32 %v5187_v17, %v4967_v42  ;;  %v824_v21 = vmul.f32 %v9893_v56, %v13574_v40  ;;  %v718_v31 = vadd.f32 %v686_v58, %v550_v59  ;;  %v785_v0 = vadd.f32 %v753_v29, %v649_v8  ;;  %v13634_v8 = vld [vmem:[#allocation40_spill] sm:$0xff]  ;;  %v13635_v29 = vld [vmem:[#allocation39_spill] sm:$0xff] }
 0x278   : > { %v786_v50 = vadd.f32 %v754_v27, %v650_v7  ;;  %v10437_v61 = vmul.f32 %v13629_v53, %v13574_v40  ;;  %v912_v49 = vrot.slane %v823_v60, 1  ;;  %v1044_v12 = vmul.f32 %v9902_v55, %v13631_v62 }
 0x279   : > { %v5248_v35 = vpack.c.bf16 %v5220_v34, %v5219_v37  ;;  %v913_v42 = vrot.slane %v824_v21, 1  ;;  %v1045_v17 = vmul.f32 %v9907_v32, %v13631_v62  ;;  %v10446_v59 = vmul.f32 %v13632_v44, %v13631_v62  ;;  %v13642_v62 = vld [vmem:[#allocation47_spill] sm:$0xff] }
 0x27a   : > { %13630 = vst [vmem:[#allocation76_spill] sm:$0xff] %v10437_v61  ;;  %v13075_v46 = vrot.slane %v10437_v61, 1  ;;  %v1264_v7 = vmul.f32 %v13618_v1, %v13634_v8  ;;  %v1132_v37 = vrot.slane %v1044_v12, 1  ;;  %v1265_v58 = vmul.f32 %v13623_v52, %v13634_v8 }
 0x27b   : > { %13633 = vst [vmem:[#allocation77_spill] sm:$0xff] %v10446_v59  ;;  %7103 = vmatmul.mubr.bf16.gmra.mrb[20].mxu1 %v5248_v35  ;;  %5484 = vmatmul.mubr.bf16.gmra.mrb[12].mxu0 %v5248_v35  ;;  %v914_v28 = vsel %vm893_vm0, %v912_v49, %v913_v42  ;;  %v10455_v27 = vmul.f32 %v13635_v29, %v13634_v8  ;;  %v1133_v21 = vrot.slane %v1045_v17, 1  ;;  %v13076_v26 = vrot.slane %v10446_v59, 1 }
 0x27c   : > { %v916_v34 = vsel %vm893_vm0, %v913_v42, %v13075_v46  ;;  %v1006_v60 = vadd.f32 %v914_v28, %v717_v9  ;;  %5493 = vmatprep.mubr.bf16.mxu0 %v13586_v22  ;;  %v1352_v49 = vrot.slane %v1264_v7, 1  ;;  %v1353_v12 = vrot.slane %v1265_v58, 1  ;;  %v13639_v22 = vld [vmem:[#allocation43_spill] sm:$0xff] }
 0x27d   : > { %13636 = vst [vmem:[#allocation78_spill] sm:$0xff] %v10455_v27  ;;  %v1007_v35 = vadd.f32 %v916_v34, %v718_v31  ;;  %v13079_v43 = vrot.slane %v10455_v27, 1  ;;  %v1134_v20 = vsel %vm893_vm0, %v1132_v37, %v1133_v21  ;;  %v1136_v61 = vsel %vm893_vm0, %v1133_v21, %v13076_v26  ;;  %v13637_v34 = vld [vmem:[#allocation38_spill] sm:$0xff] }
 0x27e   : > { %v1484_v9 = vmul.f32 %v8265_v48, %v13624_v13  ;;  %v1485_v42 = vmul.f32 %v8265_v48, %v13626_v23  ;;  %v1226_v17 = vadd.f32 %v1134_v20, %v785_v0  ;;  %v1227_v28 = vadd.f32 %v1136_v61, %v786_v50  ;;  %v10484_v0 = vld [vmem:[%s8101_s2 + $0x100] sm:$0xff] }
 0x27f   : > { %v1354_v31 = vsel %vm893_vm0, %v1352_v49, %v1353_v12  ;;  %v1356_v7 = vsel %vm893_vm0, %v1353_v12, %v13079_v43  ;;  %v10477_v46 = vmul.f32 %v8265_v48, %v13637_v34  ;;  %v1704_v59 = vmul.f32 %v10422_v6, %v13639_v22  ;;  %13640 = vst [vmem:[#allocation80_spill] sm:$0xff] %v10484_v0 }
 0x280   : > { %v1446_v58 = vadd.f32 %v1354_v31, %v1006_v60  ;;  %v1447_v37 = vadd.f32 %v1356_v7, %v1007_v35  ;;  %v1572_v21 = vrot.slane %v1484_v9, 1  ;;  %v1573_v26 = vrot.slane %v1485_v42, 1  ;;  %v13641_v60 = vld [vmem:[#allocation31_spill] sm:$0xff] }
 0x281   : > { %13638 = vst [vmem:[#allocation79_spill] sm:$0xff] %v10477_v46  ;;  %v1705_v20 = vmul.f32 %v10427_v39, %v13639_v22  ;;  %v10488_v50 = vmul.f32 %v10484_v0, %v13639_v22  ;;  %v13093_v61 = vrot.slane %v10477_v46, 1  ;;  %v1924_v35 = vmul.f32 %v9888_v63, %v13641_v60 }
 0x282   : > { %v1925_v49 = vmul.f32 %v9893_v56, %v13641_v60  ;;  %v10497_v12 = vmul.f32 %v13629_v53, %v13641_v60  ;;  %v1574_v9 = vsel %vm893_vm0, %v1572_v21, %v1573_v26  ;;  %v1792_v42 = vrot.slane %v1704_v59, 1 }
 0x283   : > { %v1793_v31 = vrot.slane %v1705_v20, 1  ;;  %v13092_v7 = vrot.slane %v10488_v50, 1  ;;  %v1576_v43 = vsel %vm893_vm0, %v1573_v26, %v13093_v61  ;;  %v1666_v22 = vadd.f32 %v1574_v9, %v1226_v17 }
 0x284   : > { %v2013_v27 = vrot.slane %v1924_v35, 2  ;;  %v2014_v63 = vrot.slane %v1925_v49, 2  ;;  %v1667_v48 = vadd.f32 %v1576_v43, %v1227_v28  ;;  %v13091_v21 = vrot.slane %v10497_v12, 2 }
 0x285   : > { %v1794_v56 = vsel %vm893_vm0, %v1792_v42, %v1793_v31  ;;  %v1796_v60 = vsel %vm893_vm0, %v1793_v31, %v13092_v7  ;;  %v2145_v46 = vmul.f32 %v9902_v55, %v13642_v62  ;;  %v2146_v17 = vmul.f32 %v9907_v32, %v13642_v62 }
 0x286   : > { %v1886_v59 = vadd.f32 %v1794_v56, %v1446_v58  ;;  %v1887_v20 = vadd.f32 %v1796_v60, %v1447_v37  ;;  %v2015_v8 = vsel %vm1994_vm1, %v2013_v27, %v2014_v63  ;;  %v2017_v26 = vsel %vm1994_vm1, %v2014_v63, %v13091_v21 }
 0x287   : > { %v2107_v43 = vadd.f32 %v2015_v8, %v1666_v22  ;;  %v10519_v28 = vmul.f32 %v13632_v44, %v13642_v62  ;;  %v2108_v35 = vadd.f32 %v2017_v26, %v1667_v48  ;;  %v2233_v58 = vrot.slane %v2145_v46, 2 }
 0x288   : > { %v2365_v27 = vmul.f32 %v13618_v1, %v13597_v16  ;;  %v2366_v55 = vmul.f32 %v13623_v52, %v13597_v16  ;;  %v2234_v37 = vrot.slane %v2146_v17, 2  ;;  %v10528_v22 = vmul.f32 %v13635_v29, %v13597_v16 }
 0x289   : > { %v13090_v60 = vrot.slane %v10519_v28, 2  ;;  %v2585_v32 = vmul.f32 %v13598_v25, %v13624_v13  ;;  %v2586_v48 = vmul.f32 %v13598_v25, %v13626_v23  ;;  %v10536_v1 = vmul.f32 %v13598_v25, %v13637_v34 }
 0x28a   : > { %v2453_v8 = vrot.slane %v2365_v27, 2  ;;  %v2454_v49 = vrot.slane %v2366_v55, 2  ;;  %v2235_v52 = vsel %vm1994_vm1, %v2233_v58, %v2234_v37  ;;  %v13088_v9 = vrot.slane %v10528_v22, 2 }
 0x28b   : > { %v2237_v46 = vsel %vm1994_vm1, %v2234_v37, %v13090_v60  ;;  %v2673_v42 = vrot.slane %v2585_v32, 2  ;;  %v2327_v13 = vadd.f32 %v2235_v52, %v1886_v59  ;;  %v2674_v56 = vrot.slane %v2586_v48, 2 }
 0x28c   : > { %v2328_v31 = vadd.f32 %v2237_v46, %v1887_v20  ;;  %v2455_v63 = vsel %vm1994_vm1, %v2453_v8, %v2454_v49  ;;  %v2457_v23 = vsel %vm1994_vm1, %v2454_v49, %v13088_v9  ;;  %v13089_v17 = vrot.slane %v10536_v1, 2  ;;  %v7475_v8 = vld [vmem:[%s8101_s2 + $0x50] sm:$0xff]  ;;  %v7476_v46 = vld [vmem:[%s8101_s2 + $0x58] sm:$0xff] }
 0x28d   : > { %v2547_v26 = vadd.f32 %v2455_v63, %v2107_v43  ;;  %v2805_v58 = vmul.f32 %v10422_v6, %v13476_v47  ;;  %v2548_v27 = vadd.f32 %v2457_v23, %v2108_v35  ;;  %v2675_v55 = vsel %vm1994_vm1, %v2673_v42, %v2674_v56  ;;  %v10570_v9 = vld [vmem:[%s8101_s2 + $0x78] sm:$0xff] }
 0x28e   : > { %v2806_v59 = vmul.f32 %v10427_v39, %v13476_v47  ;;  %v10555_v20 = vmul.f32 %v10484_v0, %v13476_v47  ;;  %v2677_v43 = vsel %vm1994_vm1, %v2674_v56, %v13089_v17  ;;  %v2767_v37 = vadd.f32 %v2675_v55, %v2327_v13  ;;  %13643 = vst [vmem:[#allocation81_spill] sm:$0xff] %v10570_v9  ;;  %v10575_v56 = vld [vmem:[%s8101_s2 + $0x80] sm:$0xff] }
 0x28f   : > { %v2893_v32 = vrot.slane %v2805_v58, 2  ;;  %v3025_v35 = vmul.f32 %v7475_v8, %v13481_v38  ;;  %v2768_v49 = vadd.f32 %v2677_v43, %v2328_v31  ;;  %v3026_v42 = vmul.f32 %v7476_v46, %v13481_v38  ;;  %13644 = vst [vmem:[#allocation82_spill] sm:$0xff] %v10575_v56 }
 0x290   : > { %v2894_v48 = vrot.slane %v2806_v59, 2  ;;  %v13094_v52 = vrot.slane %v10555_v20, 2  ;;  %v10567_v63 = vmul.f32 %v13629_v53, %v13481_v38  ;;  %v3246_v13 = vmul.f32 %v10570_v9, %v13528_v36 }
 0x291   : > { %v3114_v23 = vrot.slane %v3025_v35, 3  ;;  %v3247_v31 = vmul.f32 %v10575_v56, %v13528_v36  ;;  %v3115_v55 = vrot.slane %v3026_v42, 3  ;;  %v10585_v59 = vmul.f32 %v13632_v44, %v13528_v36 }
 0x292   : > { %v2895_v58 = vsel %vm1994_vm1, %v2893_v32, %v2894_v48  ;;  %v2897_v53 = vsel %vm1994_vm1, %v2894_v48, %v13094_v52  ;;  %v13095_v17 = vrot.slane %v10567_v63, 3  ;;  %v3334_v60 = vrot.slane %v3246_v13, 3  ;;  %v10591_v32 = vld [vmem:[%s8101_s2 + $0xa0] sm:$0xff] }
 0x293   : > { %13645 = vst [vmem:[#allocation83_spill] sm:$0xff] %v10585_v59  ;;  %v2987_v43 = vadd.f32 %v2895_v58, %v2547_v26  ;;  %v2988_v35 = vadd.f32 %v2897_v53, %v2548_v27  ;;  %v3116_v21 = vsel %vm3095_vm2, %v3114_v23, %v3115_v55  ;;  %v3335_v7 = vrot.slane %v3247_v31, 3  ;;  %13646 = vst [vmem:[#allocation84_spill] sm:$0xff] %v10591_v32  ;;  %v10599_v27 = vld [vmem:[%s8101_s2 + $0xa8] sm:$0xff] }
 0x294   : > { %v13097_v61 = vrot.slane %v10585_v59, 3  ;;  %v3466_v48 = vmul.f32 %v10591_v32, %v13605_v19  ;;  %v3118_v44 = vsel %vm3095_vm2, %v3115_v55, %v13095_v17  ;;  %v3208_v26 = vadd.f32 %v3116_v21, %v2767_v37  ;;  %13647 = vst [vmem:[#allocation85_spill] sm:$0xff] %v10599_v27  ;;  %v10613_v17 = vld [vmem:[%s8101_s2 + $0xc8] sm:$0xff] }
 0x295   : > { %v3467_v42 = vmul.f32 %v10599_v27, %v13605_v19  ;;  %v10605_v23 = vmul.f32 %v13635_v29, %v13605_v19  ;;  %v3209_v13 = vadd.f32 %v3118_v44, %v2768_v49  ;;  %v3336_v31 = vsel %vm3095_vm2, %v3334_v60, %v3335_v7  ;;  %v10618_v29 = vld [vmem:[%s8101_s2 + $0xd0] sm:$0xff]  ;;  %v7483_v19 = vld [vmem:[%s8101_s2 + $0x60] sm:$0xff] }
 0x296   : > { %v3338_v58 = vsel %vm3095_vm2, %v3335_v7, %v13097_v61  ;;  %v3554_v53 = vrot.slane %v3466_v48, 3  ;;  %v3428_v52 = vadd.f32 %v3336_v31, %v2987_v43  ;;  %v3686_v36 = vmul.f32 %v10613_v17, %v13384_v15  ;;  %13649 = vst [vmem:[#allocation87_spill] sm:$0xff] %v10618_v29 }
 0x297   : > { %13648 = vst [vmem:[#allocation86_spill] sm:$0xff] %v10605_v23  ;;  %v3429_v55 = vadd.f32 %v3338_v58, %v2988_v35  ;;  %v3555_v21 = vrot.slane %v3467_v42, 3  ;;  %v13101_v37 = vrot.slane %v10605_v23, 3  ;;  %v3687_v60 = vmul.f32 %v10618_v29, %v13384_v15 }
 0x298   : > { %v10624_v49 = vmul.f32 %v13384_v15, %v13637_v34  ;;  %v3906_v7 = vmul.f32 %v10422_v6, %v13608_v24  ;;  %v3907_v48 = vmul.f32 %v10427_v39, %v13608_v24  ;;  %v10636_v44 = vmul.f32 %v10484_v0, %v13608_v24 }
 0x299   : > { %v3556_v43 = vsel %vm3095_vm2, %v3554_v53, %v3555_v21  ;;  %v3558_v35 = vsel %vm3095_vm2, %v3555_v21, %v13101_v37  ;;  %v3774_v31 = vrot.slane %v3686_v36, 3  ;;  %v3775_v58 = vrot.slane %v3687_v60, 3 }
 0x29a   : > { %v3648_v42 = vadd.f32 %v3556_v43, %v3208_v26  ;;  %v3649_v34 = vadd.f32 %v3558_v35, %v3209_v13  ;;  %v13105_v61 = vrot.slane %v10624_v49, 3  ;;  %v3994_v59 = vrot.slane %v3906_v7, 3 }
 0x29b   : > { %v3995_v15 = vrot.slane %v3907_v48, 3  ;;  %v13104_v53 = vrot.slane %v10636_v44, 3  ;;  %v3776_v23 = vsel %vm3095_vm2, %v3774_v31, %v3775_v58  ;;  %v4126_v21 = vmul.f32 %v7475_v8, %v8446_v54 }
 0x29c   : > { %v4127_v37 = vmul.f32 %v7476_v46, %v8446_v54  ;;  %v10645_v24 = vmul.f32 %v7483_v19, %v8446_v54  ;;  %v3778_v36 = vsel %vm3095_vm2, %v3775_v58, %v13105_v61  ;;  %v3868_v26 = vadd.f32 %v3776_v23, %v3428_v52  ;;  %v10660_v52 = vld [vmem:[%s8101_s2 + $0x88] sm:$0xff] }
 0x29d   : > { %v3996_v13 = vsel %vm3095_vm2, %v3994_v59, %v3995_v15  ;;  %v3998_v60 = vsel %vm3095_vm2, %v3995_v15, %v13104_v53  ;;  %v3869_v8 = vadd.f32 %v3778_v36, %v3429_v55  ;;  %v4215_v46 = vrot.slane %v4126_v21, 4  ;;  %13650 = vst [vmem:[#allocation88_spill] sm:$0xff] %v10660_v52  ;;  %v10671_v55 = vld [vmem:[%s8101_s2 + $0xb0] sm:$0xff] }
 0x29e   : > { %v4088_v7 = vadd.f32 %v3996_v13, %v3648_v42  ;;  %v4089_v43 = vadd.f32 %v3998_v60, %v3649_v34  ;;  %v4216_v35 = vrot.slane %v4127_v37, 4  ;;  %v13117_v48 = vrot.slane %v10645_v24, 4  ;;  %13651 = vst [vmem:[#allocation45_spill] sm:$0xff] %v10671_v55 }
 0x29f   : > { %v4347_v31 = vmul.f32 %v10570_v9, %v8450_v10  ;;  %v4348_v58 = vmul.f32 %v10575_v56, %v8450_v10  ;;  %v10664_v59 = vmul.f32 %v10660_v52, %v8450_v10  ;;  %v4567_v15 = vmul.f32 %v10591_v32, %v8509_v5 }
 0x2a0   : > { %v4568_v23 = vmul.f32 %v10599_v27, %v8509_v5  ;;  %v10675_v37 = vmul.f32 %v10671_v55, %v8509_v5  ;;  %v4217_v42 = vsel %vm4196_vm3, %v4215_v46, %v4216_v35  ;;  %v4219_v34 = vsel %vm4196_vm3, %v4216_v35, %v13117_v48 }
 0x2a1   : > { %v4435_v21 = vrot.slane %v4347_v31, 4  ;;  %v4436_v36 = vrot.slane %v4348_v58, 4  ;;  %v4309_v13 = vadd.f32 %v4217_v42, %v3868_v26  ;;  %v4310_v60 = vadd.f32 %v4219_v34, %v3869_v8  ;;  %v10692_v8 = vld [vmem:[%s8101_s2 + $0xd8] sm:$0xff] }
 0x2a2   : > { %v13114_v53 = vrot.slane %v10664_v59, 4  ;;  %v4655_v61 = vrot.slane %v4567_v15, 4  ;;  %v4656_v32 = vrot.slane %v4568_v23, 4  ;;  %v13115_v56 = vrot.slane %v10675_v37, 4  ;;  %13652 = vst [vmem:[#allocation46_spill] sm:$0xff] %v10692_v8 }
 0x2a3   : > { %v4437_v27 = vsel %vm4196_vm3, %v4435_v21, %v4436_v36  ;;  %v4787_v9 = vmul.f32 %v10613_v17, %v8535_v14  ;;  %v4788_v26 = vmul.f32 %v10618_v29, %v8535_v14  ;;  %v10696_v31 = vmul.f32 %v10692_v8, %v8535_v14 }
 0x2a4   : > { %v4439_v46 = vsel %vm4196_vm3, %v4436_v36, %v13114_v53  ;;  %v4529_v35 = vadd.f32 %v4437_v27, %v4088_v7  ;;  %v4657_v15 = vsel %vm4196_vm3, %v4655_v61, %v4656_v32  ;;  %v4659_v23 = vsel %vm4196_vm3, %v4656_v32, %v13115_v56 }
 0x2a5   : > { %v4530_v58 = vadd.f32 %v4439_v46, %v4089_v43  ;;  %v4875_v42 = vrot.slane %v4787_v9, 4  ;;  %v4749_v34 = vadd.f32 %v4657_v15, %v4309_v13  ;;  %v4750_v21 = vadd.f32 %v4659_v23, %v4310_v60 }
 0x2a6   : > { %v4876_v27 = vrot.slane %v4788_v26, 4  ;;  %v13116_v7 = vrot.slane %v10696_v31, 4  ;;  %v5007_v36 = vmul.f32 %v10422_v6, %v8539_v51  ;;  %v5008_v53 = vmul.f32 %v10427_v39, %v8539_v51 }
 0x2a7   : > { %v10709_v43 = vmul.f32 %v10484_v0, %v8539_v51  ;;  %v483_v61 = vmul.f32 %v7483_v19, %v8174_v33  ;;  %v484_v13 = vmul.f32 %v10313_v41, %v8174_v33  ;;  %v551_v60 = vmul.f32 %v10660_v52, %v13393_v30 }
 0x2a8   : > { %v4877_v32 = vsel %vm4196_vm3, %v4875_v42, %v4876_v27  ;;  %v4879_v9 = vsel %vm4196_vm3, %v4876_v27, %v13116_v7  ;;  %v5095_v15 = vrot.slane %v5007_v36, 4  ;;  %v5096_v23 = vrot.slane %v5008_v53, 4 }
 0x2a9   : > { %v4969_v46 = vadd.f32 %v4877_v32, %v4529_v35  ;;  %v4970_v26 = vadd.f32 %v4879_v9, %v4530_v58  ;;  %v13133_v56 = vrot.slane %v10709_v43, 4  ;;  %v552_v19 = vmul.f32 %v10323_v2, %v13393_v30 }
 0x2aa   : > { %v619_v42 = vmul.f32 %v10671_v55, %v13397_v3  ;;  %v620_v27 = vmul.f32 %v10331_v57, %v13397_v3  ;;  %v5097_v7 = vsel %vm4196_vm3, %v5095_v15, %v5096_v23  ;;  %v687_v35 = vmul.f32 %v10692_v8, %v13625_v11  ;;  %v10738_v15 = vld [vmem:[%s8101_s2 + $0x108] sm:$0xff] }
 0x2ab   : > { %v688_v53 = vmul.f32 %v13625_v11, %v10209_v18  ;;  %v755_v58 = vmul.f32 %v10484_v0, %v8211_v45  ;;  %v5099_v36 = vsel %vm4196_vm3, %v5096_v23, %v13133_v56  ;;  %v5189_v32 = vadd.f32 %v5097_v7, %v4749_v34  ;;  %v13653_v7 = vld [vmem:[#allocation36_spill] sm:$0xff] }
 0x2ac   : > { %v651_v9 = vadd.f32 %v619_v42, %v483_v61  ;;  %v652_v48 = vadd.f32 %v620_v27, %v484_v13  ;;  %v5190_v55 = vadd.f32 %v5099_v36, %v4750_v21  ;;  %v719_v52 = vadd.f32 %v687_v35, %v551_v60  ;;  %v13654_v61 = vld [vmem:[#allocation72_spill] sm:$0xff]  ;;  %v13656_v27 = vld [vmem:[#allocation73_spill] sm:$0xff] }
 0x2ad   : > { %v720_v39 = vadd.f32 %v688_v53, %v552_v19  ;;  %v756_v8 = vmul.f32 %v10738_v15, %v8211_v45  ;;  %v5221_v6 = vadd.f32 %v5189_v32, %v4969_v46  ;;  %v826_v0 = vmul.f32 %v10313_v41, %v13574_v40  ;;  %v13655_v42 = vld [vmem:[#allocation40_spill] sm:$0xff]  ;;  %v13662_v45 = vld [vmem:[#allocation78_spill] sm:$0xff] }
 0x2ae   : > { %v787_v11 = vadd.f32 %v755_v58, %v651_v9  ;;  %v827_v29 = vmul.f32 %v10358_v4, %v13574_v40  ;;  %v5222_v23 = vadd.f32 %v5190_v55, %v4970_v26  ;;  %v1047_v21 = vmul.f32 %v10323_v2, %v13653_v7  ;;  %v13657_v55 = vld [vmem:[#allocation42_spill] sm:$0xff]  ;;  %v13660_v40 = vld [vmem:[#allocation77_spill] sm:$0xff] }
 0x2af   : > { %v788_v34 = vadd.f32 %v756_v8, %v652_v48  ;;  %v1048_v13 = vmul.f32 %v13654_v61, %v13653_v7  ;;  %v917_v60 = vrot.slane %v826_v0, 1  ;;  %v1267_v46 = vmul.f32 %v10331_v57, %v13655_v42  ;;  %v13658_v8 = vld [vmem:[#allocation76_spill] sm:$0xff] }
 0x2b0   : > { %v919_v19 = vrot.slane %v827_v29, 1  ;;  %v1268_v35 = vmul.f32 %v13656_v27, %v13655_v42  ;;  %v5249_v53 = vpack.c.bf16 %v5222_v23, %v5221_v6  ;;  %v1137_v58 = vrot.slane %v1047_v21, 1 }
 0x2b1   : > { %v1139_v36 = vrot.slane %v1048_v13, 1  ;;  %v1487_v48 = vmul.f32 %v13657_v55, %v10209_v18  ;;  %v13659_v26 = vrot.slane %v13658_v8, 1  ;;  %v1357_v0 = vrot.slane %v1267_v46, 1 }
 0x2b2   : > { %v920_v9 = vsel %vm893_vm0, %v917_v60, %v919_v19  ;;  %v1359_v29 = vrot.slane %v1268_v35, 1  ;;  %7106 = vmatprep.mubr.bf16.mxu1 %v5249_v53  ;;  %v13661_v42 = vrot.slane %v13660_v40, 1  ;;  %v13663_v8 = vrot.slane %v13662_v45, 1  ;;  %5494 = vmatmul.mubr.bf16.gmra.mrb[16].mxu0 %v5249_v53  ;;  %v13664_v35 = vld [vmem:[#allocation71_spill] sm:$0xff] }
 0x2b3   : > { %v918_v32 = vsel %vm893_vm0, %v13659_v26, %v917_v60  ;;  %v1009_v7 = vadd.f32 %v920_v9, %v720_v39  ;;  %v1140_v23 = vsel %vm893_vm0, %v1137_v58, %v1139_v36  ;;  %v1488_v39 = vmul.f32 %v13657_v55, %v13664_v35 }
 0x2b4   : > { %v1008_v56 = vadd.f32 %v918_v32, %v719_v52  ;;  %v1138_v6 = vsel %vm893_vm0, %v13661_v42, %v1137_v58  ;;  %v1229_v13 = vadd.f32 %v1140_v23, %v788_v34  ;;  %v1358_v26 = vsel %vm893_vm0, %v13663_v8, %v1357_v0  ;;  %v13666_v42 = vld [vmem:[#allocation43_spill] sm:$0xff] }
 0x2b5   : > { %v1228_v21 = vadd.f32 %v1138_v6, %v787_v11  ;;  %v1360_v60 = vsel %vm893_vm0, %v1357_v0, %v1359_v29  ;;  %v1577_v52 = vrot.slane %v1487_v48, 1  ;;  %v13665_v40 = vmov 0   ;;  %v10774_v11 = vld [vmem:[%s8101_s2 + $0x110] sm:$0xf] }
 0x2b6   : > { %v1448_v19 = vadd.f32 %v1358_v26, %v1008_v56  ;;  %v1449_v46 = vadd.f32 %v1360_v60, %v1009_v7  ;;  %5503 = vmatprep.mubr.bf16.mxu0 %v13665_v40  ;;  %v1707_v58 = vmul.f32 %v10738_v15, %v13666_v42  ;;  %13667 = vst [vmem:[#allocation51_spill] sm:$0xff] %v10774_v11  ;;  %v13668_v34 = vld [vmem:[#allocation31_spill] sm:$0xff]  ;;  %v1579_v32 = vrot.slane %v1488_v39, 1 }
 0x2b7   : > { %v1708_v45 = vmul.f32 %v10774_v11, %v13666_v42  ;;  %v1927_v36 = vmul.f32 %v10313_v41, %v13668_v34  ;;  %v1928_v56 = vmul.f32 %v10358_v4, %v13668_v34  ;;  %v13669_v7 = vld [vmem:[#allocation79_spill] sm:$0xff]  ;;  %v2148_v9 = vmul.f32 %v10323_v2, %v13642_v62 }
 0x2b8   : > { %v13670_v53 = vrot.slane %v13669_v7, 1  ;;  %v2149_v0 = vmul.f32 %v13654_v61, %v13642_v62  ;;  %v1797_v6 = vrot.slane %v1707_v58, 1  ;;  %v1580_v26 = vsel %vm893_vm0, %v1577_v52, %v1579_v32 }
 0x2b9   : > { %v1799_v23 = vrot.slane %v1708_v45, 1  ;;  %v2018_v8 = vrot.slane %v1927_v36, 2  ;;  %v2020_v60 = vrot.slane %v1928_v56, 2  ;;  %v2238_v42 = vrot.slane %v2148_v9, 2 }
 0x2ba   : > { %v1578_v48 = vsel %vm893_vm0, %v13670_v53, %v1577_v52  ;;  %v2240_v34 = vrot.slane %v2149_v0, 2  ;;  %v1669_v55 = vadd.f32 %v1580_v26, %v1229_v13  ;;  %v13671_v7 = vrot.slane %v10488_v50, 1 }
 0x2bb   : > { %v1668_v29 = vadd.f32 %v1578_v48, %v1228_v21  ;;  %v1800_v53 = vsel %vm893_vm0, %v1797_v6, %v1799_v23  ;;  %v13672_v40 = vrot.slane %v10497_v12, 2  ;;  %v2021_v45 = vsel %vm1994_vm1, %v2018_v8, %v2020_v60 }
 0x2bc   : > { %v1798_v39 = vsel %vm893_vm0, %v13671_v7, %v1797_v6  ;;  %v1889_v58 = vadd.f32 %v1800_v53, %v1449_v46  ;;  %v2110_v52 = vadd.f32 %v2021_v45, %v1669_v55  ;;  %v13673_v56 = vrot.slane %v10519_v28, 2 }
 0x2bd   : > { %v2019_v62 = vsel %vm1994_vm1, %v13672_v40, %v2018_v8  ;;  %v1888_v21 = vadd.f32 %v1798_v39, %v1448_v19  ;;  %v2241_v50 = vsel %vm1994_vm1, %v2238_v42, %v2240_v34  ;;  %v2368_v48 = vmul.f32 %v10331_v57, %v13597_v16 }
 0x2be   : > { %v2109_v36 = vadd.f32 %v2019_v62, %v1668_v29  ;;  %v2239_v13 = vsel %vm1994_vm1, %v13673_v56, %v2238_v42  ;;  %v2330_v9 = vadd.f32 %v2241_v50, %v1889_v58  ;;  %v2369_v12 = vmul.f32 %v13656_v27, %v13597_v16 }
 0x2bf   : > { %v2329_v32 = vadd.f32 %v2239_v13, %v1888_v21  ;;  %v2588_v19 = vmul.f32 %v13598_v25, %v10209_v18  ;;  %v2458_v46 = vrot.slane %v2368_v48, 2  ;;  %v2589_v62 = vmul.f32 %v13598_v25, %v13664_v35 }
 0x2c0   : > { %v2808_v28 = vmul.f32 %v10738_v15, %v13476_v47  ;;  %v2809_v55 = vmul.f32 %v10774_v11, %v13476_v47  ;;  %v2460_v40 = vrot.slane %v2369_v12, 2  ;;  %v3028_v34 = vmul.f32 %v10313_v41, %v13481_v38 }
 0x2c1   : > { %v2678_v42 = vrot.slane %v2588_v19, 2  ;;  %v3029_v0 = vmul.f32 %v10358_v4, %v13481_v38  ;;  %v13674_v18 = vrot.slane %v10528_v22, 2  ;;  %v2680_v6 = vrot.slane %v2589_v62, 2  ;;  %v13678_v62 = vld [vmem:[#allocation55_spill] sm:$0xff] }
 0x2c2   : > { %v2898_v23 = vrot.slane %v2808_v28, 2  ;;  %v2900_v8 = vrot.slane %v2809_v55, 2  ;;  %v2461_v26 = vsel %vm1994_vm1, %v2458_v46, %v2460_v40  ;;  %v13675_v7 = vrot.slane %v10536_v1, 2  ;;  %v10842_v55 = vld [vmem:[%s8101_s2 + $0xe0] sm:$0xff] }
 0x2c3   : > { %v2459_v29 = vsel %vm1994_vm1, %v13674_v18, %v2458_v46  ;;  %v3119_v53 = vrot.slane %v3028_v34, 3  ;;  %v2550_v21 = vadd.f32 %v2461_v26, %v2110_v52  ;;  %v2681_v58 = vsel %vm1994_vm1, %v2678_v42, %v2680_v6  ;;  %v13681_v18 = vld [vmem:[#allocation60_spill] sm:$0xff] }
 0x2c4   : > { %v2549_v60 = vadd.f32 %v2459_v29, %v2109_v36  ;;  %v2679_v39 = vsel %vm1994_vm1, %v13675_v7, %v2678_v42  ;;  %v13676_v22 = vrot.slane %v10555_v20, 2  ;;  %v2770_v13 = vadd.f32 %v2681_v58, %v2330_v9  ;;  %v13679_v20 = vld [vmem:[#allocation58_spill] sm:$0xff] }
 0x2c5   : > { %v2769_v45 = vadd.f32 %v2679_v39, %v2329_v32  ;;  %v2901_v50 = vsel %vm1994_vm1, %v2898_v23, %v2900_v8  ;;  %v13677_v36 = vrot.slane %v10567_v63, 3  ;;  %v3121_v19 = vrot.slane %v3029_v0, 3  ;;  %v13680_v63 = vld [vmem:[#allocation59_spill] sm:$0xff] }
 0x2c6   : > { %v2899_v56 = vsel %vm1994_vm1, %v13676_v22, %v2898_v23  ;;  %v2990_v12 = vadd.f32 %v2901_v50, %v2550_v21  ;;  %v3249_v52 = vmul.f32 %v10323_v2, %v13678_v62  ;;  %v3250_v32 = vmul.f32 %v13654_v61, %v13678_v62 }
 0x2c7   : > { %v2989_v48 = vadd.f32 %v2899_v56, %v2549_v60  ;;  %v3120_v1 = vsel %vm3095_vm2, %v13677_v36, %v3119_v53  ;;  %v3469_v28 = vmul.f32 %v10331_v57, %v13679_v20  ;;  %v3470_v9 = vmul.f32 %v13656_v27, %v13679_v20  ;;  %v13682_v60 = vld [vmem:[#allocation83_spill] sm:$0xff] }
 0x2c8   : > { %v3210_v46 = vadd.f32 %v3120_v1, %v2769_v45  ;;  %v3689_v40 = vmul.f32 %v10842_v55, %v13680_v63  ;;  %v3122_v42 = vsel %vm3095_vm2, %v3119_v53, %v3121_v19  ;;  %v3339_v34 = vrot.slane %v3249_v52, 3 }
 0x2c9   : > { %v3690_v0 = vmul.f32 %v13680_v63, %v13664_v35  ;;  %v3909_v29 = vmul.f32 %v10738_v15, %v13681_v18  ;;  %v3211_v6 = vadd.f32 %v3122_v42, %v2770_v13  ;;  %v3341_v23 = vrot.slane %v3250_v32, 3  ;;  %v13684_v35 = vld [vmem:[#allocation86_spill] sm:$0xff] }
 0x2ca   : > { %v3559_v8 = vrot.slane %v3469_v28, 3  ;;  %v3561_v26 = vrot.slane %v3470_v9, 3  ;;  %v13683_v7 = vrot.slane %v13682_v60, 3  ;;  %v3779_v21 = vrot.slane %v3689_v40, 3 }
 0x2cb   : > { %v3781_v58 = vrot.slane %v3690_v0, 3  ;;  %v3910_v53 = vmul.f32 %v10774_v11, %v13681_v18  ;;  %v3342_v45 = vsel %vm3095_vm2, %v3339_v34, %v3341_v23  ;;  %v13685_v56 = vrot.slane %v13684_v35, 3 }
 0x2cc   : > { %v3340_v39 = vsel %vm3095_vm2, %v13683_v7, %v3339_v34  ;;  %v3562_v13 = vsel %vm3095_vm2, %v3559_v8, %v3561_v26  ;;  %v3431_v36 = vadd.f32 %v3342_v45, %v2990_v12  ;;  %v13686_v52 = vrot.slane %v10624_v49, 3 }
 0x2cd   : > { %v3430_v22 = vadd.f32 %v3340_v39, %v2989_v48  ;;  %v3560_v50 = vsel %vm3095_vm2, %v13685_v56, %v3559_v8  ;;  %v3651_v19 = vadd.f32 %v3562_v13, %v3211_v6  ;;  %v3782_v28 = vsel %vm3095_vm2, %v3779_v21, %v3781_v58 }
 0x2ce   : > { %v3650_v1 = vadd.f32 %v3560_v50, %v3210_v46  ;;  %v3780_v32 = vsel %vm3095_vm2, %v13686_v52, %v3779_v21  ;;  %v3999_v40 = vrot.slane %v3909_v29, 3  ;;  %v4001_v42 = vrot.slane %v3910_v53, 3 }
 0x2cf   : > { %v3870_v9 = vadd.f32 %v3780_v32, %v3430_v22  ;;  %v3871_v34 = vadd.f32 %v3782_v28, %v3431_v36  ;;  %v4129_v48 = vmul.f32 %v10313_v41, %v8446_v54  ;;  %v4130_v0 = vmul.f32 %v10358_v4, %v8446_v54 }
 0x2d0   : > { %v4350_v12 = vmul.f32 %v10323_v2, %v8450_v10  ;;  %v13687_v46 = vrot.slane %v10636_v44, 3  ;;  %v4002_v6 = vsel %vm3095_vm2, %v3999_v40, %v4001_v42  ;;  %v4351_v29 = vmul.f32 %v13654_v61, %v8450_v10 }
 0x2d1   : > { %v4570_v23 = vmul.f32 %v10331_v57, %v8509_v5  ;;  %v4091_v8 = vadd.f32 %v4002_v6, %v3651_v19  ;;  %v4220_v26 = vrot.slane %v4129_v48, 4  ;;  %v4222_v4 = vrot.slane %v4130_v0, 4  ;;  %v10888_v57 = vld [vmem:[%s8101_s2 + $0xe8] sm:$0xf] }
 0x2d2   : > { %v4000_v49 = vsel %vm3095_vm2, %v13687_v46, %v3999_v40  ;;  %v4440_v60 = vrot.slane %v4350_v12, 4  ;;  %v4442_v7 = vrot.slane %v4351_v29, 4  ;;  %v4571_v2 = vmul.f32 %v13656_v27, %v8509_v5  ;;  %v13691_v40 = vld [vmem:[#allocation81_spill] sm:$0xff] }
 0x2d3   : > { %v4090_v41 = vadd.f32 %v4000_v49, %v3650_v1  ;;  %v4660_v44 = vrot.slane %v4570_v23, 4  ;;  %v13688_v39 = vrot.slane %v10645_v24, 4  ;;  %v4223_v58 = vsel %vm4196_vm3, %v4220_v26, %v4222_v4 }
 0x2d4   : > { %v4790_v61 = vmul.f32 %v10842_v55, %v8535_v14  ;;  %v4791_v53 = vmul.f32 %v10888_v57, %v8535_v14  ;;  %v4312_v22 = vadd.f32 %v4223_v58, %v3871_v34  ;;  %v13689_v35 = vrot.slane %v10664_v59, 4  ;;  %v13692_v34 = vld [vmem:[#allocation82_spill] sm:$0xff]  ;;  %v13698_v58 = vld [vmem:[#allocation35_spill] sm:$0xff] }
 0x2d5   : > { %v4221_v21 = vsel %vm4196_vm3, %v13688_v39, %v4220_v26  ;;  %v4443_v24 = vsel %vm4196_vm3, %v4440_v60, %v4442_v7  ;;  %v13690_v13 = vrot.slane %v10675_v37, 4  ;;  %v4662_v1 = vrot.slane %v4571_v2, 4  ;;  %v13697_v2 = vld [vmem:[#allocation87_spill] sm:$0xff] }
 0x2d6   : > { %v4311_v45 = vadd.f32 %v4221_v21, %v3870_v9  ;;  %v4441_v27 = vsel %vm4196_vm3, %v13689_v35, %v4440_v60  ;;  %v4532_v50 = vadd.f32 %v4443_v24, %v4091_v8  ;;  %v4880_v52 = vrot.slane %v4790_v61, 4  ;;  %v13696_v60 = vld [vmem:[#allocation85_spill] sm:$0xff]  ;;  %v13699_v61 = vld [vmem:[#allocation74_spill] sm:$0xff]  ;;  %v10929_v24 = vld [vmem:[%s8101_s2 + $0x118] sm:$0xff] }
 0x2d7   : > { %v4531_v56 = vadd.f32 %v4441_v27, %v4090_v41  ;;  %v4661_v36 = vsel %vm4196_vm3, %v13690_v13, %v4660_v44  ;;  %v4882_v32 = vrot.slane %v4791_v53, 4  ;;  %v5010_v28 = vmul.f32 %v10738_v15, %v8539_v51  ;;  %v13694_v41 = vld [vmem:[#allocation84_spill] sm:$0xff] }
 0x2d8   : > { %v4751_v19 = vadd.f32 %v4661_v36, %v4311_v45  ;;  %v4663_v9 = vsel %vm4196_vm3, %v4660_v44, %v4662_v1  ;;  %v5011_v59 = vmul.f32 %v10774_v11, %v8539_v51  ;;  %v485_v42 = vmul.f32 %v13691_v40, %v8174_v33  ;;  %v13713_v11 = vld [vmem:[#allocation42_spill] sm:$0xff] }
 0x2d9   : > { %v486_v37 = vmul.f32 %v13692_v34, %v8174_v33  ;;  %v4752_v48 = vadd.f32 %v4663_v9, %v4312_v22  ;;  %v13693_v0 = vrot.slane %v10696_v31, 4  ;;  %v4883_v46 = vsel %vm4196_vm3, %v4880_v52, %v4882_v32  ;;  %v13703_v9 = vld [vmem:[#allocation30_spill] sm:$0xff] }
 0x2da   : > { %v5100_v49 = vrot.slane %v5010_v28, 4  ;;  %v4972_v29 = vadd.f32 %v4883_v46, %v4532_v50  ;;  %v5102_v23 = vrot.slane %v5011_v59, 4  ;;  %v553_v8 = vmul.f32 %v13694_v41, %v13393_v30 }
 0x2db   : > { %v4881_v12 = vsel %vm4196_vm3, %v13693_v0, %v4880_v52  ;;  %v13695_v26 = vrot.slane %v10709_v43, 4  ;;  %v554_v31 = vmul.f32 %v13696_v60, %v13393_v30  ;;  %v621_v7 = vmul.f32 %v10613_v17, %v13397_v3  ;;  %v13700_v43 = vld [vmem:[#allocation75_spill] sm:$0xff]  ;;  %v10934_v52 = vld [vmem:[%s8101_s2 + $0x120] sm:$0xff] }
 0x2dc   : > { %v4971_v6 = vadd.f32 %v4881_v12, %v4531_v56  ;;  %v622_v44 = vmul.f32 %v13697_v2, %v13397_v3  ;;  %v5103_v39 = vsel %vm4196_vm3, %v5100_v49, %v5102_v23  ;;  %v689_v53 = vmul.f32 %v13699_v61, %v13698_v58  ;;  %v13701_v56 = vld [vmem:[#allocation37_spill] sm:$0xff]  ;;  %13702 = vst [vmem:[#allocation27_spill] sm:$0xff] %v10934_v52  ;;  %v13706_v12 = vld [vmem:[#allocation36_spill] sm:$0xff] }
 0x2dd   : > { %v5101_v4 = vsel %vm4196_vm3, %v13695_v26, %v5100_v49  ;;  %v690_v45 = vmul.f32 %v13700_v43, %v13698_v58  ;;  %v5192_v22 = vadd.f32 %v5103_v39, %v4752_v48  ;;  %v653_v35 = vadd.f32 %v621_v7, %v485_v42  ;;  %v13704_v48 = vld [vmem:[#allocation88_spill] sm:$0xff] }
 0x2de   : > { %v5191_v21 = vadd.f32 %v5101_v4, %v4751_v19  ;;  %v654_v27 = vadd.f32 %v622_v44, %v486_v37  ;;  %v757_v50 = vmul.f32 %v10929_v24, %v13701_v56  ;;  %v721_v36 = vadd.f32 %v689_v53, %v553_v8  ;;  %v13707_v8 = vld [vmem:[#allocation45_spill] sm:$0xff]  ;;  %v13709_v44 = vld [vmem:[#allocation40_spill] sm:$0xff] }
 0x2df   : > { %v722_v1 = vadd.f32 %v690_v45, %v554_v31  ;;  %v758_v19 = vmul.f32 %v10934_v52, %v13701_v56  ;;  %v5224_v32 = vadd.f32 %v5192_v22, %v4972_v29  ;;  %v828_v59 = vmul.f32 %v13691_v40, %v13703_v9  ;;  %v13710_v22 = vld [vmem:[#allocation46_spill] sm:$0xff] }
 0x2e0   : > { %v5223_v13 = vadd.f32 %v5191_v21, %v4971_v6  ;;  %v789_v28 = vadd.f32 %v757_v50, %v653_v35  ;;  %v829_v42 = vmul.f32 %v13692_v34, %v13703_v9  ;;  %v10944_v0 = vmul.f32 %v13704_v48, %v13703_v9 }
 0x2e1   : > { %v790_v37 = vadd.f32 %v758_v19, %v654_v27  ;;  %v1049_v46 = vmul.f32 %v13694_v41, %v13706_v12  ;;  %v1050_v49 = vmul.f32 %v13696_v60, %v13706_v12  ;;  %v921_v29 = vrot.slane %v828_v59, 1 }
 0x2e2   : > { %13705 = vst [vmem:[#allocation29_spill] sm:$0xff] %v10944_v0  ;;  %v5250_v6 = vpack.c.bf16 %v5224_v32, %v5223_v13  ;;  %v922_v23 = vrot.slane %v829_v42, 1  ;;  %v10952_v26 = vmul.f32 %v13707_v8, %v13706_v12  ;;  %v13146_v4 = vrot.slane %v10944_v0, 1  ;;  %v13718_v0 = vld [vmem:[#allocation31_spill] sm:$0xff] }
 0x2e3   : > { %v1141_v31 = vrot.slane %v1049_v46, 1  ;;  %v1142_v7 = vrot.slane %v1050_v49, 1  ;;  %v1269_v39 = vmul.f32 %v10613_v17, %v13709_v44  ;;  %v1270_v45 = vmul.f32 %v13697_v2, %v13709_v44 }
 0x2e4   : > { %13708 = vst [vmem:[#allocation56_spill] sm:$0xff] %v10952_v26  ;;  %7107 = vmatmul.mubr.bf16.gmra.mrb[24].mxu1 %v5250_v6  ;;  %v923_v21 = vsel %vm893_vm0, %v921_v29, %v922_v23  ;;  %v13145_v53 = vrot.slane %v10952_v26, 1  ;;  %v10963_v35 = vmul.f32 %v13710_v22, %v13709_v44  ;;  %5504 = vmatmul.mubr.bf16.gmra.mrb[20].mxu0 %v5250_v6  ;;  %v13712_v32 = vmov 0  }
 0x2e5   : > { %v925_v27 = vsel %vm893_vm0, %v922_v23, %v13146_v4  ;;  %v1010_v50 = vadd.f32 %v923_v21, %v721_v36  ;;  %v1143_v13 = vsel %vm893_vm0, %v1141_v31, %v1142_v7  ;;  %v1361_v19 = vrot.slane %v1269_v39, 1  ;;  %5513 = vmatprep.mubr.bf16.mxu0 %v13712_v32  ;;  %v13716_v21 = vld [vmem:[#allocation43_spill] sm:$0xff] }
 0x2e6   : > { %13711 = vst [vmem:[#allocation41_spill] sm:$0xff] %v10963_v35  ;;  %v1011_v59 = vadd.f32 %v925_v27, %v722_v1  ;;  %v1145_v42 = vsel %vm893_vm0, %v1142_v7, %v13145_v53  ;;  %v1230_v46 = vadd.f32 %v1143_v13, %v789_v28  ;;  %v1362_v49 = vrot.slane %v1270_v45, 1  ;;  %v13714_v1 = vld [vmem:[#allocation80_spill] sm:$0xff]  ;;  %v10992_v53 = vld [vmem:[%s8101_s2 + $0x128] sm:$0xff] }
 0x2e7   : > { %v1231_v29 = vadd.f32 %v1145_v42, %v790_v37  ;;  %v13151_v6 = vrot.slane %v10963_v35, 1  ;;  %v1489_v23 = vmul.f32 %v13699_v61, %v13713_v11  ;;  %v1490_v36 = vmul.f32 %v13700_v43, %v13713_v11  ;;  %13717 = vst [vmem:[#allocation63_spill] sm:$0xff] %v10992_v53 }
 0x2e8   : > { %v1363_v31 = vsel %vm893_vm0, %v1361_v19, %v1362_v49  ;;  %v10981_v39 = vmul.f32 %v13714_v1, %v13713_v11  ;;  %v1709_v28 = vmul.f32 %v10929_v24, %v13716_v21  ;;  %v1710_v37 = vmul.f32 %v10934_v52, %v13716_v21 }
 0x2e9   : > { %v1365_v7 = vsel %vm893_vm0, %v1362_v49, %v13151_v6  ;;  %v1450_v45 = vadd.f32 %v1363_v31, %v1010_v50  ;;  %v1581_v27 = vrot.slane %v1489_v23, 1  ;;  %v1582_v13 = vrot.slane %v1490_v36, 1 }
 0x2ea   : > { %13715 = vst [vmem:[#allocation44_spill] sm:$0xff] %v10981_v39  ;;  %v1451_v42 = vadd.f32 %v1365_v7, %v1011_v59  ;;  %v13153_v19 = vrot.slane %v10981_v39, 1  ;;  %v10996_v4 = vmul.f32 %v10992_v53, %v13716_v21  ;;  %v1801_v32 = vrot.slane %v1709_v28, 1 }
 0x2eb   : > { %v1583_v26 = vsel %vm893_vm0, %v1581_v27, %v1582_v13  ;;  %v1802_v11 = vrot.slane %v1710_v37, 1  ;;  %v1929_v35 = vmul.f32 %v13691_v40, %v13718_v0  ;;  %v1930_v50 = vmul.f32 %v13692_v34, %v13718_v0 }
 0x2ec   : > { %v1585_v59 = vsel %vm893_vm0, %v1582_v13, %v13153_v19  ;;  %v1670_v49 = vadd.f32 %v1583_v26, %v1230_v46  ;;  %v13154_v23 = vrot.slane %v10996_v4, 1  ;;  %v11009_v36 = vmul.f32 %v13704_v48, %v13718_v0  ;;  %v13720_v13 = vld [vmem:[#allocation47_spill] sm:$0xff] }
 0x2ed   : > { %v1671_v31 = vadd.f32 %v1585_v59, %v1231_v29  ;;  %v1803_v28 = vsel %vm893_vm0, %v1801_v32, %v1802_v11  ;;  %v2022_v37 = vrot.slane %v1929_v35, 2  ;;  %v2023_v7 = vrot.slane %v1930_v50, 2 }
 0x2ee   : > { %13719 = vst [vmem:[#allocation64_spill] sm:$0xff] %v11009_v36  ;;  %v1805_v27 = vsel %vm893_vm0, %v1802_v11, %v13154_v23  ;;  %v1890_v6 = vadd.f32 %v1803_v28, %v1450_v45  ;;  %v13155_v39 = vrot.slane %v11009_v36, 2  ;;  %v2150_v26 = vmul.f32 %v13694_v41, %v13720_v13 }
 0x2ef   : > { %v1891_v46 = vadd.f32 %v1805_v27, %v1451_v42  ;;  %v2024_v19 = vsel %vm1994_vm1, %v2022_v37, %v2023_v7  ;;  %v2151_v29 = vmul.f32 %v13696_v60, %v13720_v13  ;;  %v11023_v35 = vmul.f32 %v13707_v8, %v13720_v13 }
 0x2f0   : > { %v2026_v11 = vsel %vm1994_vm1, %v2023_v7, %v13155_v39  ;;  %v2111_v32 = vadd.f32 %v2024_v19, %v1670_v49  ;;  %v2242_v45 = vrot.slane %v2150_v26, 2  ;;  %v2370_v50 = vmul.f32 %v10613_v17, %v13597_v16 }
 0x2f1   : > { %v2112_v59 = vadd.f32 %v2026_v11, %v1671_v31  ;;  %v2243_v42 = vrot.slane %v2151_v29, 2  ;;  %v13158_v28 = vrot.slane %v11023_v35, 2  ;;  %v2371_v37 = vmul.f32 %v13697_v2, %v13597_v16 }
 0x2f2   : > { %v11035_v27 = vmul.f32 %v13710_v22, %v13597_v16  ;;  %v2462_v23 = vrot.slane %v2370_v50, 2  ;;  %v2590_v7 = vmul.f32 %v13699_v61, %v13598_v25  ;;  %v2591_v19 = vmul.f32 %v13700_v43, %v13598_v25 }
 0x2f3   : > { %v2244_v49 = vsel %vm1994_vm1, %v2242_v45, %v2243_v42  ;;  %v2246_v31 = vsel %vm1994_vm1, %v2243_v42, %v13158_v28  ;;  %v2463_v26 = vrot.slane %v2371_v37, 2  ;;  %v11047_v29 = vmul.f32 %v13714_v1, %v13598_v25 }
 0x2f4   : > { %13721 = vst [vmem:[#allocation65_spill] sm:$0xff] %v11035_v27  ;;  %v2331_v11 = vadd.f32 %v2244_v49, %v1890_v6  ;;  %v2332_v39 = vadd.f32 %v2246_v31, %v1891_v46  ;;  %v13161_v50 = vrot.slane %v11035_v27, 2  ;;  %v2682_v16 = vrot.slane %v2590_v7, 2 }
 0x2f5   : > { %13722 = vst [vmem:[#allocation66_spill] sm:$0xff] %v11047_v29  ;;  %v2464_v61 = vsel %vm1994_vm1, %v2462_v23, %v2463_v26  ;;  %v2683_v36 = vrot.slane %v2591_v19, 2  ;;  %v13160_v43 = vrot.slane %v11047_v29, 2  ;;  %v2810_v45 = vmul.f32 %v10929_v24, %v13476_v47 }
 0x2f6   : > { %v2466_v42 = vsel %vm1994_vm1, %v2463_v26, %v13161_v50  ;;  %v2551_v37 = vadd.f32 %v2464_v61, %v2111_v32  ;;  %v2811_v6 = vmul.f32 %v10934_v52, %v13476_v47  ;;  %v11061_v46 = vmul.f32 %v10992_v53, %v13476_v47 }
 0x2f7   : > { %v2552_v7 = vadd.f32 %v2466_v42, %v2112_v59  ;;  %v2684_v23 = vsel %vm1994_vm1, %v2682_v16, %v2683_v36  ;;  %v2686_v19 = vsel %vm1994_vm1, %v2683_v36, %v13160_v43  ;;  %v2902_v49 = vrot.slane %v2810_v45, 2 }
 0x2f8   : > { %13723 = vst [vmem:[#allocation67_spill] sm:$0xff] %v11061_v46  ;;  %v2771_v31 = vadd.f32 %v2684_v23, %v2331_v11  ;;  %v2772_v28 = vadd.f32 %v2686_v19, %v2332_v39  ;;  %v2903_v27 = vrot.slane %v2811_v6, 2  ;;  %v13163_v32 = vrot.slane %v11061_v46, 2 }
 0x2f9   : > { %v3030_v26 = vmul.f32 %v13691_v40, %v13481_v38  ;;  %v3031_v61 = vmul.f32 %v13692_v34, %v13481_v38  ;;  %v11074_v59 = vmul.f32 %v13704_v48, %v13481_v38  ;;  %v3251_v16 = vmul.f32 %v13694_v41, %v13678_v62 }
 0x2fa   : > { %v2904_v36 = vsel %vm1994_vm1, %v2902_v49, %v2903_v27  ;;  %v2906_v39 = vsel %vm1994_vm1, %v2903_v27, %v13163_v32  ;;  %v3252_v11 = vmul.f32 %v13696_v60, %v13678_v62  ;;  %v11086_v45 = vmul.f32 %v13707_v8, %v13678_v62 }
 0x2fb   : > { %13724 = vst [vmem:[#allocation33_spill] sm:$0xff] %v11074_v59  ;;  %v2991_v42 = vadd.f32 %v2904_v36, %v2551_v37  ;;  %v2992_v6 = vadd.f32 %v2906_v39, %v2552_v7  ;;  %v3123_v23 = vrot.slane %v3030_v26, 3  ;;  %v3124_v19 = vrot.slane %v3031_v61, 3 }
 0x2fc   : > { %13725 = vst [vmem:[#allocation68_spill] sm:$0xff] %v11086_v45  ;;  %v13170_v43 = vrot.slane %v11074_v59, 3  ;;  %v3343_v50 = vrot.slane %v3251_v16, 3  ;;  %v3344_v29 = vrot.slane %v3252_v11, 3  ;;  %v13169_v49 = vrot.slane %v11086_v45, 3 }
 0x2fd   : > { %v3125_v27 = vsel %vm3095_vm2, %v3123_v23, %v3124_v19  ;;  %v3471_v32 = vmul.f32 %v10613_v17, %v13679_v20  ;;  %v3472_v62 = vmul.f32 %v13697_v2, %v13679_v20  ;;  %v11097_v37 = vmul.f32 %v13710_v22, %v13679_v20  ;;  %v11108_v20 = vld [vmem:[%s8101_s2 + $0xf0] sm:$0xff] }
 0x2fe   : > { %v3127_v7 = vsel %vm3095_vm2, %v3124_v19, %v13170_v43  ;;  %v3212_v26 = vadd.f32 %v3125_v27, %v2771_v31  ;;  %v3345_v61 = vsel %vm3095_vm2, %v3343_v50, %v3344_v29  ;;  %v3347_v16 = vsel %vm3095_vm2, %v3344_v29, %v13169_v49  ;;  %v11113_v19 = vld [vmem:[%s8101_s2 + $0xf8] sm:$0xff] }
 0x2ff   : > { %v3213_v36 = vadd.f32 %v3127_v7, %v2772_v28  ;;  %v3432_v39 = vadd.f32 %v3345_v61, %v2991_v42  ;;  %v3433_v11 = vadd.f32 %v3347_v16, %v2992_v6  ;;  %v3563_v23 = vrot.slane %v3471_v32, 3 }
 0x300   : > { %v3564_v46 = vrot.slane %v3472_v62, 3  ;;  %v13179_v38 = vrot.slane %v11097_v37, 3  ;;  %v3691_v59 = vmul.f32 %v11108_v20, %v13680_v63  ;;  %v3692_v50 = vmul.f32 %v11113_v19, %v13680_v63 }
 0x301   : > { %v11119_v29 = vmul.f32 %v13714_v1, %v13680_v63  ;;  %v3911_v28 = vmul.f32 %v10929_v24, %v13681_v18  ;;  %v3912_v62 = vmul.f32 %v10934_v52, %v13681_v18  ;;  %v11127_v31 = vmul.f32 %v10992_v53, %v13681_v18 }
 0x302   : > { %v3565_v32 = vsel %vm3095_vm2, %v3563_v23, %v3564_v46  ;;  %v3567_v42 = vsel %vm3095_vm2, %v3564_v46, %v13179_v38  ;;  %v3783_v6 = vrot.slane %v3691_v59, 3  ;;  %v3784_v27 = vrot.slane %v3692_v50, 3 }
 0x303   : > { %v3652_v1 = vadd.f32 %v3565_v32, %v3212_v26  ;;  %v3653_v7 = vadd.f32 %v3567_v42, %v3213_v36  ;;  %v13175_v61 = vrot.slane %v11119_v29, 3  ;;  %v4003_v16 = vrot.slane %v3911_v28, 3 }
 0x304   : > { %v3785_v49 = vsel %vm3095_vm2, %v3783_v6, %v3784_v27  ;;  %v4004_v43 = vrot.slane %v3912_v62, 3  ;;  %v13174_v45 = vrot.slane %v11127_v31, 3  ;;  %v4131_v18 = vmul.f32 %v13691_v40, %v8446_v54 }
 0x305   : > { %v3787_v23 = vsel %vm3095_vm2, %v3784_v27, %v13175_v61  ;;  %v3872_v46 = vadd.f32 %v3785_v49, %v3432_v39  ;;  %v4132_v59 = vmul.f32 %v13692_v34, %v8446_v54  ;;  %v11145_v26 = vmul.f32 %v13704_v48, %v8446_v54 }
 0x306   : > { %v3873_v36 = vadd.f32 %v3787_v23, %v3433_v11  ;;  %v4005_v50 = vsel %vm3095_vm2, %v4003_v16, %v4004_v43  ;;  %v4007_v28 = vsel %vm3095_vm2, %v4004_v43, %v13174_v45  ;;  %v4224_v40 = vrot.slane %v4131_v18, 4 }
 0x307   : > { %v4092_v62 = vadd.f32 %v4005_v50, %v3652_v1  ;;  %v4093_v32 = vadd.f32 %v4007_v28, %v3653_v7  ;;  %v4225_v42 = vrot.slane %v4132_v59, 4  ;;  %v13173_v49 = vrot.slane %v11145_v26, 4 }
 0x308   : > { %v4352_v34 = vmul.f32 %v13694_v41, %v8450_v10  ;;  %v4353_v39 = vmul.f32 %v13696_v60, %v8450_v10  ;;  %v11158_v11 = vmul.f32 %v13707_v8, %v8450_v10  ;;  %v4572_v6 = vmul.f32 %v10613_v17, %v8509_v5 }
 0x309   : > { %v4226_v18 = vsel %vm4196_vm3, %v4224_v40, %v4225_v42  ;;  %v4228_v43 = vsel %vm4196_vm3, %v4225_v42, %v13173_v49  ;;  %v4573_v41 = vmul.f32 %v13697_v2, %v8509_v5  ;;  %v11170_v60 = vmul.f32 %v13710_v22, %v8509_v5  ;;  %v11180_v42 = vld [vmem:[%s8101_s2 + $0x100] sm:$0xff] }
 0x30a   : > { %v4313_v27 = vadd.f32 %v4226_v18, %v3872_v46  ;;  %v4314_v1 = vadd.f32 %v4228_v43, %v3873_v36  ;;  %v4444_v7 = vrot.slane %v4352_v34, 4  ;;  %v4445_v16 = vrot.slane %v4353_v39, 4  ;;  %13726 = vst [vmem:[#allocation70_spill] sm:$0xff] %v11180_v42 }
 0x30b   : > { %v13178_v17 = vrot.slane %v11158_v11, 4  ;;  %v4664_v23 = vrot.slane %v4572_v6, 4  ;;  %v4665_v59 = vrot.slane %v4573_v41, 4  ;;  %v13176_v50 = vrot.slane %v11170_v60, 4 }
 0x30c   : > { %v4446_v28 = vsel %vm4196_vm3, %v4444_v7, %v4445_v16  ;;  %v4792_v40 = vmul.f32 %v11108_v20, %v8535_v14  ;;  %v4793_v2 = vmul.f32 %v11113_v19, %v8535_v14  ;;  %v11184_v46 = vmul.f32 %v11180_v42, %v8535_v14 }
 0x30d   : > { %v4448_v36 = vsel %vm4196_vm3, %v4445_v16, %v13178_v17  ;;  %v4533_v34 = vadd.f32 %v4446_v28, %v4092_v62  ;;  %v4666_v39 = vsel %vm4196_vm3, %v4664_v23, %v4665_v59  ;;  %v4668_v6 = vsel %vm4196_vm3, %v4665_v59, %v13176_v50 }
 0x30e   : > { %v4534_v18 = vadd.f32 %v4448_v36, %v4093_v32  ;;  %v4753_v43 = vadd.f32 %v4666_v39, %v4313_v27  ;;  %v4754_v41 = vadd.f32 %v4668_v6, %v4314_v1  ;;  %v4884_v7 = vrot.slane %v4792_v40, 4  ;;  %v11205_v27 = vld [vmem:[%s8101_s2 + $0x90] sm:$0xff]  ;;  %v11217_v6 = vld [vmem:[%s8101_s2 + $0xb8] sm:$0xff] }
 0x30f   : > { %v4885_v49 = vrot.slane %v4793_v2, 4  ;;  %v13177_v45 = vrot.slane %v11184_v46, 4  ;;  %v5012_v61 = vmul.f32 %v10929_v24, %v8539_v51  ;;  %v5013_v62 = vmul.f32 %v10934_v52, %v8539_v51 }
 0x310   : > { %v11200_v16 = vmul.f32 %v10992_v53, %v8539_v51  ;;  %v487_v32 = vmul.f32 %v13704_v48, %v8174_v33  ;;  %v488_v1 = vmul.f32 %v11205_v27, %v8174_v33  ;;  %v555_v23 = vmul.f32 %v13707_v8, %v13393_v30 }
 0x311   : > { %v4886_v59 = vsel %vm4196_vm3, %v4884_v7, %v4885_v49  ;;  %v4888_v28 = vsel %vm4196_vm3, %v4885_v49, %v13177_v45  ;;  %v5104_v40 = vrot.slane %v5012_v61, 4  ;;  %v5105_v2 = vrot.slane %v5013_v62, 4 }
 0x312   : > { %v4973_v36 = vadd.f32 %v4886_v59, %v4533_v34  ;;  %v4974_v39 = vadd.f32 %v4888_v28, %v4534_v18  ;;  %v13184_v48 = vrot.slane %v11200_v16, 4  ;;  %v556_v50 = vmul.f32 %v11217_v6, %v13393_v30 }
 0x313   : > { %v5106_v8 = vsel %vm4196_vm3, %v5104_v40, %v5105_v2  ;;  %v623_v7 = vmul.f32 %v13710_v22, %v13397_v3  ;;  %v624_v49 = vmul.f32 %v10842_v55, %v13397_v3  ;;  %v691_v61 = vmul.f32 %v11180_v42, %v13698_v58  ;;  %v11236_v42 = vld [vmem:[%s8101_s2 + $0x130] sm:$0xff] }
 0x314   : > { %v5108_v34 = vsel %vm4196_vm3, %v5105_v2, %v13184_v48  ;;  %v5193_v18 = vadd.f32 %v5106_v8, %v4753_v43  ;;  %v692_v62 = vmul.f32 %v10738_v15, %v13698_v58  ;;  %v759_v59 = vmul.f32 %v10992_v53, %v13701_v56  ;;  %v11243_v48 = vld [vmem:[%s8101_s2 + $0x98] sm:$0xf] }
 0x315   : > { %v5194_v28 = vadd.f32 %v5108_v34, %v4754_v41  ;;  %v655_v22 = vadd.f32 %v623_v7, %v487_v32  ;;  %v656_v40 = vadd.f32 %v624_v49, %v488_v1  ;;  %v723_v45 = vadd.f32 %v691_v61, %v555_v23  ;;  %v11250_v23 = vld [vmem:[%s8101_s2 + $0xc0] sm:$0xf] }
 0x316   : > { %v5225_v17 = vadd.f32 %v5193_v18, %v4973_v36  ;;  %v724_v38 = vadd.f32 %v692_v62, %v556_v50  ;;  %v760_v52 = vmul.f32 %v11236_v42, %v13701_v56  ;;  %v831_v43 = vmul.f32 %v11205_v27, %v13703_v9  ;;  %v13727_v18 = vld [vmem:[#allocation29_spill] sm:$0xff] }
 0x317   : > { %v5226_v2 = vadd.f32 %v5194_v28, %v4974_v39  ;;  %v791_v8 = vadd.f32 %v759_v59, %v655_v22  ;;  %v832_v41 = vmul.f32 %v11243_v48, %v13703_v9  ;;  %v1052_v32 = vmul.f32 %v11217_v6, %v13706_v12  ;;  %v13729_v22 = vld [vmem:[#allocation42_spill] sm:$0xff] }
 0x318   : > { %v792_v1 = vadd.f32 %v760_v52, %v656_v40  ;;  %v926_v50 = vrot.slane %v831_v43, 1  ;;  %v1053_v36 = vmul.f32 %v11250_v23, %v13706_v12  ;;  %v1272_v7 = vmul.f32 %v10842_v55, %v13709_v44  ;;  %v13730_v12 = vld [vmem:[#allocation56_spill] sm:$0xff] }
 0x319   : > { %v5251_v39 = vpack.c.bf16 %v5226_v2, %v5225_v17  ;;  %v928_v49 = vrot.slane %v832_v41, 1  ;;  %v1146_v61 = vrot.slane %v1052_v32, 1  ;;  %v1273_v34 = vmul.f32 %v10888_v57, %v13709_v44 }
 0x31a   : > { %v13728_v62 = vrot.slane %v13727_v18, 1  ;;  %v1148_v52 = vrot.slane %v1053_v36, 1  ;;  %v1366_v28 = vrot.slane %v1272_v7, 1  ;;  %v1492_v40 = vmul.f32 %v10738_v15, %v13729_v22  ;;  %v13732_v36 = vld [vmem:[#allocation41_spill] sm:$0xff] }
 0x31b   : > { %7110 = vmatprep.mubr.bf16.mxu1 %v5251_v39  ;;  %v929_v43 = vsel %vm893_vm0, %v926_v50, %v928_v49  ;;  %v13731_v17 = vrot.slane %v13730_v12, 1  ;;  %v1368_v41 = vrot.slane %v1273_v34, 1  ;;  %5514 = vmatmul.mubr.bf16.gmra.mrb[24].mxu0 %v5251_v39  ;;  %v13733_v7 = vrot.slane %v13732_v36, 1  ;;  %v13735_v12 = vld [vmem:[#allocation51_spill] sm:$0xff]  ;;  %v11278_v39 = vld [vmem:[%s8101_s2 + $0x138] sm:$0xf] }
 0x31c   : > { %v927_v59 = vsel %vm893_vm0, %v13728_v62, %v926_v50  ;;  %v1013_v32 = vadd.f32 %v929_v43, %v724_v38  ;;  %v1149_v18 = vsel %vm893_vm0, %v1146_v61, %v1148_v52  ;;  %v13734_v9 = vmov 0   ;;  %13736 = vst [vmem:[#allocation26_spill] sm:$0xff] %v11278_v39  ;;  %v13737_v52 = vld [vmem:[#allocation44_spill] sm:$0xff] }
 0x31d   : > { %v1012_v53 = vadd.f32 %v927_v59, %v723_v45  ;;  %v1147_v2 = vsel %vm893_vm0, %v13731_v17, %v1146_v61  ;;  %v1367_v44 = vsel %vm893_vm0, %v13733_v7, %v1366_v28  ;;  %5523 = vmatprep.mubr.bf16.mxu0 %v13734_v9  ;;  %v1233_v56 = vadd.f32 %v1149_v18, %v792_v1 }
 0x31e   : > { %v1232_v62 = vadd.f32 %v1147_v2, %v791_v8  ;;  %v1369_v45 = vsel %vm893_vm0, %v1366_v28, %v1368_v41  ;;  %v1493_v49 = vmul.f32 %v13735_v12, %v13729_v22  ;;  %v1586_v34 = vrot.slane %v1492_v40, 1 }
 0x31f   : > { %v1452_v50 = vadd.f32 %v1367_v44, %v1012_v53  ;;  %v1453_v59 = vadd.f32 %v1369_v45, %v1013_v32  ;;  %v1712_v38 = vmul.f32 %v11236_v42, %v13716_v21  ;;  %v1713_v8 = vmul.f32 %v11278_v39, %v13716_v21 }
 0x320   : > { %v1588_v61 = vrot.slane %v1493_v49, 1  ;;  %v1932_v1 = vmul.f32 %v11205_v27, %v13718_v0  ;;  %v1933_v44 = vmul.f32 %v11243_v48, %v13718_v0  ;;  %v2153_v53 = vmul.f32 %v11217_v6, %v13720_v13 }
 0x321   : > { %v13738_v28 = vrot.slane %v13737_v52, 1  ;;  %v1806_v43 = vrot.slane %v1712_v38, 1  ;;  %v1808_v17 = vrot.slane %v1713_v8, 1  ;;  %v2154_v2 = vmul.f32 %v11250_v23, %v13720_v13  ;;  %v13740_v38 = vld [vmem:[#allocation64_spill] sm:$0xff] }
 0x322   : > { %v1589_v41 = vsel %vm893_vm0, %v1586_v34, %v1588_v61  ;;  %v2027_v18 = vrot.slane %v1932_v1, 2  ;;  %v2029_v36 = vrot.slane %v1933_v44, 2  ;;  %v13739_v45 = vrot.slane %v10996_v4, 1  ;;  %v13743_v44 = vld [vmem:[#allocation48_spill] sm:$0xff] }
 0x323   : > { %v1587_v40 = vsel %vm893_vm0, %v13738_v28, %v1586_v34  ;;  %v1673_v7 = vadd.f32 %v1589_v41, %v1233_v56  ;;  %v1809_v0 = vsel %vm893_vm0, %v1806_v43, %v1808_v17  ;;  %v2247_v52 = vrot.slane %v2153_v53, 2 }
 0x324   : > { %v1672_v32 = vadd.f32 %v1587_v40, %v1232_v62  ;;  %v1807_v49 = vsel %vm893_vm0, %v13739_v45, %v1806_v43  ;;  %v1893_v28 = vadd.f32 %v1809_v0, %v1453_v59  ;;  %v13741_v8 = vrot.slane %v13740_v38, 2  ;;  %v13747_v38 = vld [vmem:[#allocation66_spill] sm:$0xff] }
 0x325   : > { %v1892_v21 = vadd.f32 %v1807_v49, %v1452_v50  ;;  %v2030_v13 = vsel %vm1994_vm1, %v2027_v18, %v2029_v36  ;;  %v13742_v61 = vrot.slane %v11023_v35, 2  ;;  %v2249_v4 = vrot.slane %v2154_v2, 2 }
 0x326   : > { %v2028_v22 = vsel %vm1994_vm1, %v13741_v8, %v2027_v18  ;;  %v2114_v62 = vadd.f32 %v2030_v13, %v1673_v7  ;;  %v2373_v40 = vmul.f32 %v10842_v55, %v13743_v44  ;;  %v2374_v0 = vmul.f32 %v10888_v57, %v13743_v44  ;;  %v13744_v18 = vld [vmem:[#allocation32_spill] sm:$0xff]  ;;  %v13745_v7 = vld [vmem:[#allocation65_spill] sm:$0xff] }
 0x327   : > { %v2113_v34 = vadd.f32 %v2028_v22, %v1672_v32  ;;  %v2248_v56 = vsel %vm1994_vm1, %v13742_v61, %v2247_v52  ;;  %v2593_v50 = vmul.f32 %v10738_v15, %v13598_v25  ;;  %v2250_v59 = vsel %vm1994_vm1, %v2247_v52, %v2249_v4 }
 0x328   : > { %v2333_v1 = vadd.f32 %v2248_v56, %v1892_v21  ;;  %v2594_v13 = vmul.f32 %v13735_v12, %v13598_v25  ;;  %v2813_v35 = vmul.f32 %v11236_v42, %v13476_v47  ;;  %v2814_v21 = vmul.f32 %v11278_v39, %v13476_v47 }
 0x329   : > { %v2334_v22 = vadd.f32 %v2250_v59, %v1893_v28  ;;  %v2467_v53 = vrot.slane %v2373_v40, 2  ;;  %v2469_v43 = vrot.slane %v2374_v0, 2  ;;  %v2687_v17 = vrot.slane %v2593_v50, 2  ;;  %v13749_v59 = vld [vmem:[#allocation67_spill] sm:$0xff] }
 0x32a   : > { %v2689_v2 = vrot.slane %v2594_v13, 2  ;;  %v2907_v41 = vrot.slane %v2813_v35, 2  ;;  %v2909_v32 = vrot.slane %v2814_v21, 2  ;;  %v3033_v36 = vmul.f32 %v11205_v27, %v13744_v18 }
 0x32b   : > { %v13746_v45 = vrot.slane %v13745_v7, 2  ;;  %v2470_v52 = vsel %vm1994_vm1, %v2467_v53, %v2469_v43  ;;  %v13748_v8 = vrot.slane %v13747_v38, 2  ;;  %v3034_v28 = vmul.f32 %v11243_v48, %v13744_v18  ;;  %v13751_v38 = vld [vmem:[#allocation55_spill] sm:$0xff]  ;;  %v13752_v18 = vld [vmem:[#allocation33_spill] sm:$0xff] }
 0x32c   : > { %v2554_v4 = vadd.f32 %v2470_v52, %v2114_v62  ;;  %v2690_v40 = vsel %vm1994_vm1, %v2687_v17, %v2689_v2  ;;  %v13750_v13 = vrot.slane %v13749_v59, 2  ;;  %v2910_v21 = vsel %vm1994_vm1, %v2907_v41, %v2909_v32 }
 0x32d   : > { %v2468_v49 = vsel %vm1994_vm1, %v13746_v45, %v2467_v53  ;;  %v2688_v61 = vsel %vm1994_vm1, %v13748_v8, %v2687_v17  ;;  %v2774_v50 = vadd.f32 %v2690_v40, %v2334_v22  ;;  %v3128_v53 = vrot.slane %v3033_v36, 3  ;;  %v13754_v22 = vld [vmem:[#allocation58_spill] sm:$0xff] }
 0x32e   : > { %v2553_v56 = vadd.f32 %v2468_v49, %v2113_v34  ;;  %v2773_v0 = vadd.f32 %v2688_v61, %v2333_v1  ;;  %v2908_v35 = vsel %vm1994_vm1, %v13750_v13, %v2907_v41  ;;  %v2994_v7 = vadd.f32 %v2910_v21, %v2554_v4 }
 0x32f   : > { %v3130_v45 = vrot.slane %v3034_v28, 3  ;;  %v3254_v8 = vmul.f32 %v11217_v6, %v13751_v38  ;;  %v13753_v34 = vrot.slane %v13752_v18, 3  ;;  %v3255_v1 = vmul.f32 %v11250_v23, %v13751_v38 }
 0x330   : > { %v2993_v43 = vadd.f32 %v2908_v35, %v2553_v56  ;;  %v3474_v17 = vmul.f32 %v10842_v55, %v13754_v22  ;;  %v3475_v2 = vmul.f32 %v10888_v57, %v13754_v22  ;;  %v3694_v49 = vmul.f32 %v10738_v15, %v13680_v63  ;;  %v13755_v56 = vld [vmem:[#allocation68_spill] sm:$0xff] }
 0x331   : > { %v3129_v62 = vsel %vm3095_vm2, %v13753_v34, %v3128_v53  ;;  %v3131_v41 = vsel %vm3095_vm2, %v3128_v53, %v3130_v45  ;;  %v3348_v36 = vrot.slane %v3254_v8, 3  ;;  %v3350_v18 = vrot.slane %v3255_v1, 3  ;;  %v13757_v35 = vld [vmem:[#allocation60_spill] sm:$0xff] }
 0x332   : > { %v3214_v32 = vadd.f32 %v3129_v62, %v2773_v0  ;;  %v3215_v52 = vadd.f32 %v3131_v41, %v2774_v50  ;;  %v3568_v61 = vrot.slane %v3474_v17, 3  ;;  %v3570_v28 = vrot.slane %v3475_v2, 3 }
 0x333   : > { %v13756_v4 = vrot.slane %v13755_v56, 3  ;;  %v3695_v59 = vmul.f32 %v13735_v12, %v13680_v63  ;;  %v3788_v13 = vrot.slane %v3694_v49, 3  ;;  %v3914_v21 = vmul.f32 %v11236_v42, %v13757_v35 }
 0x334   : > { %v3351_v0 = vsel %vm3095_vm2, %v3348_v36, %v3350_v18  ;;  %v13758_v15 = vrot.slane %v11097_v37, 3  ;;  %v3571_v45 = vsel %vm3095_vm2, %v3568_v61, %v3570_v28  ;;  %v13759_v1 = vrot.slane %v11119_v29, 3 }
 0x335   : > { %v3349_v40 = vsel %vm3095_vm2, %v13756_v4, %v3348_v36  ;;  %v3435_v8 = vadd.f32 %v3351_v0, %v2994_v7  ;;  %v3655_v62 = vadd.f32 %v3571_v45, %v3215_v52  ;;  %v3790_v17 = vrot.slane %v3695_v59, 3 }
 0x336   : > { %v3434_v53 = vadd.f32 %v3349_v40, %v2993_v43  ;;  %v3569_v50 = vsel %vm3095_vm2, %v13758_v15, %v3568_v61  ;;  %v3789_v12 = vsel %vm3095_vm2, %v13759_v1, %v3788_v13  ;;  %v3915_v41 = vmul.f32 %v11278_v39, %v13757_v35 }
 0x337   : > { %v3654_v34 = vadd.f32 %v3569_v50, %v3214_v32  ;;  %v4008_v36 = vrot.slane %v3914_v21, 3  ;;  %v4134_v37 = vmul.f32 %v11205_v27, %v8446_v54  ;;  %v4135_v43 = vmul.f32 %v11243_v48, %v8446_v54 }
 0x338   : > { %v3874_v2 = vadd.f32 %v3789_v12, %v3434_v53  ;;  %v4355_v7 = vmul.f32 %v11217_v6, %v8450_v10  ;;  %v4356_v29 = vmul.f32 %v11250_v23, %v8450_v10  ;;  %v3791_v32 = vsel %vm3095_vm2, %v3788_v13, %v3790_v17 }
 0x339   : > { %v13760_v49 = vrot.slane %v11127_v31, 3  ;;  %v4010_v18 = vrot.slane %v3915_v41, 3  ;;  %v4575_v61 = vmul.f32 %v10842_v55, %v8509_v5  ;;  %v3875_v27 = vadd.f32 %v3791_v32, %v3435_v8  ;;  %v11394_v41 = vld [vmem:[%s8101_s2 + $0x108] sm:$0xff] }
 0x33a   : > { %v4229_v56 = vrot.slane %v4134_v37, 4  ;;  %v4231_v48 = vrot.slane %v4135_v43, 4  ;;  %v4449_v40 = vrot.slane %v4355_v7, 4  ;;  %v4451_v59 = vrot.slane %v4356_v29, 4  ;;  %v11409_v7 = vld [vmem:[%s8101_s2 + $0xa0] sm:$0xff]  ;;  %v11414_v32 = vld [vmem:[%s8101_s2 + $0xa8] sm:$0xff] }
 0x33b   : > { %v4009_v52 = vsel %vm3095_vm2, %v13760_v49, %v4008_v36  ;;  %v4011_v4 = vsel %vm3095_vm2, %v4008_v36, %v4010_v18  ;;  %v4576_v13 = vmul.f32 %v10888_v57, %v8509_v5  ;;  %v13761_v21 = vrot.slane %v11145_v26, 4 }
 0x33c   : > { %v4094_v28 = vadd.f32 %v4009_v52, %v3654_v34  ;;  %v4095_v31 = vadd.f32 %v4011_v4, %v3655_v62  ;;  %v4232_v55 = vsel %vm4196_vm3, %v4229_v56, %v4231_v48  ;;  %v4669_v53 = vrot.slane %v4575_v61, 4  ;;  %v11424_v4 = vld [vmem:[%s8101_s2 + $0xd0] sm:$0xff] }
 0x33d   : > { %v4230_v0 = vsel %vm4196_vm3, %v13761_v21, %v4229_v56  ;;  %v4316_v50 = vadd.f32 %v4232_v55, %v3875_v27  ;;  %v13762_v45 = vrot.slane %v11158_v11, 4  ;;  %v4452_v34 = vsel %vm4196_vm3, %v4449_v40, %v4451_v59  ;;  %v11399_v11 = vld [vmem:[%s8101_s2 + $0x110] sm:$0xf]  ;;  %v11419_v56 = vld [vmem:[%s8101_s2 + $0xc8] sm:$0xff] }
 0x33e   : > { %v4315_v15 = vadd.f32 %v4230_v0, %v3874_v2  ;;  %v4536_v1 = vadd.f32 %v4452_v34, %v4095_v31  ;;  %v13763_v62 = vrot.slane %v11170_v60, 4  ;;  %v4671_v12 = vrot.slane %v4576_v13, 4  ;;  %13764 = vst [vmem:[#allocation54_spill] sm:$0xff] %v11399_v11 }
 0x33f   : > { %v4450_v8 = vsel %vm4196_vm3, %v13762_v45, %v4449_v40  ;;  %v4795_v2 = vmul.f32 %v11394_v41, %v8535_v14  ;;  %v4796_v36 = vmul.f32 %v11399_v11, %v8535_v14  ;;  %v5015_v37 = vmul.f32 %v11236_v42, %v8539_v51 }
 0x340   : > { %v4535_v57 = vadd.f32 %v4450_v8, %v4094_v28  ;;  %v4670_v26 = vsel %vm4196_vm3, %v13763_v62, %v4669_v53  ;;  %v4672_v60 = vsel %vm4196_vm3, %v4669_v53, %v4671_v12  ;;  %v5016_v43 = vmul.f32 %v11278_v39, %v8539_v51  ;;  %v13779_v39 = vld [vmem:[#allocation42_spill] sm:$0xff] }
 0x341   : > { %v4755_v17 = vadd.f32 %v4670_v26, %v4315_v15  ;;  %v489_v29 = vmul.f32 %v11409_v7, %v8174_v33  ;;  %v490_v49 = vmul.f32 %v11414_v32, %v8174_v33  ;;  %v4756_v52 = vadd.f32 %v4672_v60, %v4316_v50 }
 0x342   : > { %v4889_v18 = vrot.slane %v4795_v2, 4  ;;  %v4891_v61 = vrot.slane %v4796_v36, 4  ;;  %v5109_v27 = vrot.slane %v5015_v37, 4  ;;  %v5111_v28 = vrot.slane %v5016_v43, 4  ;;  %v11445_v36 = vld [vmem:[%s8111_s16] sm:$0xff] }
 0x343   : > { %v557_v48 = vmul.f32 %v11419_v56, %v13393_v30  ;;  %v558_v40 = vmul.f32 %v11424_v4, %v13393_v30  ;;  %v625_v59 = vmul.f32 %v11108_v20, %v13397_v3  ;;  %v13765_v13 = vrot.slane %v11184_v46, 4  ;;  %13768 = vst [vmem:[#allocation57_spill] sm:$0xff] %v11445_v36  ;;  %v13769_v37 = vld [vmem:[#allocation37_spill] sm:$0xff] }
 0x344   : > { %v4892_v21 = vsel %vm4196_vm3, %v4889_v18, %v4891_v61  ;;  %v13766_v0 = vrot.slane %v11200_v16, 4  ;;  %v626_v53 = vmul.f32 %v11113_v19, %v13397_v3  ;;  %v5112_v45 = vsel %vm4196_vm3, %v5109_v27, %v5111_v28  ;;  %v13767_v16 = vld [vmem:[#allocation27_spill] sm:$0xff] }
 0x345   : > { %v4890_v31 = vsel %vm4196_vm3, %v13765_v13, %v4889_v18  ;;  %v4976_v50 = vadd.f32 %v4892_v21, %v4536_v1  ;;  %v5196_v34 = vadd.f32 %v5112_v45, %v4756_v52  ;;  %v657_v62 = vadd.f32 %v625_v59, %v489_v29  ;;  %v11450_v1 = vld [vmem:[%s8111_s16 + $0x8] sm:$0xff]  ;;  %v11459_v28 = vld [vmem:[%s8101_s2 + $0xb0] sm:$0xff] }
 0x346   : > { %v5110_v55 = vsel %vm4196_vm3, %v13766_v0, %v5109_v27  ;;  %v4975_v15 = vadd.f32 %v4890_v31, %v4535_v57  ;;  %v658_v46 = vadd.f32 %v626_v53, %v490_v49  ;;  %v693_v26 = vmul.f32 %v10929_v24, %v13698_v58  ;;  %13770 = vst [vmem:[#allocation34_spill] sm:$0xff] %v11450_v1  ;;  %v13771_v29 = vld [vmem:[#allocation30_spill] sm:$0xff]  ;;  %v13773_v0 = vld [vmem:[#allocation36_spill] sm:$0xff] }
 0x347   : > { %v5195_v8 = vadd.f32 %v5110_v55, %v4755_v17  ;;  %v694_v2 = vmul.f32 %v13767_v16, %v13698_v58  ;;  %v761_v57 = vmul.f32 %v11445_v36, %v13769_v37  ;;  %v762_v17 = vmul.f32 %v11450_v1, %v13769_v37 }
 0x348   : > { %v5228_v60 = vadd.f32 %v5196_v34, %v4976_v50  ;;  %v725_v43 = vadd.f32 %v693_v26, %v557_v48  ;;  %v833_v49 = vmul.f32 %v11409_v7, %v13771_v29  ;;  %v834_v52 = vmul.f32 %v11414_v32, %v13771_v29  ;;  %v13776_v50 = vld [vmem:[#allocation40_spill] sm:$0xff] }
 0x349   : > { %v5227_v12 = vadd.f32 %v5195_v8, %v4975_v15  ;;  %v726_v18 = vadd.f32 %v694_v2, %v558_v40  ;;  %v793_v61 = vadd.f32 %v761_v57, %v657_v62  ;;  %v794_v27 = vadd.f32 %v762_v17, %v658_v46  ;;  %v11471_v40 = vld [vmem:[%s8101_s2 + $0xd8] sm:$0xff]  ;;  %v13777_v46 = vld [vmem:[#allocation70_spill] sm:$0xff] }
 0x34a   : > { %v11463_v59 = vmul.f32 %v11459_v28, %v13771_v29  ;;  %v930_v31 = vrot.slane %v833_v49, 1  ;;  %v931_v21 = vrot.slane %v834_v52, 1  ;;  %v1054_v48 = vmul.f32 %v11419_v56, %v13773_v0  ;;  %13774 = vst [vmem:[#allocation39_spill] sm:$0xff] %v11471_v40 }
 0x34b   : > { %v5252_v13 = vpack.c.bf16 %v5228_v60, %v5227_v12  ;;  %v1055_v53 = vmul.f32 %v11424_v4, %v13773_v0  ;;  %v11475_v15 = vmul.f32 %v11471_v40, %v13773_v0  ;;  %v1274_v45 = vmul.f32 %v11108_v20, %v13776_v50  ;;  %v13785_v0 = vld [vmem:[#allocation47_spill] sm:$0xff] }
 0x34c   : > { %13772 = vst [vmem:[#allocation28_spill] sm:$0xff] %v11463_v59  ;;  %v13198_v55 = vrot.slane %v11463_v59, 1  ;;  %v932_v8 = vsel %vm893_vm0, %v930_v31, %v931_v21  ;;  %v1150_v34 = vrot.slane %v1054_v48, 1  ;;  %v1275_v62 = vmul.f32 %v11113_v19, %v13776_v50 }
 0x34d   : > { %13775 = vst [vmem:[#allocation38_spill] sm:$0xff] %v11475_v15  ;;  %7111 = vmatmul.mubr.bf16.gmra.mrb[28].mxu1 %v5252_v13  ;;  %v11484_v26 = vmul.f32 %v13777_v46, %v13776_v50  ;;  %5524 = vmatmul.mubr.bf16.gmra.mrb[28].mxu0 %v5252_v13  ;;  %v1014_v2 = vadd.f32 %v932_v8, %v725_v43  ;;  %v1151_v57 = vrot.slane %v1055_v53, 1  ;;  %v13199_v17 = vrot.slane %v11475_v15, 1 }
 0x34e   : > { %v934_v12 = vsel %vm893_vm0, %v931_v21, %v13198_v55  ;;  %5533 = vmatprep.mubr.bf16.mxu0 %v13734_v9  ;;  %v1370_v49 = vrot.slane %v1274_v45, 1  ;;  %v1371_v52 = vrot.slane %v1275_v62, 1  ;;  %v1494_v43 = vmul.f32 %v10929_v24, %v13779_v39  ;;  %v13782_v9 = vld [vmem:[#allocation43_spill] sm:$0xff] }
 0x34f   : > { %13778 = vst [vmem:[#allocation72_spill] sm:$0xff] %v11484_v26  ;;  %v1015_v60 = vadd.f32 %v934_v12, %v726_v18  ;;  %v13202_v31 = vrot.slane %v11484_v26, 1  ;;  %v1152_v48 = vsel %vm893_vm0, %v1150_v34, %v1151_v57  ;;  %v1154_v13 = vsel %vm893_vm0, %v1151_v57, %v13199_v17  ;;  %v13780_v12 = vld [vmem:[#allocation63_spill] sm:$0xff] }
 0x350   : > { %v1495_v21 = vmul.f32 %v13767_v16, %v13779_v39  ;;  %v1234_v53 = vadd.f32 %v1152_v48, %v793_v61  ;;  %v1235_v8 = vadd.f32 %v1154_v13, %v794_v27  ;;  %v1372_v18 = vsel %vm893_vm0, %v1370_v49, %v1371_v52  ;;  %v11513_v27 = vld [vmem:[%s8111_s16 + $0x10] sm:$0xff] }
 0x351   : > { %v1374_v45 = vsel %vm893_vm0, %v1371_v52, %v13202_v31  ;;  %v1454_v62 = vadd.f32 %v1372_v18, %v1014_v2  ;;  %v11506_v55 = vmul.f32 %v13780_v12, %v13779_v39  ;;  %v1590_v57 = vrot.slane %v1494_v43, 1  ;;  %13783 = vst [vmem:[#allocation76_spill] sm:$0xff] %v11513_v27 }
 0x352   : > { %v1455_v34 = vadd.f32 %v1374_v45, %v1015_v60  ;;  %v1591_v17 = vrot.slane %v1495_v21, 1  ;;  %v1714_v15 = vmul.f32 %v11445_v36, %v13782_v9  ;;  %v1715_v61 = vmul.f32 %v11450_v1, %v13782_v9  ;;  %v13784_v60 = vld [vmem:[#allocation31_spill] sm:$0xff] }
 0x353   : > { %13781 = vst [vmem:[#allocation73_spill] sm:$0xff] %v11506_v55  ;;  %v11517_v49 = vmul.f32 %v11513_v27, %v13782_v9  ;;  %v13215_v2 = vrot.slane %v11506_v55, 1  ;;  %v1934_v52 = vmul.f32 %v11409_v7, %v13784_v60  ;;  %v1935_v48 = vmul.f32 %v11414_v32, %v13784_v60 }
 0x354   : > { %v11526_v13 = vmul.f32 %v11459_v28, %v13784_v60  ;;  %v1592_v43 = vsel %vm893_vm0, %v1590_v57, %v1591_v17  ;;  %v1810_v21 = vrot.slane %v1714_v15, 1  ;;  %v1811_v18 = vrot.slane %v1715_v61, 1 }
 0x355   : > { %v13214_v45 = vrot.slane %v11517_v49, 1  ;;  %v1594_v31 = vsel %vm893_vm0, %v1591_v17, %v13215_v2  ;;  %v1674_v9 = vadd.f32 %v1592_v43, %v1234_v53  ;;  %v2031_v26 = vrot.slane %v1934_v52, 2 }
 0x356   : > { %v2032_v59 = vrot.slane %v1935_v48, 2  ;;  %v1675_v39 = vadd.f32 %v1594_v31, %v1235_v8  ;;  %v1812_v11 = vsel %vm893_vm0, %v1810_v21, %v1811_v18  ;;  %v13213_v57 = vrot.slane %v11526_v13, 2 }
 0x357   : > { %v1814_v60 = vsel %vm893_vm0, %v1811_v18, %v13214_v45  ;;  %v1894_v15 = vadd.f32 %v1812_v11, %v1454_v62  ;;  %v2155_v55 = vmul.f32 %v11419_v56, %v13785_v0  ;;  %v2156_v53 = vmul.f32 %v11424_v4, %v13785_v0 }
 0x358   : > { %v1895_v61 = vadd.f32 %v1814_v60, %v1455_v34  ;;  %v2033_v50 = vsel %vm1994_vm1, %v2031_v26, %v2032_v59  ;;  %v2035_v17 = vsel %vm1994_vm1, %v2032_v59, %v13213_v57  ;;  %v11548_v8 = vmul.f32 %v11471_v40, %v13785_v0 }
 0x359   : > { %v2115_v31 = vadd.f32 %v2033_v50, %v1674_v9  ;;  %v2116_v52 = vadd.f32 %v2035_v17, %v1675_v39  ;;  %v2251_v11 = vrot.slane %v2155_v55, 2  ;;  %v2375_v26 = vmul.f32 %v11108_v20, %v13743_v44 }
 0x35a   : > { %v2376_v62 = vmul.f32 %v11113_v19, %v13743_v44  ;;  %v2252_v34 = vrot.slane %v2156_v53, 2  ;;  %v13218_v60 = vrot.slane %v11548_v8, 2  ;;  %v11557_v9 = vmul.f32 %v13777_v46, %v13743_v44 }
 0x35b   : > { %v2595_v59 = vmul.f32 %v10929_v24, %v13598_v25  ;;  %v2471_v50 = vrot.slane %v2375_v26, 2  ;;  %v2596_v39 = vmul.f32 %v13767_v16, %v13598_v25  ;;  %v11565_v55 = vmul.f32 %v13780_v12, %v13598_v25 }
 0x35c   : > { %v2472_v48 = vrot.slane %v2376_v62, 2  ;;  %v2253_v43 = vsel %vm1994_vm1, %v2251_v11, %v2252_v34  ;;  %v2255_v21 = vsel %vm1994_vm1, %v2252_v34, %v13218_v60  ;;  %v13217_v18 = vrot.slane %v11557_v9, 2 }
 0x35d   : > { %13786 = vst [vmem:[#allocation77_spill] sm:$0xff] %v11565_v55  ;;  %v2691_v17 = vrot.slane %v2595_v59, 2  ;;  %v2335_v53 = vadd.f32 %v2253_v43, %v1894_v15  ;;  %v2336_v24 = vadd.f32 %v2255_v21, %v1895_v61  ;;  %v2692_v62 = vrot.slane %v2596_v39, 2 }
 0x35e   : > { %v2473_v26 = vsel %vm1994_vm1, %v2471_v50, %v2472_v48  ;;  %v2475_v16 = vsel %vm1994_vm1, %v2472_v48, %v13217_v18  ;;  %v13216_v45 = vrot.slane %v11565_v55, 2  ;;  %v2815_v11 = vmul.f32 %v11445_v36, %v13476_v47  ;;  %v13787_v48 = vld [vmem:[#allocation32_spill] sm:$0xff] }
 0x35f   : > { %v2555_v57 = vadd.f32 %v2473_v26, %v2115_v31  ;;  %v2556_v2 = vadd.f32 %v2475_v16, %v2116_v52  ;;  %v2693_v34 = vsel %vm1994_vm1, %v2691_v17, %v2692_v62  ;;  %v2816_v15 = vmul.f32 %v11450_v1, %v13476_v47 }
 0x360   : > { %v11584_v61 = vmul.f32 %v11513_v27, %v13476_v47  ;;  %v2695_v59 = vsel %vm1994_vm1, %v2692_v62, %v13216_v45  ;;  %v2775_v31 = vadd.f32 %v2693_v34, %v2335_v53  ;;  %v2911_v50 = vrot.slane %v2815_v11, 2 }
 0x361   : > { %v3035_v39 = vmul.f32 %v11409_v7, %v13787_v48  ;;  %v2776_v43 = vadd.f32 %v2695_v59, %v2336_v24  ;;  %v2912_v52 = vrot.slane %v2816_v15, 2  ;;  %v3036_v17 = vmul.f32 %v11414_v32, %v13787_v48 }
 0x362   : > { %v13220_v21 = vrot.slane %v11584_v61, 2  ;;  %v11596_v26 = vmul.f32 %v11459_v28, %v13787_v48  ;;  %v3256_v62 = vmul.f32 %v11419_v56, %v13751_v38  ;;  %v3257_v53 = vmul.f32 %v11424_v4, %v13751_v38 }
 0x363   : > { %v3132_v16 = vrot.slane %v3035_v39, 3  ;;  %v2913_v11 = vsel %vm1994_vm1, %v2911_v50, %v2912_v52  ;;  %v3133_v34 = vrot.slane %v3036_v17, 3  ;;  %v11608_v15 = vmul.f32 %v11471_v40, %v13751_v38 }
 0x364   : > { %13788 = vst [vmem:[#allocation78_spill] sm:$0xff] %v11596_v26  ;;  %v2915_v24 = vsel %vm1994_vm1, %v2912_v52, %v13220_v21  ;;  %v2995_v59 = vadd.f32 %v2913_v11, %v2555_v57  ;;  %v13223_v39 = vrot.slane %v11596_v26, 3  ;;  %v3352_v18 = vrot.slane %v3256_v62, 3 }
 0x365   : > { %13789 = vst [vmem:[#allocation71_spill] sm:$0xff] %v11608_v15  ;;  %v2996_v45 = vadd.f32 %v2915_v24, %v2556_v2  ;;  %v3134_v60 = vsel %vm3095_vm2, %v3132_v16, %v3133_v34  ;;  %v3353_v55 = vrot.slane %v3257_v53, 3  ;;  %v13224_v50 = vrot.slane %v11608_v15, 3 }
 0x366   : > { %v3476_v52 = vmul.f32 %v11108_v20, %v13754_v22  ;;  %v3136_v17 = vsel %vm3095_vm2, %v3133_v34, %v13223_v39  ;;  %v3216_v21 = vadd.f32 %v3134_v60, %v2775_v31  ;;  %v3477_v2 = vmul.f32 %v11113_v19, %v13754_v22  ;;  %v11630_v31 = vld [vmem:[%s8101_s2 + $0x118] sm:$0xff]  ;;  %v11635_v39 = vld [vmem:[%s8101_s2 + $0x120] sm:$0xff] }
 0x367   : > { %v11622_v57 = vmul.f32 %v13777_v46, %v13754_v22  ;;  %v3217_v16 = vadd.f32 %v3136_v17, %v2776_v43  ;;  %v3354_v62 = vsel %vm3095_vm2, %v3352_v18, %v3353_v55  ;;  %v3356_v53 = vsel %vm3095_vm2, %v3353_v55, %v13224_v50  ;;  %13791 = vst [vmem:[#allocation83_spill] sm:$0xff] %v11630_v31 }
 0x368   : > { %v3572_v11 = vrot.slane %v3476_v52, 3  ;;  %v3436_v24 = vadd.f32 %v3354_v62, %v2995_v59  ;;  %v3437_v38 = vadd.f32 %v3356_v53, %v2996_v45  ;;  %v3573_v26 = vrot.slane %v3477_v2, 3  ;;  %13792 = vst [vmem:[#allocation86_spill] sm:$0xff] %v11635_v39 }
 0x369   : > { %13790 = vst [vmem:[#allocation79_spill] sm:$0xff] %v11622_v57  ;;  %v13228_v60 = vrot.slane %v11622_v57, 3  ;;  %v3696_v34 = vmul.f32 %v11630_v31, %v13680_v63  ;;  %v3697_v18 = vmul.f32 %v11635_v39, %v13680_v63  ;;  %v11641_v43 = vmul.f32 %v13780_v12, %v13680_v63 }
 0x36a   : > { %v3916_v45 = vmul.f32 %v11445_v36, %v13757_v35  ;;  %v3574_v55 = vsel %vm3095_vm2, %v3572_v11, %v3573_v26  ;;  %v3917_v52 = vmul.f32 %v11450_v1, %v13757_v35  ;;  %v11653_v17 = vmul.f32 %v11513_v27, %v13757_v35 }
 0x36b   : > { %v3576_v59 = vsel %vm3095_vm2, %v3573_v26, %v13228_v60  ;;  %v3656_v2 = vadd.f32 %v3574_v55, %v3216_v21  ;;  %v3792_v12 = vrot.slane %v3696_v34, 3  ;;  %v3793_v53 = vrot.slane %v3697_v18, 3 }
 0x36c   : > { %v3657_v62 = vadd.f32 %v3576_v59, %v3217_v16  ;;  %v13232_v50 = vrot.slane %v11641_v43, 3  ;;  %v4012_v15 = vrot.slane %v3916_v45, 3  ;;  %v4013_v63 = vrot.slane %v3917_v52, 3 }
 0x36d   : > { %v13231_v11 = vrot.slane %v11653_v17, 3  ;;  %v3794_v57 = vsel %vm3095_vm2, %v3792_v12, %v3793_v53  ;;  %v4136_v26 = vmul.f32 %v11409_v7, %v8446_v54  ;;  %v4137_v60 = vmul.f32 %v11414_v32, %v8446_v54 }
 0x36e   : > { %v11664_v21 = vmul.f32 %v11459_v28, %v8446_v54  ;;  %v3796_v16 = vsel %vm3095_vm2, %v3793_v53, %v13232_v50  ;;  %v3876_v34 = vadd.f32 %v3794_v57, %v3436_v24  ;;  %v4014_v18 = vsel %vm3095_vm2, %v4012_v15, %v4013_v63 }
 0x36f   : > { %v4016_v45 = vsel %vm3095_vm2, %v4013_v63, %v13231_v11  ;;  %v3877_v55 = vadd.f32 %v3796_v16, %v3437_v38  ;;  %v4096_v7 = vadd.f32 %v4014_v18, %v3656_v2  ;;  %v4233_v52 = vrot.slane %v4136_v26, 4 }
 0x370   : > { %v4097_v59 = vadd.f32 %v4016_v45, %v3657_v62  ;;  %v4234_v32 = vrot.slane %v4137_v60, 4  ;;  %v13236_v12 = vrot.slane %v11664_v21, 4  ;;  %v4357_v54 = vmul.f32 %v11419_v56, %v8450_v10 }
 0x371   : > { %v4358_v53 = vmul.f32 %v11424_v4, %v8450_v10  ;;  %v11680_v15 = vmul.f32 %v11471_v40, %v8450_v10  ;;  %v4577_v63 = vmul.f32 %v11108_v20, %v8509_v5  ;;  %v4578_v38 = vmul.f32 %v11113_v19, %v8509_v5 }
 0x372   : > { %v11688_v57 = vmul.f32 %v13777_v46, %v8509_v5  ;;  %v4235_v24 = vsel %vm4196_vm3, %v4233_v52, %v4234_v32  ;;  %v4237_v60 = vsel %vm4196_vm3, %v4234_v32, %v13236_v12  ;;  %v4453_v2 = vrot.slane %v4357_v54, 4 }
 0x373   : > { %v4454_v62 = vrot.slane %v4358_v53, 4  ;;  %v4317_v26 = vadd.f32 %v4235_v24, %v3876_v34  ;;  %v4318_v16 = vadd.f32 %v4237_v60, %v3877_v55  ;;  %v13233_v20 = vrot.slane %v11680_v15, 4  ;;  %v11705_v34 = vld [vmem:[%s8101_s2 + $0x128] sm:$0xff] }
 0x374   : > { %v4673_v18 = vrot.slane %v4577_v63, 4  ;;  %v4674_v45 = vrot.slane %v4578_v38, 4  ;;  %v13234_v11 = vrot.slane %v11688_v57, 4  ;;  %v4797_v50 = vmul.f32 %v11630_v31, %v8535_v14  ;;  %13793 = vst [vmem:[#allocation81_spill] sm:$0xff] %v11705_v34  ;;  %v13802_v31 = vld [vmem:[#allocation72_spill] sm:$0xff] }
 0x375   : > { %v4455_v19 = vsel %vm4196_vm3, %v4453_v2, %v4454_v62  ;;  %v4457_v52 = vsel %vm4196_vm3, %v4454_v62, %v13233_v20  ;;  %v4798_v54 = vmul.f32 %v11635_v39, %v8535_v14  ;;  %v11709_v55 = vmul.f32 %v11705_v34, %v8535_v14 }
 0x376   : > { %v4537_v32 = vadd.f32 %v4455_v19, %v4096_v7  ;;  %v4538_v53 = vadd.f32 %v4457_v52, %v4097_v59  ;;  %v4675_v63 = vsel %vm4196_vm3, %v4673_v18, %v4674_v45  ;;  %v4677_v38 = vsel %vm4196_vm3, %v4674_v45, %v13234_v11 }
 0x377   : > { %v4893_v24 = vrot.slane %v4797_v50, 4  ;;  %v4757_v60 = vadd.f32 %v4675_v63, %v4317_v26  ;;  %v4758_v2 = vadd.f32 %v4677_v38, %v4318_v16  ;;  %v4894_v7 = vrot.slane %v4798_v54, 4 }
 0x378   : > { %v13235_v62 = vrot.slane %v11709_v55, 4  ;;  %v5017_v19 = vmul.f32 %v11445_v36, %v8539_v51  ;;  %v5018_v20 = vmul.f32 %v11450_v1, %v8539_v51  ;;  %v11722_v59 = vmul.f32 %v11513_v27, %v8539_v51  ;;  %v11755_v36 = vld [vmem:[%s8111_s16 + $0x18] sm:$0xff] }
 0x379   : > { %v491_v18 = vmul.f32 %v11459_v28, %v8174_v33  ;;  %v4895_v50 = vsel %vm4196_vm3, %v4893_v24, %v4894_v7  ;;  %v492_v16 = vmul.f32 %v11217_v6, %v8174_v33  ;;  %v559_v45 = vmul.f32 %v11471_v40, %v13393_v30  ;;  %v11736_v28 = vld [vmem:[%s8101_s2 + $0xe0] sm:$0xff] }
 0x37a   : > { %v4897_v26 = vsel %vm4196_vm3, %v4894_v7, %v13235_v62  ;;  %v4977_v52 = vadd.f32 %v4895_v50, %v4537_v32  ;;  %v5113_v63 = vrot.slane %v5017_v19, 4  ;;  %v5114_v38 = vrot.slane %v5018_v20, 4 }
 0x37b   : > { %v4978_v54 = vadd.f32 %v4897_v26, %v4538_v53  ;;  %v13250_v11 = vrot.slane %v11722_v59, 4  ;;  %v560_v24 = vmul.f32 %v11736_v28, %v13393_v30  ;;  %v627_v7 = vmul.f32 %v13777_v46, %v13397_v3 }
 0x37c   : > { %v628_v62 = vmul.f32 %v11394_v41, %v13397_v3  ;;  %v5115_v12 = vsel %vm4196_vm3, %v5113_v63, %v5114_v38  ;;  %v695_v32 = vmul.f32 %v11705_v34, %v13698_v58  ;;  %v696_v20 = vmul.f32 %v11236_v42, %v13698_v58 }
 0x37d   : > { %v763_v53 = vmul.f32 %v11513_v27, %v13769_v37  ;;  %v5117_v19 = vsel %vm4196_vm3, %v5114_v38, %v13250_v11  ;;  %v5197_v46 = vadd.f32 %v5115_v12, %v4757_v60  ;;  %v659_v50 = vadd.f32 %v627_v7, %v491_v18  ;;  %v13794_v60 = vld [vmem:[#allocation36_spill] sm:$0xff]  ;;  %v13796_v7 = vld [vmem:[#allocation54_spill] sm:$0xff] }
 0x37e   : > { %v660_v26 = vadd.f32 %v628_v62, %v492_v16  ;;  %v5198_v40 = vadd.f32 %v5117_v19, %v4758_v2  ;;  %v727_v1 = vadd.f32 %v695_v32, %v559_v45  ;;  %v728_v63 = vadd.f32 %v696_v20, %v560_v24  ;;  %v11766_v62 = vld [vmem:[%s8101_s2 + $0xe8] sm:$0xf]  ;;  %v13798_v19 = vld [vmem:[#allocation28_spill] sm:$0xff] }
 0x37f   : > { %v764_v34 = vmul.f32 %v11755_v36, %v13769_v37  ;;  %v5229_v58 = vadd.f32 %v5197_v46, %v4977_v52  ;;  %v795_v39 = vadd.f32 %v763_v53, %v659_v50  ;;  %v836_v27 = vmul.f32 %v11217_v6, %v13771_v29  ;;  %v13795_v52 = vld [vmem:[#allocation40_spill] sm:$0xff]  ;;  %v13800_v37 = vld [vmem:[#allocation38_spill] sm:$0xff] }
 0x380   : > { %v837_v38 = vmul.f32 %v11250_v23, %v13771_v29  ;;  %v5230_v11 = vadd.f32 %v5198_v40, %v4978_v54  ;;  %v1057_v2 = vmul.f32 %v11736_v28, %v13794_v60  ;;  %v1058_v18 = vmul.f32 %v11766_v62, %v13794_v60 }
 0x381   : > { %v796_v12 = vadd.f32 %v764_v34, %v660_v26  ;;  %v935_v16 = vrot.slane %v836_v27, 1  ;;  %v1277_v24 = vmul.f32 %v11394_v41, %v13795_v52  ;;  %v1278_v32 = vmul.f32 %v13796_v7, %v13795_v52  ;;  %v13797_v34 = vld [vmem:[#allocation42_spill] sm:$0xff] }
 0x382   : > { %v937_v45 = vrot.slane %v837_v38, 1  ;;  %v5253_v20 = vpack.c.bf16 %v5230_v11, %v5229_v58  ;;  %v1155_v53 = vrot.slane %v1057_v2, 1  ;;  %v1157_v40 = vrot.slane %v1058_v18, 1 }
 0x383   : > { %v1497_v54 = vmul.f32 %v11236_v42, %v13797_v34  ;;  %v13799_v46 = vrot.slane %v13798_v19, 1  ;;  %v1375_v27 = vrot.slane %v1277_v24, 1  ;;  %v1377_v38 = vrot.slane %v1278_v32, 1 }
 0x384   : > { %v938_v26 = vsel %vm893_vm0, %v935_v16, %v937_v45  ;;  %7114 = vmatprep.mubr.bf16.mxu1 %v5253_v20  ;;  %v13801_v52 = vrot.slane %v13800_v37, 1  ;;  %v1158_v11 = vsel %vm893_vm0, %v1155_v53, %v1157_v40  ;;  %v13803_v19 = vrot.slane %v13802_v31, 1  ;;  %5534 = vmatmul.mubr.bf16.gmra.mrb[32].mxu0 %v5253_v20 }
 0x385   : > { %v936_v50 = vsel %vm893_vm0, %v13799_v46, %v935_v16  ;;  %v1017_v29 = vadd.f32 %v938_v26, %v728_v63  ;;  %v1237_v18 = vadd.f32 %v1158_v11, %v796_v12  ;;  %v1378_v16 = vsel %vm893_vm0, %v1375_v27, %v1377_v38  ;;  %v13808_v12 = vld [vmem:[#allocation31_spill] sm:$0xff] }
 0x386   : > { %v1016_v60 = vadd.f32 %v936_v50, %v727_v1  ;;  %v1156_v58 = vsel %vm893_vm0, %v13801_v52, %v1155_v53  ;;  %v1376_v46 = vsel %vm893_vm0, %v13803_v19, %v1375_v27  ;;  %v13804_v1 = vld [vmem:[#allocation26_spill] sm:$0xff]  ;;  %v1595_v32 = vrot.slane %v1497_v54, 1  ;;  %v13806_v52 = vld [vmem:[#allocation43_spill] sm:$0xff] }
 0x387   : > { %v1236_v2 = vadd.f32 %v1156_v58, %v795_v39  ;;  %v1457_v24 = vadd.f32 %v1378_v16, %v1017_v29  ;;  %v1498_v63 = vmul.f32 %v13804_v1, %v13797_v34  ;;  %v13805_v37 = vmov 0   ;;  %v11794_v39 = vld [vmem:[%s8111_s16 + $0x20] sm:$0xf] }
 0x388   : > { %v1456_v45 = vadd.f32 %v1376_v46, %v1016_v60  ;;  %5543 = vmatprep.mubr.bf16.mxu0 %v13805_v37  ;;  %v1717_v53 = vmul.f32 %v11755_v36, %v13806_v52  ;;  %13807 = vst [vmem:[#allocation82_spill] sm:$0xff] %v11794_v39  ;;  %v1718_v31 = vmul.f32 %v11794_v39, %v13806_v52  ;;  %v13809_v60 = vld [vmem:[#allocation73_spill] sm:$0xff]  ;;  %v13812_v37 = vrot.slane %v11526_v13, 2 }
 0x389   : > { %v1937_v40 = vmul.f32 %v11217_v6, %v13808_v12  ;;  %v1938_v29 = vmul.f32 %v11250_v23, %v13808_v12  ;;  %v13810_v20 = vrot.slane %v13809_v60, 1  ;;  %v1597_v50 = vrot.slane %v1498_v63, 1 }
 0x38a   : > { %v2158_v26 = vmul.f32 %v11736_v28, %v13785_v0  ;;  %v2159_v27 = vmul.f32 %v11766_v62, %v13785_v0  ;;  %v1815_v58 = vrot.slane %v1717_v53, 1  ;;  %v1817_v11 = vrot.slane %v1718_v31, 1 }
 0x38b   : > { %v1596_v54 = vsel %vm893_vm0, %v13810_v20, %v1595_v32  ;;  %v2036_v19 = vrot.slane %v1937_v40, 2  ;;  %v1598_v46 = vsel %vm893_vm0, %v1595_v32, %v1597_v50  ;;  %v2038_v16 = vrot.slane %v1938_v29, 2 }
 0x38c   : > { %v1676_v38 = vadd.f32 %v1596_v54, %v1236_v2  ;;  %v2256_v52 = vrot.slane %v2158_v26, 2  ;;  %v2258_v12 = vrot.slane %v2159_v27, 2  ;;  %v1677_v34 = vadd.f32 %v1598_v46, %v1237_v18 }
 0x38d   : > { %v13811_v60 = vrot.slane %v11517_v49, 1  ;;  %v1818_v20 = vsel %vm893_vm0, %v1815_v58, %v1817_v11  ;;  %v2037_v0 = vsel %vm1994_vm1, %v13812_v37, %v2036_v19  ;;  %v2039_v31 = vsel %vm1994_vm1, %v2036_v19, %v2038_v16 }
 0x38e   : > { %v1897_v53 = vadd.f32 %v1818_v20, %v1457_v24  ;;  %v2117_v40 = vadd.f32 %v2037_v0, %v1676_v38  ;;  %v2118_v32 = vadd.f32 %v2039_v31, %v1677_v34  ;;  %v13813_v29 = vrot.slane %v11548_v8, 2 }
 0x38f   : > { %v1816_v63 = vsel %vm893_vm0, %v13811_v60, %v1815_v58  ;;  %v2259_v49 = vsel %vm1994_vm1, %v2256_v52, %v2258_v12  ;;  %v2378_v54 = vmul.f32 %v11394_v41, %v13743_v44  ;;  %v2379_v13 = vmul.f32 %v13796_v7, %v13743_v44 }
 0x390   : > { %v1896_v2 = vadd.f32 %v1816_v63, %v1456_v45  ;;  %v2257_v18 = vsel %vm1994_vm1, %v13813_v29, %v2256_v52  ;;  %v2338_v26 = vadd.f32 %v2259_v49, %v1897_v53  ;;  %v2598_v45 = vmul.f32 %v11236_v42, %v13598_v25  ;;  %v13815_v63 = vld [vmem:[#allocation77_spill] sm:$0xff] }
 0x391   : > { %v2476_v24 = vrot.slane %v2378_v54, 2  ;;  %v2599_v0 = vmul.f32 %v13804_v1, %v13598_v25  ;;  %v2818_v8 = vmul.f32 %v11755_v36, %v13476_v47  ;;  %v2819_v34 = vmul.f32 %v11794_v39, %v13476_v47 }
 0x392   : > { %v2337_v50 = vadd.f32 %v2257_v18, %v1896_v2  ;;  %v2478_v37 = vrot.slane %v2379_v13, 2  ;;  %v2696_v52 = vrot.slane %v2598_v45, 2  ;;  %v3038_v12 = vmul.f32 %v11217_v6, %v13787_v48  ;;  %v13818_v13 = vld [vmem:[#allocation78_spill] sm:$0xff] }
 0x393   : > { %v3039_v27 = vmul.f32 %v11250_v23, %v13787_v48  ;;  %v13814_v38 = vrot.slane %v11557_v9, 2  ;;  %v2698_v11 = vrot.slane %v2599_v0, 2  ;;  %v2916_v19 = vrot.slane %v2818_v8, 2 }
 0x394   : > { %v2918_v46 = vrot.slane %v2819_v34, 2  ;;  %v2479_v16 = vsel %vm1994_vm1, %v2476_v24, %v2478_v37  ;;  %v13816_v20 = vrot.slane %v13815_v63, 2  ;;  %v3137_v53 = vrot.slane %v3038_v12, 3  ;;  %v13820_v34 = vld [vmem:[#allocation55_spill] sm:$0xff] }
 0x395   : > { %v2477_v58 = vsel %vm1994_vm1, %v13814_v38, %v2476_v24  ;;  %v2558_v31 = vadd.f32 %v2479_v16, %v2118_v32  ;;  %v2699_v6 = vsel %vm1994_vm1, %v2696_v52, %v2698_v11  ;;  %v13817_v23 = vrot.slane %v11584_v61, 2  ;;  %v13821_v37 = vld [vmem:[#allocation59_spill] sm:$0xff] }
 0x396   : > { %v2557_v60 = vadd.f32 %v2477_v58, %v2117_v40  ;;  %v2697_v2 = vsel %vm1994_vm1, %v13816_v20, %v2696_v52  ;;  %v2778_v18 = vadd.f32 %v2699_v6, %v2338_v26  ;;  %v2919_v49 = vsel %vm1994_vm1, %v2916_v19, %v2918_v46 }
 0x397   : > { %v2777_v29 = vadd.f32 %v2697_v2, %v2337_v50  ;;  %v2917_v9 = vsel %vm1994_vm1, %v13817_v23, %v2916_v19  ;;  %v13819_v45 = vrot.slane %v13818_v13, 3  ;;  %v2998_v24 = vadd.f32 %v2919_v49, %v2558_v31 }
 0x398   : > { %v2997_v54 = vadd.f32 %v2917_v9, %v2557_v60  ;;  %v3139_v0 = vrot.slane %v3039_v27, 3  ;;  %v3259_v32 = vmul.f32 %v11736_v28, %v13820_v34  ;;  %v3260_v50 = vmul.f32 %v11766_v62, %v13820_v34  ;;  %v13822_v60 = vld [vmem:[#allocation71_spill] sm:$0xff] }
 0x399   : > { %v3138_v40 = vsel %vm3095_vm2, %v13819_v45, %v3137_v53  ;;  %v3479_v61 = vmul.f32 %v11394_v41, %v13754_v22  ;;  %v3480_v26 = vmul.f32 %v13796_v7, %v13754_v22  ;;  %v3699_v52 = vmul.f32 %v11236_v42, %v13821_v37 }
 0x39a   : > { %v3218_v8 = vadd.f32 %v3138_v40, %v2777_v29  ;;  %v3140_v12 = vsel %vm3095_vm2, %v3137_v53, %v3139_v0  ;;  %v3357_v38 = vrot.slane %v3259_v32, 3  ;;  %v3700_v27 = vmul.f32 %v13804_v1, %v13821_v37  ;;  %v13824_v29 = vld [vmem:[#allocation79_spill] sm:$0xff] }
 0x39b   : > { %v3919_v58 = vmul.f32 %v11755_v36, %v13757_v35  ;;  %v3219_v11 = vadd.f32 %v3140_v12, %v2778_v18  ;;  %v3359_v19 = vrot.slane %v3260_v50, 3  ;;  %v3577_v46 = vrot.slane %v3479_v61, 3  ;;  %v13827_v12 = vld [vmem:[#allocation61_spill] sm:$0xff] }
 0x39c   : > { %v3579_v16 = vrot.slane %v3480_v26, 3  ;;  %v13823_v63 = vrot.slane %v13822_v60, 3  ;;  %v3797_v2 = vrot.slane %v3699_v52, 3  ;;  %v3799_v42 = vrot.slane %v3700_v27, 3  ;;  %v7522_v27 = vld [vmem:[%s8101_s2 + $0xc0] sm:$0xf] }
 0x39d   : > { %v3920_v53 = vmul.f32 %v11794_v39, %v13757_v35  ;;  %v3360_v31 = vsel %vm3095_vm2, %v3357_v38, %v3359_v19  ;;  %v13825_v23 = vrot.slane %v13824_v29, 3  ;;  %v13826_v40 = vrot.slane %v11641_v43, 3 }
 0x39e   : > { %v3358_v20 = vsel %vm3095_vm2, %v13823_v63, %v3357_v38  ;;  %v3580_v18 = vsel %vm3095_vm2, %v3577_v46, %v3579_v16  ;;  %v3439_v49 = vadd.f32 %v3360_v31, %v2998_v24  ;;  %v3800_v32 = vsel %vm3095_vm2, %v3797_v2, %v3799_v42 }
 0x39f   : > { %v3438_v6 = vadd.f32 %v3358_v20, %v2997_v54  ;;  %v3578_v9 = vsel %vm3095_vm2, %v13825_v23, %v3577_v46  ;;  %v3659_v45 = vadd.f32 %v3580_v18, %v3219_v11  ;;  %v3798_v0 = vsel %vm3095_vm2, %v13826_v40, %v3797_v2  ;;  %v7521_v54 = vld [vmem:[%s8101_s2 + $0xb8] sm:$0xff]  ;;  %v11903_v23 = vld [vmem:[%s8101_s2 + $0x130] sm:$0xff] }
 0x3a0   : > { %v3658_v13 = vadd.f32 %v3578_v9, %v3218_v8  ;;  %v4017_v61 = vrot.slane %v3919_v58, 3  ;;  %v4019_v26 = vrot.slane %v3920_v53, 3  ;;  %v3879_v52 = vadd.f32 %v3800_v32, %v3439_v49 }
 0x3a1   : > { %v3878_v50 = vadd.f32 %v3798_v0, %v3438_v6  ;;  %v4139_v38 = vmul.f32 %v7521_v54, %v13827_v12  ;;  %v4140_v19 = vmul.f32 %v7522_v27, %v13827_v12  ;;  %v4360_v24 = vmul.f32 %v11736_v28, %v8450_v10  ;;  %v11918_v54 = vpop.f32.mrb[0].mxu0 }
 0x3a2   : > { %v13828_v43 = vrot.slane %v11653_v17, 3  ;;  %v4020_v11 = vsel %vm3095_vm2, %v4017_v61, %v4019_v26  ;;  %v4361_v58 = vmul.f32 %v11766_v62, %v8450_v10  ;;  %v4580_v46 = vmul.f32 %v11394_v41, %v8509_v5  ;;  %v11916_v26 = vpop.f32.mrb[0].mxu1  ;;  %13833 = vst [vmem:[#allocation85_spill] sm:$0xff] %v11918_v54  ;;  %v11924_v27 = vpop.f32.mrb[1].mxu0  ;;  %v12012_v54 = vld [vmem:[%s8101_s2 + $0x100] sm:$0xff] }
 0x3a3   : > { %v4099_v60 = vadd.f32 %v4020_v11, %v3659_v45  ;;  %v4238_v63 = vrot.slane %v4139_v38, 4  ;;  %v4240_v20 = vrot.slane %v4140_v19, 4  ;;  %v4458_v2 = vrot.slane %v4360_v24, 4  ;;  %13832 = vst [vmem:[#allocation84_spill] sm:$0xff] %v11916_v26  ;;  %v11922_v38 = vpop.f32.mrb[1].mxu1  ;;  %13835 = vst [vmem:[#allocation74_spill] sm:$0xff] %v11924_v27 }
 0x3a4   : > { %v4018_v8 = vsel %vm3095_vm2, %v13828_v43, %v4017_v61  ;;  %v4460_v42 = vrot.slane %v4361_v58, 4  ;;  %v4581_v53 = vmul.f32 %v13796_v7, %v8509_v5  ;;  %v4678_v17 = vrot.slane %v4580_v46, 4  ;;  %13834 = vst [vmem:[#allocation87_spill] sm:$0xff] %v11922_v38  ;;  %v11935_v11 = vpop.f32.mrb[2].mxu0 }
 0x3a5   : > { %v4098_v16 = vadd.f32 %v4018_v8, %v3658_v13  ;;  %v13829_v31 = vrot.slane %v11664_v21, 4  ;;  %v4241_v29 = vsel %vm4196_vm3, %v4238_v63, %v4240_v20  ;;  %v4800_v41 = vmul.f32 %v11903_v23, %v8535_v14  ;;  %v11933_v8 = vpop.f32.mrb[2].mxu1  ;;  %13837 = vst [vmem:[#allocation88_spill] sm:$0xff] %v11935_v11  ;;  %v11989_v11 = vld [vmem:[%s8111_s16 + $0x30] sm:$0xff] }
 0x3a6   : > { %v4801_v9 = vmul.f32 %v13804_v1, %v8535_v14  ;;  %v4320_v49 = vadd.f32 %v4241_v29, %v3879_v52  ;;  %v13830_v13 = vrot.slane %v11680_v15, 4  ;;  %v4461_v21 = vsel %vm4196_vm3, %v4458_v2, %v4460_v42  ;;  %13836 = vst [vmem:[#allocation75_spill] sm:$0xff] %v11933_v8  ;;  %v11941_v20 = vpop.f32.mrb[3].mxu1 }
 0x3a7   : > { %v4239_v6 = vsel %vm4196_vm3, %v13829_v31, %v4238_v63  ;;  %v4540_v40 = vadd.f32 %v4461_v21, %v4099_v60  ;;  %v13831_v0 = vrot.slane %v11688_v57, 4  ;;  %v4680_v61 = vrot.slane %v4581_v53, 4  ;;  %13839 = vst [vmem:[#allocation45_spill] sm:$0xff] %v11941_v20  ;;  %v11946_v31 = vld [vmem:[%s8101_s2 + $0xf0] sm:$0xff]  ;;  %v11950_v29 = vpop.f32.mrb[4].mxu1  ;;  %v13845_v21 = vld [vmem:[#allocation86_spill] sm:$0xff] }
 0x3a8   : > { %v4319_v18 = vadd.f32 %v4239_v6, %v3878_v50  ;;  %v4459_v7 = vsel %vm4196_vm3, %v13830_v13, %v4458_v2  ;;  %v4898_v50 = vrot.slane %v4800_v41, 4  ;;  %v4900_v52 = vrot.slane %v4801_v9, 4  ;;  %v11943_v2 = vpop.f32.mrb[3].mxu0  ;;  %13841 = vst [vmem:[#allocation80_spill] sm:$0xff] %v11950_v29  ;;  %v13844_v13 = vld [vmem:[#allocation83_spill] sm:$0xff] }
 0x3a9   : > { %v4539_v45 = vadd.f32 %v4459_v7, %v4098_v16  ;;  %v4679_v32 = vsel %vm4196_vm3, %v13831_v0, %v4678_v17  ;;  %v5020_v15 = vmul.f32 %v11755_v36, %v8539_v51  ;;  %v4681_v57 = vsel %vm4196_vm3, %v4678_v17, %v4680_v61  ;;  %13840 = vst [vmem:[#allocation46_spill] sm:$0xff] %v11943_v2  ;;  %v13848_v61 = vld [vmem:[#allocation35_spill] sm:$0xff] }
 0x3aa   : > { %v4759_v1 = vadd.f32 %v4679_v32, %v4319_v18  ;;  %v5021_v19 = vmul.f32 %v11794_v39, %v8539_v51  ;;  %v493_v24 = vmul.f32 %v11419_v56, %v8174_v33  ;;  %v494_v43 = vmul.f32 %v11424_v4, %v8174_v33  ;;  %v11958_v18 = vld [vmem:[%s8101_s2 + $0xf8] sm:$0xff] }
 0x3ab   : > { %v4760_v58 = vadd.f32 %v4681_v57, %v4320_v49  ;;  %v13838_v46 = vrot.slane %v11709_v55, 4  ;;  %v4901_v60 = vsel %vm4196_vm3, %v4898_v50, %v4900_v52  ;;  %v5118_v63 = vrot.slane %v5020_v15, 4  ;;  %v11952_v55 = vpop.f32.mrb[4].mxu0  ;;  %v13850_v15 = vld [vmem:[#allocation34_spill] sm:$0xff] }
 0x3ac   : > { %v4980_v53 = vadd.f32 %v4901_v60, %v4540_v40  ;;  %v5120_v17 = vrot.slane %v5021_v19, 4  ;;  %v561_v6 = vmul.f32 %v11946_v31, %v13393_v30  ;;  %13842 = vst [vmem:[#allocation29_spill] sm:$0xff] %v11952_v55  ;;  %v13843_v41 = vrot.slane %v11722_v59, 4  ;;  %v11966_v40 = vpop.f32.mrb[5].mxu1  ;;  %v11968_v0 = vpop.f32.mrb[5].mxu0  ;;  %v11980_v55 = vld [vmem:[%s8111_s16 + $0x28] sm:$0xff] }
 0x3ad   : > { %v4899_v16 = vsel %vm4196_vm3, %v13838_v46, %v4898_v50  ;;  %v562_v49 = vmul.f32 %v11958_v18, %v13393_v30  ;;  %v629_v7 = vmul.f32 %v13844_v13, %v13397_v3  ;;  %13846 = vst [vmem:[#allocation56_spill] sm:$0xff] %v11966_v40  ;;  %13847 = vst [vmem:[#allocation41_spill] sm:$0xff] %v11968_v0  ;;  %v13849_v50 = vld [vmem:[#allocation57_spill] sm:$0xff]  ;;  %v11975_v19 = vpop.f32.mrb[6].mxu1  ;;  %v11977_v46 = vpop.f32.mrb[6].mxu0  ;;  %v13864_v40 = vld [vmem:[#allocation40_spill] sm:$0xff] }
 0x3ae   : > { %v4979_v42 = vadd.f32 %v4899_v16, %v4539_v45  ;;  %v5119_v9 = vsel %vm4196_vm3, %v13843_v41, %v5118_v63  ;;  %v630_v45 = vmul.f32 %v13845_v21, %v13397_v3  ;;  %v5121_v59 = vsel %vm4196_vm3, %v5118_v63, %v5120_v17  ;;  %13851 = vst [vmem:[#allocation51_spill] sm:$0xff] %v11975_v19  ;;  %v13853_v0 = vld [vmem:[#allocation37_spill] sm:$0xff]  ;;  %v11984_v17 = vpop.f32.mrb[7].mxu1 }
 0x3af   : > { %v5199_v32 = vadd.f32 %v5119_v9, %v4759_v1  ;;  %v697_v52 = vmul.f32 %v13849_v50, %v13848_v61  ;;  %v698_v57 = vmul.f32 %v13850_v15, %v13848_v61  ;;  %13852 = vst [vmem:[#allocation44_spill] sm:$0xff] %v11977_v46  ;;  %v5200_v16 = vadd.f32 %v5121_v59, %v4760_v58  ;;  %v11986_v1 = vpop.f32.mrb[7].mxu0 }
 0x3b0   : > { %v661_v60 = vadd.f32 %v629_v7, %v493_v24  ;;  %v662_v41 = vadd.f32 %v630_v45, %v494_v43  ;;  %v765_v63 = vmul.f32 %v11980_v55, %v13853_v0  ;;  %13854 = vst [vmem:[#allocation64_spill] sm:$0xff] %v11984_v17  ;;  %13855 = vst [vmem:[#allocation65_spill] sm:$0xff] %v11986_v1  ;;  %v11993_v24 = vpop.f32.mrb[8].mxu1  ;;  %v13857_v45 = vld [vmem:[#allocation30_spill] sm:$0xff]  ;;  %v13869_v20 = vmov 0   ;;  %v12042_v38 = vpop.f32.mrb[8].mxu0 }
 0x3b1   : > { %v5231_v9 = vadd.f32 %v5199_v32, %v4979_v42  ;;  %v729_v2 = vadd.f32 %v697_v52, %v561_v6  ;;  %v730_v27 = vadd.f32 %v698_v57, %v562_v49  ;;  %v766_v58 = vmul.f32 %v11989_v11, %v13853_v0  ;;  %13856 = vst [vmem:[#allocation66_spill] sm:$0xff] %v11993_v24  ;;  %v11999_v1 = vpop.f32.mrb[9].mxu1  ;;  %v13859_v6 = vld [vmem:[#allocation39_spill] sm:$0xff]  ;;  %v13861_v32 = vld [vmem:[#allocation36_spill] sm:$0xff] }
 0x3b2   : > { %v5232_v43 = vadd.f32 %v5200_v16, %v4980_v53  ;;  %v797_v7 = vadd.f32 %v765_v63, %v661_v60  ;;  %v838_v59 = vmul.f32 %v11419_v56, %v13857_v45  ;;  %v839_v46 = vmul.f32 %v11424_v4, %v13857_v45  ;;  %13858 = vst [vmem:[#allocation67_spill] sm:$0xff] %v11999_v1  ;;  %v12009_v57 = vpop.f32.mrb[10].mxu1 }
 0x3b3   : > { %v798_v42 = vadd.f32 %v766_v58, %v662_v41  ;;  %v12003_v49 = vmul.f32 %v13859_v6, %v13857_v45  ;;  %v1059_v52 = vmul.f32 %v11946_v31, %v13861_v32  ;;  %v1060_v53 = vmul.f32 %v11958_v18, %v13861_v32  ;;  %13862 = vst [vmem:[#allocation68_spill] sm:$0xff] %v12009_v57  ;;  %v12018_v58 = vpop.f32.mrb[11].mxu1 }
 0x3b4   : > { %v5254_v16 = vpack.c.bf16 %v5232_v43, %v5231_v9  ;;  %v939_v60 = vrot.slane %v838_v59, 1  ;;  %v940_v63 = vrot.slane %v839_v46, 1  ;;  %v12016_v41 = vmul.f32 %v12012_v54, %v13861_v32  ;;  %13863 = vst [vmem:[#allocation27_spill] sm:$0xff] %v12018_v58  ;;  %v12023_v29 = vpop.f32.mrb[12].mxu1  ;;  %v13866_v59 = vld [vmem:[#allocation81_spill] sm:$0xff]  ;;  %13871 = vst [vmem:[#allocation38_spill] sm:$0xff] %v12042_v38 }
 0x3b5   : > { %13860 = vst [vmem:[#allocation33_spill] sm:$0xff] %v12003_v49  ;;  %v13264_v1 = vrot.slane %v12003_v49, 1  ;;  %v1159_v24 = vrot.slane %v1059_v52, 1  ;;  %v1160_v17 = vrot.slane %v1060_v53, 1  ;;  %v1279_v19 = vmul.f32 %v13844_v13, %v13864_v40  ;;  %13865 = vst [vmem:[#allocation70_spill] sm:$0xff] %v12023_v29  ;;  %v12033_v52 = vpop.f32.mrb[13].mxu1 }
 0x3b6   : > { %7115 = vmatmul.mubr.bf16.gmra.mrb[32].mxu1 %v5254_v16  ;;  %v941_v46 = vsel %vm893_vm0, %v939_v60, %v940_v63  ;;  %v1280_v43 = vmul.f32 %v13845_v21, %v13864_v40  ;;  %v12031_v58 = vmul.f32 %v13866_v59, %v13864_v40  ;;  %5544 = vmatmul.mubr.bf16.gmra.mrb[36].mxu0 %v5254_v16  ;;  %v12040_v9 = vpop.f32.mrb[14].mxu1  ;;  %v13872_v26 = vrot.slane %v12016_v41, 1 }
 0x3b7   : > { %13868 = vst [vmem:[#allocation54_spill] sm:$0xff] %v12033_v52  ;;  %v943_v53 = vsel %vm893_vm0, %v940_v63, %v13264_v1  ;;  %v1018_v29 = vadd.f32 %v941_v46, %v729_v2  ;;  %v1161_v57 = vsel %vm893_vm0, %v1159_v24, %v1160_v17  ;;  %v1379_v60 = vrot.slane %v1279_v19, 1  ;;  %5553 = vmatprep.mubr.bf16.mxu0 %v13869_v20  ;;  %v12047_v49 = vpop.f32.mrb[15].mxu1  ;;  %v12049_v63 = vpop.f32.mrb[9].mxu0  ;;  %v13875_v24 = vld [vmem:[#allocation42_spill] sm:$0xff]  ;;  %v12082_v20 = vld [vmem:[%s8111_s16 + $0x38] sm:$0xff] }
 0x3b8   : > { %13867 = vst [vmem:[#allocation63_spill] sm:$0xff] %v12031_v58  ;;  %13870 = vst [vmem:[#allocation28_spill] sm:$0xff] %v12040_v9  ;;  %v1019_v8 = vadd.f32 %v943_v53, %v730_v27  ;;  %v1163_v16 = vsel %vm893_vm0, %v1160_v17, %v13872_v26  ;;  %v1238_v52 = vadd.f32 %v1161_v57, %v797_v7  ;;  %v1380_v39 = vrot.slane %v1280_v43, 1  ;;  %v12056_v27 = vpop.f32.mrb[16].mxu1  ;;  %v12058_v53 = vpop.f32.mrb[10].mxu0  ;;  %v13878_v17 = vld [vmem:[#allocation76_spill] sm:$0xff] }
 0x3b9   : > { %13873 = vst [vmem:[#allocation72_spill] sm:$0xff] %v12047_v49  ;;  %13874 = vst [vmem:[#allocation26_spill] sm:$0xff] %v12049_v63  ;;  %v1239_v2 = vadd.f32 %v1163_v16, %v798_v42  ;;  %v13266_v19 = vrot.slane %v12031_v58, 1  ;;  %v1499_v46 = vmul.f32 %v13849_v50, %v13875_v24  ;;  %v1500_v1 = vmul.f32 %v13850_v15, %v13875_v24  ;;  %v13880_v42 = vld [vmem:[#allocation43_spill] sm:$0xff]  ;;  %v12069_v43 = vpop.f32.mrb[17].mxu1  ;;  %v12071_v15 = vpop.f32.mrb[11].mxu0 }
 0x3ba   : > { %13876 = vst [vmem:[#allocation73_spill] sm:$0xff] %v12056_v27  ;;  %13877 = vst [vmem:[#allocation77_spill] sm:$0xff] %v12058_v53  ;;  %v1381_v26 = vsel %vm893_vm0, %v1379_v60, %v1380_v39  ;;  %v12063_v7 = vmul.f32 %v13878_v17, %v13875_v24  ;;  %v1719_v57 = vmul.f32 %v11980_v55, %v13880_v42  ;;  %v12076_v38 = vpop.f32.mrb[18].mxu1  ;;  %v12078_v27 = vpop.f32.mrb[12].mxu0 }
 0x3bb   : > { %v1720_v50 = vmul.f32 %v11989_v11, %v13880_v42  ;;  %13881 = vst [vmem:[#allocation59_spill] sm:$0xff] %v12069_v43  ;;  %13882 = vst [vmem:[#allocation71_spill] sm:$0xff] %v12071_v15  ;;  %v1383_v16 = vsel %vm893_vm0, %v1380_v39, %v13266_v19  ;;  %v1458_v63 = vadd.f32 %v1381_v26, %v1018_v29  ;;  %v1599_v60 = vrot.slane %v1499_v46, 1  ;;  %v12088_v58 = vpop.f32.mrb[19].mxu1  ;;  %v12090_v39 = vpop.f32.mrb[13].mxu0  ;;  %v13888_v46 = vld [vmem:[#allocation31_spill] sm:$0xff] }
 0x3bc   : > { %13879 = vst [vmem:[#allocation78_spill] sm:$0xff] %v12063_v7  ;;  %v1600_v53 = vrot.slane %v1500_v1, 1  ;;  %13883 = vst [vmem:[#allocation79_spill] sm:$0xff] %v12076_v38  ;;  %v1459_v49 = vadd.f32 %v1383_v16, %v1019_v8  ;;  %v13268_v9 = vrot.slane %v12063_v7, 1  ;;  %v12086_v43 = vmul.f32 %v12082_v20, %v13880_v42  ;;  %v12097_v16 = vpop.f32.mrb[20].mxu1  ;;  %v12099_v19 = vpop.f32.mrb[14].mxu0 }
 0x3bd   : > { %13884 = vst [vmem:[#allocation61_spill] sm:$0xff] %v12078_v27  ;;  %v1819_v15 = vrot.slane %v1719_v57, 1  ;;  %13886 = vst [vmem:[#allocation86_spill] sm:$0xff] %v12088_v58  ;;  %v1820_v1 = vrot.slane %v1720_v50, 1  ;;  %v1939_v26 = vmul.f32 %v11419_v56, %v13888_v46  ;;  %v1940_v8 = vmul.f32 %v11424_v4, %v13888_v46  ;;  %v12111_v56 = vpop.f32.mrb[15].mxu0 }
 0x3be   : > { %13885 = vst [vmem:[#allocation83_spill] sm:$0xff] %v12086_v43  ;;  %13887 = vst [vmem:[#allocation35_spill] sm:$0xff] %v12090_v39  ;;  %v1601_v29 = vsel %vm893_vm0, %v1599_v60, %v1600_v53  ;;  %v1603_v57 = vsel %vm893_vm0, %v1600_v53, %v13268_v9  ;;  %v13269_v39 = vrot.slane %v12086_v43, 1  ;;  %v12107_v50 = vmul.f32 %v13859_v6, %v13888_v46  ;;  %v12109_v60 = vpop.f32.mrb[21].mxu1  ;;  %v12116_v7 = vpop.f32.mrb[16].mxu0 }
 0x3bf   : > { %13889 = vst [vmem:[#allocation57_spill] sm:$0xff] %v12097_v16  ;;  %13890 = vst [vmem:[#allocation34_spill] sm:$0xff] %v12099_v19  ;;  %v1678_v27 = vadd.f32 %v1601_v29, %v1238_v52  ;;  %v1679_v4 = vadd.f32 %v1603_v57, %v1239_v2  ;;  %v1821_v16 = vsel %vm893_vm0, %v1819_v15, %v1820_v1  ;;  %v2040_v58 = vrot.slane %v1939_v26, 2  ;;  %v12114_v38 = vpop.f32.mrb[22].mxu1  ;;  %v13896_v29 = vld [vmem:[#allocation47_spill] sm:$0xff]  ;;  %v12126_v2 = vpop.f32.mrb[17].mxu0 }
 0x3c0   : > { %13891 = vst [vmem:[#allocation37_spill] sm:$0xff] %v12107_v50  ;;  %13892 = vst [vmem:[#allocation30_spill] sm:$0xff] %v12109_v60  ;;  %v2041_v19 = vrot.slane %v1940_v8, 2  ;;  %v1823_v52 = vsel %vm893_vm0, %v1820_v1, %v13269_v39  ;;  %v1898_v53 = vadd.f32 %v1821_v16, %v1458_v63  ;;  %v13270_v6 = vrot.slane %v12107_v50, 2  ;;  %v12135_v63 = vpop.f32.mrb[18].mxu0 }
 0x3c1   : > { %13893 = vst [vmem:[#allocation39_spill] sm:$0xff] %v12111_v56  ;;  %13894 = vst [vmem:[#allocation36_spill] sm:$0xff] %v12114_v38  ;;  %v2160_v9 = vmul.f32 %v11946_v31, %v13896_v29  ;;  %v12124_v56 = vpop.f32.mrb[23].mxu1  ;;  %v1899_v15 = vadd.f32 %v1823_v52, %v1459_v49  ;;  %v2161_v8 = vmul.f32 %v11958_v18, %v13896_v29  ;;  %v12144_v52 = vpop.f32.mrb[19].mxu0 }
 0x3c2   : > { %13895 = vst [vmem:[#allocation40_spill] sm:$0xff] %v12116_v7  ;;  %13897 = vst [vmem:[#allocation81_spill] sm:$0xff] %v12124_v56  ;;  %v2042_v26 = vsel %vm1994_vm1, %v2040_v58, %v2041_v19  ;;  %v12133_v1 = vmul.f32 %v12012_v54, %v13896_v29  ;;  %v2044_v16 = vsel %vm1994_vm1, %v2041_v19, %v13270_v6  ;;  %v12142_v58 = vpop.f32.mrb[24].mxu1  ;;  %v12161_v6 = vld [vmem:[%s8111_s16 + $0x8] sm:$0xff] }
 0x3c3   : > { %13898 = vst [vmem:[#allocation42_spill] sm:$0xff] %v12126_v2  ;;  %13900 = vst [vmem:[#allocation43_spill] sm:$0xff] %v12135_v63  ;;  %v2119_v57 = vadd.f32 %v2042_v26, %v1678_v27  ;;  %v2260_v39 = vrot.slane %v2160_v9, 2  ;;  %v2380_v49 = vmul.f32 %v13844_v13, %v13743_v44  ;;  %v2120_v2 = vadd.f32 %v2044_v16, %v1679_v4  ;;  %v12149_v38 = vpop.f32.mrb[25].mxu1  ;;  %v12156_v27 = vld [vmem:[%s8111_s16] sm:$0xff] }
 0x3c4   : > { %13899 = vst [vmem:[#allocation76_spill] sm:$0xff] %v12133_v1  ;;  %13901 = vst [vmem:[#allocation31_spill] sm:$0xff] %v12142_v58  ;;  %v2261_v7 = vrot.slane %v2161_v8, 2  ;;  %v13275_v56 = vrot.slane %v12133_v1, 2  ;;  %v2381_v63 = vmul.f32 %v13845_v21, %v13743_v44  ;;  %v12153_v19 = vmul.f32 %v13866_v59, %v13743_v44  ;;  %v12165_v8 = vpop.f32.mrb[26].mxu1 }
 0x3c5   : > { %13902 = vst [vmem:[#allocation47_spill] sm:$0xff] %v12144_v52  ;;  %13903 = vst [vmem:[#allocation89_spill] sm:$0xff] %v12149_v38  ;;  %v2480_v9 = vrot.slane %v2380_v49, 2  ;;  %v2600_v26 = vmul.f32 %v12156_v27, %v13598_v25  ;;  %v2601_v4 = vmul.f32 %v12161_v6, %v13598_v25  ;;  %v12173_v49 = vmul.f32 %v13878_v17, %v13598_v25  ;;  %v12175_v58 = vpop.f32.mrb[27].mxu1 }
 0x3c6   : > { %13904 = vst [vmem:[#allocation90_spill] sm:$0xff] %v12153_v19  ;;  %13905 = vst [vmem:[#allocation91_spill] sm:$0xff] %v12165_v8  ;;  %v2262_v16 = vsel %vm1994_vm1, %v2260_v39, %v2261_v7  ;;  %v2264_v52 = vsel %vm1994_vm1, %v2261_v7, %v13275_v56  ;;  %v2481_v38 = vrot.slane %v2381_v63, 2  ;;  %v13276_v50 = vrot.slane %v12153_v19, 2 }
 0x3c7   : > { %13906 = vst [vmem:[#allocation92_spill] sm:$0xff] %v12173_v49  ;;  %13907 = vst [vmem:[#allocation93_spill] sm:$0xff] %v12175_v58  ;;  %v2339_v60 = vadd.f32 %v2262_v16, %v1898_v53  ;;  %v2340_v44 = vadd.f32 %v2264_v52, %v1899_v15  ;;  %v2700_v43 = vrot.slane %v2600_v26, 2  ;;  %v2701_v39 = vrot.slane %v2601_v4, 2  ;;  %v7533_v58 = vld [vmem:[%s8101_s2 + $0xd0] sm:$0xff] }
 0x3c8   : > { %v2482_v8 = vsel %vm1994_vm1, %v2480_v9, %v2481_v38  ;;  %v13279_v1 = vrot.slane %v12173_v49, 2  ;;  %v2820_v7 = vmul.f32 %v11980_v55, %v13476_v47  ;;  %v2484_v17 = vsel %vm1994_vm1, %v2481_v38, %v13276_v50 }
 0x3c9   : > { %v2559_v53 = vadd.f32 %v2482_v8, %v2119_v57  ;;  %v2821_v15 = vmul.f32 %v11989_v11, %v13476_v47  ;;  %v12189_v63 = vmul.f32 %v12082_v20, %v13476_v47  ;;  %v2560_v52 = vadd.f32 %v2484_v17, %v2120_v2  ;;  %v7532_v8 = vld [vmem:[%s8101_s2 + $0xc8] sm:$0xff]  ;;  %v12201_v47 = vld [vmem:[%s8101_s2 + $0xd8] sm:$0xff] }
 0x3ca   : > { %v2702_v9 = vsel %vm1994_vm1, %v2700_v43, %v2701_v39  ;;  %v2704_v26 = vsel %vm1994_vm1, %v2701_v39, %v13279_v1  ;;  %v2920_v4 = vrot.slane %v2820_v7, 2  ;;  %v3040_v50 = vmul.f32 %v7532_v8, %v13787_v48 }
 0x3cb   : > { %13908 = vst [vmem:[#allocation94_spill] sm:$0xff] %v12189_v63  ;;  %v2779_v16 = vadd.f32 %v2702_v9, %v2339_v60  ;;  %v2780_v56 = vadd.f32 %v2704_v26, %v2340_v44  ;;  %v2921_v38 = vrot.slane %v2821_v15, 2  ;;  %v13283_v57 = vrot.slane %v12189_v63, 2 }
 0x3cc   : > { %v3041_v19 = vmul.f32 %v7533_v58, %v13787_v48  ;;  %v12205_v43 = vmul.f32 %v12201_v47, %v13787_v48  ;;  %v3261_v2 = vmul.f32 %v11946_v31, %v13820_v34  ;;  %v3262_v39 = vmul.f32 %v11958_v18, %v13820_v34 }
 0x3cd   : > { %v2922_v44 = vsel %vm1994_vm1, %v2920_v4, %v2921_v38  ;;  %v2924_v60 = vsel %vm1994_vm1, %v2921_v38, %v13283_v57  ;;  %v12217_v7 = vmul.f32 %v12012_v54, %v13820_v34  ;;  %v3141_v9 = vrot.slane %v3040_v50, 3 }
 0x3ce   : > { %13909 = vst [vmem:[#allocation95_spill] sm:$0xff] %v12205_v43  ;;  %v2999_v17 = vadd.f32 %v2922_v44, %v2559_v53  ;;  %v3000_v15 = vadd.f32 %v2924_v60, %v2560_v52  ;;  %v3142_v26 = vrot.slane %v3041_v19, 3  ;;  %v13289_v1 = vrot.slane %v12205_v43, 3  ;;  %v12237_v44 = vpop.f32.mrb[20].mxu0 }
 0x3cf   : > { %13910 = vst [vmem:[#allocation96_spill] sm:$0xff] %v12217_v7  ;;  %v3361_v49 = vrot.slane %v3261_v2, 3  ;;  %v3362_v48 = vrot.slane %v3262_v39, 3  ;;  %v13288_v4 = vrot.slane %v12217_v7, 3  ;;  %v3481_v38 = vmul.f32 %v13844_v13, %v13754_v22  ;;  %13912 = vst [vmem:[#allocation98_spill] sm:$0xff] %v12237_v44  ;;  %v12239_v25 = vpop.f32.mrb[21].mxu0 }
 0x3d0   : > { %v3143_v63 = vsel %vm3095_vm2, %v3141_v9, %v3142_v26  ;;  %v3482_v57 = vmul.f32 %v13845_v21, %v13754_v22  ;;  %v12228_v53 = vmul.f32 %v13866_v59, %v13754_v22  ;;  %v3145_v50 = vsel %vm3095_vm2, %v3142_v26, %v13289_v1  ;;  %13913 = vst [vmem:[#allocation99_spill] sm:$0xff] %v12239_v25 }
 0x3d1   : > { %v3220_v19 = vadd.f32 %v3143_v63, %v2779_v16  ;;  %v3363_v52 = vsel %vm3095_vm2, %v3361_v49, %v3362_v48  ;;  %v3365_v2 = vsel %vm3095_vm2, %v3362_v48, %v13288_v4  ;;  %v3221_v60 = vadd.f32 %v3145_v50, %v2780_v56  ;;  %v12247_v16 = vld [vmem:[%s8111_s16 + $0x10] sm:$0xff] }
 0x3d2   : > { %13911 = vst [vmem:[#allocation97_spill] sm:$0xff] %v12228_v53  ;;  %v3440_v39 = vadd.f32 %v3363_v52, %v2999_v17  ;;  %v3441_v9 = vadd.f32 %v3365_v2, %v3000_v15  ;;  %v3581_v34 = vrot.slane %v3481_v38, 3  ;;  %v3582_v22 = vrot.slane %v3482_v57, 3 }
 0x3d3   : > { %v3584_v43 = vrot.slane %v12228_v53, 3  ;;  %v3701_v63 = vmul.f32 %v12156_v27, %v13821_v37  ;;  %v3702_v49 = vmul.f32 %v12161_v6, %v13821_v37  ;;  %v12251_v48 = vmul.f32 %v12247_v16, %v13821_v37 }
 0x3d4   : > { %v3921_v56 = vmul.f32 %v11980_v55, %v13757_v35  ;;  %v3922_v57 = vmul.f32 %v11989_v11, %v13757_v35  ;;  %v12259_v17 = vmul.f32 %v12082_v20, %v13757_v35  ;;  %v3583_v15 = vsel %vm3095_vm2, %v3581_v34, %v3582_v22 }
 0x3d5   : > { %v3585_v26 = vsel %vm3095_vm2, %v3582_v22, %v3584_v43  ;;  %v3801_v38 = vrot.slane %v3701_v63, 3  ;;  %v3802_v50 = vrot.slane %v3702_v49, 3  ;;  %v3660_v52 = vadd.f32 %v3583_v15, %v3220_v19 }
 0x3d6   : > { %v3661_v2 = vadd.f32 %v3585_v26, %v3221_v60  ;;  %v3804_v4 = vrot.slane %v12251_v48, 3  ;;  %v4021_v1 = vrot.slane %v3921_v56, 3  ;;  %v4022_v44 = vrot.slane %v3922_v57, 3 }
 0x3d7   : > { %v3803_v25 = vsel %vm3095_vm2, %v3801_v38, %v3802_v50  ;;  %v4024_v7 = vrot.slane %v12259_v17, 3  ;;  %v4141_v35 = vmul.f32 %v7532_v8, %v13827_v12  ;;  %v4142_v22 = vmul.f32 %v7533_v58, %v13827_v12 }
 0x3d8   : > { %v3805_v34 = vsel %vm3095_vm2, %v3802_v50, %v3804_v4  ;;  %v3880_v53 = vadd.f32 %v3803_v25, %v3440_v39  ;;  %v12275_v19 = vmul.f32 %v12201_v47, %v13827_v12  ;;  %v4023_v63 = vsel %vm3095_vm2, %v4021_v1, %v4022_v44 }
 0x3d9   : > { %v3881_v60 = vadd.f32 %v3805_v34, %v3441_v9  ;;  %v4025_v49 = vsel %vm3095_vm2, %v4022_v44, %v4024_v7  ;;  %v4242_v56 = vrot.slane %v4141_v35, 4  ;;  %v4100_v8 = vadd.f32 %v4023_v63, %v3660_v52 }
 0x3da   : > { %v4101_v57 = vadd.f32 %v4025_v49, %v3661_v2  ;;  %v4243_v15 = vrot.slane %v4142_v22, 4  ;;  %v4245_v26 = vrot.slane %v12275_v19, 4  ;;  %v4362_v25 = vmul.f32 %v11946_v31, %v8450_v10 }
 0x3db   : > { %v4363_v58 = vmul.f32 %v11958_v18, %v8450_v10  ;;  %v12288_v39 = vmul.f32 %v12012_v54, %v8450_v10  ;;  %v4582_v1 = vmul.f32 %v13844_v13, %v8509_v5  ;;  %v4583_v9 = vmul.f32 %v13845_v21, %v8509_v5 }
 0x3dc   : > { %v4244_v35 = vsel %vm4196_vm3, %v4242_v56, %v4243_v15  ;;  %v4246_v44 = vsel %vm4196_vm3, %v4243_v15, %v4245_v26  ;;  %v12300_v31 = vmul.f32 %v13866_v59, %v8509_v5  ;;  %v4462_v50 = vrot.slane %v4362_v25, 4 }
 0x3dd   : > { %v4321_v18 = vadd.f32 %v4244_v35, %v3880_v53  ;;  %v4322_v38 = vadd.f32 %v4246_v44, %v3881_v60  ;;  %v4463_v52 = vrot.slane %v4363_v58, 4  ;;  %v4465_v2 = vrot.slane %v12288_v39, 4 }
 0x3de   : > { %v4682_v13 = vrot.slane %v4582_v1, 4  ;;  %v4683_v34 = vrot.slane %v4583_v9, 4  ;;  %v4685_v22 = vrot.slane %v12300_v31, 4  ;;  %v4802_v49 = vmul.f32 %v12156_v27, %v8535_v14  ;;  %v13947_v31 = vld [vmem:[#allocation84_spill] sm:$0xff] }
 0x3df   : > { %v4464_v63 = vsel %vm4196_vm3, %v4462_v50, %v4463_v52  ;;  %v4803_v21 = vmul.f32 %v12161_v6, %v8535_v14  ;;  %v12311_v53 = vmul.f32 %v12247_v16, %v8535_v14  ;;  %v4466_v60 = vsel %vm4196_vm3, %v4463_v52, %v4465_v2 }
 0x3e0   : > { %v4541_v56 = vadd.f32 %v4464_v63, %v4100_v8  ;;  %v4684_v15 = vsel %vm4196_vm3, %v4682_v13, %v4683_v34  ;;  %v4686_v25 = vsel %vm4196_vm3, %v4683_v34, %v4685_v22  ;;  %v4542_v58 = vadd.f32 %v4466_v60, %v4101_v57 }
 0x3e1   : > { %v4761_v27 = vadd.f32 %v4684_v15, %v4321_v18  ;;  %v4762_v1 = vadd.f32 %v4686_v25, %v4322_v38  ;;  %v4902_v35 = vrot.slane %v4802_v49, 4  ;;  %v4903_v6 = vrot.slane %v4803_v21, 4  ;;  %v12341_v21 = vld [vmem:[%s8101_s2 + $0x108] sm:$0xff] }
 0x3e2   : > { %v4905_v44 = vrot.slane %v12311_v53, 4  ;;  %v5022_v9 = vmul.f32 %v11980_v55, %v8539_v51  ;;  %v5023_v8 = vmul.f32 %v11989_v11, %v8539_v51  ;;  %v12327_v50 = vmul.f32 %v12082_v20, %v8539_v51 }
 0x3e3   : > { %v495_v57 = vmul.f32 %v12201_v47, %v8174_v33  ;;  %v496_v18 = vmul.f32 %v11736_v28, %v8174_v33  ;;  %v563_v38 = vmul.f32 %v12012_v54, %v13393_v30  ;;  %v4904_v52 = vsel %vm4196_vm3, %v4902_v35, %v4903_v6 }
 0x3e4   : > { %v4906_v55 = vsel %vm4196_vm3, %v4903_v6, %v4905_v44  ;;  %v5122_v11 = vrot.slane %v5022_v9, 4  ;;  %v5123_v13 = vrot.slane %v5023_v8, 4  ;;  %v4981_v34 = vadd.f32 %v4904_v52, %v4541_v56 }
 0x3e5   : > { %v4982_v63 = vadd.f32 %v4906_v55, %v4542_v58  ;;  %v5125_v49 = vrot.slane %v12327_v50, 4  ;;  %v564_v33 = vmul.f32 %v12341_v21, %v13393_v30  ;;  %v631_v54 = vmul.f32 %v13866_v59, %v13397_v3  ;;  %v13952_v50 = vld [vmem:[#allocation51_spill] sm:$0xff] }
 0x3e6   : > { %v5124_v47 = vsel %vm4196_vm3, %v5122_v11, %v5123_v13  ;;  %v632_v60 = vmul.f32 %v11903_v23, %v13397_v3  ;;  %v699_v56 = vmul.f32 %v12247_v16, %v13848_v61  ;;  %v700_v58 = vmul.f32 %v11755_v36, %v13848_v61  ;;  %v12360_v16 = vld [vmem:[%s8111_s16 + $0x40] sm:$0xff] }
 0x3e7   : > { %v5126_v15 = vsel %vm4196_vm3, %v5123_v13, %v5125_v49  ;;  %v5201_v25 = vadd.f32 %v5124_v47, %v4761_v27  ;;  %v767_v30 = vmul.f32 %v12082_v20, %v13853_v0  ;;  %v663_v59 = vadd.f32 %v631_v54, %v495_v57  ;;  %v13914_v47 = vld [vmem:[#allocation33_spill] sm:$0xff] }
 0x3e8   : > { %v5202_v35 = vadd.f32 %v5126_v15, %v4762_v1  ;;  %v664_v6 = vadd.f32 %v632_v60, %v496_v18  ;;  %v731_v9 = vadd.f32 %v699_v56, %v563_v38  ;;  %v732_v8 = vadd.f32 %v700_v58, %v564_v33  ;;  %v12371_v38 = vld [vmem:[%s8101_s2 + $0x110] sm:$0xf]  ;;  %v12378_v33 = vld [vmem:[%s8101_s2 + $0x138] sm:$0xf] }
 0x3e9   : > { %v5233_v3 = vadd.f32 %v5201_v25, %v4981_v34  ;;  %v768_v52 = vmul.f32 %v12360_v16, %v13853_v0  ;;  %v841_v27 = vmul.f32 %v11736_v28, %v13857_v45  ;;  %v799_v55 = vadd.f32 %v767_v30, %v663_v59 }
 0x3ea   : > { %v5234_v61 = vadd.f32 %v5202_v35, %v4982_v63  ;;  %v842_v20 = vmul.f32 %v11766_v62, %v13857_v45  ;;  %v1062_v1 = vmul.f32 %v12341_v21, %v13861_v32  ;;  %v1063_v11 = vmul.f32 %v12371_v38, %v13861_v32 }
 0x3eb   : > { %v800_v57 = vadd.f32 %v768_v52, %v664_v6  ;;  %v944_v18 = vrot.slane %v841_v27, 1  ;;  %v1282_v0 = vmul.f32 %v11903_v23, %v13864_v40  ;;  %v1283_v45 = vmul.f32 %v12378_v33, %v13864_v40  ;;  %v13917_v52 = vld [vmem:[#allocation63_spill] sm:$0xff] }
 0x3ec   : > { %v5255_v13 = vpack.c.bf16 %v5234_v61, %v5233_v3  ;;  %v946_v34 = vrot.slane %v842_v20, 1  ;;  %v1164_v63 = vrot.slane %v1062_v1, 1  ;;  %v13915_v54 = vrot.slane %v13914_v47, 1 }
 0x3ed   : > { %v1166_v56 = vrot.slane %v1063_v11, 1  ;;  %v1384_v15 = vrot.slane %v1282_v0, 1  ;;  %v1502_v32 = vmul.f32 %v11755_v36, %v13875_v24  ;;  %v13916_v30 = vrot.slane %v12016_v41, 1  ;;  %v13920_v41 = vld [vmem:[#allocation82_spill] sm:$0xff] }
 0x3ee   : > { %v945_v60 = vsel %vm893_vm0, %v13915_v54, %v944_v18  ;;  %7118 = vmatprep.mubr.bf16.mxu1 %v5255_v13  ;;  %v947_v25 = vsel %vm893_vm0, %v944_v18, %v946_v34  ;;  %v1386_v59 = vrot.slane %v1283_v45, 1  ;;  %5554 = vmatmul.mubr.bf16.gmra.mrb[40].mxu0 %v5255_v13  ;;  %v13918_v27 = vrot.slane %v13917_v52, 1  ;;  %v12402_v13 = vld [vmem:[%s8111_s16 + $0x48] sm:$0xf]  ;;  %v13925_v52 = vld [vmem:[#allocation37_spill] sm:$0xff] }
 0x3ef   : > { %v1020_v58 = vadd.f32 %v945_v60, %v731_v9  ;;  %v1165_v35 = vsel %vm893_vm0, %v13916_v30, %v1164_v63  ;;  %v1021_v40 = vadd.f32 %v947_v25, %v732_v8  ;;  %v1167_v6 = vsel %vm893_vm0, %v1164_v63, %v1166_v56  ;;  %v13921_v45 = vld [vmem:[#allocation78_spill] sm:$0xff] }
 0x3f0   : > { %v1240_v3 = vadd.f32 %v1165_v35, %v799_v55  ;;  %v1385_v61 = vsel %vm893_vm0, %v13918_v27, %v1384_v15  ;;  %v13919_v36 = vmov 0   ;;  %v1241_v20 = vadd.f32 %v1167_v6, %v800_v57 }
 0x3f1   : > { %5563 = vmatprep.mubr.bf16.mxu0 %v13919_v36  ;;  %v1387_v9 = vsel %vm893_vm0, %v1384_v15, %v1386_v59  ;;  %v1460_v1 = vadd.f32 %v1385_v61, %v1020_v58  ;;  %v1503_v18 = vmul.f32 %v13920_v41, %v13875_v24  ;;  %v1604_v0 = vrot.slane %v1502_v32, 1 }
 0x3f2   : > { %v1461_v11 = vadd.f32 %v1387_v9, %v1021_v40  ;;  %v1722_v8 = vmul.f32 %v12360_v16, %v13880_v42  ;;  %v1723_v55 = vmul.f32 %v12402_v13, %v13880_v42  ;;  %v1942_v57 = vmul.f32 %v11736_v28, %v13888_v46  ;;  %v13927_v9 = vld [vmem:[#allocation76_spill] sm:$0xff] }
 0x3f3   : > { %v1606_v34 = vrot.slane %v1503_v18, 1  ;;  %v1943_v63 = vmul.f32 %v11766_v62, %v13888_v46  ;;  %v2163_v24 = vmul.f32 %v12341_v21, %v13896_v29  ;;  %v13922_v47 = vrot.slane %v13921_v45, 1  ;;  %v13923_v62 = vld [vmem:[#allocation83_spill] sm:$0xff] }
 0x3f4   : > { %v1824_v60 = vrot.slane %v1722_v8, 1  ;;  %v1826_v56 = vrot.slane %v1723_v55, 1  ;;  %v2164_v15 = vmul.f32 %v12371_v38, %v13896_v29  ;;  %v2045_v25 = vrot.slane %v1942_v57, 2  ;;  %v13929_v55 = vld [vmem:[#allocation48_spill] sm:$0xff]  ;;  %v13930_v57 = vld [vmem:[#allocation49_spill] sm:$0xff] }
 0x3f5   : > { %v1605_v54 = vsel %vm893_vm0, %v13922_v47, %v1604_v0  ;;  %v1607_v42 = vsel %vm893_vm0, %v1604_v0, %v1606_v34  ;;  %v2047_v28 = vrot.slane %v1943_v63, 2  ;;  %v13924_v46 = vrot.slane %v13923_v62, 1  ;;  %v13931_v47 = vld [vmem:[#allocation53_spill] sm:$0xff] }
 0x3f6   : > { %v1680_v32 = vadd.f32 %v1605_v54, %v1240_v3  ;;  %v1681_v58 = vadd.f32 %v1607_v42, %v1241_v20  ;;  %v1827_v35 = vsel %vm893_vm0, %v1824_v60, %v1826_v56  ;;  %v2265_v59 = vrot.slane %v2163_v24, 2  ;;  %v7542_v62 = vld [vmem:[%s8101_s2 + $0xe0] sm:$0xff] }
 0x3f7   : > { %v1825_v30 = vsel %vm893_vm0, %v13924_v46, %v1824_v60  ;;  %v1901_v6 = vadd.f32 %v1827_v35, %v1461_v11  ;;  %v13926_v27 = vrot.slane %v13925_v52, 2  ;;  %v2048_v61 = vsel %vm1994_vm1, %v2045_v25, %v2047_v28  ;;  %v12434_v11 = vld [vmem:[%s8111_s16 + $0x18] sm:$0xff]  ;;  %v13933_v35 = vld [vmem:[#allocation90_spill] sm:$0xff] }
 0x3f8   : > { %v1900_v40 = vadd.f32 %v1825_v30, %v1460_v1  ;;  %v2122_v36 = vadd.f32 %v2048_v61, %v1681_v58  ;;  %v13928_v18 = vrot.slane %v13927_v9, 2  ;;  %v2267_v0 = vrot.slane %v2164_v15, 2  ;;  %v13932_v46 = vld [vmem:[#allocation32_spill] sm:$0xff] }
 0x3f9   : > { %v2046_v29 = vsel %vm1994_vm1, %v13926_v27, %v2045_v25  ;;  %v2383_v34 = vmul.f32 %v11903_v23, %v13929_v55  ;;  %v2384_v1 = vmul.f32 %v12378_v33, %v13929_v55  ;;  %v2603_v63 = vmul.f32 %v12434_v11, %v13930_v57  ;;  %v13935_v52 = vld [vmem:[#allocation92_spill] sm:$0xff] }
 0x3fa   : > { %v2121_v3 = vadd.f32 %v2046_v29, %v1680_v32  ;;  %v2266_v20 = vsel %vm1994_vm1, %v13928_v18, %v2265_v59  ;;  %v2268_v24 = vsel %vm1994_vm1, %v2265_v59, %v2267_v0  ;;  %v2604_v45 = vmul.f32 %v13920_v41, %v13930_v57 }
 0x3fb   : > { %v2341_v8 = vadd.f32 %v2266_v20, %v1900_v40  ;;  %v2823_v54 = vmul.f32 %v12360_v16, %v13931_v47  ;;  %v2824_v60 = vmul.f32 %v12402_v13, %v13931_v47  ;;  %v2342_v56 = vadd.f32 %v2268_v24, %v1901_v6  ;;  %v7543_v6 = vld [vmem:[%s8101_s2 + $0xe8] sm:$0xf] }
 0x3fc   : > { %v2485_v15 = vrot.slane %v2383_v34, 2  ;;  %v2487_v42 = vrot.slane %v2384_v1, 2  ;;  %v2705_v32 = vrot.slane %v2603_v63, 2  ;;  %v2707_v25 = vrot.slane %v2604_v45, 2  ;;  %v13937_v34 = vld [vmem:[#allocation94_spill] sm:$0xff] }
 0x3fd   : > { %v2925_v28 = vrot.slane %v2823_v54, 2  ;;  %v2927_v58 = vrot.slane %v2824_v60, 2  ;;  %v3043_v30 = vmul.f32 %v7542_v62, %v13932_v46  ;;  %v13934_v59 = vrot.slane %v13933_v35, 2  ;;  %v13939_v60 = vld [vmem:[#allocation55_spill] sm:$0xff] }
 0x3fe   : > { %v2488_v40 = vsel %vm1994_vm1, %v2485_v15, %v2487_v42  ;;  %v13936_v27 = vrot.slane %v13935_v52, 2  ;;  %v3044_v61 = vmul.f32 %v7543_v6, %v13932_v46  ;;  %v2708_v20 = vsel %vm1994_vm1, %v2705_v32, %v2707_v25  ;;  %v13943_v52 = vld [vmem:[#allocation96_spill] sm:$0xff] }
 0x3ff   : > { %v2486_v41 = vsel %vm1994_vm1, %v13934_v59, %v2485_v15  ;;  %v2562_v18 = vadd.f32 %v2488_v40, %v2122_v36  ;;  %v2782_v55 = vadd.f32 %v2708_v20, %v2342_v56  ;;  %v13938_v1 = vrot.slane %v13937_v34, 2  ;;  %v13942_v56 = vld [vmem:[#allocation58_spill] sm:$0xff]  ;;  %v13945_v20 = vld [vmem:[#allocation60_spill] sm:$0xff] }
 0x400   : > { %v2706_v29 = vsel %vm1994_vm1, %v13936_v27, %v2705_v32  ;;  %v2561_v9 = vadd.f32 %v2486_v41, %v2121_v3  ;;  %v2928_v63 = vsel %vm1994_vm1, %v2925_v28, %v2927_v58  ;;  %v3146_v24 = vrot.slane %v3043_v30, 3  ;;  %v13940_v3 = vld [vmem:[#allocation95_spill] sm:$0xff] }
 0x401   : > { %v2781_v0 = vadd.f32 %v2706_v29, %v2341_v8  ;;  %v2926_v57 = vsel %vm1994_vm1, %v13938_v1, %v2925_v28  ;;  %v3002_v47 = vadd.f32 %v2928_v63, %v2562_v18  ;;  %v3148_v54 = vrot.slane %v3044_v61, 3  ;;  %v7544_v61 = vld [vmem:[%s8111_s16 + $0x20] sm:$0xf]  ;;  %s14002_s16 = sld [smem:[#allocation23_spill]] }
 0x402   : > { %v3001_v45 = vadd.f32 %v2926_v57, %v2561_v9  ;;  %v3264_v15 = vmul.f32 %v12341_v21, %v13939_v60  ;;  %v13941_v36 = vrot.slane %v13940_v3, 3  ;;  %v3265_v8 = vmul.f32 %v12371_v38, %v13939_v60  ;;  %v13950_v57 = vld [vmem:[#allocation45_spill] sm:$0xff] }
 0x403   : > { %v3484_v32 = vmul.f32 %v11903_v23, %v13942_v56  ;;  %v3485_v25 = vmul.f32 %v12378_v33, %v13942_v56  ;;  %v3149_v28 = vsel %vm3095_vm2, %v3146_v24, %v3148_v54  ;;  %v3704_v30 = vmul.f32 %v12434_v11, %v13821_v37 }
 0x404   : > { %v3147_v42 = vsel %vm3095_vm2, %v13941_v36, %v3146_v24  ;;  %v3366_v46 = vrot.slane %v3264_v15, 3  ;;  %v3223_v35 = vadd.f32 %v3149_v28, %v2782_v55  ;;  %v3368_v59 = vrot.slane %v3265_v8, 3 }
 0x405   : > { %v3222_v58 = vadd.f32 %v3147_v42, %v2781_v0  ;;  %v3586_v41 = vrot.slane %v3484_v32, 3  ;;  %v3588_v40 = vrot.slane %v3485_v25, 3  ;;  %v13944_v27 = vrot.slane %v13943_v52, 3 }
 0x406   : > { %v3705_v9 = vmul.f32 %v7544_v61, %v13821_v37  ;;  %v3806_v18 = vrot.slane %v3704_v30, 3  ;;  %v3924_v34 = vmul.f32 %v12360_v16, %v13945_v20  ;;  %v3369_v0 = vsel %vm3095_vm2, %v3366_v46, %v3368_v59 }
 0x407   : > { %v3367_v29 = vsel %vm3095_vm2, %v13944_v27, %v3366_v46  ;;  %v3587_v55 = vsel %vm3095_vm2, %v3584_v43, %v3586_v41  ;;  %v3589_v63 = vsel %vm3095_vm2, %v3586_v41, %v3588_v40  ;;  %v3443_v24 = vadd.f32 %v3369_v0, %v3002_v47  ;;  %p14003_p11 = scmp.ne.s32.totalorder %s14002_s16, 0 }
 0x408   : > { %v3442_v1 = vadd.f32 %v3367_v29, %v3001_v45  ;;  %v3662_v54 = vadd.f32 %v3587_v55, %v3222_v58  ;;  %v3663_v60 = vadd.f32 %v3589_v63, %v3223_v35  ;;  %v3807_v37 = vsel %vm3095_vm2, %v3804_v4, %v3806_v18  ;;  %v13951_v63 = vld [vmem:[#allocation80_spill] sm:$0xff] }
 0x409   : > { %v3808_v15 = vrot.slane %v3705_v9, 3  ;;  %v3925_v36 = vmul.f32 %v12402_v13, %v13945_v20  ;;  %v4026_v42 = vrot.slane %v3924_v34, 3  ;;  %v4144_v45 = vmul.f32 %v7542_v62, %v13827_v12  ;;  %p7659_p12 = pnand %p7658_p10, %p14003_p11 }
 0x40a   : > { %v3882_v3 = vadd.f32 %v3807_v37, %v3442_v1  ;;  %v4145_v8 = vmul.f32 %v7543_v6, %v13827_v12  ;;  %v4365_v43 = vmul.f32 %v12341_v21, %v8450_v10  ;;  %v4366_v47 = vmul.f32 %v12371_v38, %v8450_v10 }
 0x40b   : > { %v3809_v48 = vsel %vm3095_vm2, %v3806_v18, %v3808_v15  ;;  %v4027_v4 = vsel %vm3095_vm2, %v4024_v7, %v4026_v42  ;;  %v4028_v56 = vrot.slane %v3925_v36, 3  ;;  %v4585_v32 = vmul.f32 %v11903_v23, %v8509_v5  ;;  %v13954_v36 = vld [vmem:[#allocation64_spill] sm:$0xff]  ;;  %p7660_p0 = pneg %p7659_p12 }
 0x40c   : > { %v3883_v25 = vadd.f32 %v3809_v48, %v3443_v24  ;;  %v4102_v62 = vadd.f32 %v4027_v4, %v3662_v54  ;;  %v4247_v28 = vrot.slane %v4144_v45, 4  ;;  %v4249_v12 = vrot.slane %v4145_v8, 4  ;;  %v13955_v8 = vld [vmem:[#allocation66_spill] sm:$0xff]  ;;  %v13957_v4 = vld [vmem:[#allocation67_spill] sm:$0xff] }
 0x40d   : > { %v4029_v6 = vsel %vm3095_vm2, %v4026_v42, %v4028_v56  ;;  %v4467_v21 = vrot.slane %v4365_v43, 4  ;;  %v4469_v10 = vrot.slane %v4366_v47, 4  ;;  %v4586_v38 = vmul.f32 %v12378_v33, %v8509_v5  ;;  %v13956_v47 = vld [vmem:[#allocation68_spill] sm:$0xff]  ;;  %v13958_v56 = vld [vmem:[#allocation27_spill] sm:$0xff]  ;;  %p7667_p8 = pnand %p7666_p4, %p7660_p0 }
 0x40e   : > { %v4103_v17 = vadd.f32 %v4029_v6, %v3663_v60  ;;  %v4248_v7 = vsel %vm4196_vm3, %v4245_v26, %v4247_v28  ;;  %v4250_v23 = vsel %vm4196_vm3, %v4247_v28, %v4249_v12  ;;  %v4687_v58 = vrot.slane %v4585_v32, 4  ;;  %v13959_v28 = vld [vmem:[#allocation85_spill] sm:$0xff]  ;;  %v13960_v6 = vld [vmem:[#allocation70_spill] sm:$0xff] }
 0x40f   : > { %v4323_v46 = vadd.f32 %v4248_v7, %v3882_v3  ;;  %v4324_v30 = vadd.f32 %v4250_v23, %v3883_v25  ;;  %v4468_v35 = vsel %vm4196_vm3, %v4465_v2, %v4467_v21  ;;  %v4470_v59 = vsel %vm4196_vm3, %v4467_v21, %v4469_v10  ;;  %v13953_v3 = vld [vmem:[#allocation56_spill] sm:$0xff]  ;;  %v13962_v23 = vld [vmem:[#allocation74_spill] sm:$0xff] }
 0x410   : > { %v4543_v41 = vadd.f32 %v4468_v35, %v4102_v62  ;;  %v4544_v40 = vadd.f32 %v4470_v59, %v4103_v17  ;;  %v4688_v5 = vsel %vm4196_vm3, %v4685_v22, %v4687_v58  ;;  %v4689_v19 = vrot.slane %v4586_v38, 4  ;;  %v13948_v22 = vld [vmem:[#allocation75_spill] sm:$0xff]  ;;  %v13961_v17 = vld [vmem:[#allocation88_spill] sm:$0xff] }
 0x411   : > { %v4763_v26 = vadd.f32 %v4688_v5, %v4323_v46  ;;  %v4805_v33 = vmul.f32 %v12434_v11, %v8535_v14  ;;  %v4806_v52 = vmul.f32 %v7544_v61, %v8535_v14  ;;  %v5025_v39 = vmul.f32 %v12360_v16, %v8539_v51  ;;  %v13949_v61 = vld [vmem:[#allocation87_spill] sm:$0xff] }
 0x412   : > { %v4690_v2 = vsel %vm4196_vm3, %v4687_v58, %v4689_v19  ;;  %v5026_v27 = vmul.f32 %v12402_v13, %v8539_v51  ;;  %v5799_v29 = vmax.f32 %v13947_v31, 0.0  ;;  %v5800_v9 = vmax.f32 %v13948_v22, 0.0  ;;  %v13963_v58 = vld [vmem:[#allocation46_spill] sm:$0xff] }
 0x413   : > { %v4764_v18 = vadd.f32 %v4690_v2, %v4324_v30  ;;  %v4907_v20 = vrot.slane %v4805_v33, 4  ;;  %v4909_v34 = vrot.slane %v4806_v52, 4  ;;  %v5127_v0 = vrot.slane %v5025_v39, 4  ;;  %v13965_v19 = vld [vmem:[#allocation54_spill] sm:$0xff]  ;;  %v13967_v52 = vld [vmem:[#allocation29_spill] sm:$0xff] }
 0x414   : > { %v5129_v11 = vrot.slane %v5026_v27, 4  ;;  %v5831_v1 = vmul.f32 %v5799_v29, %v5799_v29  ;;  %v5832_v14 = vmul.f32 %v5800_v9, %v5800_v9  ;;  %v6931_v16 = vpack.c.bf16 %v13950_v57, %v13949_v61  ;;  %v13968_v2 = vld [vmem:[#allocation73_spill] sm:$0xff]  ;;  %v13969_v29 = vld [vmem:[#allocation44_spill] sm:$0xff]  ;;  %v13970_v9 = vld [vmem:[#allocation59_spill] sm:$0xff] }
 0x415   : > { %v4908_v55 = vsel %vm4196_vm3, %v4905_v44, %v4907_v20  ;;  %v4910_v51 = vsel %vm4196_vm3, %v4907_v20, %v4909_v34  ;;  %v5128_v13 = vsel %vm4196_vm3, %v5125_v49, %v5127_v0  ;;  %v5801_v24 = vmax.f32 %v13951_v63, 0.0  ;;  %v13971_v20 = vld [vmem:[#allocation41_spill] sm:$0xff]  ;;  %v13974_v61 = vld [vmem:[#allocation79_spill] sm:$0xff]  ;;  %v13976_v63 = vld [vmem:[#allocation38_spill] sm:$0xff] }
 0x416   : > { %v4983_v54 = vadd.f32 %v4908_v55, %v4543_v41  ;;  %v4984_v60 = vadd.f32 %v4910_v51, %v4544_v40  ;;  %v5130_v37 = vsel %vm4196_vm3, %v5127_v0, %v5129_v11  ;;  %v5203_v15 = vadd.f32 %v5128_v13, %v4763_v26  ;;  %5863 = vst [vmem:[%s12541_s3 + $0xc0] sm:$0xff] %v5831_v1  ;;  %v13964_v41 = vld [vmem:[#allocation28_spill] sm:$0xff]  ;;  %v13972_v34 = vld [vmem:[#allocation65_spill] sm:$0xff]  ;;  %v5509_v11 = vpop.f32.mrb[22].mxu0  ;;  %v13973_v1 = vld [vmem:[#allocation62_spill] sm:$0xff] }
 0x417   : > { %5864 = vst [vmem:[%s12541_s3 + $0xc8] sm:$0xff] %v5832_v14  ;;  %7039 = vst [vmem:[%s12547_s5 + $0x60] sm:$0xff] %v6931_v16   ;;  %v5204_v53 = vadd.f32 %v5130_v37, %v4764_v18  ;;  %v5833_v44 = vmul.f32 %v5801_v24, %v5801_v24  ;;  %v5802_v49 = vmax.f32 %v13952_v50, 0.0  ;;  %v6936_v42 = vpack.c.bf16 %v13954_v36, %v13953_v3  ;;  %v13966_v26 = vld [vmem:[#allocation72_spill] sm:$0xff]  ;;  %v13975_v16 = vld [vmem:[#allocation86_spill] sm:$0xff]  ;;  %v5511_v51 = vpop.f32.mrb[23].mxu0 }
 0x418   : > { %v5235_v45 = vadd.f32 %v5203_v15, %v4983_v54  ;;  %v5803_v43 = vmax.f32 %v13955_v8, 0.0  ;;  %v5804_v48 = vmax.f32 %v13956_v47, 0.0  ;;  %v6941_v32 = vpack.c.bf16 %v13958_v56, %v13957_v4  ;;  %v13977_v54 = vld [vmem:[#allocation57_spill] sm:$0xff]  ;;  %v13980_v50 = vld [vmem:[#allocation26_spill] sm:$0xff]  ;;  %v13985_v56 = vld [vmem:[#allocation31_spill] sm:$0xff] }
 0x419   : > { %v5236_v25 = vadd.f32 %v5204_v53, %v4984_v60  ;;  %5865 = vst [vmem:[%s12541_s3 + $0xd0] sm:$0xff] %v5833_v44  ;;  %v5834_v62 = vmul.f32 %v5802_v49, %v5802_v49  ;;  %7040 = vst [vmem:[%s12547_s5 + $0x68] sm:$0xff] %v6936_v42   ;;  %v5775_v12 = vmax.f32 %v13959_v28, 0.0  ;;  %v5805_v21 = vmax.f32 %v13960_v6, 0.0  ;;  %v13978_v37 = vld [vmem:[#allocation77_spill] sm:$0xff]  ;;  %v13979_v53 = vld [vmem:[#allocation30_spill] sm:$0xff] }
 0x41a   : > { %v5835_v10 = vmul.f32 %v5803_v43, %v5803_v43  ;;  %v5836_v38 = vmul.f32 %v5804_v48, %v5804_v48  ;;  %7041 = vst [vmem:[%s12547_s5 + $0x70] sm:$0xff] %v6941_v32   ;;  %v5776_v7 = vmax.f32 %v13961_v17, 0.0  ;;  %v6871_v46 = vpack.c.bf16 %v13963_v58, %v13962_v23  ;;  %v13981_v49 = vld [vmem:[#allocation71_spill] sm:$0xff]  ;;  %v13982_v42 = vld [vmem:[#allocation36_spill] sm:$0xff]  ;;  %v13983_v8 = vld [vmem:[#allocation81_spill] sm:$0xff] }
 0x41b   : > { %v5256_v30 = vpack.c.bf16 %v5236_v25, %v5235_v45  ;;  %5866 = vst [vmem:[%s12541_s3 + $0xd8] sm:$0xff] %v5834_v62  ;;  %v5807_v35 = vmul.f32 %v5775_v12, %v5775_v12  ;;  %v5837_v59 = vmul.f32 %v5805_v21, %v5805_v21  ;;  %v5806_v40 = vmax.f32 %v13964_v41, 0.0  ;;  %v13984_v48 = vld [vmem:[#allocation61_spill] sm:$0xff]  ;;  %v13986_v25 = vld [vmem:[#allocation34_spill] sm:$0xff]  ;;  %v13988_v6 = vld [vmem:[#allocation35_spill] sm:$0xff] }
 0x41c   : > { %5867 = vst [vmem:[%s12541_s3 + $0xe0] sm:$0xff] %v5835_v10  ;;  %5868 = vst [vmem:[%s12541_s3 + $0xe8] sm:$0xff] %v5836_v38  ;;  %v5808_v5 = vmul.f32 %v5776_v7, %v5776_v7  ;;  %v6946_v33 = vpack.c.bf16 %v13966_v26, %v13965_v19  ;;  %v5777_v39 = vmax.f32 %v13967_v52, 0.0  ;;  %v6728_v27 = vmul.f32 -1.442695, %v13968_v2  ;;  %v13987_v28 = vld [vmem:[#allocation89_spill] sm:$0xff] }
 0x41d   : > { %6872 = vst [vmem:[%s12547_s5] sm:$0xff] %v6871_v46   ;;  %7119 = vmatmul.mubr.bf16.gmra.mrb[36].mxu1 %v5256_v30  ;;  %5564 = vmatmul.mubr.bf16.gmra.mrb[44].mxu0 %v5256_v30  ;;  %5839 = vst [vmem:[%s12541_s3] sm:$0xff] %v5807_v35  ;;  %v5838_v31 = vmul.f32 %v5806_v40, %v5806_v40  ;;  %v5778_v22 = vmax.f32 %v13969_v29, 0.0  ;;  %v6726_v18 = vmul.f32 -1.442695, %v13970_v9  ;;  %v6729_v57 = vmul.f32 -1.442695, %v13974_v61  ;;  %v13989_v21 = vld [vmem:[#allocation39_spill] sm:$0xff] }
 0x41e   : > { %5869 = vst [vmem:[%s12541_s3 + $0xf0] sm:$0xff] %v5837_v59  ;;  %v6876_v0 = vpack.c.bf16 %v13972_v34, %v13971_v20  ;;  %7122 = vmatprep.mubr.bf16.mxu1 %v13973_v1  ;;  %5840 = vst [vmem:[%s12541_s3 + $0x8] sm:$0xff] %v5808_v5  ;;  %v5809_v14 = vmul.f32 %v5777_v39, %v5777_v39  ;;  %7304 = vpow2.f32 %v6728_v27  ;;  %v6727_v55 = vmul.f32 -1.442695, %v13975_v16  ;;  %v13990_v17 = vld [vmem:[#allocation91_spill] sm:$0xff]  ;;  %v13991_v23 = vld [vmem:[#allocation93_spill] sm:$0xff] }
 0x41f   : > { %7042 = vst [vmem:[%s12547_s5 + $0x78] sm:$0xff] %v6946_v33   ;;  %5870 = vst [vmem:[%s12541_s3 + $0xf8] sm:$0xff] %v5838_v31  ;;  %v5810_v13 = vmul.f32 %v5778_v22, %v5778_v22  ;;  %7306 = vpow2.f32 %v6726_v18  ;;  %v5779_v24 = vmax.f32 %v13976_v63, 0.0  ;;  %v6732_v60 = vmul.f32 -1.442695, %v13977_v54  ;;  %v13992_v46 = vld [vmem:[#allocation50_spill] sm:$0xff] }
 0x420   : > { %7028 = vst [vmem:[%s12547_s5 + $0x8] sm:$0xff] %v6876_v0   ;;  %5841 = vst [vmem:[%s12541_s3 + $0x10] sm:$0xff] %v5809_v14  ;;  %7308 = vpow2.f32 %v6729_v57  ;;  %v5780_v15 = vmax.f32 %v13978_v37, 0.0  ;;  %v6730_v44 = vmul.f32 -1.442695, %v13979_v53  ;;  %v6881_v3 = vpack.c.bf16 %v13981_v49, %v13980_v50  ;;  %v13993_v35 = vld [vmem:[#allocation40_spill] sm:$0xff] }
 0x421   : > { %5842 = vst [vmem:[%s12541_s3 + $0x18] sm:$0xff] %v5810_v13  ;;  %7310 = vpow2.f32 %v6727_v55  ;;  %v5811_v36 = vmul.f32 %v5779_v24, %v5779_v24  ;;  %v6733_v45 = vmul.f32 -1.442695, %v13982_v42  ;;  %v6731_v43 = vmul.f32 -1.442695, %v13983_v8  ;;  %v13994_v41 = vld [vmem:[#allocation43_spill] sm:$0xff] }
 0x422   : > { %7312 = vpow2.f32 %v6732_v60  ;;  %v5812_v47 = vmul.f32 %v5780_v15, %v5780_v15  ;;  %7029 = vst [vmem:[%s12547_s5 + $0x10] sm:$0xff] %v6881_v3   ;;  %v5781_v4 = vmax.f32 %v13984_v48, 0.0  ;;  %v6736_v32 = vmul.f32 -1.442695, %v13985_v56  ;;  %v13995_v5 = vld [vmem:[#allocation69_spill] sm:$0xff]  ;;  %v13996_v19 = vld [vmem:[#allocation42_spill] sm:$0xff] }
 0x423   : > { %5843 = vst [vmem:[%s12541_s3 + $0x20] sm:$0xff] %v5811_v36  ;;  %7314 = vpow2.f32 %v6730_v44  ;;  %v5782_v62 = vmax.f32 %v13986_v25, 0.0  ;;  %v6734_v12 = vmul.f32 -1.442695, %v13987_v28  ;;  %v6886_v10 = vpack.c.bf16 %v13989_v21, %v13988_v6  ;;  %v13997_v26 = vld [vmem:[#allocation47_spill] sm:$0xff]  ;;  %v13998_v52 = vld [vmem:[#allocation98_spill] sm:$0xff] }
 0x424   : > { %5844 = vst [vmem:[%s12541_s3 + $0x28] sm:$0xff] %v5812_v47  ;;  %7316 = vpow2.f32 %v6733_v45  ;;  %v5813_v38 = vmul.f32 %v5781_v4, %v5781_v4  ;;  %v6737_v7 = vmul.f32 -1.442695, %v13990_v17  ;;  %v6735_v58 = vmul.f32 -1.442695, %v13991_v23  ;;  %v13999_v29 = vld [vmem:[#allocation99_spill] sm:$0xff] }
 0x425   : > { %7123 = vmatmul.mubr.bf16.gmra.mrb[40].mxu1 %v13992_v46  ;;  %7318 = vpow2.f32 %v6731_v43  ;;  %v5814_v30 = vmul.f32 %v5782_v62, %v5782_v62  ;;  %7030 = vst [vmem:[%s12547_s5 + $0x18] sm:$0xff] %v6886_v10   ;;  %v5783_v59 = vmax.f32 %v13993_v35, 0.0  ;;  %v5784_v40 = vmax.f32 %v13994_v41, 0.0  ;;  %v14000_v54 = vld [vmem:[#allocation52_spill] sm:$0xff]  ;;  %v5515_v37 = vpop.f32.mrb[24].mxu0 }
 0x426   : > { %7126 = vmatprep.mubr.bf16.mxu1 %v13995_v5  ;;  %5845 = vst [vmem:[%s12541_s3 + $0x30] sm:$0xff] %v5813_v38  ;;  %7320 = vpow2.f32 %v6736_v32  ;;  %v6891_v33 = vpack.c.bf16 %v13997_v26, %v13996_v19  ;;  %v5785_v39 = vmax.f32 %v13998_v52, 0.0  ;;  %v5786_v2 = vmax.f32 %v5509_v11, 0.0  ;;  %v7112_v11 = vpop.f32.mrb[28].mxu1  ;;  %v12626_v50 = vpop.f32.mrb[25].mxu0 }
 0x427   : > { %5846 = vst [vmem:[%s12541_s3 + $0x38] sm:$0xff] %v5814_v30  ;;  %7322 = vpow2.f32 %v6734_v12  ;;  %v5815_v27 = vmul.f32 %v5783_v59, %v5783_v59  ;;  %v5816_v31 = vmul.f32 %v5784_v40, %v5784_v40  ;;  %v6896_v22 = vpack.c.bf16 %v5511_v51, %v13999_v29  ;;  %v5696_v61 = vpop.f32.mrb[29].mxu1 }
 0x428   : > { %v7305_v9 = vpop.eup %7304  ;;  %7324 = vpow2.f32 %v6737_v7  ;;  %7031 = vst [vmem:[%s12547_s5 + $0x20] sm:$0xff] %v6891_v33   ;;  %v5817_v18 = vmul.f32 %v5785_v39, %v5785_v39  ;;  %v5818_v20 = vmul.f32 %v5786_v2, %v5786_v2  ;;  %v7113_v55 = vpop.f32.mrb[30].mxu1  ;;  %v5787_v44 = vmax.f32 %v5515_v37, 0.0 }
 0x429   : > { %v7307_v34 = vpop.eup %7306  ;;  %v6129_v0 = vadd.f32 1.0, %v7305_v9  ;;  %7326 = vpow2.f32 %v6735_v58  ;;  %5847 = vst [vmem:[%s12541_s3 + $0x40] sm:$0xff] %v5815_v27  ;;  %5848 = vst [vmem:[%s12541_s3 + $0x48] sm:$0xff] %v5816_v31  ;;  %v5699_v63 = vpop.f32.mrb[31].mxu1  ;;  %v6740_v32 = vmul.f32 -1.442695, %v7112_v11 }
 0x42a   : > { %7032 = vst [vmem:[%s12547_s5 + $0x28] sm:$0xff] %v6896_v22   ;;  %v7309_v1 = vpop.eup %7308  ;;  %v6127_v14 = vadd.f32 1.0, %v7307_v34  ;;  %5849 = vst [vmem:[%s12541_s3 + $0x50] sm:$0xff] %v5817_v18  ;;  %v5819_v45 = vmul.f32 %v5787_v44, %v5787_v44  ;;  %v6738_v62 = vmul.f32 -1.442695, %v5696_v61 }
 0x42b   : > { %5850 = vst [vmem:[%s12541_s3 + $0x58] sm:$0xff] %v5818_v20  ;;  %v7311_v57 = vpop.eup %7310  ;;  %7328 = vrcp.f32 %v6129_v0  ;;  %v6130_v16 = vadd.f32 1.0, %v7309_v1  ;;  %v6741_v12 = vmul.f32 -1.442695, %v7113_v55  ;;  %v6739_v21 = vmul.f32 -1.442695, %v5699_v63 }
 0x42c   : > { %v7313_v51 = vpop.eup %7312  ;;  %7330 = vrcp.f32 %v6127_v14  ;;  %v6128_v13 = vadd.f32 1.0, %v7311_v57  ;;  %5851 = vst [vmem:[%s12541_s3 + $0x60] sm:$0xff] %v5819_v45  ;;  %v5519_v14 = vpop.f32.mrb[26].mxu0 }
 0x42d   : > { %v7315_v24 = vpop.eup %7314  ;;  %7127 = vmatmul.mubr.bf16.gmra.mrb[44].mxu1 %v14000_v54  ;;  %7332 = vrcp.f32 %v6130_v16  ;;  %v6133_v60 = vadd.f32 1.0, %v7313_v51  ;;  %v5521_v61 = vpop.f32.mrb[27].mxu0  ;;  %v5788_v57 = vmax.f32 %v5519_v14, 0.0 }
 0x42e   : > { %v7317_v15 = vpop.eup %7316  ;;  %7334 = vrcp.f32 %v6128_v13  ;;  %v6131_v53 = vadd.f32 1.0, %v7315_v24  ;;  %v6901_v16 = vpack.c.bf16 %v5521_v61, %v12626_v50  ;;  %v5525_v51 = vpop.f32.mrb[28].mxu0 }
 0x42f   : > { %v7319_v49 = vpop.eup %7318  ;;  %7336 = vrcp.f32 %v6133_v60  ;;  %v6134_v3 = vadd.f32 1.0, %v7317_v15  ;;  %v5820_v55 = vmul.f32 %v5788_v57, %v5788_v57  ;;  %v5527_v13 = vpop.f32.mrb[29].mxu0  ;;  %v5789_v54 = vmax.f32 %v5525_v51, 0.0 }
 0x430   : > { %v7321_v36 = vpop.eup %7320  ;;  %7338 = vrcp.f32 %v6131_v53  ;;  %v6132_v42 = vadd.f32 1.0, %v7319_v49  ;;  %7033 = vst [vmem:[%s12547_s5 + $0x30] sm:$0xff] %v6901_v16   ;;  %v5529_v63 = vpop.f32.mrb[30].mxu0 }
 0x431   : > { %v7323_v8 = vpop.eup %7322  ;;  %7340 = vrcp.f32 %v6134_v3  ;;  %v6137_v43 = vadd.f32 1.0, %v7321_v36  ;;  %5852 = vst [vmem:[%s12541_s3 + $0x68] sm:$0xff] %v5820_v55  ;;  %v5531_v24 = vpop.f32.mrb[31].mxu0  ;;  %v5790_v60 = vmax.f32 %v5529_v63, 0.0  ;;  %v5821_v15 = vmul.f32 %v5789_v54, %v5789_v54 }
 0x432   : > { %v7325_v47 = vpop.eup %7324  ;;  %7342 = vrcp.f32 %v6132_v42  ;;  %v6135_v48 = vadd.f32 1.0, %v7323_v8  ;;  %v6906_v37 = vpack.c.bf16 %v5531_v24, %v5527_v13 }
 0x433   : > { %v7327_v4 = vpop.eup %7326  ;;  %7344 = vrcp.f32 %v6137_v43  ;;  %v6138_v56 = vadd.f32 1.0, %v7325_v47  ;;  %v5822_v53 = vmul.f32 %v5790_v60, %v5790_v60  ;;  %5853 = vst [vmem:[%s12541_s3 + $0x70] sm:$0xff] %v5821_v15 }
 0x434   : > { %7346 = vrcp.f32 %v6135_v48  ;;  %v6136_v25 = vadd.f32 1.0, %v7327_v4  ;;  %7034 = vst [vmem:[%s12547_s5 + $0x38] sm:$0xff] %v6906_v37  }
 0x435   : > { %v7329_v28 = vpop.eup %7328  ;;  %7348 = vrcp.f32 %v6138_v56  ;;  %5854 = vst [vmem:[%s12541_s3 + $0x78] sm:$0xff] %v5822_v53 }
 0x436   : > { %v7331_v6 = vpop.eup %7330  ;;  %7350 = vrcp.f32 %v6136_v25 }
 0x437   : > { %v7333_v10 = vpop.eup %7332  ;;  %7352 = vpow2.f32 %v6740_v32 }
 0x438   : > { %v7335_v38 = vpop.eup %7334  ;;  %v6956_v17 = vpack.c.bf16 %v7333_v10, %v7329_v28  ;;  %7354 = vpow2.f32 %v6738_v62 }
 0x439   : > { %v7337_v7 = vpop.eup %7336  ;;  %v6951_v23 = vpack.c.bf16 %v7335_v38, %v7331_v6  ;;  %7356 = vpow2.f32 %v6741_v12 }
 0x43a   : > { %v7339_v58 = vpop.eup %7338  ;;  %7043 = vst [vmem:[%s12631_s9 + $0x8] sm:$0xff] %v6956_v17   ;;  %7358 = vpow2.f32 %v6739_v21 }
 0x43b   : > { %v7341_v46 = vpop.eup %7340  ;;  %6952 = vst [vmem:[%s12631_s9] sm:$0xff] %v6951_v23  }
 0x43c   : > { %v7343_v30 = vpop.eup %7342  ;;  %v6966_v35 = vpack.c.bf16 %v7341_v46, %v7337_v7 }
 0x43d   : > { %v7345_v59 = vpop.eup %7344  ;;  %v6961_v41 = vpack.c.bf16 %v7343_v30, %v7339_v58 }
 0x43e   : > { %v7347_v40 = vpop.eup %7346  ;;  %7045 = vst [vmem:[%s12631_s9 + $0x18] sm:$0xff] %v6966_v35  }
 0x43f   : > { %v7349_v5 = vpop.eup %7348  ;;  %7044 = vst [vmem:[%s12631_s9 + $0x10] sm:$0xff] %v6961_v41  }
 0x440   : > { %v7351_v19 = vpop.eup %7350  ;;  %v6976_v26 = vpack.c.bf16 %v7349_v5, %v7345_v59 }
 0x441   : > { %v7353_v33 = vpop.eup %7352  ;;  %v6971_v52 = vpack.c.bf16 %v7351_v19, %v7347_v40 }
 0x442   : > { %v7355_v39 = vpop.eup %7354  ;;  %7047 = vst [vmem:[%s12631_s9 + $0x28] sm:$0xff] %v6976_v26   ;;  %v6141_v2 = vadd.f32 1.0, %v7353_v33 }
 0x443   : > { %v7357_v27 = vpop.eup %7356  ;;  %7046 = vst [vmem:[%s12631_s9 + $0x20] sm:$0xff] %v6971_v52   ;;  %v6139_v31 = vadd.f32 1.0, %v7355_v39 }
 0x444   : > { %v7359_v29 = vpop.eup %7358  ;;  %7360 = vrcp.f32 %v6141_v2  ;;  %v6142_v22 = vadd.f32 1.0, %v7357_v27 }
 0x445   : > { %7362 = vrcp.f32 %v6139_v31  ;;  %v6140_v9 = vadd.f32 1.0, %v7359_v29 }
 0x446   : > { %7364 = vrcp.f32 %v6142_v22 }
 0x447   : > { %7366 = vrcp.f32 %v6140_v9 }
 0x44e   : > { %v7361_v18 = vpop.eup %7360 }
 0x44f   : > { %v7363_v20 = vpop.eup %7362 }
 0x450   : > { %v7365_v34 = vpop.eup %7364 }
 0x451   : > { %v7367_v0 = vpop.eup %7366  ;;  %v6986_v11 = vpack.c.bf16 %v7365_v34, %v7361_v18 }
 0x452   : > { %v6981_v1 = vpack.c.bf16 %v7367_v0, %v7363_v20 }
 0x453   : > { %7049 = vst [vmem:[%s12631_s9 + $0x38] sm:$0xff] %v6986_v11  }
 0x454   : > { %7048 = vst [vmem:[%s12631_s9 + $0x30] sm:$0xff] %v6981_v1  }
 0x457   : > { %v5535_v44 = vpop.f32.mrb[32].mxu0 }
 0x458   : > { %v5537_v50 = vpop.f32.mrb[33].mxu0  ;;  %v5791_v3 = vmax.f32 %v5535_v44, 0.0 }
 0x459   : > { %v5539_v49 = vpop.f32.mrb[34].mxu0 }
 0x45a   : > { %v5541_v36 = vpop.f32.mrb[35].mxu0  ;;  %v5792_v42 = vmax.f32 %v5539_v49, 0.0  ;;  %v5823_v8 = vmul.f32 %v5791_v3, %v5791_v3 }
 0x45b   : > { %v6911_v45 = vpack.c.bf16 %v5541_v36, %v5537_v50 }
 0x45c   : > { %v5824_v43 = vmul.f32 %v5792_v42, %v5792_v42  ;;  %5855 = vst [vmem:[%s12541_s3 + $0x80] sm:$0xff] %v5823_v8 }
 0x45d   : > { %7035 = vst [vmem:[%s12547_s5 + $0x40] sm:$0xff] %v6911_v45  }
 0x45e   : > { %5856 = vst [vmem:[%s12541_s3 + $0x88] sm:$0xff] %v5824_v43 }
 0x489   : > { %v7116_v47 = vpop.f32.mrb[32].mxu1  ;;  %v5545_v48 = vpop.f32.mrb[36].mxu0 }
 0x48a   : > { %v6744_v4 = vmul.f32 -1.442695, %v7116_v47  ;;  %v5712_v56 = vpop.f32.mrb[33].mxu1  ;;  %v5793_v32 = vmax.f32 %v5545_v48, 0.0  ;;  %v5547_v25 = vpop.f32.mrb[37].mxu0 }
 0x48b   : > { %v6742_v62 = vmul.f32 -1.442695, %v5712_v56  ;;  %v7117_v28 = vpop.f32.mrb[34].mxu1  ;;  %v5549_v12 = vpop.f32.mrb[38].mxu0 }
 0x48c   : > { %7368 = vpow2.f32 %v6744_v4  ;;  %v6745_v6 = vmul.f32 -1.442695, %v7117_v28  ;;  %v5715_v21 = vpop.f32.mrb[35].mxu1  ;;  %v5825_v10 = vmul.f32 %v5793_v32, %v5793_v32  ;;  %v5794_v38 = vmax.f32 %v5549_v12, 0.0  ;;  %v5551_v17 = vpop.f32.mrb[39].mxu0 }
 0x48d   : > { %7370 = vpow2.f32 %v6742_v62  ;;  %v6743_v7 = vmul.f32 -1.442695, %v5715_v21  ;;  %v6916_v23 = vpack.c.bf16 %v5551_v17, %v5547_v25 }
 0x48e   : > { %7372 = vpow2.f32 %v6745_v6  ;;  %5857 = vst [vmem:[%s12541_s3 + $0x90] sm:$0xff] %v5825_v10  ;;  %v5826_v58 = vmul.f32 %v5794_v38, %v5794_v38 }
 0x48f   : > { %7374 = vpow2.f32 %v6743_v7  ;;  %7036 = vst [vmem:[%s12547_s5 + $0x48] sm:$0xff] %v6916_v23  }
 0x490   : > { %5858 = vst [vmem:[%s12541_s3 + $0x98] sm:$0xff] %v5826_v58 }
 0x496   : > { %v7369_v46 = vpop.eup %7368 }
 0x497   : > { %v7371_v30 = vpop.eup %7370  ;;  %v6145_v35 = vadd.f32 1.0, %v7369_v46 }
 0x498   : > { %v7373_v59 = vpop.eup %7372  ;;  %v6143_v41 = vadd.f32 1.0, %v7371_v30 }
 0x499   : > { %v7375_v40 = vpop.eup %7374  ;;  %7376 = vrcp.f32 %v6145_v35  ;;  %v6146_v5 = vadd.f32 1.0, %v7373_v59 }
 0x49a   : > { %7378 = vrcp.f32 %v6143_v41  ;;  %v6144_v19 = vadd.f32 1.0, %v7375_v40 }
 0x49b   : > { %7380 = vrcp.f32 %v6146_v5 }
 0x49c   : > { %7382 = vrcp.f32 %v6144_v19 }
 0x4a3   : > { %v7377_v26 = vpop.eup %7376 }
 0x4a4   : > { %v7379_v33 = vpop.eup %7378 }
 0x4a5   : > { %v7381_v52 = vpop.eup %7380 }
 0x4a6   : > { %v7383_v39 = vpop.eup %7382  ;;  %v6996_v2 = vpack.c.bf16 %v7381_v52, %v7377_v26 }
 0x4a7   : > { %v6991_v27 = vpack.c.bf16 %v7383_v39, %v7379_v33 }
 0x4a8   : > { %7051 = vst [vmem:[%s12631_s9 + $0x48] sm:$0xff] %v6996_v2  }
 0x4a9   : > { %7050 = vst [vmem:[%s12631_s9 + $0x40] sm:$0xff] %v6991_v27  }
 0x4c1   : > { %v5555_v31 = vpop.f32.mrb[40].mxu0 }
 0x4c2   : > { %v5795_v29 = vmax.f32 %v5555_v31, 0.0  ;;  %v5557_v22 = vpop.f32.mrb[41].mxu0 }
 0x4c3   : > { %v5559_v9 = vpop.f32.mrb[42].mxu0 }
 0x4c4   : > { %v5827_v18 = vmul.f32 %v5795_v29, %v5795_v29  ;;  %v5796_v20 = vmax.f32 %v5559_v9, 0.0  ;;  %v5561_v34 = vpop.f32.mrb[43].mxu0 }
 0x4c5   : > { %v6921_v0 = vpack.c.bf16 %v5561_v34, %v5557_v22 }
 0x4c6   : > { %5859 = vst [vmem:[%s12541_s3 + $0xa0] sm:$0xff] %v5827_v18  ;;  %v5828_v11 = vmul.f32 %v5796_v20, %v5796_v20 }
 0x4c7   : > { %7037 = vst [vmem:[%s12547_s5 + $0x50] sm:$0xff] %v6921_v0  }
 0x4c8   : > { %5860 = vst [vmem:[%s12541_s3 + $0xa8] sm:$0xff] %v5828_v11 }
 0x4f0   : > { %v7120_v1 = vpop.f32.mrb[36].mxu1  ;;  %v5565_v14 = vpop.f32.mrb[44].mxu0 }
 0x4f1   : > { %v6748_v61 = vmul.f32 -1.442695, %v7120_v1  ;;  %v5728_v57 = vpop.f32.mrb[37].mxu1  ;;  %v5797_v16 = vmax.f32 %v5565_v14, 0.0  ;;  %v5567_v55 = vpop.f32.mrb[45].mxu0 }
 0x4f2   : > { %v6746_v51 = vmul.f32 -1.442695, %v5728_v57  ;;  %v7121_v13 = vpop.f32.mrb[38].mxu1  ;;  %v5569_v63 = vpop.f32.mrb[46].mxu0 }
 0x4f3   : > { %7384 = vpow2.f32 %v6748_v61  ;;  %v6749_v24 = vmul.f32 -1.442695, %v7121_v13  ;;  %v5731_v54 = vpop.f32.mrb[39].mxu1  ;;  %v5829_v60 = vmul.f32 %v5797_v16, %v5797_v16  ;;  %v5798_v37 = vmax.f32 %v5569_v63, 0.0  ;;  %v5571_v15 = vpop.f32.mrb[47].mxu0 }
 0x4f4   : > { %7386 = vpow2.f32 %v6746_v51  ;;  %v6747_v53 = vmul.f32 -1.442695, %v5731_v54  ;;  %v6926_v44 = vpack.c.bf16 %v5571_v15, %v5567_v55 }
 0x4f5   : > { %7388 = vpow2.f32 %v6749_v24  ;;  %5861 = vst [vmem:[%s12541_s3 + $0xb0] sm:$0xff] %v5829_v60  ;;  %v5830_v50 = vmul.f32 %v5798_v37, %v5798_v37 }
 0x4f6   : > { %7390 = vpow2.f32 %v6747_v53  ;;  %7038 = vst [vmem:[%s12547_s5 + $0x58] sm:$0xff] %v6926_v44  }
 0x4f7   : > { %5862 = vst [vmem:[%s12541_s3 + $0xb8] sm:$0xff] %v5830_v50 }
 0x4f8   : > { %7670 = shalt.err (!%p7667_p8)
}
 0x4f9   : > { %s7671_s29 = scalar_lea.hbm %s12676_s30, 2048  ;;  %s7675_s5 = scalar_lea.hbm %s14001_s18, 8192 }
 0x4fa   : > { %p7672_p3 = scmp.ne.s32.totalorder %s12676_s30, %s7671_s29  ;;  %p7676_p13 = scmp.lt.u32.totalorder %s12676_s30, %s14001_s18 }
 0x4fb   : > { %p7677_p2 = scmp.lt.u32.totalorder %s7675_s5, %s7671_s29  ;;  %p7679_p10 = scmp.lt.u32.totalorder %s7671_s29, %s12676_s30 }
 0x4fc   : > { %p7673_p9 = pnand %p7672_p3, %p14003_p11 }
 0x4fd   : > { %p7678_p5 = por %p7677_p2, %p7676_p13 }
 0x4fe   : > { %p7674_p7 = pneg %p7673_p9 }
 0x4ff   : > { %p7680_p12 = por %p7679_p10, %p7678_p5 }
 0x501   : > { %p7681_p0 = pnand %p7680_p12, %p7674_p7 }
 0x503   : > { %7684 = shalt.err (!%p7681_p0)
}
 0x504   : > { %s7845_s25 = smov 64   ;;  %s7846_s2 = smov 4   ;;  %v7124_v49 = vpop.f32.mrb[40].mxu1 }
 0x505   : > { %7166 = dma.vmem_to_hbm [thread:$0]  (%p14003_p11), %s12678_s7, 2048, %s12676_s30, %s12687_s12, %s7845_s25, %s7845_s25, %s7846_s2  }
 0x506   : > { %s6384_s19 = scalar_lea.sflag [#allocation4], %s8097_s17  ;;  %s7685_s14 = scalar_lea.vmem %s12680_s24, 4096 }
 0x507   : > { %p7686_p1 = scmp.ne.s32.totalorder %s12680_s24, %s7685_s14  ;;  %s7847_s10 = smov [#allocation10]  }
 0x508   : > { %s7689_s6 = sshll.u32 %s7847_s10, 4  ;;  %s7690_s6 = int_to_ptr.vmem [resolvable:$false] %s7689_s6 }
 0x509   : > { %p7687_p6 = pnand %p7686_p1, %p14003_p11  ;;  %s7691_s29 = scalar_lea.vmem %s7690_s6, 8192 }
 0x50a   : > { %p7692_p8 = scmp.lt.s32.totalorder %s12680_s24, %s7690_s6  ;;  %p7693_p3 = scmp.lt.s32.totalorder %s7691_s29, %s7685_s14 }
 0x50b   : > { %p7688_p4 = pneg %p7687_p6 }
 0x50c   : > { %p7694_p9 = por %p7693_p3, %p7692_p8 }
 0x50e   : > { %p7695_p7 = pnand %p7694_p9, %p7688_p4 }
 0x510   : > { %7698 = shalt.err (!%p7695_p7)
}
 0x511   : > { %s7699_s7 = scalar_lea.hbm %s12668_s21, 4096  ;;  %s7703_s3 = scalar_lea.hbm %s12813_s4, 16384 }
 0x512   : > { %p7700_p13 = scmp.ne.s32.totalorder %s12668_s21, %s7699_s7  ;;  %p7704_p10 = scmp.lt.u32.totalorder %s12668_s21, %s12813_s4 }
 0x513   : > { %p7705_p12 = scmp.lt.u32.totalorder %s7703_s3, %s7699_s7  ;;  %p7707_p1 = scmp.lt.u32.totalorder %s7699_s7, %s12668_s21 }
 0x514   : > { %p7701_p2 = pnand %p7700_p13, %p14003_p11 }
 0x515   : > { %p7706_p0 = por %p7705_p12, %p7704_p10 }
 0x516   : > { %p7702_p5 = pneg %p7701_p2 }
 0x517   : > { %p7708_p6 = por %p7707_p1, %p7706_p0 }
 0x519   : > { %p7709_p4 = pnand %p7708_p6, %p7702_p5 }
 0x51b   : > { %7712 = shalt.err (!%p7709_p4)
}
 0x51c   : > { %s7848_s15 = smov 128   ;;  %s7849_s14 = smov 8   ;;  %v6752_v3 = vmul.f32 -1.442695, %v7124_v49  ;;  %v5744_v36 = vpop.f32.mrb[41].mxu1  ;;  %v7385_v48 = vpop.eup %7384 }
 0x51d   : > { %7165 = dma.vmem_to_hbm [thread:$0]  (%p14003_p11), %s12680_s24, 4096, %s12668_s21, %s6384_s19, %s7848_s15, %s7848_s15, %s7849_s14   ;;  %v6750_v42 = vmul.f32 -1.442695, %v5744_v36  ;;  %v7125_v45 = vpop.f32.mrb[42].mxu1  ;;  %v7387_v4 = vpop.eup %7386  ;;  %v6149_v56 = vadd.f32 1.0, %v7385_v48 }
 0x51e   : > { %7392 = vpow2.f32 %v6752_v3  ;;  %v6753_v8 = vmul.f32 -1.442695, %v7125_v45  ;;  %v5747_v43 = vpop.f32.mrb[43].mxu1  ;;  %v7389_v32 = vpop.eup %7388  ;;  %v6147_v25 = vadd.f32 1.0, %v7387_v4  ;;  %s6445_s17 = sshll.u32 %s12631_s9, 4  ;;  %s14004_s19 = sld [smem:[#allocation103_spill]]  ;;  %s12750_s17 = int_to_ptr.vmem [resolvable:$true] %s6445_s17 }
 0x51f   : > { %7394 = vpow2.f32 %v6750_v42  ;;  %v6751_v47 = vmul.f32 -1.442695, %v5747_v43  ;;  %v7391_v62 = vpop.eup %7390  ;;  %v6150_v28 = vadd.f32 1.0, %v7389_v32  ;;  %v7128_v12 = vpop.f32.mrb[44].mxu1  ;;  %s7713_s6 = scalar_lea.vmem %s12750_s17, 2048  ;;  %s7850_s29 = smov [#allocation13]  }
 0x520   : > { %7396 = vpow2.f32 %v6753_v8  ;;  %v6148_v6 = vadd.f32 1.0, %v7391_v62  ;;  %v6756_v21 = vmul.f32 -1.442695, %v7128_v12  ;;  %v5760_v10 = vpop.f32.mrb[45].mxu1  ;;  %p7714_p8 = scmp.ne.s32.totalorder %s12750_s17, %s7713_s6  ;;  %s7717_s7 = sshll.u32 %s7850_s29, 4  ;;  %s7718_s7 = int_to_ptr.vmem [resolvable:$false] %s7717_s7 }
 0x521   : > { %7398 = vpow2.f32 %v6751_v47  ;;  %v6754_v38 = vmul.f32 -1.442695, %v5760_v10  ;;  %v7129_v17 = vpop.f32.mrb[46].mxu1  ;;  %s7719_s20 = scalar_lea.vmem %s7718_s7, 4096  ;;  %p7720_p7 = scmp.lt.s32.totalorder %s12750_s17, %s7718_s7 }
 0x522   : > { %7400 = vrcp.f32 %v6149_v56  ;;  %v6757_v7 = vmul.f32 -1.442695, %v7129_v17  ;;  %v5763_v23 = vpop.f32.mrb[47].mxu1  ;;  %p7715_p3 = pnand %p7714_p8, %p14003_p11  ;;  %p7721_p13 = scmp.lt.s32.totalorder %s7719_s20, %s7713_s6 }
 0x523   : > { %7402 = vrcp.f32 %v6147_v25  ;;  %v6755_v58 = vmul.f32 -1.442695, %v5763_v23 }
 0x524   : > { %7404 = vrcp.f32 %v6150_v28  ;;  %s12748_s10 = scalar_lea.hbm %s14004_s19, %s6798_s13  ;;  %p7716_p9 = pneg %p7715_p3 }
 0x525   : > { %7406 = vrcp.f32 %v6148_v6  ;;  %p7722_p2 = por %p7721_p13, %p7720_p7 }
 0x526   : > { %7408 = vpow2.f32 %v6756_v21 }
 0x527   : > { %7410 = vpow2.f32 %v6754_v38  ;;  %p7723_p5 = pnand %p7722_p2, %p7716_p9 }
 0x528   : > { %v7393_v46 = vpop.eup %7392  ;;  %7412 = vpow2.f32 %v6757_v7 }
 0x529   : > { %v7395_v30 = vpop.eup %7394  ;;  %v6153_v35 = vadd.f32 1.0, %v7393_v46  ;;  %7414 = vpow2.f32 %v6755_v58 }
 0x52a   : > { %v7397_v59 = vpop.eup %7396  ;;  %v6151_v41 = vadd.f32 1.0, %v7395_v30 }
 0x52b   : > { %v7399_v40 = vpop.eup %7398  ;;  %7416 = vrcp.f32 %v6153_v35  ;;  %v6154_v5 = vadd.f32 1.0, %v7397_v59 }
 0x52c   : > { %7418 = vrcp.f32 %v6151_v41  ;;  %v6152_v19 = vadd.f32 1.0, %v7399_v40  ;;  %v7401_v26 = vpop.eup %7400 }
 0x52d   : > { %7420 = vrcp.f32 %v6154_v5  ;;  %v7403_v33 = vpop.eup %7402 }
 0x52e   : > { %7422 = vrcp.f32 %v6152_v19  ;;  %v7405_v52 = vpop.eup %7404 }
 0x52f   : > { %v7407_v39 = vpop.eup %7406  ;;  %v7006_v2 = vpack.c.bf16 %v7405_v52, %v7401_v26 }
 0x530   : > { %v7409_v27 = vpop.eup %7408  ;;  %v7001_v31 = vpack.c.bf16 %v7407_v39, %v7403_v33 }
 0x531   : > { %v7411_v29 = vpop.eup %7410  ;;  %7053 = vst [vmem:[%s12631_s9 + $0x58] sm:$0xff] %v7006_v2   ;;  %v6157_v22 = vadd.f32 1.0, %v7409_v27 }
 0x532   : > { %v7413_v9 = vpop.eup %7412  ;;  %7052 = vst [vmem:[%s12631_s9 + $0x50] sm:$0xff] %v7001_v31   ;;  %v6155_v18 = vadd.f32 1.0, %v7411_v29 }
 0x533   : > { %v7415_v20 = vpop.eup %7414  ;;  %7424 = vrcp.f32 %v6157_v22  ;;  %v6158_v34 = vadd.f32 1.0, %v7413_v9 }
 0x534   : > { %7426 = vrcp.f32 %v6155_v18  ;;  %v6156_v11 = vadd.f32 1.0, %v7415_v20 }
 0x535   : > { %v7417_v0 = vpop.eup %7416  ;;  %7428 = vrcp.f32 %v6158_v34 }
 0x536   : > { %v7419_v1 = vpop.eup %7418  ;;  %7430 = vrcp.f32 %v6156_v11 }
 0x537   : > { %v7421_v14 = vpop.eup %7420 }
 0x538   : > { %v7423_v61 = vpop.eup %7422  ;;  %v7016_v57 = vpack.c.bf16 %v7421_v14, %v7417_v0 }
 0x539   : > { %v7011_v16 = vpack.c.bf16 %v7423_v61, %v7419_v1 }
 0x53a   : > { %7055 = vst [vmem:[%s12631_s9 + $0x68] sm:$0xff] %v7016_v57  }
 0x53b   : > { %7054 = vst [vmem:[%s12631_s9 + $0x60] sm:$0xff] %v7011_v16  }
 0x53d   : > { %v7425_v55 = vpop.eup %7424 }
 0x53e   : > { %v7427_v51 = vpop.eup %7426 }
 0x53f   : > { %v7429_v13 = vpop.eup %7428 }
 0x540   : > { %v7431_v63 = vpop.eup %7430  ;;  %v7026_v24 = vpack.c.bf16 %v7429_v13, %v7425_v55 }
 0x541   : > { %v7021_v54 = vpack.c.bf16 %v7431_v63, %v7427_v51 }
 0x542   : > { %7057 = vst [vmem:[%s12631_s9 + $0x78] sm:$0xff] %v7026_v24  }
 0x543   : > { %7056 = vst [vmem:[%s12631_s9 + $0x70] sm:$0xff] %v7021_v54  }
 0x544   : > { %7726 = shalt.err (!%p7723_p5)
}
 0x545   : > { %s7727_s9 = scalar_lea.hbm %s12748_s10, 2048  ;;  %s7731_s11 = scalar_lea.hbm %s14004_s19, 8192 }
 0x546   : > { %p7728_p10 = scmp.ne.s32.totalorder %s12748_s10, %s7727_s9  ;;  %p7732_p1 = scmp.lt.u32.totalorder %s12748_s10, %s14004_s19 }
 0x547   : > { %p7733_p6 = scmp.lt.u32.totalorder %s7731_s11, %s7727_s9  ;;  %p7735_p8 = scmp.lt.u32.totalorder %s7727_s9, %s12748_s10 }
 0x548   : > { %p7729_p12 = pnand %p7728_p10, %p14003_p11 }
 0x549   : > { %p7734_p4 = por %p7733_p6, %p7732_p1 }
 0x54a   : > { %p7730_p0 = pneg %p7729_p12 }
 0x54b   : > { %p7736_p3 = por %p7735_p8, %p7734_p4 }
 0x54d   : > { %p7737_p9 = pnand %p7736_p3, %p7730_p0 }
 0x54f   : > { %7740 = shalt.err (!%p7737_p9)
}
 0x550   : > { %7167 = dma.vmem_to_hbm [thread:$0]  (%p14003_p11), %s12750_s17, 2048, %s12748_s10, %s12687_s12, %s7845_s25, %s7845_s25, %s7846_s2  }
 0x551 PF: > { %s14005_s8 = sld [smem:[#allocation20_spill]]  ;;  %s14006_s15 = sld [smem:[#allocation24_spill]] }
 0x552   : > { %p7192_p7 = scmp.ge.s32.totalorder %s7829_s28, 2 }
 0x557   : > { %s6460_s14 = sand.u32 1, %s14005_s8   ;;  %p14007_p13 = scmp.ne.s32.totalorder %s14006_s15, 0 }
 0x558   : > { %s6461_s21 = scalar_lea.sflag [#allocation4], %s6460_s14 }
 0x559   : > { %p7179_p2 = pnand %p7192_p7, %p14007_p13 }
 0x55b   : > { %7790 = dma.done.wait (!%p7179_p2), %s6461_s21, 4096  }
 0x55c   : > { %7792 = vsyncadd (!%p7179_p2), %s6461_s21, 4294963200  ;;  %s14008_s16 = sadd.s32 4294967294, %s7829_s28  }
 0x55d   : > { %s6469_s24 = sand.u32 1, %s14008_s16  }
 0x55e   : > { %s6470_s6 = scalar_lea.sflag [#allocation12], %s6469_s24 }
 0x55f   : > { %7794 = dma.done.wait (!%p7179_p2), %s6470_s6, 4096  }
 0x560   : > { %7796 = vsyncadd (!%p7179_p2), %s6470_s6, 4294963200  ;;  %s30_s28 = sadd.s32 1, %s7829_s28   ;;  %s14009_s12 = sld [smem:[#allocation25_spill]] }
 0x561   : > { %p27_p11 = scmp.ge.s32.totalorder %s30_s28, 6   ;;  %s14010_s2 = sld [smem:[#allocation21_spill]] }
 0x562   : > { %s14011_s17 = sld [smem:[#allocation22_spill]]  ;;  %s14012_s21 = smov %s7805_s22 }
 0x563   : > { %s14013_s22 = smov %s7809_s23  ;;  %s14015_s24 = smov %s7821_s26 }
 0x564   : > { %s14016_s25 = smov %s7825_s27  ;;  %29 = sbr.rel (!%p27_p11) target bundleno = 17 (0x11), region = 134 }
 0x566   : > { %s14014_s23 = smov %s14009_s12 }
 0x567   : > { %s14017_s26 = smov %s14010_s2 }
 0x568   : > { %s14018_s27 = smov %s14011_s17 }
 0x56b   :  { %6484 = vsyncpa [#allocation3], 1 }
 0x56c   :  { %6486 = vsyncpa [#allocation3 + $0x1], 1 }
 0x56d   :  { %6487 = vsyncpa [#allocation6], 1 }
 0x56e   :  { %6489 = vsyncpa [#allocation6 + $0x1], 1 }
 0x56f   :  { %6490 = vsyncpa [#allocation9], 1 }
 0x570   :  { %6491 = vsyncpa [#allocation4], 1 }
 0x571   :  { %6493 = vsyncpa [#allocation4 + $0x1], 1 }
 0x572   :  { %6494 = vsyncpa [#allocation12], 1 }
 0x573   :  { %6496 = vsyncpa [#allocation12 + $0x1], 1 }

</bundles_post_ra>
